<compile_context>
chip_gen: v5e
topology: v5e:2x2
jax: 0.10.0
libtpu: 0.0.40
codegen_flags: <defaults>
</compile_context>

<pallas_src>
import math

import numpy as np
import jax
import jax.numpy as jnp
from jax.experimental import pallas as pl
from jax.experimental.pallas import tpu as pltpu

# ---------------- config (small synthetic ViT, consistent with the module) ----
IMG_DIM   = 14          # img_dim
PATCH     = 7           # patch__dim
IN_CHANS  = 1
EMBED_DIM = 32          # embed_dim (kept small)
N_HEADS   = 2           # n_heads
DEPTH     = 2
N_CLASSES = 10
N_PATCH   = (IMG_DIM // PATCH) ** 2      # 4
SEQ_LEN   = N_PATCH + 1                  # 5 (cls token + patches)
LN_EPS    = 1e-5

E   = EMBED_DIM
H   = N_HEADS
EH  = E * H                              # per-head dim is n_embd (as in the ref)
K_PATCH = IN_CHANS * PATCH * PATCH       # 49
KPAD    = 64                             # patch-feature lane width of the input slab
NCP     = 128                            # classifier lanes padded to 128 (lane-dense)
ROWS_TARGET = 128                        # token rows per grid step (lane-dense)
assert K_PATCH <= KPAD


# ---------------- kernel helpers ----------------
def _norm(x):
    # LayerNorm with the affine part folded into the following matmul weights.
    mu = jnp.mean(x, axis=-1, keepdims=True)
    xc = x - mu
    var = jnp.mean(xc * xc, axis=-1, keepdims=True)
    return xc * jax.lax.rsqrt(var + LN_EPS)


def _gelu(x):
    # TODO(synk): PyTorch nn.GELU() defaults to the exact erf form; erf has no
    # clean Mosaic lowering here, so the tanh approximation is used.
    return 0.5 * x * (1.0 + jnp.tanh(0.7978845608028654
                                     * (x + 0.044715 * x * x * x)))


# ---------------- fused ViT kernel (one lane-dense batch block per grid step) --
def vit_kernel(tok_ref,     # (ROWS_BLK, KPAD)  bf16 patch features (cls row = 0)
               pos_ref,     # (ROWS_BLK, E)     f32  cls/conv-bias/2*pos additive
               mask_ref,    # (ROWS_BLK, ROWS_BLK) f32 block-diagonal additive mask
               rsel_ref,    # (OUT_BLK, ROWS_BLK)  bf16 one-hot cls-row selector
               wpe_ref,     # (KPAD, E)         bf16
               wqkv_ref,    # (DEPTH, E, 3*EH)  bf16 (LN1 + 1/sqrt(E) folded in)
               bqkv_ref,    # (DEPTH, 3*EH)     f32
               wproj_ref,   # (DEPTH, EH, E)    bf16
               bproj_ref,   # (DEPTH, E)        f32
               wmlp1_ref,   # (DEPTH, E, E)     bf16 (LN2 folded in)
               bmlp1_ref,   # (DEPTH, E)        f32
               wmlp2_ref,   # (DEPTH, E, E)     bf16
               bmlp2_ref,   # (DEPTH, E)        f32
               whead_ref,   # (E, NCP)          bf16
               bhead_ref,   # (1, NCP)          f32
               out_ref):    # (OUT_BLK, NCP)    f32
    f32, bf16 = jnp.float32, jnp.bfloat16
    mask = mask_ref[...]                                  # loaded once, reused

    # patch embedding; cls token, conv bias and the doubled positional
    # embedding are pre-folded into the additive pos slab.
    x = jnp.dot(tok_ref[...], wpe_ref[...],
                preferred_element_type=f32) + pos_ref[...]

    for d in range(DEPTH):                                # static unroll
        # ---- multi-head attention (fused QKV; LN affine + scale pre-folded) --
        x1  = _norm(x).astype(bf16)
        qkv = jnp.dot(x1, wqkv_ref[d],
                      preferred_element_type=f32) + bqkv_ref[d:d + 1, :]
        wp_d = wproj_ref[d]                               # (EH, E) bf16

        attn = None
        for hd in range(H):
            lo, hi = hd * E, (hd + 1) * E
            qh = qkv[:, lo:hi].astype(bf16)
            kh = qkv[:, EH + lo:EH + hi].astype(bf16)
            vh = qkv[:, 2 * EH + lo:2 * EH + hi].astype(bf16)
            s = jax.lax.dot_general(qh, kh, (((1,), (1,)), ((), ())),
                                    preferred_element_type=f32)
            s = s + mask                                  # block-diag over batch
            s = s - jnp.max(s, axis=-1, keepdims=True)
            p = jnp.exp(s)
            p = p * pl.reciprocal(jnp.sum(p, axis=-1, keepdims=True))
            head = jnp.dot(p.astype(bf16), vh, preferred_element_type=f32)
            # accumulate straight into the output projection (no lane concat)
            contrib = jnp.dot(head.astype(bf16), wp_d[lo:hi, :],
                              preferred_element_type=f32)
            attn = contrib if attn is None else attn + contrib
        x = x + attn + bproj_ref[d:d + 1, :]

        # ---- MLP (LN2 affine folded into W1) ----
        xm = _norm(x).astype(bf16)
        h1 = jnp.dot(xm, wmlp1_ref[d],
                     preferred_element_type=f32) + bmlp1_ref[d:d + 1, :]
        h1 = _gelu(h1)
        x = x + jnp.dot(h1.astype(bf16), wmlp2_ref[d],
                        preferred_element_type=f32) + bmlp2_ref[d:d + 1, :]

    # ---- classifier head on the cls token (row 0 of every sequence) ----
    cls_feat = jnp.dot(rsel_ref[...], x.astype(bf16),
                       preferred_element_type=f32)        # (OUT_BLK, E)
    logits = jnp.dot(cls_feat.astype(bf16), whead_ref[...],
                     preferred_element_type=f32) + bhead_ref[...]
    out_ref[...] = logits.astype(out_ref.dtype)


# ---------------- parameter init (raw, PyTorch-like) + packing ----------------
def _linear_init(key, fan_in, fan_out):
    kw, kb = jax.random.split(key)
    bound = 1.0 / math.sqrt(fan_in)
    w = jax.random.uniform(kw, (fan_in, fan_out), jnp.float32, -bound, bound)
    b = jax.random.uniform(kb, (fan_out,), jnp.float32, -bound, bound)
    return w, b


def init_params(key):
    keys = jax.random.split(key, 4 + DEPTH)
    w_patch, b_patch = _linear_init(keys[0], K_PATCH, E)   # Conv2d == Linear on patches
    cls = jax.random.normal(keys[1], (E,), jnp.float32)
    pos = jax.random.normal(keys[2], (SEQ_LEN, E), jnp.float32)
    w_head, b_head = _linear_init(keys[3], E, N_CLASSES)
    layers = []
    for d in range(DEPTH):
        bk = jax.random.split(keys[4 + d], 6)
        wq, bq = _linear_init(bk[0], E, EH)
        wk, bkk = _linear_init(bk[1], E, EH)
        wv, bv = _linear_init(bk[2], E, EH)
        wp, bp = _linear_init(bk[3], EH, E)
        w1, b1 = _linear_init(bk[4], E, E)                  # MLP hidden_dim == n_embd
        w2, b2 = _linear_init(bk[5], E, E)
        layers.append(dict(
            wq=wq, bq=bq, wk=wk, bk=bkk, wv=wv, bv=bv, wp=wp, bp=bp,
            w1=w1, b1=b1, w2=w2, b2=b2,
            ln1_g=jnp.ones((E,), jnp.float32), ln1_b=jnp.zeros((E,), jnp.float32),
            ln2_g=jnp.ones((E,), jnp.float32), ln2_b=jnp.zeros((E,), jnp.float32)))
    return dict(w_patch=w_patch, b_patch=b_patch, cls=cls, pos=pos,
                w_head=w_head, b_head=b_head, layers=layers)


def pack_params(raw):
    """Fold LN affines / attention scale / cls+bias+2*pos into weight slabs."""
    bf = jnp.bfloat16
    qscale = 1.0 / math.sqrt(E)           # k.size(-1) == n_embd == per-head dim

    wqkv_l, bqkv_l, wproj_l, bproj_l = [], [], [], []
    w1_l, b1_l, w2_l, b2_l = [], [], [], []
    for L in raw["layers"]:
        w_qkv = jnp.concatenate([L["wq"] * qscale, L["wk"], L["wv"]], axis=1)
        b_qkv = jnp.concatenate([L["bq"] * qscale, L["bk"], L["bv"]])
        w_qkv_f = L["ln1_g"][:, None] * w_qkv              # LN1 gamma fold
        b_qkv_f = b_qkv + L["ln1_b"] @ w_qkv               # LN1 beta fold
        w1_f = L["ln2_g"][:, None] * L["w1"]               # LN2 gamma fold
        b1_f = L["b1"] + L["ln2_b"] @ L["w1"]              # LN2 beta fold
        wqkv_l.append(w_qkv_f); bqkv_l.append(b_qkv_f)
        wproj_l.append(L["wp"]); bproj_l.append(L["bp"])
        w1_l.append(w1_f); b1_l.append(b1_f)
        w2_l.append(L["w2"]); b2_l.append(L["b2"])

    w_pe = jnp.zeros((KPAD, E), jnp.float32).at[:K_PATCH].set(raw["w_patch"])
    # the reference adds pos_embedding twice: `... + pos` and then `e += pos`
    add_tok = jnp.concatenate(
        [raw["cls"][None, :] + 2.0 * raw["pos"][:1],
         raw["b_patch"][None, :] + 2.0 * raw["pos"][1:]], axis=0)   # (SEQ_LEN, E)

    w_head = jnp.pad(raw["w_head"], ((0, 0), (0, NCP - N_CLASSES)))
    b_head = jnp.pad(raw["b_head"], ((0, NCP - N_CLASSES),))[None, :]

    return dict(
        w_pe=w_pe.astype(bf), add_tok=add_tok,
        w_qkv=jnp.stack(wqkv_l).astype(bf), b_qkv=jnp.stack(bqkv_l),
        w_proj=jnp.stack(wproj_l).astype(bf), b_proj=jnp.stack(bproj_l),
        w_mlp1=jnp.stack(w1_l).astype(bf), b_mlp1=jnp.stack(b1_l),
        w_mlp2=jnp.stack(w2_l).astype(bf), b_mlp2=jnp.stack(b2_l),
        w_head=w_head.astype(bf), b_head=b_head)


# ---------------- blocking / baked constants ----------------
def _round_up(v, m):
    return -(-v // m) * m


def _megacore():
    # v7x (and v4/v5p) expose 2 TensorCores to one "parallel" Pallas grid.
    try:
        kind = jax.devices()[0].device_kind.lower()
    except Exception:
        return False
    return any(tag in kind for tag in ("v7", "v4", "v5p"))


def _choose_blocking(batch):
    if batch * SEQ_LEN <= ROWS_TARGET:
        nb = 2 if (batch >= 2 and _megacore()) else 1      # feed both TCs on v7x
        img_blk = -(-batch // nb)
        nb = -(-batch // img_blk)
    else:
        img_blk = ROWS_TARGET // SEQ_LEN
        nb = -(-batch // img_blk)
    rows_blk = _round_up(img_blk * SEQ_LEN, 128)           # lane-dense score tiles
    out_blk = _round_up(img_blk, 8)
    return nb, img_blk, rows_blk, out_blk


def _build_mask(img_blk, rows_blk):
    ids = np.full((rows_blk,), img_blk, dtype=np.int64)    # pad rows: one fake batch
    real = img_blk * SEQ_LEN
    ids[:real] = np.arange(real) // SEQ_LEN
    m = np.where(ids[:, None] == ids[None, :], 0.0, -1e30).astype(np.float32)
    return jnp.asarray(m)


def _build_rsel(img_blk, rows_blk, out_blk):
    r = np.zeros((out_blk, rows_blk), dtype=np.float32)
    r[np.arange(img_blk), np.arange(img_blk) * SEQ_LEN] = 1.0
    return jnp.asarray(r, dtype=jnp.bfloat16)


# ---------------- forward: light JAX glue + one fused pallas_call ----------------
def vit_forward(x, params):
    B, C, Hh, Ww = x.shape
    n = Hh // PATCH

    nb, img_blk, rows_blk, out_blk = _choose_blocking(B)
    real_rows = img_blk * SEQ_LEN

    # patchify == strided Conv2d: patch features flattened in (c, ph, pw) order
    xp = x.reshape(B, C, n, PATCH, n, PATCH).transpose(0, 2, 4, 1, 3, 5)
    xp = xp.reshape(B, N_PATCH, K_PATCH)
    # token rows: zero cls row + patch rows, narrow lane pad, bf16 (no one-hot scatter)
    tok = jnp.concatenate([jnp.zeros((B, 1, K_PATCH), xp.dtype), xp], axis=1)
    tok = jnp.pad(tok, ((0, nb * img_blk - B), (0, 0), (0, KPAD - K_PATCH)))
    tok = tok.reshape(nb, real_rows, KPAD)
    tok = jnp.pad(tok, ((0, 0), (0, rows_blk - real_rows), (0, 0)))
    tok = tok.reshape(nb * rows_blk, KPAD).astype(jnp.bfloat16)

    # per-block constants (mask / selector are numpy, baked at trace time)
    mask = _build_mask(img_blk, rows_blk)
    rsel = _build_rsel(img_blk, rows_blk, out_blk)
    pos_add = jnp.pad(jnp.tile(params["add_tok"], (img_blk, 1)),
                      ((0, rows_blk - real_rows), (0, 0)))

    def full(a):
        return pl.BlockSpec(a.shape, lambda i, nd=a.ndim: (0,) * nd)

    out = pl.pallas_call(
        vit_kernel,
        out_shape=jax.ShapeDtypeStruct((nb * out_blk, NCP), jnp.float32),
        grid=(nb,),
        in_specs=[pl.BlockSpec((rows_blk, KPAD), lambda i: (i, 0)),
                  full(pos_add), full(mask), full(rsel),
                  full(params["w_pe"]),
                  full(params["w_qkv"]), full(params["b_qkv"]),
                  full(params["w_proj"]), full(params["b_proj"]),
                  full(params["w_mlp1"]), full(params["b_mlp1"]),
                  full(params["w_mlp2"]), full(params["b_mlp2"]),
                  full(params["w_head"]), full(params["b_head"])],
        out_specs=pl.BlockSpec((out_blk, NCP), lambda i: (i, 0)),
        compiler_params=pltpu.CompilerParams(
            dimension_semantics=("parallel",)),    # shard batch blocks across TCs
    )(tok, pos_add, mask, rsel,
      params["w_pe"],
      params["w_qkv"], params["b_qkv"],
      params["w_proj"], params["b_proj"],
      params["w_mlp1"], params["b_mlp1"],
      params["w_mlp2"], params["b_mlp2"],
      params["w_head"], params["b_head"])

    out = out.reshape(nb, out_blk, NCP)[:, :img_blk, :]
    out = out.reshape(nb * img_blk, NCP)
    return out[:B, :N_CLASSES]


# ---------------- pure-JAX reference (f32, exact GELU) for validation ----------
def _ln_ref(x, g, b):
    mu = jnp.mean(x, axis=-1, keepdims=True)
    var = jnp.mean((x - mu) ** 2, axis=-1, keepdims=True)
    return (x - mu) * jax.lax.rsqrt(var + LN_EPS) * g + b


def vit_reference(x, raw):
    B = x.shape[0]
    n = IMG_DIM // PATCH
    xp = x.reshape(B, IN_CHANS, n, PATCH, n, PATCH).transpose(0, 2, 4, 1, 3, 5)
    xp = xp.reshape(B, N_PATCH, K_PATCH)
    e = xp @ raw["w_patch"] + raw["b_patch"]
    cls = jnp.broadcast_to(raw["cls"], (B, 1, E))
    e = jnp.concatenate([cls, e], axis=1) + raw["pos"]
    e = e + raw["pos"]                      # reference adds pos_embedding twice
    xx = e
    for L in raw["layers"]:
        x1 = _ln_ref(xx, L["ln1_g"], L["ln1_b"])
        q = (x1 @ L["wq"] + L["bq"]).reshape(B, SEQ_LEN, H, E).transpose(0, 2, 1, 3)
        k = (x1 @ L["wk"] + L["bk"]).reshape(B, SEQ_LEN, H, E).transpose(0, 2, 1, 3)
        v = (x1 @ L["wv"] + L["bv"]).reshape(B, SEQ_LEN, H, E).transpose(0, 2, 1, 3)
        s = (q @ jnp.swapaxes(k, -1, -2)) / math.sqrt(E)
        a = jax.nn.softmax(s, axis=-1)
        y = (a @ v).transpose(0, 2, 1, 3).reshape(B, SEQ_LEN, EH)
        xx = xx + (y @ L["wp"] + L["bp"])
        x2 = _ln_ref(xx, L["ln2_g"], L["ln2_b"])
        h1 = jax.nn.gelu(x2 @ L["w1"] + L["b1"], approximate=False)
        xx = xx + (h1 @ L["w2"] + L["b2"])
    return xx[:, 0, :] @ raw["w_head"] + raw["b_head"]


if __name__ == "__main__":
    key = jax.random.PRNGKey(0)
    kx, kp = jax.random.split(key)
    B = 16
    x = jax.random.normal(kx, (B, IN_CHANS, IMG_DIM, IMG_DIM), jnp.float32)  # NCHW
    raw = init_params(kp)
    packed = pack_params(raw)

    fwd = jax.jit(vit_forward)
    y = jax.block_until_ready(fwd(x, packed))
    assert y.shape == (B, N_CLASSES), y.shape
    assert bool(jnp.all(jnp.isfinite(y)))

    y_ref = vit_reference(x, raw)
    err = float(jnp.max(jnp.abs(y - y_ref)))
    assert err < 0.3, f"max |kernel - reference| = {err}"
    print("KERNEL_OK")
</pallas_src>

<mosaic_0001>
module attributes {stable_mosaic.version = 11 : i64} {
  func.func @vit_kernel(%arg0: i32, %arg1: memref<128x64xbf16, #tpu.memory_space<vmem>>, %arg2: memref<128x32xf32, #tpu.memory_space<vmem>>, %arg3: memref<128x128xf32, #tpu.memory_space<vmem>>, %arg4: memref<16x128xbf16, #tpu.memory_space<vmem>>, %arg5: memref<64x32xbf16, #tpu.memory_space<vmem>>, %arg6: memref<2x32x192xbf16, #tpu.memory_space<vmem>>, %arg7: memref<2x192xf32, #tpu.memory_space<vmem>>, %arg8: memref<2x64x32xbf16, #tpu.memory_space<vmem>>, %arg9: memref<2x32xf32, #tpu.memory_space<vmem>>, %arg10: memref<2x32x32xbf16, #tpu.memory_space<vmem>>, %arg11: memref<2x32xf32, #tpu.memory_space<vmem>>, %arg12: memref<2x32x32xbf16, #tpu.memory_space<vmem>>, %arg13: memref<2x32xf32, #tpu.memory_space<vmem>>, %arg14: memref<32x128xbf16, #tpu.memory_space<vmem>>, %arg15: memref<1x128xf32, #tpu.memory_space<vmem>>, %arg16: memref<16x128xf32, #tpu.memory_space<vmem>>) attributes {dimension_semantics = [#tpu.dimension_semantics<parallel>], iteration_bounds = array<i64: 1>, scalar_prefetch = 0 : i64, scratch_operands = 0 : i64, tpu.core_type = #tpu.core_type<tc>, window_params = [{transform_indices = @transform_0, window_bounds = array<i64: 128, 64>}, {pipeline_mode = #tpu.pipeline_mode<synchronous>, transform_indices = @transform_1, window_bounds = array<i64: 128, 32>}, {pipeline_mode = #tpu.pipeline_mode<synchronous>, transform_indices = @transform_2, window_bounds = array<i64: 128, 128>}, {pipeline_mode = #tpu.pipeline_mode<synchronous>, transform_indices = @transform_3, window_bounds = array<i64: 16, 128>}, {pipeline_mode = #tpu.pipeline_mode<synchronous>, transform_indices = @transform_4, window_bounds = array<i64: 64, 32>}, {pipeline_mode = #tpu.pipeline_mode<synchronous>, transform_indices = @transform_5, window_bounds = array<i64: 2, 32, 192>}, {pipeline_mode = #tpu.pipeline_mode<synchronous>, transform_indices = @transform_6, window_bounds = array<i64: 2, 192>}, {pipeline_mode = #tpu.pipeline_mode<synchronous>, transform_indices = @transform_7, window_bounds = array<i64: 2, 64, 32>}, {pipeline_mode = #tpu.pipeline_mode<synchronous>, transform_indices = @transform_8, window_bounds = array<i64: 2, 32>}, {pipeline_mode = #tpu.pipeline_mode<synchronous>, transform_indices = @transform_9, window_bounds = array<i64: 2, 32, 32>}, {pipeline_mode = #tpu.pipeline_mode<synchronous>, transform_indices = @transform_10, window_bounds = array<i64: 2, 32>}, {pipeline_mode = #tpu.pipeline_mode<synchronous>, transform_indices = @transform_11, window_bounds = array<i64: 2, 32, 32>}, {pipeline_mode = #tpu.pipeline_mode<synchronous>, transform_indices = @transform_12, window_bounds = array<i64: 2, 32>}, {pipeline_mode = #tpu.pipeline_mode<synchronous>, transform_indices = @transform_13, window_bounds = array<i64: 32, 128>}, {pipeline_mode = #tpu.pipeline_mode<synchronous>, transform_indices = @transform_14, window_bounds = array<i64: 1, 128>}, {transform_indices = @transform_15, window_bounds = array<i64: 16, 128>}]} {
    %c0 = arith.constant 0 : index
    %c0_0 = arith.constant 0 : index
    %0 = vector.load %arg3[%c0, %c0_0] : memref<128x128xf32, #tpu.memory_space<vmem>>, vector<128x128xf32>
    %c0_1 = arith.constant 0 : index
    %c0_2 = arith.constant 0 : index
    %1 = vector.load %arg1[%c0_1, %c0_2] : memref<128x64xbf16, #tpu.memory_space<vmem>>, vector<128x64xbf16>
    %c0_3 = arith.constant 0 : index
    %c0_4 = arith.constant 0 : index
    %2 = vector.load %arg5[%c0_3, %c0_4] : memref<64x32xbf16, #tpu.memory_space<vmem>>, vector<64x32xbf16>
    %cst = arith.constant dense<0.000000e+00> : vector<128x32xf32>
    %3 = tpu.matmul %1, %2, %cst {dimension_numbers = #tpu.dot_dimension_numbers<[1], [0], [0], [1], [0, 0, 1, 1], [], []>} : vector<128x64xbf16>, vector<64x32xbf16>, vector<128x32xf32> -> vector<128x32xf32>
    %c0_5 = arith.constant 0 : index
    %c0_6 = arith.constant 0 : index
    %4 = vector.load %arg2[%c0_5, %c0_6] : memref<128x32xf32, #tpu.memory_space<vmem>>, vector<128x32xf32>
    %5 = arith.addf %3, %4 : vector<128x32xf32>
    %cst_7 = arith.constant dense<0.000000e+00> : vector<128xf32>
    %6 = vector.multi_reduction <add>, %5, %cst_7 [1] : vector<128x32xf32> to vector<128xf32>
    %7 = vector.shape_cast %6 : vector<128xf32> to vector<128x1xf32>
    %cst_8 = arith.constant 3.200000e+01 : f32
    %8 = vector.broadcast %cst_8 : f32 to vector<128x1xf32>
    %9 = arith.divf %7, %8 : vector<128x1xf32>
    %10 = vector.broadcast %9 : vector<128x1xf32> to vector<128x32xf32>
    %11 = arith.subf %5, %10 : vector<128x32xf32>
    %12 = arith.mulf %11, %11 : vector<128x32xf32>
    %cst_9 = arith.constant dense<0.000000e+00> : vector<128xf32>
    %13 = vector.multi_reduction <add>, %12, %cst_9 [1] : vector<128x32xf32> to vector<128xf32>
    %14 = vector.shape_cast %13 : vector<128xf32> to vector<128x1xf32>
    %cst_10 = arith.constant 3.200000e+01 : f32
    %15 = vector.broadcast %cst_10 : f32 to vector<128x1xf32>
    %16 = arith.divf %14, %15 : vector<128x1xf32>
    %cst_11 = arith.constant 9.99999974E-6 : f32
    %17 = vector.broadcast %cst_11 : f32 to vector<128x1xf32>
    %18 = arith.addf %16, %17 : vector<128x1xf32>
    %19 = math.rsqrt %18 : vector<128x1xf32>
    %20 = vector.broadcast %19 : vector<128x1xf32> to vector<128x32xf32>
    %21 = arith.mulf %11, %20 : vector<128x32xf32>
    %22 = arith.truncf %21 : vector<128x32xf32> to vector<128x32xbf16>
    %c0_12 = arith.constant 0 : index
    %c0_13 = arith.constant 0 : index
    %c0_14 = arith.constant 0 : index
    %23 = vector.load %arg6[%c0_12, %c0_13, %c0_14] : memref<2x32x192xbf16, #tpu.memory_space<vmem>>, vector<1x32x192xbf16>
    %24 = vector.shape_cast %23 : vector<1x32x192xbf16> to vector<32x192xbf16>
    %cst_15 = arith.constant dense<0.000000e+00> : vector<128x192xf32>
    %25 = tpu.matmul %22, %24, %cst_15 {dimension_numbers = #tpu.dot_dimension_numbers<[1], [0], [0], [1], [0, 0, 1, 1], [], []>} : vector<128x32xbf16>, vector<32x192xbf16>, vector<128x192xf32> -> vector<128x192xf32>
    %c0_16 = arith.constant 0 : index
    %c0_17 = arith.constant 0 : index
    %26 = vector.load %arg7[%c0_16, %c0_17] : memref<2x192xf32, #tpu.memory_space<vmem>>, vector<1x192xf32>
    %27 = vector.broadcast %26 : vector<1x192xf32> to vector<128x192xf32>
    %28 = arith.addf %25, %27 : vector<128x192xf32>
    %c0_18 = arith.constant 0 : index
    %c0_19 = arith.constant 0 : index
    %c0_20 = arith.constant 0 : index
    %29 = vector.load %arg8[%c0_18, %c0_19, %c0_20] : memref<2x64x32xbf16, #tpu.memory_space<vmem>>, vector<1x64x32xbf16>
    %30 = vector.shape_cast %29 : vector<1x64x32xbf16> to vector<64x32xbf16>
    %31 = vector.extract_strided_slice %28 {offsets = [0, 0], sizes = [128, 32], strides = [1, 1]} : vector<128x192xf32> to vector<128x32xf32>
    %32 = arith.truncf %31 : vector<128x32xf32> to vector<128x32xbf16>
    %33 = vector.extract_strided_slice %28 {offsets = [0, 64], sizes = [128, 32], strides = [1, 1]} : vector<128x192xf32> to vector<128x32xf32>
    %34 = arith.truncf %33 : vector<128x32xf32> to vector<128x32xbf16>
    %35 = vector.extract_strided_slice %28 {offsets = [0, 128], sizes = [128, 32], strides = [1, 1]} : vector<128x192xf32> to vector<128x32xf32>
    %36 = arith.truncf %35 : vector<128x32xf32> to vector<128x32xbf16>
    %cst_21 = arith.constant dense<0.000000e+00> : vector<128x128xf32>
    %37 = tpu.matmul %32, %34, %cst_21 {dimension_numbers = #tpu.dot_dimension_numbers<[1], [1], [0], [0], [0, 0, 1, 0], [], []>} : vector<128x32xbf16>, vector<128x32xbf16>, vector<128x128xf32> -> vector<128x128xf32>
    %38 = arith.addf %37, %0 : vector<128x128xf32>
    %cst_22 = arith.constant dense<0xFF800000> : vector<128xf32>
    %39 = vector.multi_reduction <maximumf>, %38, %cst_22 [1] : vector<128x128xf32> to vector<128xf32>
    %40 = vector.shape_cast %39 : vector<128xf32> to vector<128x1xf32>
    %41 = vector.broadcast %40 : vector<128x1xf32> to vector<128x128xf32>
    %42 = arith.subf %38, %41 : vector<128x128xf32>
    %43 = math.exp %42 : vector<128x128xf32>
    %cst_23 = arith.constant dense<0.000000e+00> : vector<128xf32>
    %44 = vector.multi_reduction <add>, %43, %cst_23 [1] : vector<128x128xf32> to vector<128xf32>
    %45 = vector.shape_cast %44 : vector<128xf32> to vector<128x1xf32>
    %46 = tpu.reciprocal %45 : vector<128x1xf32> -> vector<128x1xf32>
    %47 = vector.broadcast %46 : vector<128x1xf32> to vector<128x128xf32>
    %48 = arith.mulf %43, %47 : vector<128x128xf32>
    %49 = arith.truncf %48 : vector<128x128xf32> to vector<128x128xbf16>
    %cst_24 = arith.constant dense<0.000000e+00> : vector<128x32xf32>
    %50 = tpu.matmul %49, %36, %cst_24 {dimension_numbers = #tpu.dot_dimension_numbers<[1], [0], [0], [1], [0, 0, 1, 1], [], []>} : vector<128x128xbf16>, vector<128x32xbf16>, vector<128x32xf32> -> vector<128x32xf32>
    %51 = arith.truncf %50 : vector<128x32xf32> to vector<128x32xbf16>
    %52 = vector.extract_strided_slice %30 {offsets = [0, 0], sizes = [32, 32], strides = [1, 1]} : vector<64x32xbf16> to vector<32x32xbf16>
    %cst_25 = arith.constant dense<0.000000e+00> : vector<128x32xf32>
    %53 = tpu.matmul %51, %52, %cst_25 {dimension_numbers = #tpu.dot_dimension_numbers<[1], [0], [0], [1], [0, 0, 1, 1], [], []>} : vector<128x32xbf16>, vector<32x32xbf16>, vector<128x32xf32> -> vector<128x32xf32>
    %54 = vector.extract_strided_slice %28 {offsets = [0, 32], sizes = [128, 32], strides = [1, 1]} : vector<128x192xf32> to vector<128x32xf32>
    %55 = arith.truncf %54 : vector<128x32xf32> to vector<128x32xbf16>
    %56 = vector.extract_strided_slice %28 {offsets = [0, 96], sizes = [128, 32], strides = [1, 1]} : vector<128x192xf32> to vector<128x32xf32>
    %57 = arith.truncf %56 : vector<128x32xf32> to vector<128x32xbf16>
    %58 = vector.extract_strided_slice %28 {offsets = [0, 160], sizes = [128, 32], strides = [1, 1]} : vector<128x192xf32> to vector<128x32xf32>
    %59 = arith.truncf %58 : vector<128x32xf32> to vector<128x32xbf16>
    %cst_26 = arith.constant dense<0.000000e+00> : vector<128x128xf32>
    %60 = tpu.matmul %55, %57, %cst_26 {dimension_numbers = #tpu.dot_dimension_numbers<[1], [1], [0], [0], [0, 0, 1, 0], [], []>} : vector<128x32xbf16>, vector<128x32xbf16>, vector<128x128xf32> -> vector<128x128xf32>
    %61 = arith.addf %60, %0 : vector<128x128xf32>
    %cst_27 = arith.constant dense<0xFF800000> : vector<128xf32>
    %62 = vector.multi_reduction <maximumf>, %61, %cst_27 [1] : vector<128x128xf32> to vector<128xf32>
    %63 = vector.shape_cast %62 : vector<128xf32> to vector<128x1xf32>
    %64 = vector.broadcast %63 : vector<128x1xf32> to vector<128x128xf32>
    %65 = arith.subf %61, %64 : vector<128x128xf32>
    %66 = math.exp %65 : vector<128x128xf32>
    %cst_28 = arith.constant dense<0.000000e+00> : vector<128xf32>
    %67 = vector.multi_reduction <add>, %66, %cst_28 [1] : vector<128x128xf32> to vector<128xf32>
    %68 = vector.shape_cast %67 : vector<128xf32> to vector<128x1xf32>
    %69 = tpu.reciprocal %68 : vector<128x1xf32> -> vector<128x1xf32>
    %70 = vector.broadcast %69 : vector<128x1xf32> to vector<128x128xf32>
    %71 = arith.mulf %66, %70 : vector<128x128xf32>
    %72 = arith.truncf %71 : vector<128x128xf32> to vector<128x128xbf16>
    %cst_29 = arith.constant dense<0.000000e+00> : vector<128x32xf32>
    %73 = tpu.matmul %72, %59, %cst_29 {dimension_numbers = #tpu.dot_dimension_numbers<[1], [0], [0], [1], [0, 0, 1, 1], [], []>} : vector<128x128xbf16>, vector<128x32xbf16>, vector<128x32xf32> -> vector<128x32xf32>
    %74 = arith.truncf %73 : vector<128x32xf32> to vector<128x32xbf16>
    %75 = vector.extract_strided_slice %30 {offsets = [32, 0], sizes = [32, 32], strides = [1, 1]} : vector<64x32xbf16> to vector<32x32xbf16>
    %cst_30 = arith.constant dense<0.000000e+00> : vector<128x32xf32>
    %76 = tpu.matmul %74, %75, %cst_30 {dimension_numbers = #tpu.dot_dimension_numbers<[1], [0], [0], [1], [0, 0, 1, 1], [], []>} : vector<128x32xbf16>, vector<32x32xbf16>, vector<128x32xf32> -> vector<128x32xf32>
    %77 = arith.addf %53, %76 : vector<128x32xf32>
    %78 = arith.addf %5, %77 : vector<128x32xf32>
    %c0_31 = arith.constant 0 : index
    %c0_32 = arith.constant 0 : index
    %79 = vector.load %arg9[%c0_31, %c0_32] : memref<2x32xf32, #tpu.memory_space<vmem>>, vector<1x32xf32>
    %80 = vector.broadcast %79 : vector<1x32xf32> to vector<128x32xf32>
    %81 = arith.addf %78, %80 : vector<128x32xf32>
    %cst_33 = arith.constant dense<0.000000e+00> : vector<128xf32>
    %82 = vector.multi_reduction <add>, %81, %cst_33 [1] : vector<128x32xf32> to vector<128xf32>
    %83 = vector.shape_cast %82 : vector<128xf32> to vector<128x1xf32>
    %cst_34 = arith.constant 3.200000e+01 : f32
    %84 = vector.broadcast %cst_34 : f32 to vector<128x1xf32>
    %85 = arith.divf %83, %84 : vector<128x1xf32>
    %86 = vector.broadcast %85 : vector<128x1xf32> to vector<128x32xf32>
    %87 = arith.subf %81, %86 : vector<128x32xf32>
    %88 = arith.mulf %87, %87 : vector<128x32xf32>
    %cst_35 = arith.constant dense<0.000000e+00> : vector<128xf32>
    %89 = vector.multi_reduction <add>, %88, %cst_35 [1] : vector<128x32xf32> to vector<128xf32>
    %90 = vector.shape_cast %89 : vector<128xf32> to vector<128x1xf32>
    %cst_36 = arith.constant 3.200000e+01 : f32
    %91 = vector.broadcast %cst_36 : f32 to vector<128x1xf32>
    %92 = arith.divf %90, %91 : vector<128x1xf32>
    %cst_37 = arith.constant 9.99999974E-6 : f32
    %93 = vector.broadcast %cst_37 : f32 to vector<128x1xf32>
    %94 = arith.addf %92, %93 : vector<128x1xf32>
    %95 = math.rsqrt %94 : vector<128x1xf32>
    %96 = vector.broadcast %95 : vector<128x1xf32> to vector<128x32xf32>
    %97 = arith.mulf %87, %96 : vector<128x32xf32>
    %98 = arith.truncf %97 : vector<128x32xf32> to vector<128x32xbf16>
    %c0_38 = arith.constant 0 : index
    %c0_39 = arith.constant 0 : index
    %c0_40 = arith.constant 0 : index
    %99 = vector.load %arg10[%c0_38, %c0_39, %c0_40] : memref<2x32x32xbf16, #tpu.memory_space<vmem>>, vector<1x32x32xbf16>
    %100 = vector.shape_cast %99 : vector<1x32x32xbf16> to vector<32x32xbf16>
    %cst_41 = arith.constant dense<0.000000e+00> : vector<128x32xf32>
    %101 = tpu.matmul %98, %100, %cst_41 {dimension_numbers = #tpu.dot_dimension_numbers<[1], [0], [0], [1], [0, 0, 1, 1], [], []>} : vector<128x32xbf16>, vector<32x32xbf16>, vector<128x32xf32> -> vector<128x32xf32>
    %c0_42 = arith.constant 0 : index
    %c0_43 = arith.constant 0 : index
    %102 = vector.load %arg11[%c0_42, %c0_43] : memref<2x32xf32, #tpu.memory_space<vmem>>, vector<1x32xf32>
    %103 = vector.broadcast %102 : vector<1x32xf32> to vector<128x32xf32>
    %104 = arith.addf %101, %103 : vector<128x32xf32>
    %cst_44 = arith.constant 5.000000e-01 : f32
    %105 = vector.broadcast %cst_44 : f32 to vector<128x32xf32>
    %106 = arith.mulf %105, %104 : vector<128x32xf32>
    %cst_45 = arith.constant 4.471500e-02 : f32
    %107 = vector.broadcast %cst_45 : f32 to vector<128x32xf32>
    %108 = arith.mulf %107, %104 : vector<128x32xf32>
    %109 = arith.mulf %108, %104 : vector<128x32xf32>
    %110 = arith.mulf %109, %104 : vector<128x32xf32>
    %111 = arith.addf %104, %110 : vector<128x32xf32>
    %cst_46 = arith.constant 0.797884583 : f32
    %112 = vector.broadcast %cst_46 : f32 to vector<128x32xf32>
    %113 = arith.mulf %112, %111 : vector<128x32xf32>
    %114 = math.tanh %113 : vector<128x32xf32>
    %cst_47 = arith.constant 1.000000e+00 : f32
    %115 = vector.broadcast %cst_47 : f32 to vector<128x32xf32>
    %116 = arith.addf %115, %114 : vector<128x32xf32>
    %117 = arith.mulf %106, %116 : vector<128x32xf32>
    %118 = arith.truncf %117 : vector<128x32xf32> to vector<128x32xbf16>
    %c0_48 = arith.constant 0 : index
    %c0_49 = arith.constant 0 : index
    %c0_50 = arith.constant 0 : index
    %119 = vector.load %arg12[%c0_48, %c0_49, %c0_50] : memref<2x32x32xbf16, #tpu.memory_space<vmem>>, vector<1x32x32xbf16>
    %120 = vector.shape_cast %119 : vector<1x32x32xbf16> to vector<32x32xbf16>
    %cst_51 = arith.constant dense<0.000000e+00> : vector<128x32xf32>
    %121 = tpu.matmul %118, %120, %cst_51 {dimension_numbers = #tpu.dot_dimension_numbers<[1], [0], [0], [1], [0, 0, 1, 1], [], []>} : vector<128x32xbf16>, vector<32x32xbf16>, vector<128x32xf32> -> vector<128x32xf32>
    %122 = arith.addf %81, %121 : vector<128x32xf32>
    %c0_52 = arith.constant 0 : index
    %c0_53 = arith.constant 0 : index
    %123 = vector.load %arg13[%c0_52, %c0_53] : memref<2x32xf32, #tpu.memory_space<vmem>>, vector<1x32xf32>
    %124 = vector.broadcast %123 : vector<1x32xf32> to vector<128x32xf32>
    %125 = arith.addf %122, %124 : vector<128x32xf32>
    %cst_54 = arith.constant dense<0.000000e+00> : vector<128xf32>
    %126 = vector.multi_reduction <add>, %125, %cst_54 [1] : vector<128x32xf32> to vector<128xf32>
    %127 = vector.shape_cast %126 : vector<128xf32> to vector<128x1xf32>
    %cst_55 = arith.constant 3.200000e+01 : f32
    %128 = vector.broadcast %cst_55 : f32 to vector<128x1xf32>
    %129 = arith.divf %127, %128 : vector<128x1xf32>
    %130 = vector.broadcast %129 : vector<128x1xf32> to vector<128x32xf32>
    %131 = arith.subf %125, %130 : vector<128x32xf32>
    %132 = arith.mulf %131, %131 : vector<128x32xf32>
    %cst_56 = arith.constant dense<0.000000e+00> : vector<128xf32>
    %133 = vector.multi_reduction <add>, %132, %cst_56 [1] : vector<128x32xf32> to vector<128xf32>
    %134 = vector.shape_cast %133 : vector<128xf32> to vector<128x1xf32>
    %cst_57 = arith.constant 3.200000e+01 : f32
    %135 = vector.broadcast %cst_57 : f32 to vector<128x1xf32>
    %136 = arith.divf %134, %135 : vector<128x1xf32>
    %cst_58 = arith.constant 9.99999974E-6 : f32
    %137 = vector.broadcast %cst_58 : f32 to vector<128x1xf32>
    %138 = arith.addf %136, %137 : vector<128x1xf32>
    %139 = math.rsqrt %138 : vector<128x1xf32>
    %140 = vector.broadcast %139 : vector<128x1xf32> to vector<128x32xf32>
    %141 = arith.mulf %131, %140 : vector<128x32xf32>
    %142 = arith.truncf %141 : vector<128x32xf32> to vector<128x32xbf16>
    %c1 = arith.constant 1 : index
    %c0_59 = arith.constant 0 : index
    %c0_60 = arith.constant 0 : index
    %143 = vector.load %arg6[%c1, %c0_59, %c0_60] : memref<2x32x192xbf16, #tpu.memory_space<vmem>>, vector<1x32x192xbf16>
    %144 = vector.shape_cast %143 : vector<1x32x192xbf16> to vector<32x192xbf16>
    %cst_61 = arith.constant dense<0.000000e+00> : vector<128x192xf32>
    %145 = tpu.matmul %142, %144, %cst_61 {dimension_numbers = #tpu.dot_dimension_numbers<[1], [0], [0], [1], [0, 0, 1, 1], [], []>} : vector<128x32xbf16>, vector<32x192xbf16>, vector<128x192xf32> -> vector<128x192xf32>
    %c1_62 = arith.constant 1 : index
    %c0_63 = arith.constant 0 : index
    %146 = vector.load %arg7[%c1_62, %c0_63] : memref<2x192xf32, #tpu.memory_space<vmem>>, vector<1x192xf32>
    %147 = vector.broadcast %146 : vector<1x192xf32> to vector<128x192xf32>
    %148 = arith.addf %145, %147 : vector<128x192xf32>
    %c1_64 = arith.constant 1 : index
    %c0_65 = arith.constant 0 : index
    %c0_66 = arith.constant 0 : index
    %149 = vector.load %arg8[%c1_64, %c0_65, %c0_66] : memref<2x64x32xbf16, #tpu.memory_space<vmem>>, vector<1x64x32xbf16>
    %150 = vector.shape_cast %149 : vector<1x64x32xbf16> to vector<64x32xbf16>
    %151 = vector.extract_strided_slice %148 {offsets = [0, 0], sizes = [128, 32], strides = [1, 1]} : vector<128x192xf32> to vector<128x32xf32>
    %152 = arith.truncf %151 : vector<128x32xf32> to vector<128x32xbf16>
    %153 = vector.extract_strided_slice %148 {offsets = [0, 64], sizes = [128, 32], strides = [1, 1]} : vector<128x192xf32> to vector<128x32xf32>
    %154 = arith.truncf %153 : vector<128x32xf32> to vector<128x32xbf16>
    %155 = vector.extract_strided_slice %148 {offsets = [0, 128], sizes = [128, 32], strides = [1, 1]} : vector<128x192xf32> to vector<128x32xf32>
    %156 = arith.truncf %155 : vector<128x32xf32> to vector<128x32xbf16>
    %cst_67 = arith.constant dense<0.000000e+00> : vector<128x128xf32>
    %157 = tpu.matmul %152, %154, %cst_67 {dimension_numbers = #tpu.dot_dimension_numbers<[1], [1], [0], [0], [0, 0, 1, 0], [], []>} : vector<128x32xbf16>, vector<128x32xbf16>, vector<128x128xf32> -> vector<128x128xf32>
    %158 = arith.addf %157, %0 : vector<128x128xf32>
    %cst_68 = arith.constant dense<0xFF800000> : vector<128xf32>
    %159 = vector.multi_reduction <maximumf>, %158, %cst_68 [1] : vector<128x128xf32> to vector<128xf32>
    %160 = vector.shape_cast %159 : vector<128xf32> to vector<128x1xf32>
    %161 = vector.broadcast %160 : vector<128x1xf32> to vector<128x128xf32>
    %162 = arith.subf %158, %161 : vector<128x128xf32>
    %163 = math.exp %162 : vector<128x128xf32>
    %cst_69 = arith.constant dense<0.000000e+00> : vector<128xf32>
    %164 = vector.multi_reduction <add>, %163, %cst_69 [1] : vector<128x128xf32> to vector<128xf32>
    %165 = vector.shape_cast %164 : vector<128xf32> to vector<128x1xf32>
    %166 = tpu.reciprocal %165 : vector<128x1xf32> -> vector<128x1xf32>
    %167 = vector.broadcast %166 : vector<128x1xf32> to vector<128x128xf32>
    %168 = arith.mulf %163, %167 : vector<128x128xf32>
    %169 = arith.truncf %168 : vector<128x128xf32> to vector<128x128xbf16>
    %cst_70 = arith.constant dense<0.000000e+00> : vector<128x32xf32>
    %170 = tpu.matmul %169, %156, %cst_70 {dimension_numbers = #tpu.dot_dimension_numbers<[1], [0], [0], [1], [0, 0, 1, 1], [], []>} : vector<128x128xbf16>, vector<128x32xbf16>, vector<128x32xf32> -> vector<128x32xf32>
    %171 = arith.truncf %170 : vector<128x32xf32> to vector<128x32xbf16>
    %172 = vector.extract_strided_slice %150 {offsets = [0, 0], sizes = [32, 32], strides = [1, 1]} : vector<64x32xbf16> to vector<32x32xbf16>
    %cst_71 = arith.constant dense<0.000000e+00> : vector<128x32xf32>
    %173 = tpu.matmul %171, %172, %cst_71 {dimension_numbers = #tpu.dot_dimension_numbers<[1], [0], [0], [1], [0, 0, 1, 1], [], []>} : vector<128x32xbf16>, vector<32x32xbf16>, vector<128x32xf32> -> vector<128x32xf32>
    %174 = vector.extract_strided_slice %148 {offsets = [0, 32], sizes = [128, 32], strides = [1, 1]} : vector<128x192xf32> to vector<128x32xf32>
    %175 = arith.truncf %174 : vector<128x32xf32> to vector<128x32xbf16>
    %176 = vector.extract_strided_slice %148 {offsets = [0, 96], sizes = [128, 32], strides = [1, 1]} : vector<128x192xf32> to vector<128x32xf32>
    %177 = arith.truncf %176 : vector<128x32xf32> to vector<128x32xbf16>
    %178 = vector.extract_strided_slice %148 {offsets = [0, 160], sizes = [128, 32], strides = [1, 1]} : vector<128x192xf32> to vector<128x32xf32>
    %179 = arith.truncf %178 : vector<128x32xf32> to vector<128x32xbf16>
    %cst_72 = arith.constant dense<0.000000e+00> : vector<128x128xf32>
    %180 = tpu.matmul %175, %177, %cst_72 {dimension_numbers = #tpu.dot_dimension_numbers<[1], [1], [0], [0], [0, 0, 1, 0], [], []>} : vector<128x32xbf16>, vector<128x32xbf16>, vector<128x128xf32> -> vector<128x128xf32>
    %181 = arith.addf %180, %0 : vector<128x128xf32>
    %cst_73 = arith.constant dense<0xFF800000> : vector<128xf32>
    %182 = vector.multi_reduction <maximumf>, %181, %cst_73 [1] : vector<128x128xf32> to vector<128xf32>
    %183 = vector.shape_cast %182 : vector<128xf32> to vector<128x1xf32>
    %184 = vector.broadcast %183 : vector<128x1xf32> to vector<128x128xf32>
    %185 = arith.subf %181, %184 : vector<128x128xf32>
    %186 = math.exp %185 : vector<128x128xf32>
    %cst_74 = arith.constant dense<0.000000e+00> : vector<128xf32>
    %187 = vector.multi_reduction <add>, %186, %cst_74 [1] : vector<128x128xf32> to vector<128xf32>
    %188 = vector.shape_cast %187 : vector<128xf32> to vector<128x1xf32>
    %189 = tpu.reciprocal %188 : vector<128x1xf32> -> vector<128x1xf32>
    %190 = vector.broadcast %189 : vector<128x1xf32> to vector<128x128xf32>
    %191 = arith.mulf %186, %190 : vector<128x128xf32>
    %192 = arith.truncf %191 : vector<128x128xf32> to vector<128x128xbf16>
    %cst_75 = arith.constant dense<0.000000e+00> : vector<128x32xf32>
    %193 = tpu.matmul %192, %179, %cst_75 {dimension_numbers = #tpu.dot_dimension_numbers<[1], [0], [0], [1], [0, 0, 1, 1], [], []>} : vector<128x128xbf16>, vector<128x32xbf16>, vector<128x32xf32> -> vector<128x32xf32>
    %194 = arith.truncf %193 : vector<128x32xf32> to vector<128x32xbf16>
    %195 = vector.extract_strided_slice %150 {offsets = [32, 0], sizes = [32, 32], strides = [1, 1]} : vector<64x32xbf16> to vector<32x32xbf16>
    %cst_76 = arith.constant dense<0.000000e+00> : vector<128x32xf32>
    %196 = tpu.matmul %194, %195, %cst_76 {dimension_numbers = #tpu.dot_dimension_numbers<[1], [0], [0], [1], [0, 0, 1, 1], [], []>} : vector<128x32xbf16>, vector<32x32xbf16>, vector<128x32xf32> -> vector<128x32xf32>
    %197 = arith.addf %173, %196 : vector<128x32xf32>
    %198 = arith.addf %125, %197 : vector<128x32xf32>
    %c1_77 = arith.constant 1 : index
    %c0_78 = arith.constant 0 : index
    %199 = vector.load %arg9[%c1_77, %c0_78] : memref<2x32xf32, #tpu.memory_space<vmem>>, vector<1x32xf32>
    %200 = vector.broadcast %199 : vector<1x32xf32> to vector<128x32xf32>
    %201 = arith.addf %198, %200 : vector<128x32xf32>
    %cst_79 = arith.constant dense<0.000000e+00> : vector<128xf32>
    %202 = vector.multi_reduction <add>, %201, %cst_79 [1] : vector<128x32xf32> to vector<128xf32>
    %203 = vector.shape_cast %202 : vector<128xf32> to vector<128x1xf32>
    %cst_80 = arith.constant 3.200000e+01 : f32
    %204 = vector.broadcast %cst_80 : f32 to vector<128x1xf32>
    %205 = arith.divf %203, %204 : vector<128x1xf32>
    %206 = vector.broadcast %205 : vector<128x1xf32> to vector<128x32xf32>
    %207 = arith.subf %201, %206 : vector<128x32xf32>
    %208 = arith.mulf %207, %207 : vector<128x32xf32>
    %cst_81 = arith.constant dense<0.000000e+00> : vector<128xf32>
    %209 = vector.multi_reduction <add>, %208, %cst_81 [1] : vector<128x32xf32> to vector<128xf32>
    %210 = vector.shape_cast %209 : vector<128xf32> to vector<128x1xf32>
    %cst_82 = arith.constant 3.200000e+01 : f32
    %211 = vector.broadcast %cst_82 : f32 to vector<128x1xf32>
    %212 = arith.divf %210, %211 : vector<128x1xf32>
    %cst_83 = arith.constant 9.99999974E-6 : f32
    %213 = vector.broadcast %cst_83 : f32 to vector<128x1xf32>
    %214 = arith.addf %212, %213 : vector<128x1xf32>
    %215 = math.rsqrt %214 : vector<128x1xf32>
    %216 = vector.broadcast %215 : vector<128x1xf32> to vector<128x32xf32>
    %217 = arith.mulf %207, %216 : vector<128x32xf32>
    %218 = arith.truncf %217 : vector<128x32xf32> to vector<128x32xbf16>
    %c1_84 = arith.constant 1 : index
    %c0_85 = arith.constant 0 : index
    %c0_86 = arith.constant 0 : index
    %219 = vector.load %arg10[%c1_84, %c0_85, %c0_86] : memref<2x32x32xbf16, #tpu.memory_space<vmem>>, vector<1x32x32xbf16>
    %220 = vector.shape_cast %219 : vector<1x32x32xbf16> to vector<32x32xbf16>
    %cst_87 = arith.constant dense<0.000000e+00> : vector<128x32xf32>
    %221 = tpu.matmul %218, %220, %cst_87 {dimension_numbers = #tpu.dot_dimension_numbers<[1], [0], [0], [1], [0, 0, 1, 1], [], []>} : vector<128x32xbf16>, vector<32x32xbf16>, vector<128x32xf32> -> vector<128x32xf32>
    %c1_88 = arith.constant 1 : index
    %c0_89 = arith.constant 0 : index
    %222 = vector.load %arg11[%c1_88, %c0_89] : memref<2x32xf32, #tpu.memory_space<vmem>>, vector<1x32xf32>
    %223 = vector.broadcast %222 : vector<1x32xf32> to vector<128x32xf32>
    %224 = arith.addf %221, %223 : vector<128x32xf32>
    %cst_90 = arith.constant 5.000000e-01 : f32
    %225 = vector.broadcast %cst_90 : f32 to vector<128x32xf32>
    %226 = arith.mulf %225, %224 : vector<128x32xf32>
    %cst_91 = arith.constant 4.471500e-02 : f32
    %227 = vector.broadcast %cst_91 : f32 to vector<128x32xf32>
    %228 = arith.mulf %227, %224 : vector<128x32xf32>
    %229 = arith.mulf %228, %224 : vector<128x32xf32>
    %230 = arith.mulf %229, %224 : vector<128x32xf32>
    %231 = arith.addf %224, %230 : vector<128x32xf32>
    %cst_92 = arith.constant 0.797884583 : f32
    %232 = vector.broadcast %cst_92 : f32 to vector<128x32xf32>
    %233 = arith.mulf %232, %231 : vector<128x32xf32>
    %234 = math.tanh %233 : vector<128x32xf32>
    %cst_93 = arith.constant 1.000000e+00 : f32
    %235 = vector.broadcast %cst_93 : f32 to vector<128x32xf32>
    %236 = arith.addf %235, %234 : vector<128x32xf32>
    %237 = arith.mulf %226, %236 : vector<128x32xf32>
    %238 = arith.truncf %237 : vector<128x32xf32> to vector<128x32xbf16>
    %c1_94 = arith.constant 1 : index
    %c0_95 = arith.constant 0 : index
    %c0_96 = arith.constant 0 : index
    %239 = vector.load %arg12[%c1_94, %c0_95, %c0_96] : memref<2x32x32xbf16, #tpu.memory_space<vmem>>, vector<1x32x32xbf16>
    %240 = vector.shape_cast %239 : vector<1x32x32xbf16> to vector<32x32xbf16>
    %cst_97 = arith.constant dense<0.000000e+00> : vector<128x32xf32>
    %241 = tpu.matmul %238, %240, %cst_97 {dimension_numbers = #tpu.dot_dimension_numbers<[1], [0], [0], [1], [0, 0, 1, 1], [], []>} : vector<128x32xbf16>, vector<32x32xbf16>, vector<128x32xf32> -> vector<128x32xf32>
    %242 = arith.addf %201, %241 : vector<128x32xf32>
    %c1_98 = arith.constant 1 : index
    %c0_99 = arith.constant 0 : index
    %243 = vector.load %arg13[%c1_98, %c0_99] : memref<2x32xf32, #tpu.memory_space<vmem>>, vector<1x32xf32>
    %244 = vector.broadcast %243 : vector<1x32xf32> to vector<128x32xf32>
    %245 = arith.addf %242, %244 : vector<128x32xf32>
    %c0_100 = arith.constant 0 : index
    %c0_101 = arith.constant 0 : index
    %246 = vector.load %arg4[%c0_100, %c0_101] : memref<16x128xbf16, #tpu.memory_space<vmem>>, vector<16x128xbf16>
    %247 = arith.truncf %245 : vector<128x32xf32> to vector<128x32xbf16>
    %cst_102 = arith.constant dense<0.000000e+00> : vector<16x32xf32>
    %248 = tpu.matmul %246, %247, %cst_102 {dimension_numbers = #tpu.dot_dimension_numbers<[1], [0], [0], [1], [0, 0, 1, 1], [], []>} : vector<16x128xbf16>, vector<128x32xbf16>, vector<16x32xf32> -> vector<16x32xf32>
    %249 = arith.truncf %248 : vector<16x32xf32> to vector<16x32xbf16>
    %c0_103 = arith.constant 0 : index
    %c0_104 = arith.constant 0 : index
    %250 = vector.load %arg14[%c0_103, %c0_104] : memref<32x128xbf16, #tpu.memory_space<vmem>>, vector<32x128xbf16>
    %cst_105 = arith.constant dense<0.000000e+00> : vector<16x128xf32>
    %251 = tpu.matmul %249, %250, %cst_105 {dimension_numbers = #tpu.dot_dimension_numbers<[1], [0], [0], [1], [0, 0, 1, 1], [], []>} : vector<16x32xbf16>, vector<32x128xbf16>, vector<16x128xf32> -> vector<16x128xf32>
    %c0_106 = arith.constant 0 : index
    %c0_107 = arith.constant 0 : index
    %252 = vector.load %arg15[%c0_106, %c0_107] : memref<1x128xf32, #tpu.memory_space<vmem>>, vector<1x128xf32>
    %253 = vector.broadcast %252 : vector<1x128xf32> to vector<16x128xf32>
    %254 = arith.addf %251, %253 : vector<16x128xf32>
    %c0_108 = arith.constant 0 : index
    %c0_109 = arith.constant 0 : index
    %255 = vector.load %arg16[%c0_108, %c0_109] : memref<16x128xf32, #tpu.memory_space<vmem>>, vector<16x128xf32>
    tpu.vector_store %arg16[%c0_108, %c0_109], %254 {strides = array<i32>} : memref<16x128xf32, #tpu.memory_space<vmem>>, vector<16x128xf32>,
    return
  }
  func.func @transform_0(%arg0: i32) -> (i32, i32) {
    %c0_i32 = arith.constant 0 : i32
    %c0_i32_0 = arith.constant 0 : i32
    return %arg0, %c0_i32 : i32, i32
  }
  func.func @transform_1(%arg0: i32) -> (i32, i32) {
    %c0_i32 = arith.constant 0 : i32
    %c0_i32_0 = arith.constant 0 : i32
    %c0_i32_1 = arith.constant 0 : i32
    return %c0_i32, %c0_i32_0 : i32, i32
  }
  func.func @transform_2(%arg0: i32) -> (i32, i32) {
    %c0_i32 = arith.constant 0 : i32
    %c0_i32_0 = arith.constant 0 : i32
    %c0_i32_1 = arith.constant 0 : i32
    return %c0_i32, %c0_i32_0 : i32, i32
  }
  func.func @transform_3(%arg0: i32) -> (i32, i32) {
    %c0_i32 = arith.constant 0 : i32
    %c0_i32_0 = arith.constant 0 : i32
    %c0_i32_1 = arith.constant 0 : i32
    return %c0_i32, %c0_i32_0 : i32, i32
  }
  func.func @transform_4(%arg0: i32) -> (i32, i32) {
    %c0_i32 = arith.constant 0 : i32
    %c0_i32_0 = arith.constant 0 : i32
    %c0_i32_1 = arith.constant 0 : i32
    return %c0_i32, %c0_i32_0 : i32, i32
  }
  func.func @transform_5(%arg0: i32) -> (i32, i32, i32) {
    %c0_i32 = arith.constant 0 : i32
    %c0_i32_0 = arith.constant 0 : i32
    %c0_i32_1 = arith.constant 0 : i32
    %c0_i32_2 = arith.constant 0 : i32
    return %c0_i32, %c0_i32_0, %c0_i32_1 : i32, i32, i32
  }
  func.func @transform_6(%arg0: i32) -> (i32, i32) {
    %c0_i32 = arith.constant 0 : i32
    %c0_i32_0 = arith.constant 0 : i32
    %c0_i32_1 = arith.constant 0 : i32
    return %c0_i32, %c0_i32_0 : i32, i32
  }
  func.func @transform_7(%arg0: i32) -> (i32, i32, i32) {
    %c0_i32 = arith.constant 0 : i32
    %c0_i32_0 = arith.constant 0 : i32
    %c0_i32_1 = arith.constant 0 : i32
    %c0_i32_2 = arith.constant 0 : i32
    return %c0_i32, %c0_i32_0, %c0_i32_1 : i32, i32, i32
  }
  func.func @transform_8(%arg0: i32) -> (i32, i32) {
    %c0_i32 = arith.constant 0 : i32
    %c0_i32_0 = arith.constant 0 : i32
    %c0_i32_1 = arith.constant 0 : i32
    return %c0_i32, %c0_i32_0 : i32, i32
  }
  func.func @transform_9(%arg0: i32) -> (i32, i32, i32) {
    %c0_i32 = arith.constant 0 : i32
    %c0_i32_0 = arith.constant 0 : i32
    %c0_i32_1 = arith.constant 0 : i32
    %c0_i32_2 = arith.constant 0 : i32
    return %c0_i32, %c0_i32_0, %c0_i32_1 : i32, i32, i32
  }
  func.func @transform_10(%arg0: i32) -> (i32, i32) {
    %c0_i32 = arith.constant 0 : i32
    %c0_i32_0 = arith.constant 0 : i32
    %c0_i32_1 = arith.constant 0 : i32
    return %c0_i32, %c0_i32_0 : i32, i32
  }
  func.func @transform_11(%arg0: i32) -> (i32, i32, i32) {
    %c0_i32 = arith.constant 0 : i32
    %c0_i32_0 = arith.constant 0 : i32
    %c0_i32_1 = arith.constant 0 : i32
    %c0_i32_2 = arith.constant 0 : i32
    return %c0_i32, %c0_i32_0, %c0_i32_1 : i32, i32, i32
  }
  func.func @transform_12(%arg0: i32) -> (i32, i32) {
    %c0_i32 = arith.constant 0 : i32
    %c0_i32_0 = arith.constant 0 : i32
    %c0_i32_1 = arith.constant 0 : i32
    return %c0_i32, %c0_i32_0 : i32, i32
  }
  func.func @transform_13(%arg0: i32) -> (i32, i32) {
    %c0_i32 = arith.constant 0 : i32
    %c0_i32_0 = arith.constant 0 : i32
    %c0_i32_1 = arith.constant 0 : i32
    return %c0_i32, %c0_i32_0 : i32, i32
  }
  func.func @transform_14(%arg0: i32) -> (i32, i32) {
    %c0_i32 = arith.constant 0 : i32
    %c0_i32_0 = arith.constant 0 : i32
    %c0_i32_1 = arith.constant 0 : i32
    return %c0_i32, %c0_i32_0 : i32, i32
  }
  func.func @transform_15(%arg0: i32) -> (i32, i32) {
    %c0_i32 = arith.constant 0 : i32
    %c0_i32_0 = arith.constant 0 : i32
    return %arg0, %c0_i32 : i32, i32
  }
}

</mosaic_0001>

<bundles_post_ra>
// kernel: tile.9
= control target key start
LH: loop header
LB: loop body
LE: loop exit
PB: predicated region body
PF: predicated region fallthrough
CT: control target
= control target key end

     0   :  { %vm3_vm0 = vcmask 261120   ;;  %s232_s0 = inlined_call_operand.vmem [shape: f32[16,5,32], index: 0, kind: input, shape index: {}]   ;;  %s233_s1 = inlined_call_operand.vmem [shape: f32[80,32], index: 1, kind: output, shape index: {}]  }
   0x1   :  { %v2_v0 = vld [vmem:[%s232_s0] sm:$0x1f]   ;;  %v80_v1 = vld [vmem:[%s232_s0 + $0x8] sm:$0x1f]   ;;  %v82_v2 = vld [vmem:[%s232_s0 + $0x10] sm:$0x1f]  }
   0x2   :  { %4 = vst.msk [vmem:[%s233_s1] sm:$0x1f] %vm3_vm0, %v2_v0   ;;  %v84_v3 = vld [vmem:[%s232_s0 + $0x18] sm:$0x1f]   ;;  %v86_v4 = vld [vmem:[%s232_s0 + $0x20] sm:$0x1f]  }
   0x3   :  { %81 = vst.msk [vmem:[%s233_s1 + $0x5] sm:$0x1f] %vm3_vm0, %v80_v1   ;;  %v88_v5 = vld [vmem:[%s232_s0 + $0x28] sm:$0x1f]   ;;  %v90_v6 = vld [vmem:[%s232_s0 + $0x30] sm:$0x1f]  }
   0x4   :  { %83 = vst.msk [vmem:[%s233_s1 + $0xa] sm:$0x1f] %vm3_vm0, %v82_v2   ;;  %v92_v7 = vld [vmem:[%s232_s0 + $0x38] sm:$0x1f]   ;;  %v94_v8 = vld [vmem:[%s232_s0 + $0x40] sm:$0x1f]  }
   0x5   :  { %85 = vst.msk [vmem:[%s233_s1 + $0xf] sm:$0x1f] %vm3_vm0, %v84_v3   ;;  %v96_v9 = vld [vmem:[%s232_s0 + $0x48] sm:$0x1f]   ;;  %v98_v10 = vld [vmem:[%s232_s0 + $0x50] sm:$0x1f]  }
   0x6   :  { %87 = vst.msk [vmem:[%s233_s1 + $0x14] sm:$0x1f] %vm3_vm0, %v86_v4   ;;  %v100_v11 = vld [vmem:[%s232_s0 + $0x58] sm:$0x1f]   ;;  %v102_v12 = vld [vmem:[%s232_s0 + $0x60] sm:$0x1f]  }
   0x7   :  { %89 = vst.msk [vmem:[%s233_s1 + $0x19] sm:$0x1f] %vm3_vm0, %v88_v5   ;;  %v104_v13 = vld [vmem:[%s232_s0 + $0x68] sm:$0x1f]   ;;  %v106_v14 = vld [vmem:[%s232_s0 + $0x70] sm:$0x1f]  }
   0x8   :  { %91 = vst.msk [vmem:[%s233_s1 + $0x1e] sm:$0x1f] %vm3_vm0, %v90_v6   ;;  %v108_v15 = vld [vmem:[%s232_s0 + $0x78] sm:$0x1f]  }
   0x9   :  { %93 = vst.msk [vmem:[%s233_s1 + $0x23] sm:$0x1f] %vm3_vm0, %v92_v7  }
   0xa   :  { %95 = vst.msk [vmem:[%s233_s1 + $0x28] sm:$0x1f] %vm3_vm0, %v94_v8  }
   0xb   :  { %97 = vst.msk [vmem:[%s233_s1 + $0x2d] sm:$0x1f] %vm3_vm0, %v96_v9  }
   0xc   :  { %99 = vst.msk [vmem:[%s233_s1 + $0x32] sm:$0x1f] %vm3_vm0, %v98_v10  }
   0xd   :  { %101 = vst.msk [vmem:[%s233_s1 + $0x37] sm:$0x1f] %vm3_vm0, %v100_v11  }
   0xe   :  { %103 = vst.msk [vmem:[%s233_s1 + $0x3c] sm:$0x1f] %vm3_vm0, %v102_v12  }
   0xf   :  { %105 = vst.msk [vmem:[%s233_s1 + $0x41] sm:$0x1f] %vm3_vm0, %v104_v13  }
  0x10   :  { %107 = vst.msk [vmem:[%s233_s1 + $0x46] sm:$0x1f] %vm3_vm0, %v106_v14  }
  0x11   :  { %109 = vst.msk [vmem:[%s233_s1 + $0x4b] sm:$0x1f] %vm3_vm0, %v108_v15  }

// kernel: vit_forward.1
= control target key start
LH: loop header
LB: loop body
LE: loop exit
PB: predicated region body
PF: predicated region fallthrough
CT: control target
= control target key end

     0   :  { %s9680_s0 = inlined_call_operand.vmem [shape: bf16[128,64], index: 0, kind: input, shape index: {}]   ;;  %s9681_s1 = inlined_call_operand.vmem [shape: f32[128,32], index: 1, kind: input, shape index: {}]   ;;  %s9682_s2 = inlined_call_operand.vmem [shape: f32[128,128], index: 2, kind: input, shape index: {}]   ;;  %s9683_s3 = inlined_call_operand.vmem [shape: bf16[16,128], index: 3, kind: input, shape index: {}]   ;;  %s9684_s4 = inlined_call_operand.vmem [shape: bf16[64,32], index: 4, kind: input, shape index: {}]   ;;  %s9685_s5 = inlined_call_operand.vmem [shape: bf16[2,32,192], index: 5, kind: input, shape index: {}]   ;;  %s9686_s6 = inlined_call_operand.vmem [shape: f32[2,192], index: 6, kind: input, shape index: {}]   ;;  %s9687_s7 = inlined_call_operand.vmem [shape: bf16[2,64,32], index: 7, kind: input, shape index: {}]   ;;  %s9688_s8 = inlined_call_operand.vmem [shape: f32[2,32], index: 8, kind: input, shape index: {}]   ;;  %s9689_s9 = inlined_call_operand.vmem [shape: bf16[2,32,32], index: 9, kind: input, shape index: {}]   ;;  %s9690_s10 = inlined_call_operand.vmem [shape: f32[2,32], index: 10, kind: input, shape index: {}]   ;;  %s9691_s11 = inlined_call_operand.vmem [shape: bf16[2,32,32], index: 11, kind: input, shape index: {}]   ;;  %s9692_s12 = inlined_call_operand.vmem [shape: f32[2,32], index: 12, kind: input, shape index: {}]   ;;  %s9693_s13 = inlined_call_operand.vmem [shape: bf16[32,128], index: 13, kind: input, shape index: {}]   ;;  %s9694_s14 = inlined_call_operand.vmem [shape: f32[1,128], index: 14, kind: input, shape index: {}]   ;;  %s9695_s15 = inlined_call_operand.hbm [shape: f32[16,128], index: 15, kind: output, shape index: {}]  }
   0x1   :  { %v5836_v0 = vld [vmem:[%s9684_s4 + $0x18] sm:$0xff]  ;;  %v5835_v1 = vld [vmem:[%s9684_s4 + $0x10] sm:$0xff] }
   0x2   :  { %201 = vmatpush.bf16.msra.mxu0 %v5836_v0 }
   0x3   :  { %20 = vsyncpa [#allocation3], 0  ;;  %v5834_v2 = vld [vmem:[%s9684_s4 + $0x8] sm:$0xff]  ;;  %v5833_v3 = vld [vmem:[%s9684_s4] sm:$0xff]  ;;  %vm172_vm0 = vcmask 523264   ;;  %vm246_vm1 = vcmask 261120  }
   0x4   :  { %v5825_v4 = vld [vmem:[%s9680_s0] sm:$0xff]  ;;  %v5826_v5 = vld [vmem:[%s9680_s0 + $0x8] sm:$0xff]  ;;  %v5827_v6 = vld [vmem:[%s9680_s0 + $0x10] sm:$0xff]  ;;  %v6374_v60 = vmov 32.0   ;;  %s6376_s24 = smov 64   ;;  %s6377_s25 = smov 96  }
   0x5   :  { %v5828_v7 = vld [vmem:[%s9680_s0 + $0x18] sm:$0xff]  ;;  %v5829_v8 = vld [vmem:[%s9680_s0 + $0x20] sm:$0xff]  ;;  %v5830_v9 = vld [vmem:[%s9680_s0 + $0x28] sm:$0xff]  ;;  %5882 = vrcp.f32 %v6374_v60  ;;  %s6378_s16 = smov [#allocation2]   ;;  %s5499_s4 = sshll.u32 %s9695_s15, 4  ;;  %s5500_s4 = int_to_ptr.hbm [resolvable:$true] %s5499_s4 }
   0x6   :  { %202 = vmatpush.bf16.msra.mxu0 %v5835_v1  ;;  %v5831_v10 = vld [vmem:[%s9680_s0 + $0x30] sm:$0xff]  ;;  %v5832_v11 = vld [vmem:[%s9680_s0 + $0x38] sm:$0xff]  ;;  %v100_v20 = vld [vmem:[%s9681_s1 + $0x40] sm:$0xff]  ;;  %s5497_s17 = sshll.u32 %s6378_s16, 4  ;;  %s6380_s19 = smov 8   ;;  %s5498_s17 = int_to_ptr.vmem [resolvable:$true] %s5497_s17 }
   0x7   :  { %v101_v24 = vld [vmem:[%s9681_s1 + $0x48] sm:$0xff]  ;;  %v92_v28 = vld [vmem:[%s9681_s1] sm:$0xff]  ;;  %v102_v29 = vld [vmem:[%s9681_s1 + $0x50] sm:$0xff] }
   0x8   :  { %v103_v35 = vld [vmem:[%s9681_s1 + $0x58] sm:$0xff]  ;;  %v93_v39 = vld [vmem:[%s9681_s1 + $0x8] sm:$0xff]  ;;  %v104_v40 = vld [vmem:[%s9681_s1 + $0x60] sm:$0xff] }
   0x9   :  { %v105_v46 = vld [vmem:[%s9681_s1 + $0x68] sm:$0xff]  ;;  %v106_v50 = vld [vmem:[%s9681_s1 + $0x70] sm:$0xff]  ;;  %v95_v54 = vld [vmem:[%s9681_s1 + $0x18] sm:$0xff] }
   0xa   :  { %203 = vmatpush.bf16.msra.mxu0 %v5834_v2  ;;  %v96_v57 = vld [vmem:[%s9681_s1 + $0x20] sm:$0xff]  ;;  %v99_v60 = vld [vmem:[%s9681_s1 + $0x38] sm:$0xff] }
   0xb   :  { %v5883_v61 = vpop.eup %5882 }
   0xc   :  { %v296_v62 = vmul.f32 32.0, %v5883_v61  ;;  %vm300_vm2 = vweird.f32 %v5883_v61 }
   0xe   :  { %204 = vmatpush.bf16.msra.mxu0 %v5833_v3  ;;  %v297_v63 = vsub.f32 1.0, %v296_v62 }
  0x10   :  { %v298_v0 = vmul.f32 %v5883_v61, %v297_v63 }
  0x11   :  { %5559 = vmatmul.msk.bf16.vlgmr.msra.gmra.mxu0 %vm172_vm0, %v5825_v4 }
  0x12   :  { %v299_v1 = vadd.f32 %v5883_v61, %v298_v0 }
  0x14   :  { %v6582_v2 = vsel %vm300_vm2, %v5883_v61, %v299_v1 }
  0x15   :  { %9738 = vst [vmem:[#allocation15_spill] sm:$0xff] %v6582_v2 }
  0x21   :  { %5560 = vmatmul.msk.bf16.gmra.mxu0 %vm172_vm0, %v5826_v5 }
  0x31   :  { %5561 = vmatmul.msk.bf16.gmra.mxu0 %vm172_vm0, %v5827_v6 }
  0x41   :  { %5562 = vmatmul.msk.bf16.gmra.mxu0 %vm172_vm0, %v5828_v7 }
  0x51   :  { %5563 = vmatmul.msk.bf16.gmra.mxu0 %vm172_vm0, %v5829_v8  ;;  %v107_v8 = vld [vmem:[%s9681_s1 + $0x78] sm:$0xff] }
  0x61   :  { %5564 = vmatmul.msk.bf16.gmra.mxu0 %vm172_vm0, %v5830_v9 }
  0x71   :  { %5565 = vmatmul.msk.bf16.gmra.mxu0 %vm172_vm0, %v5831_v10 }
  0x81   :  { %5566 = vmatmul.msk.bf16.gmra.mxu0 %vm172_vm0, %v5832_v11 }
  0x8e   :  { %v206_v12 = vpop.f32.mrf.mxu0 }
  0x8f   :  { %v6525_v30 = vadd.f32 %v206_v12, %v92_v28 }
  0x91   :  { %v247_v34 = vsel %vm246_vm1, %v6525_v30, 0.0 }
  0x96   :  { %v208_v13 = vpop.f32.mrf.mxu0 }
  0x97   :  { %v6546_v41 = vadd.f32 %v208_v13, %v93_v39 }
  0x99   :  { %9732 = vst [vmem:[#allocation9_spill] sm:$0xff] %v6546_v41  ;;  %v250_v45 = vsel %vm246_vm1, %v6546_v41, 0.0 }
  0x9e   :  { %v6497_v14 = vpop.f32.mrf.mxu0 }
  0xa6   :  { %v213_v15 = vpop.f32.mrf.mxu0 }
  0xa7   :  { %v6571_v55 = vadd.f32 %v213_v15, %v95_v54 }
  0xa9   :  { %9736 = vst [vmem:[#allocation13_spill] sm:$0xff] %v6571_v55  ;;  %v256_v56 = vsel %vm246_vm1, %v6571_v55, 0.0 }
  0xae   :  { %v216_v16 = vpop.f32.mrf.mxu0 }
  0xaf   :  { %v6578_v58 = vadd.f32 %v216_v16, %v96_v57 }
  0xb1   :  { %9737 = vst [vmem:[#allocation14_spill] sm:$0xff] %v6578_v58  ;;  %v259_v59 = vsel %vm246_vm1, %v6578_v58, 0.0 }
  0xb6   :  { %v6499_v17 = vpop.f32.mrf.mxu0 }
  0xbe   :  { %v6501_v18 = vpop.f32.mrf.mxu0 }
  0xc6   :  { %v6503_v19 = vpop.f32.mrf.mxu0 }
  0xc7   :  { %v6663_v0 = vadd.f32 %v6503_v19, %v99_v60 }
  0xc9   :  { %9742 = vst [vmem:[#allocation19_spill] sm:$0xff] %v6663_v0 }
  0xce   :  { %v226_v21 = vpop.f32.mrf.mxu0 }
  0xcf   :  { %v6508_v22 = vadd.f32 %v226_v21, %v100_v20  ;;  %v94_v21 = vld [vmem:[%s9681_s1 + $0x10] sm:$0xff] }
  0xd1   :  { %9728 = vst [vmem:[#allocation5_spill] sm:$0xff] %v6508_v22  ;;  %v271_v23 = vsel %vm246_vm1, %v6508_v22, 0.0 }
  0xd2   :  { %272 = vadd.xlane.f32.xlu0 %v271_v23 }
  0xd6   :  { %v228_v25 = vpop.f32.mrf.mxu0 }
  0xd7   :  { %v6515_v26 = vadd.f32 %v228_v25, %v101_v24  ;;  %v6610_v25 = vadd.f32 %v6497_v14, %v94_v21 }
  0xd9   :  { %9729 = vst [vmem:[#allocation6_spill] sm:$0xff] %v6515_v26  ;;  %v274_v27 = vsel %vm246_vm1, %v6515_v26, 0.0 }
  0xda   :  { %275 = vadd.xlane.f32.xlu0 %v274_v27  ;;  %9740 = vst [vmem:[#allocation17_spill] sm:$0xff] %v6610_v25 }
  0xde   :  { %v231_v31 = vpop.f32.mrf.mxu0 }
  0xdf   :  { %v6527_v32 = vadd.f32 %v231_v31, %v102_v29  ;;  %v253_v31 = vsel %vm246_vm1, %v6610_v25, 0.0 }
  0xe1   :  { %9730 = vst [vmem:[#allocation7_spill] sm:$0xff] %v6527_v32  ;;  %v277_v33 = vsel %vm246_vm1, %v6527_v32, 0.0 }
  0xe2   :  { %278 = vadd.xlane.f32.xlu1 %v277_v33  ;;  %248 = vadd.xlane.f32.xlu0 %v247_v34  ;;  %v97_v33 = vld [vmem:[%s9681_s1 + $0x28] sm:$0xff] }
  0xe6   :  { %v233_v36 = vpop.f32.mrf.mxu0 }
  0xe7   :  { %v6536_v37 = vadd.f32 %v233_v36, %v103_v35  ;;  %v6625_v36 = vadd.f32 %v6499_v17, %v97_v33  ;;  %v5569_v33 = vld [vmem:[%s9685_s5] sm:$0xf] }
  0xe9   :  { %9731 = vst [vmem:[#allocation8_spill] sm:$0xff] %v6536_v37  ;;  %v280_v38 = vsel %vm246_vm1, %v6536_v37, 0.0 }
  0xea   :  { %281 = vadd.xlane.f32.xlu1 %v280_v38  ;;  %9741 = vst [vmem:[#allocation18_spill] sm:$0xff] %v6625_v36 }
  0xee   :  { %v236_v42 = vpop.f32.mrf.mxu0 }
  0xef   :  { %v6548_v43 = vadd.f32 %v236_v42, %v104_v40 }
  0xf1   :  { %9733 = vst [vmem:[#allocation10_spill] sm:$0xff] %v6548_v43  ;;  %v283_v44 = vsel %vm246_vm1, %v6548_v43, 0.0 }
  0xf2   :  { %284 = vadd.xlane.f32.xlu2 %v283_v44  ;;  %251 = vadd.xlane.f32.xlu1 %v250_v45  ;;  %v262_v44 = vsel %vm246_vm1, %v6625_v36, 0.0 }
  0xf6   :  { %v238_v47 = vpop.f32.mrf.mxu0 }
  0xf7   :  { %v6557_v48 = vadd.f32 %v238_v47, %v105_v46 }
  0xf9   :  { %9734 = vst [vmem:[#allocation11_spill] sm:$0xff] %v6557_v48  ;;  %v286_v49 = vsel %vm246_vm1, %v6557_v48, 0.0 }
  0xfa   :  { %287 = vadd.xlane.f32.xlu2 %v286_v49 }
  0xfe   :  { %v241_v51 = vpop.f32.mrf.mxu0 }
  0xff   :  { %v6564_v52 = vadd.f32 %v241_v51, %v106_v50 }
 0x101   :  { %9735 = vst [vmem:[#allocation12_spill] sm:$0xff] %v6564_v52  ;;  %v289_v53 = vsel %vm246_vm1, %v6564_v52, 0.0 }
 0x102   :  { %290 = vadd.xlane.f32.xlu1 %v289_v53 }
 0x106   :  { %v243_v9 = vpop.f32.mrf.mxu0 }
 0x107   :  { %v6595_v12 = vadd.f32 %v243_v9, %v107_v8  ;;  %v268_v8 = vsel %vm246_vm1, %v6663_v0, 0.0 }
 0x109   :  { %9739 = vst [vmem:[#allocation16_spill] sm:$0xff] %v6595_v12  ;;  %v292_v16 = vsel %vm246_vm1, %v6595_v12, 0.0 }
 0x10a   :  { %257 = vadd.xlane.f32.xlu1 %v256_v56 }
 0x112   :  { %260 = vadd.xlane.f32.xlu1 %v259_v59 }
 0x145   :  { %v273_v3 = vpop.xlane.xlu0 %272 }
 0x146   :  { %v310_v4 = vmul.f32 %v6582_v2, %v273_v3 }
 0x148   :  { %v6586_v5 = vsub.f32 %v6508_v22, %v310_v4 }
 0x14a   :  { %v342_v6 = vmul.f32 %v6586_v5, %v6586_v5 }
 0x14c   :  { %v374_v7 = vsel %vm246_vm1, %v342_v6, 0.0  ;;  %v98_v6 = vld [vmem:[%s9681_s1 + $0x30] sm:$0xff]  ;;  %s6375_s1 = smov 32  }
 0x14d   :  { %375 = vadd.xlane.f32.xlu2 %v374_v7  ;;  %v276_v10 = vpop.xlane.xlu0 %275  ;;  %v6676_v9 = vadd.f32 %v6501_v18, %v98_v6 }
 0x14e   :  { %v311_v11 = vmul.f32 %v6582_v2, %v276_v10 }
 0x14f   :  { %9743 = vst [vmem:[#allocation20_spill] sm:$0xff] %v6676_v9 }
 0x150   :  { %v6598_v13 = vsub.f32 %v6515_v26, %v311_v11 }
 0x152   :  { %v343_v15 = vmul.f32 %v6598_v13, %v6598_v13 }
 0x154   :  { %v377_v20 = vsel %vm246_vm1, %v343_v15, 0.0  ;;  %v265_v15 = vsel %vm246_vm1, %v6676_v9, 0.0 }
 0x155   :  { %v279_v23 = vpop.xlane.xlu1 %278  ;;  %293 = vadd.xlane.f32.xlu2 %v292_v16  ;;  %378 = vadd.xlane.f32.xlu0 %v377_v20  ;;  %v249_v34 = vpop.xlane.xlu0 %248 }
 0x156   :  { %v312_v24 = vmul.f32 %v6582_v2, %v279_v23  ;;  %v302_v38 = vmul.f32 %v6582_v2, %v249_v34  ;;  %v5838_v34 = vld [vmem:[%s9685_s5 + $0x4] sm:$0xf0] }
 0x158   :  { %v6613_v27 = vsub.f32 %v6527_v32, %v312_v24  ;;  %v6634_v42 = vsub.f32 %v6525_v30, %v302_v38 }
 0x15a   :  { %v344_v28 = vmul.f32 %v6613_v27, %v6613_v27  ;;  %v334_v51 = vmul.f32 %v6634_v42, %v6634_v42 }
 0x15c   :  { %v380_v29 = vsel %vm246_vm1, %v344_v28, 0.0  ;;  %v350_v57 = vsel %vm246_vm1, %v334_v51, 0.0  ;;  %v5577_v28 = vld [vmem:[%s9685_s5 + $0x10] sm:$0xf] }
 0x15d   :  { %v282_v35 = vpop.xlane.xlu1 %281  ;;  %381 = vadd.xlane.f32.xlu2 %v380_v29  ;;  %254 = vadd.xlane.f32.xlu0 %v253_v31  ;;  %v5840_v29 = vld [vmem:[%s9685_s5 + $0x14] sm:$0xf0] }
 0x15e   :  { %v313_v14 = vmul.f32 %v6582_v2, %v282_v35  ;;  %v5578_v31 = vor.u32 %v5840_v29, %v5577_v28  ;;  %v5570_v35 = vor.u32 %v5838_v34, %v5569_v33 }
 0x160   :  { %v6629_v39 = vsub.f32 %v6536_v37, %v313_v14  ;;  %5864 = vmatpush.bf16.msra.mxu2 %v5578_v31  ;;  %674 = vmatpush.bf16.msra.mxu1 %v5578_v31 }
 0x162   :  { %v345_v40 = vmul.f32 %v6629_v39, %v6629_v39 }
 0x164   :  { %v383_v45 = vsel %vm246_vm1, %v345_v40, 0.0  ;;  %5865 = vmatpush.bf16.msra.mxu2 %v5570_v35  ;;  %675 = vmatpush.bf16.msra.mxu1 %v5570_v35 }
 0x165   :  { %v285_v46 = vpop.xlane.xlu2 %284  ;;  %263 = vadd.xlane.f32.xlu2 %v262_v44  ;;  %v252_v17 = vpop.xlane.xlu1 %251  ;;  %384 = vadd.xlane.f32.xlu0 %v383_v45 }
 0x166   :  { %v314_v47 = vmul.f32 %v6582_v2, %v285_v46  ;;  %v303_v50 = vmul.f32 %v6582_v2, %v252_v17 }
 0x168   :  { %v6641_v49 = vsub.f32 %v6548_v43, %v314_v47  ;;  %v6649_v54 = vsub.f32 %v6546_v41, %v303_v50 }
 0x16a   :  { %v346_v53 = vmul.f32 %v6641_v49, %v6641_v49  ;;  %v335_v63 = vmul.f32 %v6649_v54, %v6649_v54 }
 0x16c   :  { %v386_v56 = vsel %vm246_vm1, %v346_v53, 0.0  ;;  %v353_v4 = vsel %vm246_vm1, %v335_v63, 0.0 }
 0x16d   :  { %v288_v59 = vpop.xlane.xlu2 %287  ;;  %387 = vadd.xlane.f32.xlu0 %v386_v56  ;;  %351 = vadd.xlane.f32.xlu2 %v350_v57 }
 0x16e   :  { %v315_v61 = vmul.f32 %v6582_v2, %v288_v59 }
 0x170   :  { %v6658_v62 = vsub.f32 %v6557_v48, %v315_v61 }
 0x172   :  { %v347_v1 = vmul.f32 %v6658_v62, %v6658_v62 }
 0x174   :  { %v389_v3 = vsel %vm246_vm1, %v347_v1, 0.0 }
 0x175   :  { %390 = vadd.xlane.f32.xlu1 %v389_v3  ;;  %v291_v7 = vpop.xlane.xlu1 %290  ;;  %354 = vadd.xlane.f32.xlu0 %v353_v4 }
 0x176   :  { %v316_v19 = vmul.f32 %v6582_v2, %v291_v7  ;;  %269 = vadd.xlane.f32.xlu2 %v268_v8 }
 0x178   :  { %v6679_v10 = vsub.f32 %v6564_v52, %v316_v19 }
 0x17a   :  { %v348_v11 = vmul.f32 %v6679_v10, %v6679_v10 }
 0x17c   :  { %v392_v16 = vsel %vm246_vm1, %v348_v11, 0.0 }
 0x17d   :  { %266 = vadd.xlane.f32.xlu1 %v265_v15  ;;  %v258_v20 = vpop.xlane.xlu1 %257  ;;  %393 = vadd.xlane.f32.xlu0 %v392_v16 }
 0x17e   :  { %v305_v21 = vmul.f32 %v6582_v2, %v258_v20 }
 0x180   :  { %v6688_v23 = vsub.f32 %v6571_v55, %v305_v21 }
 0x182   :  { %v337_v18 = vmul.f32 %v6688_v23, %v6688_v23 }
 0x184   :  { %v359_v24 = vsel %vm246_vm1, %v337_v18, 0.0 }
 0x185   :  { %360 = vadd.xlane.f32.xlu0 %v359_v24  ;;  %v261_v44 = vpop.xlane.xlu1 %260 }
 0x186   :  { %v306_v51 = vmul.f32 %v6582_v2, %v261_v44 }
 0x188   :  { %v6715_v61 = vsub.f32 %v6578_v58, %v306_v51 }
 0x18a   :  { %v338_v15 = vmul.f32 %v6715_v61, %v6715_v61 }
 0x18c   :  { %v362_v24 = vsel %vm246_vm1, %v338_v15, 0.0 }
 0x1c0   :  { %v376_v14 = vpop.xlane.xlu2 %375 }
 0x1c1   :  { %v406_v38 = vmul.f32 %v376_v14, %v6582_v2 }
 0x1c3   :  { %v422_v40 = vadd.f32 1e-05, %v406_v38 }
 0x1c5   :  { %5884 = vrsqrt.f32 %v422_v40  ;;  %vm516_vm4 = vweird.f32 %v422_v40 }
 0x1c8   :  { %v294_v45 = vpop.xlane.xlu2 %293  ;;  %v379_v46 = vpop.xlane.xlu0 %378 }
 0x1c9   :  { %v317_v17 = vmul.f32 %v6582_v2, %v294_v45  ;;  %v407_v47 = vmul.f32 %v379_v46, %v6582_v2 }
 0x1cb   :  { %v5885_v50 = vpop.eup %5884  ;;  %v6710_v53 = vsub.f32 %v6595_v12, %v317_v17  ;;  %v423_v56 = vadd.f32 1e-05, %v407_v47 }
 0x1cc   :  { %v511_v57 = vmul.f32 %v5885_v50, %v422_v40  ;;  %vm517_vm3 = vweird.f32 %v5885_v50 }
 0x1cd   :  { %5886 = vrsqrt.f32 %v423_v56  ;;  %v349_v59 = vmul.f32 %v6710_v53, %v6710_v53  ;;  %vm518_vm6 = vmor %vm516_vm4, %vm517_vm3  ;;  %vm526_vm7 = vweird.f32 %v423_v56 }
 0x1ce   :  { %v512_v60 = vmul.f32 %v5885_v50, %v511_v57 }
 0x1cf   :  { %v395_v63 = vsel %vm246_vm1, %v349_v59, 0.0 }
 0x1d0   :  { %v513_v1 = vmul.f32 0.5, %v512_v60  ;;  %v382_v3 = vpop.xlane.xlu2 %381  ;;  %396 = vadd.xlane.f32.xlu1 %v395_v63  ;;  %v255_v4 = vpop.xlane.xlu0 %254 }
 0x1d1   :  { %v408_v6 = vmul.f32 %v382_v3, %v6582_v2  ;;  %v304_v7 = vmul.f32 %v6582_v2, %v255_v4 }
 0x1d2   :  { %v514_v16 = vsub.f32 1.5, %v513_v1 }
 0x1d3   :  { %v5887_v8 = vpop.eup %5886  ;;  %v6720_v19 = vadd.f32 1e-05, %v408_v6  ;;  %v6723_v11 = vsub.f32 %v6610_v25, %v304_v7 }
 0x1d4   :  { %v521_v20 = vmul.f32 %v5887_v8, %v423_v56  ;;  %v515_v34 = vmul.f32 %v5885_v50, %v514_v16  ;;  %vm527_vm5 = vweird.f32 %v5887_v8 }
 0x1d5   :  { %5888 = vrsqrt.f32 %v6720_v19  ;;  %v336_v21 = vmul.f32 %v6723_v11, %v6723_v11  ;;  %vm528_vm8 = vmor %vm526_vm7, %vm527_vm5  ;;  %vm536_vm10 = vweird.f32 %v6720_v19 }
 0x1d6   :  { %v522_v18 = vmul.f32 %v5887_v8, %v521_v20  ;;  %v519_v47 = vsel %vm518_vm6, %v5885_v50, %v515_v34 }
 0x1d7   :  { %v356_v28 = vsel %vm246_vm1, %v336_v21, 0.0  ;;  %v598_v63 = vmul.f32 %v519_v47, %v6586_v5 }
 0x1d8   :  { %v523_v29 = vmul.f32 0.5, %v522_v18  ;;  %v264_v31 = vpop.xlane.xlu2 %263  ;;  %363 = vadd.xlane.f32.xlu1 %v362_v24  ;;  %357 = vadd.xlane.f32.xlu2 %v356_v28  ;;  %v385_v33 = vpop.xlane.xlu0 %384 }
 0x1d9   :  { %v307_v35 = vmul.f32 %v6582_v2, %v264_v31  ;;  %v409_v14 = vmul.f32 %v385_v33, %v6582_v2 }
 0x1da   :  { %v524_v38 = vsub.f32 1.5, %v523_v29 }
 0x1db   :  { %v6734_v44 = vpop.eup %5888  ;;  %v6737_v45 = vsub.f32 %v6625_v36, %v307_v35  ;;  %v425_v46 = vadd.f32 1e-05, %v409_v14 }
 0x1dc   :  { %v531_v17 = vmul.f32 %v6734_v44, %v6720_v19  ;;  %v525_v51 = vmul.f32 %v5887_v8, %v524_v38  ;;  %vm537_vm9 = vweird.f32 %v6734_v44 }
 0x1dd   :  { %5890 = vrsqrt.f32 %v425_v46  ;;  %v339_v40 = vmul.f32 %v6737_v45, %v6737_v45  ;;  %vm6767_vm12 = vmor %vm536_vm10, %vm537_vm9  ;;  %vm546_vm13 = vweird.f32 %v425_v46 }
 0x1de   :  { %v532_v57 = vmul.f32 %v6734_v44, %v531_v17  ;;  %v529_v59 = vsel %vm528_vm8, %v5887_v8, %v525_v51 }
 0x1df   :  { %v365_v60 = vsel %vm246_vm1, %v339_v40, 0.0  ;;  %v599_v1 = vmul.f32 %v529_v59, %v6598_v13 }
 0x1e0   :  { %v352_v56 = vpop.xlane.xlu2 %351  ;;  %366 = vadd.xlane.f32.xlu2 %v365_v60  ;;  %v388_v3 = vpop.xlane.xlu0 %387  ;;  %v533_v4 = vmul.f32 0.5, %v532_v57 }
 0x1e1   :  { %v398_v50 = vmul.f32 %v352_v56, %v6582_v2  ;;  %v410_v6 = vmul.f32 %v388_v3, %v6582_v2  ;;  %v6749_v7 = vpack.c.bf16 %v599_v1, %v598_v63 }
 0x1e2   :  { %v534_v13 = vsub.f32 1.5, %v533_v4 }
 0x1e3   :  { %v5891_v15 = vpop.eup %5890  ;;  %v6751_v16 = vadd.f32 1e-05, %v398_v50  ;;  %v6753_v8 = vadd.f32 1e-05, %v410_v6  ;;  %5587 = vmatmul.msk.bf16.vlgmr.msra.gmra.mxu2 %vm246_vm1, %v6749_v7 }
 0x1e4   :  { %v541_v5 = vmul.f32 %v5891_v15, %v425_v46  ;;  %v535_v33 = vmul.f32 %v6734_v44, %v534_v13  ;;  %vm547_vm11 = vweird.f32 %v5891_v15 }
 0x1e5   :  { %5892 = vrsqrt.f32 %v6751_v16  ;;  %vm548_vm14 = vmor %vm546_vm13, %vm547_vm11  ;;  %vm556_vm2 = vweird.f32 %v6753_v8  ;;  %vm436_vm4 = vweird.f32 %v6751_v16 }
 0x1e6   :  { %v542_v20 = vmul.f32 %v5891_v15, %v541_v5  ;;  %5894 = vrsqrt.f32 %v6753_v8  ;;  %v539_v19 = vsel %vm6767_vm12, %v6734_v44, %v535_v33 }
 0x1e7   :  { %v600_v46 = vmul.f32 %v539_v19, %v6613_v27 }
 0x1e8   :  { %v543_v21 = vmul.f32 0.5, %v542_v20  ;;  %v391_v18 = vpop.xlane.xlu1 %390  ;;  %v355_v24 = vpop.xlane.xlu0 %354 }
 0x1e9   :  { %v411_v28 = vmul.f32 %v391_v18, %v6582_v2  ;;  %v270_v29 = vpop.xlane.xlu2 %269  ;;  %v399_v31 = vmul.f32 %v355_v24, %v6582_v2 }
 0x1ea   :  { %v544_v34 = vsub.f32 1.5, %v543_v21  ;;  %v309_v35 = vmul.f32 %v6582_v2, %v270_v29 }
 0x1eb   :  { %v6764_v14 = vpop.eup %5892  ;;  %v427_v38 = vadd.f32 1e-05, %v411_v28  ;;  %v415_v17 = vadd.f32 1e-05, %v399_v31 }
 0x1ec   :  { %v5895_v47 = vpop.eup %5894  ;;  %v431_v40 = vmul.f32 %v6764_v14, %v6751_v16  ;;  %v6774_v57 = vsub.f32 %v6663_v0, %v309_v35  ;;  %v545_v59 = vmul.f32 %v5891_v15, %v544_v34  ;;  %vm437_vm0 = vweird.f32 %v6764_v14 }
 0x1ed   :  { %v551_v60 = vmul.f32 %v5895_v47, %v6753_v8  ;;  %5896 = vrsqrt.f32 %v427_v38  ;;  %vm557_vm15 = vweird.f32 %v5895_v47  ;;  %vm438_vm7 = vmor %vm436_vm4, %vm437_vm0  ;;  %vm566_vm8 = vweird.f32 %v427_v38 }
 0x1ee   :  { %v432_v63 = vmul.f32 %v6764_v14, %v431_v40  ;;  %5898 = vrsqrt.f32 %v415_v17  ;;  %v341_v1 = vmul.f32 %v6774_v57, %v6774_v57  ;;  %v549_v3 = vsel %vm548_vm14, %v5891_v15, %v545_v59  ;;  %vm558_vm5 = vmor %vm556_vm2, %vm557_vm15 }
 0x1ef   :  { %v552_v56 = vmul.f32 %v5895_v47, %v551_v60  ;;  %v601_v6 = vmul.f32 %v549_v3, %v6629_v39  ;;  %vm446_vm10 = vweird.f32 %v415_v17 }
 0x1f0   :  { %v267_v4 = vpop.xlane.xlu1 %266  ;;  %v371_v50 = vsel %vm246_vm1, %v341_v1, 0.0  ;;  %v433_v5 = vmul.f32 0.5, %v432_v63 }
 0x1f1   :  { %v553_v13 = vmul.f32 0.5, %v552_v56  ;;  %v308_v44 = vmul.f32 %v6582_v2, %v267_v4  ;;  %372 = vadd.xlane.f32.xlu1 %v371_v50  ;;  %v6787_v20 = vpack.c.bf16 %v601_v6, %v600_v46 }
 0x1f2   :  { %v434_v27 = vsub.f32 1.5, %v433_v5 }
 0x1f3   :  { %v5897_v21 = vpop.eup %5896  ;;  %v6790_v18 = vsub.f32 %v6676_v9, %v308_v44  ;;  %v554_v15 = vsub.f32 1.5, %v553_v13  ;;  %5588 = vmatmul.msk.bf16.gmra.mxu2 %vm246_vm1, %v6787_v20 }
 0x1f4   :  { %v5899_v24 = vpop.eup %5898  ;;  %v561_v28 = vmul.f32 %v5897_v21, %v427_v38  ;;  %v435_v59 = vmul.f32 %v6764_v14, %v434_v27  ;;  %vm567_vm3 = vweird.f32 %v5897_v21  ;;  %v5579_v27 = vld [vmem:[%s9685_s5 + $0x18] sm:$0xf0] }
 0x1f5   :  { %v441_v29 = vmul.f32 %v5899_v24, %v415_v17  ;;  %v340_v31 = vmul.f32 %v6790_v18, %v6790_v18  ;;  %v555_v51 = vmul.f32 %v5895_v47, %v554_v15  ;;  %vm447_vm6 = vweird.f32 %v5899_v24  ;;  %vm568_vm9 = vmor %vm566_vm8, %vm567_vm3 }
 0x1f6   :  { %v562_v39 = vmul.f32 %v5897_v21, %v561_v28  ;;  %v439_v56 = vsel %vm438_vm7, %v6764_v14, %v435_v59  ;;  %vm448_vm11 = vmor %vm446_vm10, %vm447_vm6  ;;  %v394_v14 = vpop.xlane.xlu0 %393  ;;  %v5839_v28 = vld [vmem:[%s9685_s5 + $0x14] sm:$0xf] }
 0x1f7   :  { %v442_v33 = vmul.f32 %v5899_v24, %v441_v29  ;;  %v368_v35 = vsel %vm246_vm1, %v340_v31, 0.0  ;;  %v559_v63 = vsel %vm558_vm5, %v5895_v47, %v555_v51  ;;  %v590_v16 = vmul.f32 %v439_v56, %v6634_v42  ;;  %v5837_v31 = vld [vmem:[%s9685_s5 + $0x4] sm:$0xf] }
 0x1f8   :  { %v563_v34 = vmul.f32 0.5, %v562_v39  ;;  %369 = vadd.xlane.f32.xlu0 %v368_v35  ;;  %v602_v8 = vmul.f32 %v559_v63, %v6641_v49  ;;  %v412_v17 = vmul.f32 %v394_v14, %v6582_v2  ;;  %v5582_v29 = vor.u32 %v5839_v28, %v5579_v27 }
 0x1f9   :  { %v443_v40 = vmul.f32 0.5, %v442_v33  ;;  %v5571_v33 = vld [vmem:[%s9685_s5 + $0x8] sm:$0xf0] }
 0x1fa   :  { %v564_v60 = vsub.f32 1.5, %v563_v34  ;;  %v428_v49 = vadd.f32 1e-05, %v412_v17  ;;  %723 = vmatpush.bf16.msrb.mxu2 %v5582_v29 }
 0x1fb   :  { %v444_v19 = vsub.f32 1.5, %v443_v40  ;;  %v5574_v40 = vor.u32 %v5837_v31, %v5571_v33 }
 0x1fc   :  { %v565_v1 = vmul.f32 %v5897_v21, %v564_v60  ;;  %5900 = vrsqrt.f32 %v428_v49  ;;  %vm576_vm13 = vweird.f32 %v428_v49 }
 0x1fd   :  { %v445_v3 = vmul.f32 %v5899_v24, %v444_v19 }
 0x1fe   :  { %v569_v4 = vsel %vm568_vm9, %v5897_v21, %v565_v1  ;;  %v361_v47 = vpop.xlane.xlu0 %360  ;;  %724 = vmatpush.bf16.msrb.mxu2 %v5574_v40 }
 0x1ff   :  { %v449_v50 = vsel %vm448_vm11, %v5899_v24, %v445_v3  ;;  %v603_v46 = vmul.f32 %v569_v4, %v6658_v62  ;;  %v401_v42 = vmul.f32 %v361_v47, %v6582_v2 }
 0x200   :  { %v591_v6 = vmul.f32 %v449_v50, %v6649_v54 }
 0x201   :  { %v6806_v5 = vpack.c.bf16 %v603_v46, %v602_v8  ;;  %v6816_v62 = vadd.f32 1e-05, %v401_v42 }
 0x202   :  { %v6808_v38 = vpack.c.bf16 %v591_v6, %v590_v16  ;;  %v5901_v54 = vpop.eup %5900 }
 0x203   :  { %5589 = vmatmul.msk.bf16.gmra.mxu2 %vm246_vm1, %v6806_v5  ;;  %v571_v13 = vmul.f32 %v5901_v54, %v428_v49  ;;  %5902 = vrsqrt.f32 %v6816_v62  ;;  %vm577_vm12 = vweird.f32 %v5901_v54  ;;  %vm466_vm4 = vweird.f32 %v6816_v62 }
 0x204   :  { %5583 = vmatmul.msk.bf16.vlgmr.msra.gmra.mxu1 %vm246_vm1, %v6808_v38  ;;  %vm578_vm15 = vmor %vm576_vm13, %vm577_vm12 }
 0x205   :  { %v572_v15 = vmul.f32 %v5901_v54, %v571_v13 }
 0x207   :  { %v573_v34 = vmul.f32 0.5, %v572_v15 }
 0x209   :  { %v6826_v39 = vpop.eup %5902  ;;  %v574_v56 = vsub.f32 1.5, %v573_v34 }
 0x20a   :  { %v461_v59 = vmul.f32 %v6826_v39, %v6816_v62  ;;  %vm467_vm3 = vweird.f32 %v6826_v39 }
 0x20b   :  { %v575_v6 = vmul.f32 %v5901_v54, %v574_v56  ;;  %vm468_vm6 = vmor %vm466_vm4, %vm467_vm3 }
 0x20c   :  { %v462_v50 = vmul.f32 %v6826_v39, %v461_v59 }
 0x20e   :  { %v463_v14 = vmul.f32 0.5, %v462_v50 }
 0x210   :  { %v464_v15 = vsub.f32 1.5, %v463_v14 }
 0x243   :  { %v397_v44 = vpop.xlane.xlu1 %396 }
 0x244   :  { %v413_v21 = vmul.f32 %v397_v44, %v6582_v2  ;;  %v579_v44 = vsel %vm578_vm15, %v5901_v54, %v575_v6  ;;  %v465_v54 = vmul.f32 %v6826_v39, %v464_v15 }
 0x245   :  { %v604_v33 = vmul.f32 %v579_v44, %v6679_v10 }
 0x246   :  { %v429_v24 = vadd.f32 1e-05, %v413_v21 }
 0x248   :  { %5904 = vrsqrt.f32 %v429_v24  ;;  %vm586_vm0 = vweird.f32 %v429_v24 }
 0x24b   :  { %v364_v35 = vpop.xlane.xlu1 %363  ;;  %v358_v51 = vpop.xlane.xlu2 %357 }
 0x24c   :  { %v402_v60 = vmul.f32 %v364_v35, %v6582_v2  ;;  %v400_v19 = vmul.f32 %v358_v51, %v6582_v2 }
 0x24e   :  { %v5905_v63 = vpop.eup %5904  ;;  %v416_v1 = vadd.f32 1e-05, %v400_v19  ;;  %v6838_v4 = vadd.f32 1e-05, %v402_v60  ;;  %v469_v60 = vsel %vm468_vm6, %v6826_v39, %v465_v54 }
 0x24f   :  { %v581_v3 = vmul.f32 %v5905_v63, %v429_v24  ;;  %vm587_vm14 = vweird.f32 %v5905_v63  ;;  %v593_v62 = vmul.f32 %v469_v60, %v6688_v23 }
 0x250   :  { %5906 = vrsqrt.f32 %v416_v1  ;;  %vm588_vm2 = vmor %vm586_vm0, %vm587_vm14  ;;  %vm456_vm7 = vweird.f32 %v416_v1  ;;  %vm476_vm13 = vweird.f32 %v6838_v4 }
 0x251   :  { %v582_v8 = vmul.f32 %v5905_v63, %v581_v3  ;;  %5908 = vrsqrt.f32 %v6838_v4 }
 0x253   :  { %v583_v46 = vmul.f32 0.5, %v582_v8  ;;  %v367_v16 = vpop.xlane.xlu2 %366 }
 0x254   :  { %v403_v17 = vmul.f32 %v367_v16, %v6582_v2 }
 0x255   :  { %v584_v47 = vsub.f32 1.5, %v583_v46 }
 0x256   :  { %v419_v42 = vadd.f32 1e-05, %v403_v17  ;;  %v5907_v13 = vpop.eup %5906 }
 0x257   :  { %v585_v21 = vmul.f32 %v5905_v63, %v584_v47  ;;  %v451_v28 = vmul.f32 %v5907_v13, %v416_v1  ;;  %v5909_v27 = vpop.eup %5908  ;;  %vm457_vm5 = vweird.f32 %v5907_v13 }
 0x258   :  { %5910 = vrsqrt.f32 %v419_v42  ;;  %v471_v49 = vmul.f32 %v5909_v27, %v6838_v4  ;;  %vm458_vm8 = vmor %vm456_vm7, %vm457_vm5  ;;  %vm477_vm10 = vweird.f32 %v5909_v27  ;;  %vm486_vm11 = vweird.f32 %v419_v42 }
 0x259   :  { %v589_v29 = vsel %vm588_vm2, %v5905_v63, %v585_v21  ;;  %v452_v31 = vmul.f32 %v5907_v13, %v451_v28  ;;  %vm478_vm14 = vmor %vm476_vm13, %vm477_vm10 }
 0x25a   :  { %v605_v34 = vmul.f32 %v589_v29, %v6710_v53  ;;  %v472_v53 = vmul.f32 %v5909_v27, %v471_v49 }
 0x25b   :  { %v453_v35 = vmul.f32 0.5, %v452_v31 }
 0x25c   :  { %v6847_v51 = vpack.c.bf16 %v605_v34, %v604_v33  ;;  %v473_v50 = vmul.f32 0.5, %v472_v53 }
 0x25d   :  { %v454_v40 = vsub.f32 1.5, %v453_v35 }
 0x25e   :  { %v5911_v24 = vpop.eup %5910  ;;  %5590 = vmatmul.msk.bf16.gmra.mxu2 %vm246_vm1, %v6847_v51  ;;  %v474_v39 = vsub.f32 1.5, %v473_v50 }
 0x25f   :  { %v481_v10 = vmul.f32 %v5911_v24, %v419_v42  ;;  %v455_v59 = vmul.f32 %v5907_v13, %v454_v40  ;;  %vm487_vm9 = vweird.f32 %v5911_v24 }
 0x260   :  { %v475_v47 = vmul.f32 %v5909_v27, %v474_v39  ;;  %vm488_vm12 = vmor %vm486_vm11, %vm487_vm9 }
 0x261   :  { %v482_v19 = vmul.f32 %v5911_v24, %v481_v10  ;;  %v459_v63 = vsel %vm458_vm8, %v5907_v13, %v455_v59 }
 0x262   :  { %v592_v3 = vmul.f32 %v459_v63, %v6723_v11  ;;  %v479_v29 = vsel %vm478_vm14, %v5909_v27, %v475_v47 }
 0x263   :  { %v483_v56 = vmul.f32 0.5, %v482_v19  ;;  %v594_v33 = vmul.f32 %v479_v29, %v6715_v61 }
 0x264   :  { %v373_v8 = vpop.xlane.xlu1 %372  ;;  %v607_v16 = vpack.c.bf16 %v593_v62, %v592_v3  ;;  %v6874_v3 = vld [vmem:[%s9686_s6] ss:$2 sm:$0x3] }
 0x265   :  { %v405_v46 = vmul.f32 %v373_v8, %v6582_v2  ;;  %v484_v6 = vsub.f32 1.5, %v483_v56  ;;  %v620_v62 = vperm.slane %v6874_v3, 0 }
 0x266   :  { %v6857_v14 = vpop.f32.mrf.mxu2  ;;  %5584 = vmatmul.msk.bf16.gmra.mxu1 %vm246_vm1, %v607_v16 }
 0x267   :  { %v421_v1 = vadd.f32 1e-05, %v405_v46  ;;  %v485_v17 = vmul.f32 %v5911_v24, %v484_v6 }
 0x269   :  { %5912 = vrsqrt.f32 %v421_v1  ;;  %v489_v44 = vsel %vm488_vm12, %v5911_v24, %v485_v17  ;;  %vm506_vm0 = vweird.f32 %v421_v1 }
 0x26a   :  { %v595_v42 = vmul.f32 %v489_v44, %v6737_v45 }
 0x26b   :  { %v370_v11 = vpop.xlane.xlu0 %369 }
 0x26c   :  { %v404_v23 = vmul.f32 %v370_v11, %v6582_v2  ;;  %v608_v49 = vpack.c.bf16 %v595_v42, %v594_v33 }
 0x26e   :  { %v699_v13 = vpop.f32.mrf.mxu2  ;;  %5591 = vmatmul.msk.bf16.vlgmr.msrb.gmra.mxu2 %vm246_vm1, %v6808_v38  ;;  %v420_v15 = vadd.f32 1e-05, %v404_v23 }
 0x26f   :  { %v5913_v21 = vpop.eup %5912 }
 0x270   :  { %v501_v28 = vmul.f32 %v5913_v21, %v421_v1  ;;  %5914 = vrsqrt.f32 %v420_v15  ;;  %vm507_vm15 = vweird.f32 %v5913_v21  ;;  %vm496_vm4 = vweird.f32 %v420_v15 }
 0x271   :  { %vm508_vm3 = vmor %vm506_vm0, %vm507_vm15 }
 0x272   :  { %v502_v31 = vmul.f32 %v5913_v21, %v501_v28 }
 0x274   :  { %v503_v34 = vmul.f32 0.5, %v502_v31 }
 0x276   :  { %v5915_v35 = vpop.eup %5914  ;;  %5585 = vmatmul.msk.bf16.gmra.mxu1 %vm246_vm1, %v608_v49  ;;  %v702_v4 = vpop.f32.mrf.mxu2  ;;  %v504_v54 = vsub.f32 1.5, %v503_v34 }
 0x277   :  { %v491_v38 = vmul.f32 %v5915_v35, %v420_v15  ;;  %vm497_vm2 = vweird.f32 %v5915_v35 }
 0x278   :  { %v505_v10 = vmul.f32 %v5913_v21, %v504_v54  ;;  %vm498_vm5 = vmor %vm496_vm4, %vm497_vm2 }
 0x279   :  { %v492_v24 = vmul.f32 %v5915_v35, %v491_v38 }
 0x27a   :  { %v509_v53 = vsel %vm508_vm3, %v5913_v21, %v505_v10 }
 0x27b   :  { %v493_v40 = vmul.f32 0.5, %v492_v24  ;;  %v597_v19 = vmul.f32 %v509_v53, %v6774_v57  ;;  %v700_v57 = vadd.f32 %v699_v13, %v620_v62 }
 0x27d   :  { %v494_v27 = vsub.f32 1.5, %v493_v40 }
 0x27e   :  { %5592 = vmatmul.msk.bf16.gmra.mxu2 %vm246_vm1, %v607_v16  ;;  %v704_v45 = vpop.f32.mrf.mxu2 }
 0x27f   :  { %v495_v61 = vmul.f32 %v5915_v35, %v494_v27 }
 0x281   :  { %v499_v59 = vsel %vm498_vm5, %v5915_v35, %v495_v61  ;;  %v677_v1 = vpop.f32.mrf.mxu1 }
 0x282   :  { %v596_v60 = vmul.f32 %v499_v59, %v6790_v18  ;;  %v698_v18 = vadd.f32 %v6857_v14, %v620_v62  ;;  %v678_v61 = vadd.f32 %v677_v1, %v620_v62 }
 0x284   :  { %v609_v63 = vpack.c.bf16 %v597_v19, %v596_v60  ;;  %v6883_v6 = vpack.c.bf16 %v700_v57, %v698_v18  ;;  %v6945_v19 = vperm.slane %v6874_v3, 1 }
 0x286   :  { %5586 = vmatmul.msk.bf16.gmra.mxu1 %vm246_vm1, %v609_v63  ;;  %v707_v56 = vpop.f32.mrf.mxu2 }
 0x287   :  { %v708_v8 = vadd.f32 %v707_v56, %v620_v62 }
 0x289   :  { %v679_v39 = vpop.f32.mrf.mxu1 }
 0x28a   :  { %v680_v27 = vadd.f32 %v679_v39, %v620_v62 }
 0x28c   :  { %v6930_v53 = vpack.c.bf16 %v680_v27, %v678_v61 }
 0x28e   :  { %5593 = vmatmul.msk.bf16.gmra.mxu2 %vm246_vm1, %v608_v49  ;;  %v709_v50 = vpop.f32.mrf.mxu2 }
 0x28f   :  { %v710_v46 = vadd.f32 %v709_v50, %v620_v62 }
 0x291   :  { %v6878_v16 = vpack.c.bf16 %v710_v46, %v708_v8 }
 0x293   :  { %1356 = vrot.lane.b32.xlu1 %v6878_v16, %s6375_s1 }
 0x29b   :  { %1352 = vrot.lane.b32.xlu1 %v6883_v6, %s6375_s1 }
 0x29e   :  { %5594 = vmatmul.msk.bf16.gmra.mxu2 %vm246_vm1, %v609_v63 }
 0x2ae   :  { %5595 = vmatmul.msk.bf16.gmra.mxu2 %vm246_vm1, %v6749_v7  ;;  %v705_v7 = vadd.f32 %v704_v45, %v620_v62 }
 0x2be   :  { %5596 = vmatmul.msk.bf16.gmra.mxu2 %vm246_vm1, %v6787_v20 }
 0x2ce   :  { %5597 = vmatmul.msk.bf16.gmra.mxu2 %vm246_vm1, %v6806_v5  ;;  %v703_v5 = vadd.f32 %v702_v4, %v620_v62 }
 0x2de   :  { %5598 = vmatmul.msk.bf16.gmra.mxu2 %vm246_vm1, %v6847_v51  ;;  %v6904_v51 = vpack.c.bf16 %v705_v7, %v703_v5 }
 0x2e1   :  { %v712_v14 = vpop.f32.mrf.mxu2 }
 0x2e2   :  { %v713_v47 = vadd.f32 %v712_v14, %v620_v62 }
 0x2e3   :  { %v682_v17 = vpop.f32.mrf.mxu1 }
 0x2e4   :  { %v683_v4 = vadd.f32 %v682_v17, %v620_v62 }
 0x2e9   :  { %v714_v11 = vpop.f32.mrf.mxu2 }
 0x2ea   :  { %v715_v23 = vadd.f32 %v714_v11, %v620_v62 }
 0x2eb   :  { %v684_v44 = vpop.f32.mrf.mxu1 }
 0x2ec   :  { %v6896_v13 = vpack.c.bf16 %v715_v23, %v713_v47  ;;  %v685_v49 = vadd.f32 %v684_v44, %v620_v62 }
 0x2ee   :  { %812 = vrot.lane.b32.xlu0 %v6896_v13, %s6376_s24  ;;  %1358 = vrot.lane.b32.xlu2 %v6896_v13, %s6375_s1  ;;  %v6920_v54 = vpack.c.bf16 %v685_v49, %v683_v4 }
 0x2f1   :  { %v6902_v20 = vpop.f32.mrf.mxu2 }
 0x2f3   :  { %v687_v21 = vpop.f32.mrf.mxu1 }
 0x2f4   :  { %v688_v31 = vadd.f32 %v687_v21, %v620_v62 }
 0x2f6   :  { %1354 = vrot.lane.b32.xlu0 %v6904_v51, %s6375_s1  ;;  %810 = vrot.lane.b32.xlu2 %v6878_v16, %s6376_s24 }
 0x2f9   :  { %v6910_v15 = vpop.f32.mrf.mxu2 }
 0x2fb   :  { %v689_v28 = vpop.f32.mrf.mxu1 }
 0x2fc   :  { %v690_v29 = vadd.f32 %v689_v28, %v620_v62 }
 0x2fe   :  { %806 = vrot.lane.b32.xlu0 %v6883_v6, %s6376_s24  ;;  %808 = vrot.lane.b32.xlu2 %v6904_v51, %s6376_s24  ;;  %v6916_v33 = vpack.c.bf16 %v690_v29, %v688_v31 }
 0x301   :  { %v731_v42 = vpop.f32.mrf.mxu2 }
 0x302   :  { %v732_v39 = vadd.f32 %v731_v42, %v6945_v19 }
 0x303   :  { %v692_v34 = vpop.f32.mrf.mxu1 }
 0x304   :  { %v693_v24 = vadd.f32 %v692_v34, %v620_v62 }
 0x305   :  { %v1357_v29 = vpop.permute.xlu1 %1356 }
 0x306   :  { %1348 = vrot.lane.b32.xlu0 %v6916_v33, %s6375_s1  ;;  %v1403_v34 = vsel %vm246_vm1, %v1357_v29, 0 }
 0x309   :  { %v733_v35 = vpop.f32.mrf.mxu2 }
 0x30a   :  { %v734_v18 = vadd.f32 %v733_v35, %v6945_v19 }
 0x30b   :  { %v694_v38 = vpop.f32.mrf.mxu1 }
 0x30c   :  { %v695_v40 = vadd.f32 %v694_v38, %v620_v62  ;;  %v6970_v14 = vpack.c.bf16 %v734_v18, %v732_v39 }
 0x30e   :  { %800 = vrot.lane.b32.xlu0 %v6920_v54, %s6376_s24  ;;  %v6924_v10 = vpack.c.bf16 %v695_v40, %v693_v24 }
 0x310   :  { %804 = vrot.lane.b32.xlu1 %v6924_v10, %s6376_s24  ;;  %1350 = vrot.lane.b32.xlu2 %v6924_v10, %s6375_s1 }
 0x311   :  { %v736_v45 = vpop.f32.mrf.mxu2 }
 0x312   :  { %v737_v62 = vadd.f32 %v736_v45, %v6945_v19 }
 0x316   :  { %1328 = vrot.lane.b32.xlu0 %v6930_v53, %s6377_s25 }
 0x318   :  { %1346 = vrot.lane.b32.xlu1 %v6920_v54, %s6375_s1  ;;  %802 = vrot.lane.b32.xlu2 %v6916_v33, %s6376_s24 }
 0x319   :  { %v738_v59 = vpop.f32.mrf.mxu2 }
 0x31a   :  { %v739_v63 = vadd.f32 %v738_v59, %v6945_v19 }
 0x31c   :  { %v6955_v50 = vpack.c.bf16 %v739_v63, %v737_v62 }
 0x31e   :  { %1334 = vrot.lane.b32.xlu0 %v6924_v10, %s6377_s25 }
 0x320   :  { %798 = vrot.lane.b32.xlu1 %v6930_v53, %s6376_s24  ;;  %1344 = vrot.lane.b32.xlu2 %v6930_v53, %s6375_s1 }
 0x321   :  { %v741_v60 = vpop.f32.mrf.mxu2 }
 0x322   :  { %v742_v47 = vadd.f32 %v741_v60, %v6945_v19 }
 0x326   :  { %1340 = vrot.lane.b32.xlu0 %v6878_v16, %s6377_s25 }
 0x328   :  { %1332 = vrot.lane.b32.xlu1 %v6916_v33, %s6377_s25  ;;  %1330 = vrot.lane.b32.xlu2 %v6920_v54, %s6377_s25 }
 0x329   :  { %v743_v56 = vpop.f32.mrf.mxu2 }
 0x32a   :  { %v744_v11 = vadd.f32 %v743_v56, %v6945_v19 }
 0x32c   :  { %v785_v23 = vpack.c.bf16 %v744_v11, %v742_v47 }
 0x32e   :  { %1829 = vrot.lane.b32.xlu0 %v6955_v50, %s6377_s25 }
 0x330   :  { %1338 = vrot.lane.b32.xlu1 %v6904_v51, %s6377_s25  ;;  %1336 = vrot.lane.b32.xlu2 %v6883_v6, %s6377_s25 }
 0x331   :  { %v746_v3 = vpop.f32.mrf.mxu2 }
 0x332   :  { %v747_v46 = vadd.f32 %v746_v3, %v6945_v19 }
 0x338   :  { %1342 = vrot.lane.b32.xlu2 %v6896_v13, %s6377_s25 }
 0x339   :  { %v748_v8 = vpop.f32.mrf.mxu2 }
 0x33a   :  { %v749_v57 = vadd.f32 %v748_v8, %v6945_v19 }
 0x33c   :  { %v786_v1 = vpack.c.bf16 %v749_v57, %v747_v46  ;;  %v1353_v46 = vpop.permute.xlu1 %1352 }
 0x33d   :  { %v1397_v18 = vsel %vm246_vm1, %v1353_v46, 0 }
 0x33e   :  { %1833 = vrot.lane.b32.xlu1 %v786_v1, %s6377_s25 }
 0x340   :  { %1827 = vrot.lane.b32.xlu2 %v6970_v14, %s6377_s25 }
 0x341   :  { %v751_v17 = vpop.f32.mrf.mxu2 }
 0x342   :  { %v752_v28 = vadd.f32 %v751_v17, %v6945_v19 }
 0x348   :  { %v1359_v44 = vpop.permute.xlu2 %1358  ;;  %1831 = vrot.lane.b32.xlu2 %v785_v23, %s6377_s25 }
 0x349   :  { %v1406_v7 = vsel %vm246_vm1, %v1359_v44, 0  ;;  %v753_v5 = vpop.f32.mrf.mxu2 }
 0x34a   :  { %1408 = vmatpush.bf16.xpose.msra.mxu2 %v1406_v7  ;;  %v754_v21 = vadd.f32 %v753_v5, %v6945_v19 }
 0x34c   :  { %v787_v42 = vpack.c.bf16 %v754_v21, %v752_v28  ;;  %v729_v21 = vadd.f32 %v6910_v15, %v6945_v19 }
 0x350   :  { %1835 = vrot.lane.b32.xlu2 %v787_v42, %s6377_s25  ;;  %v811_v45 = vpop.permute.xlu2 %810 }
 0x351   :  { %v756_v31 = vpop.f32.mrf.mxu2  ;;  %v857_v60 = vsel %vm246_vm1, %v811_v45, 0 }
 0x352   :  { %1409 = vmatpush.bf16.xpose.msra.mxu2 %v1403_v34  ;;  %v757_v35 = vadd.f32 %v756_v31, %v6945_v19 }
 0x358   :  { %v809_v8 = vpop.permute.xlu2 %808 }
 0x359   :  { %v758_v49 = vpop.f32.mrf.mxu2  ;;  %v854_v57 = vsel %vm246_vm1, %v809_v8, 0 }
 0x35a   :  { %v759_v4 = vadd.f32 %v758_v49, %v6945_v19 }
 0x35c   :  { %v788_v38 = vpack.c.bf16 %v759_v4, %v757_v35 }
 0x35e   :  { %1837 = vrot.lane.b32.xlu0 %v788_v38, %s6377_s25 }
 0x360   :  { %v813_v24 = vpop.permute.xlu0 %812 }
 0x361   :  { %v761_v40 = vpop.f32.mrf.mxu2  ;;  %v860_v27 = vsel %vm246_vm1, %v813_v24, 0 }
 0x362   :  { %862 = vmatpush.bf16.xpose.msra.mxu3 %v860_v27  ;;  %v762_v56 = vadd.f32 %v761_v40, %v6945_v19 }
 0x368   :  { %v1355_v61 = vpop.permute.xlu0 %1354 }
 0x369   :  { %v763_v59 = vpop.f32.mrf.mxu2  ;;  %v1400_v63 = vsel %vm246_vm1, %v1355_v61, 0 }
 0x36a   :  { %v764_v62 = vadd.f32 %v763_v59, %v6945_v19  ;;  %863 = vmatpush.bf16.xpose.msra.mxu3 %v857_v60  ;;  %1410 = vmatpush.bf16.xpose.msra.mxu2 %v1400_v63  ;;  %v1351_v17 = vpop.permute.xlu2 %1350 }
 0x36b   :  { %v1394_v47 = vsel %vm246_vm1, %v1351_v17, 0 }
 0x36c   :  { %v789_v3 = vpack.c.bf16 %v764_v62, %v762_v56 }
 0x36e   :  { %1271 = vmatpush.bf16.msrb.mxu1 %v789_v3  ;;  %1839 = vrot.lane.b32.xlu1 %v789_v3, %s6377_s25 }
 0x370   :  { %v807_v39 = vpop.permute.xlu0 %806 }
 0x371   :  { %v851_v11 = vsel %vm246_vm1, %v807_v39, 0 }
 0x372   :  { %1272 = vmatpush.bf16.msrb.mxu1 %v788_v38  ;;  %864 = vmatpush.bf16.xpose.msra.mxu3 %v854_v57  ;;  %v803_v29 = vpop.permute.xlu2 %802 }
 0x373   :  { %1411 = vmatpush.bf16.xpose.msra.mxu2 %v1397_v18 }
 0x376   :  { %1273 = vmatpush.bf16.msrb.mxu1 %v787_v42  ;;  %v845_v42 = vsel %vm246_vm1, %v803_v29, 0 }
 0x378   :  { %v1349_v44 = vpop.permute.xlu0 %1348 }
 0x379   :  { %v1391_v7 = vsel %vm246_vm1, %v1349_v44, 0 }
 0x37a   :  { %1274 = vmatpush.bf16.msrb.mxu1 %v786_v1  ;;  %865 = vmatpush.bf16.xpose.msra.mxu3 %v851_v11  ;;  %v727_v1 = vadd.f32 %v6902_v20, %v6945_v19  ;;  %v1345_v15 = vpop.permute.xlu2 %1344  ;;  %v55_v11 = vld [vmem:[%s9682_s2 + $0x18] sm:$0xff] }
 0x37b   :  { %1412 = vmatpush.bf16.xpose.msra.mxu2 %v1394_v47  ;;  %v1385_v20 = vsel %vm246_vm1, %v1345_v15, 0 }
 0x37e   :  { %1275 = vmatpush.bf16.msrb.mxu1 %v785_v23  ;;  %v7003_v23 = vpack.c.bf16 %v729_v21, %v727_v1  ;;  %v56_v21 = vld [vmem:[%s9682_s2 + $0x20] sm:$0xff] }
 0x380   :  { %v801_v34 = vpop.permute.xlu0 %800 }
 0x381   :  { %v842_v49 = vsel %vm246_vm1, %v801_v34, 0 }
 0x382   :  { %1276 = vmatpush.bf16.msrb.mxu1 %v6955_v50  ;;  %v805_v5 = vpop.permute.xlu1 %804  ;;  %v1331_v4 = vpop.permute.xlu2 %1330 }
 0x383   :  { %1413 = vmatpush.bf16.xpose.msra.mxu2 %v1391_v7  ;;  %v848_v28 = vsel %vm246_vm1, %v805_v5, 0 }
 0x384   :  { %866 = vmatpush.bf16.xpose.msra.mxu3 %v848_v28 }
 0x386   :  { %1277 = vmatpush.bf16.msrb.mxu1 %v6970_v14 }
 0x388   :  { %v1329_v14 = vpop.permute.xlu0 %1328 }
 0x38a   :  { %1278 = vmatpush.bf16.msrb.mxu1 %v7003_v23  ;;  %v1347_v50 = vpop.permute.xlu1 %1346  ;;  %v1337_v24 = vpop.permute.xlu2 %1336 }
 0x38b   :  { %v1388_v31 = vsel %vm246_vm1, %v1347_v50, 0 }
 0x38c   :  { %867 = vmatpush.bf16.xpose.msra.mxu3 %v845_v42  ;;  %1414 = vmatpush.bf16.xpose.msra.mxu2 %v1388_v31  ;;  %v57_v42 = vld [vmem:[%s9682_s2 + $0x28] sm:$0xff] }
 0x390   :  { %v1335_v40 = vpop.permute.xlu0 %1334 }
 0x392   :  { %v799_v19 = vpop.permute.xlu1 %798  ;;  %v1343_v27 = vpop.permute.xlu2 %1342 }
 0x393   :  { %v839_v35 = vsel %vm246_vm1, %v799_v19, 0 }
 0x394   :  { %868 = vmatpush.bf16.xpose.msra.mxu3 %v842_v49  ;;  %1415 = vmatpush.bf16.xpose.msra.mxu2 %v1385_v20 }
 0x398   :  { %v1341_v61 = vpop.permute.xlu0 %1340 }
 0x39a   :  { %v1333_v38 = vpop.permute.xlu1 %1332 }
 0x39b   :  { %5607 = vmatmul.msk.bf16.vlgmr.msra.gmra.mxu2 %vm246_vm1, %v1329_v14 }
 0x39c   :  { %869 = vmatpush.bf16.xpose.msra.mxu3 %v839_v35  ;;  %v58_v35 = vld [vmem:[%s9682_s2 + $0x30] sm:$0xff] }
 0x3a0   :  { %v1830_v60 = vpop.permute.xlu0 %1829 }
 0x3a2   :  { %v1339_v45 = vpop.permute.xlu1 %1338 }
 0x3a3   :  { %5599 = vmatmul.msk.bf16.vlgmr.msra.gmra.mxu3 %vm246_vm1, %v6930_v53  ;;  %v1828_v53 = vpop.permute.xlu2 %1827 }
 0x3ab   :  { %5608 = vmatmul.msk.bf16.gmra.mxu2 %vm246_vm1, %v1331_v4 }
 0x3b0   :  { %v1834_v59 = vpop.permute.xlu1 %1833 }
 0x3b3   :  { %5600 = vmatmul.msk.bf16.gmra.mxu3 %vm246_vm1, %v6920_v54  ;;  %v1832_v54 = vpop.permute.xlu2 %1831 }
 0x3bb   :  { %5609 = vmatmul.msk.bf16.gmra.mxu2 %vm246_vm1, %v1333_v38 }
 0x3c3   :  { %5601 = vmatmul.msk.bf16.gmra.mxu3 %vm246_vm1, %v6916_v33  ;;  %v1836_v33 = vpop.permute.xlu2 %1835 }
 0x3cb   :  { %5610 = vmatmul.msk.bf16.gmra.mxu2 %vm246_vm1, %v1335_v40  ;;  %v60_v40 = vld [vmem:[%s9682_s2 + $0x40] sm:$0xff] }
 0x3d0   :  { %v1838_v56 = vpop.permute.xlu0 %1837 }
 0x3d3   :  { %5602 = vmatmul.msk.bf16.gmra.mxu3 %vm246_vm1, %v6924_v10 }
 0x3db   :  { %5611 = vmatmul.msk.bf16.gmra.mxu2 %vm246_vm1, %v1337_v24 }
 0x3e0   :  { %v1840_v63 = vpop.permute.xlu1 %1839 }
 0x3e1   :  { %1849 = vmatpush.bf16.msrb.mxu0 %v1840_v63 }
 0x3e3   :  { %5603 = vmatmul.msk.bf16.gmra.mxu3 %vm246_vm1, %v6883_v6  ;;  %v52_v6 = vld [vmem:[%s9682_s2] sm:$0xff] }
 0x3e5   :  { %1850 = vmatpush.bf16.msrb.mxu0 %v1838_v56 }
 0x3e9   :  { %1851 = vmatpush.bf16.msrb.mxu0 %v1836_v33 }
 0x3eb   :  { %5612 = vmatmul.msk.bf16.gmra.mxu2 %vm246_vm1, %v1339_v45 }
 0x3ed   :  { %1852 = vmatpush.bf16.msrb.mxu0 %v1834_v59 }
 0x3f1   :  { %1853 = vmatpush.bf16.msrb.mxu0 %v1832_v54  ;;  %v61_v54 = vld [vmem:[%s9682_s2 + $0x48] sm:$0xff] }
 0x3f3   :  { %5604 = vmatmul.msk.bf16.gmra.mxu3 %vm246_vm1, %v6904_v51  ;;  %v53_v51 = vld [vmem:[%s9682_s2 + $0x8] sm:$0xff] }
 0x3f5   :  { %1854 = vmatpush.bf16.msrb.mxu0 %v1830_v60 }
 0x3f9   :  { %1855 = vmatpush.bf16.msrb.mxu0 %v1828_v53 }
 0x3fb   :  { %5613 = vmatmul.msk.bf16.gmra.mxu2 %vm246_vm1, %v1341_v61  ;;  %v59_v61 = vld [vmem:[%s9682_s2 + $0x38] sm:$0xff] }
 0x403   :  { %5605 = vmatmul.msk.bf16.gmra.mxu3 %vm246_vm1, %v6878_v16 }
 0x40b   :  { %5614 = vmatmul.msk.bf16.gmra.mxu2 %vm246_vm1, %v1343_v27 }
 0x413   :  { %5606 = vmatmul.msk.bf16.gmra.mxu3 %vm246_vm1, %v6896_v13  ;;  %v54_v13 = vld [vmem:[%s9682_s2 + $0x10] sm:$0xff] }
 0x41e   :  { %v1417_v10 = vpop.f32.mrf.mxu2 }
 0x41f   :  { %v7038_v62 = vadd.f32 %v1417_v10, %v52_v6 }
 0x421   :  { %1457 = vmax.xlane.f32.xlu1 %v7038_v62 }
 0x426   :  { %v871_v3 = vpop.f32.mrf.mxu3  ;;  %v1419_v16 = vpop.f32.mrf.mxu2 }
 0x427   :  { %v7044_v8 = vadd.f32 %v871_v3, %v52_v6  ;;  %v7046_v46 = vadd.f32 %v1419_v16, %v53_v51 }
 0x429   :  { %1459 = vmax.xlane.f32.xlu0 %v7046_v46  ;;  %911 = vmax.xlane.f32.xlu2 %v7044_v8 }
 0x42e   :  { %v873_v57 = vpop.f32.mrf.mxu3  ;;  %v1422_v18 = vpop.f32.mrf.mxu2 }
 0x42f   :  { %v7053_v39 = vadd.f32 %v1422_v18, %v54_v13  ;;  %v7055_v17 = vadd.f32 %v873_v57, %v53_v51 }
 0x431   :  { %1461 = vmax.xlane.f32.xlu0 %v7053_v39  ;;  %913 = vmax.xlane.f32.xlu1 %v7055_v17 }
 0x436   :  { %v876_v47 = vpop.f32.mrf.mxu3  ;;  %v1424_v44 = vpop.f32.mrf.mxu2 }
 0x437   :  { %v7062_v7 = vadd.f32 %v876_v47, %v54_v13  ;;  %v7064_v5 = vadd.f32 %v1424_v44, %v55_v11  ;;  %v7128_v13 = vld [vmem:[%s9682_s2 + $0x58] sm:$0xff] }
 0x439   :  { %915 = vmax.xlane.f32.xlu1 %v7062_v7  ;;  %1463 = vmax.xlane.f32.xlu2 %v7064_v5 }
 0x43e   :  { %v878_v28 = vpop.f32.mrf.mxu3  ;;  %v1427_v1 = vpop.f32.mrf.mxu2 }
 0x43f   :  { %v7071_v29 = vadd.f32 %v1427_v1, %v56_v21  ;;  %v7073_v50 = vadd.f32 %v878_v28, %v55_v11 }
 0x441   :  { %917 = vmax.xlane.f32.xlu0 %v7073_v50  ;;  %1465 = vmax.xlane.f32.xlu2 %v7071_v29 }
 0x446   :  { %v881_v31 = vpop.f32.mrf.mxu3  ;;  %v1429_v15 = vpop.f32.mrf.mxu2 }
 0x447   :  { %v7080_v34 = vadd.f32 %v881_v31, %v56_v21  ;;  %v7082_v49 = vadd.f32 %v1429_v15, %v57_v42 }
 0x449   :  { %919 = vmax.xlane.f32.xlu0 %v7080_v34  ;;  %1467 = vmax.xlane.f32.xlu1 %v7082_v49 }
 0x44e   :  { %v883_v20 = vpop.f32.mrf.mxu3  ;;  %v1432_v19 = vpop.f32.mrf.mxu2 }
 0x44f   :  { %v7086_v14 = vadd.f32 %v883_v20, %v57_v42  ;;  %v7092_v24 = vadd.f32 %v1432_v19, %v58_v35 }
 0x451   :  { %921 = vmax.xlane.f32.xlu2 %v7086_v14 }
 0x456   :  { %v886_v4 = vpop.f32.mrf.mxu3  ;;  %v1434_v38 = vpop.f32.mrf.mxu2 }
 0x457   :  { %v7105_v60 = vadd.f32 %v886_v4, %v58_v35  ;;  %v7117_v10 = vadd.f32 %v1434_v38, %v59_v61 }
 0x459   :  { %1469 = vmax.xlane.f32.xlu2 %v7092_v24 }
 0x45e   :  { %v888_v27 = vpop.f32.mrf.mxu3  ;;  %v1437_v45 = vpop.f32.mrf.mxu2 }
 0x45f   :  { %v7101_v53 = vadd.f32 %v1437_v45, %v60_v40  ;;  %v7103_v59 = vadd.f32 %v888_v27, %v59_v61 }
 0x461   :  { %925 = vmax.xlane.f32.xlu0 %v7103_v59  ;;  %1473 = vmax.xlane.f32.xlu1 %v7101_v53 }
 0x462   :  { %923 = vmax.xlane.f32.xlu2 %v7105_v60 }
 0x466   :  { %v891_v63 = vpop.f32.mrf.mxu3  ;;  %v1439_v56 = vpop.f32.mrf.mxu2 }
 0x467   :  { %v7113_v33 = vadd.f32 %v891_v63, %v60_v40  ;;  %v7115_v6 = vadd.f32 %v1439_v56, %v61_v54 }
 0x469   :  { %1475 = vmax.xlane.f32.xlu0 %v7115_v6  ;;  %927 = vmax.xlane.f32.xlu1 %v7113_v33 }
 0x46a   :  { %1471 = vmax.xlane.f32.xlu2 %v7117_v10 }
 0x46e   :  { %v893_v51 = vpop.f32.mrf.mxu3  ;;  %v1442_v3 = vpop.f32.mrf.mxu2 }
 0x46f   :  { %v7122_v16 = vadd.f32 %v893_v51, %v61_v54 }
 0x471   :  { %929 = vmax.xlane.f32.xlu1 %v7122_v16 }
 0x476   :  { %v1444_v57 = vpop.f32.mrf.mxu2 }
 0x477   :  { %v7131_v18 = vadd.f32 %v1444_v57, %v7128_v13 }
 0x479   :  { %1479 = vmax.xlane.f32.xlu2 %v7131_v18 }
 0x494   :  { %v1458_v11 = vpop.xlane.xlu1 %1457 }
 0x495   :  { %v1489_v47 = vsub.f32 %v7038_v62, %v1458_v11 }
 0x497   :  { %v1505_v44 = vmul.f32 1.442695, %v1489_v47 }
 0x499   :  { %5916 = vpow2.f32 %v1505_v44  ;;  %v896_v44 = vpop.f32.mrf.mxu3 }
 0x49c   :  { %v1460_v21 = vpop.xlane.xlu0 %1459  ;;  %v912_v28 = vpop.xlane.xlu2 %911 }
 0x49d   :  { %v1490_v1 = vsub.f32 %v7046_v46, %v1460_v21  ;;  %v943_v42 = vsub.f32 %v7044_v8, %v912_v28  ;;  %v62_v8 = vld [vmem:[%s9682_s2 + $0x50] sm:$0xff] }
 0x49e   :  { %v7152_v61 = vadd.f32 %v1442_v3, %v62_v8 }
 0x49f   :  { %v7137_v31 = vpop.eup %5916  ;;  %v1507_v15 = vmul.f32 1.442695, %v1490_v1  ;;  %v959_v20 = vmul.f32 1.442695, %v943_v42  ;;  %v1447_v1 = vpop.f32.mrf.mxu2 }
 0x4a0   :  { %1537 = vadd.xlane.f32.xlu0 %v7137_v31 }
 0x4a1   :  { %5918 = vpow2.f32 %v1507_v15  ;;  %v898_v42 = vpop.f32.mrf.mxu3  ;;  %v7174_v15 = vadd.f32 %v896_v44, %v62_v8 }
 0x4a2   :  { %5920 = vpow2.f32 %v959_v20 }
 0x4a4   :  { %v1462_v19 = vpop.xlane.xlu0 %1461  ;;  %v914_v35 = vpop.xlane.xlu1 %913 }
 0x4a5   :  { %v1491_v62 = vsub.f32 %v7053_v39, %v1462_v19  ;;  %v944_v4 = vsub.f32 %v7055_v17, %v914_v35  ;;  %v7177_v19 = vadd.f32 %v898_v42, %v7128_v13 }
 0x4a7   :  { %v7142_v38 = vpop.eup %5918  ;;  %v1509_v40 = vmul.f32 1.442695, %v1491_v62  ;;  %v961_v46 = vmul.f32 1.442695, %v944_v4  ;;  %v64_v62 = vld [vmem:[%s9682_s2 + $0x60] sm:$0xff]  ;;  %v1449_v4 = vpop.f32.mrf.mxu2 }
 0x4a8   :  { %v7144_v27 = vpop.eup %5920  ;;  %1539 = vadd.xlane.f32.xlu1 %v7142_v38  ;;  %v7190_v8 = vadd.f32 %v1447_v1, %v64_v62 }
 0x4a9   :  { %5922 = vpow2.f32 %v1509_v40  ;;  %991 = vadd.xlane.f32.xlu0 %v7144_v27 }
 0x4aa   :  { %5924 = vpow2.f32 %v961_v46 }
 0x4ac   :  { %v916_v45 = vpop.xlane.xlu1 %915  ;;  %v1464_v17 = vpop.xlane.xlu2 %1463 }
 0x4ad   :  { %v945_v39 = vsub.f32 %v7062_v7, %v916_v45  ;;  %v1492_v51 = vsub.f32 %v7064_v5, %v1464_v17  ;;  %v901_v17 = vpop.f32.mrf.mxu3 }
 0x4af   :  { %v7154_v54 = vpop.eup %5922  ;;  %v963_v63 = vmul.f32 1.442695, %v945_v39  ;;  %v1511_v57 = vmul.f32 1.442695, %v1492_v51 }
 0x4b0   :  { %v7156_v56 = vpop.eup %5924  ;;  %1477 = vmax.xlane.f32.xlu1 %v7152_v61  ;;  %1541 = vadd.xlane.f32.xlu2 %v7154_v54 }
 0x4b1   :  { %5926 = vpow2.f32 %v963_v63  ;;  %993 = vadd.xlane.f32.xlu0 %v7156_v56 }
 0x4b2   :  { %5928 = vpow2.f32 %v1511_v57 }
 0x4b4   :  { %v918_v11 = vpop.xlane.xlu0 %917  ;;  %v1466_v5 = vpop.xlane.xlu2 %1465 }
 0x4b5   :  { %v946_v7 = vsub.f32 %v7073_v50, %v918_v11  ;;  %v7199_v11 = vadd.f32 %v901_v17, %v64_v62 }
 0x4b7   :  { %v7163_v3 = vpop.eup %5926  ;;  %v965_v47 = vmul.f32 1.442695, %v946_v7 }
 0x4b8   :  { %995 = vadd.xlane.f32.xlu1 %v7163_v3  ;;  %v7166_v21 = vpop.eup %5928 }
 0x4b9   :  { %5930 = vpow2.f32 %v965_v47 }
 0x4bc   :  { %v1468_v20 = vpop.xlane.xlu1 %1467  ;;  %v920_v46 = vpop.xlane.xlu0 %919 }
 0x4bd   :  { %v1494_v35 = vsub.f32 %v7082_v49, %v1468_v20  ;;  %v947_v49 = vsub.f32 %v7080_v34, %v920_v46 }
 0x4bf   :  { %v7168_v28 = vpop.eup %5930  ;;  %v1515_v13 = vmul.f32 1.442695, %v1494_v35  ;;  %v967_v63 = vmul.f32 1.442695, %v947_v49  ;;  %v1493_v35 = vsub.f32 %v7071_v29, %v1466_v5  ;;  %v1452_v29 = vpop.f32.mrf.mxu2 }
 0x4c0   :  { %997 = vadd.xlane.f32.xlu2 %v7168_v28  ;;  %1543 = vadd.xlane.f32.xlu1 %v7166_v21 }
 0x4c1   :  { %5932 = vpow2.f32 %v1515_v13 }
 0x4c2   :  { %5934 = vpow2.f32 %v967_v63 }
 0x4c4   :  { %v922_v50 = vpop.xlane.xlu2 %921 }
 0x4c5   :  { %1825 = vrot.lane.b32.xlu0 %v7003_v23, %s6377_s25  ;;  %v7188_v23 = vld [vmem:[%s9682_s2 + $0x68] sm:$0xff]  ;;  %v948_v39 = vsub.f32 %v7086_v14, %v922_v50 }
 0x4c6   :  { %v7193_v45 = vadd.f32 %v1449_v4, %v7188_v23  ;;  %v1513_v4 = vmul.f32 1.442695, %v1493_v35 }
 0x4c7   :  { %v969_v51 = vmul.f32 1.442695, %v948_v39  ;;  %v7201_v7 = vpop.eup %5932  ;;  %v903_v39 = vpop.f32.mrf.mxu3 }
 0x4c8   :  { %931 = vmax.xlane.f32.xlu2 %v7174_v15  ;;  %933 = vmax.xlane.f32.xlu1 %v7177_v19  ;;  %v7207_v42 = vpop.eup %5934 }
 0x4c9   :  { %5936 = vpow2.f32 %v969_v51 }
 0x4cc   :  { %v1470_v40 = vpop.xlane.xlu2 %1469 }
 0x4cd   :  { %v1495_v47 = vsub.f32 %v7092_v24, %v1470_v40 }
 0x4cf   :  { %v1517_v44 = vmul.f32 1.442695, %v1495_v47  ;;  %v7209_v20 = vpop.eup %5936  ;;  %v1454_v47 = vpop.f32.mrf.mxu2 }
 0x4d0   :  { %1481 = vmax.xlane.f32.xlu2 %v7190_v8  ;;  %1483 = vmax.xlane.f32.xlu1 %v7193_v45 }
 0x4d1   :  { %5938 = vpow2.f32 %v1517_v44  ;;  %v7236_v44 = vadd.f32 %v903_v39, %v7188_v23  ;;  %v66_v23 = vld [vmem:[%s9682_s2 + $0x70] sm:$0xff] }
 0x4d4   :  { %v926_v14 = vpop.xlane.xlu0 %925  ;;  %v1474_v62 = vpop.xlane.xlu1 %1473 }
 0x4d5   :  { %v924_v57 = vpop.xlane.xlu2 %923  ;;  %v950_v24 = vsub.f32 %v7103_v59, %v926_v14  ;;  %v1497_v59 = vsub.f32 %v7101_v53, %v1474_v62  ;;  %v67_v53 = vld [vmem:[%s9682_s2 + $0x78] sm:$0xff] }
 0x4d6   :  { %v949_v34 = vsub.f32 %v7105_v60, %v924_v57  ;;  %v906_v57 = vpop.f32.mrf.mxu3 }
 0x4d7   :  { %v973_v40 = vmul.f32 1.442695, %v950_v24  ;;  %v7216_v13 = vpop.eup %5938  ;;  %v1521_v17 = vmul.f32 1.442695, %v1497_v59 }
 0x4d8   :  { %935 = vmax.xlane.f32.xlu2 %v7199_v11  ;;  %1547 = vadd.xlane.f32.xlu1 %v7201_v7  ;;  %v971_v1 = vmul.f32 1.442695, %v949_v34 }
 0x4da   :  { %5940 = vpow2.f32 %v971_v1  ;;  %v7238_v1 = vadd.f32 %v1454_v47, %v67_v53 }
 0x4db   :  { %5942 = vpow2.f32 %v1513_v4  ;;  %v7250_v4 = vadd.f32 %v1452_v29, %v66_v23 }
 0x4dc   :  { %5944 = vpow2.f32 %v973_v40  ;;  %v1476_v34 = vpop.xlane.xlu0 %1475 }
 0x4dd   :  { %v1472_v50 = vpop.xlane.xlu2 %1471  ;;  %v1498_v35 = vsub.f32 %v7115_v6, %v1476_v34 }
 0x4de   :  { %v1496_v60 = vsub.f32 %v7117_v10, %v1472_v50  ;;  %v928_v10 = vpop.xlane.xlu1 %927 }
 0x4df   :  { %v1523_v62 = vmul.f32 1.442695, %v1498_v35  ;;  %v951_v6 = vsub.f32 %v7113_v33, %v928_v10 }
 0x4e0   :  { %999 = vadd.xlane.f32.xlu2 %v7207_v42  ;;  %1001 = vadd.xlane.f32.xlu1 %v7209_v20  ;;  %v1519_v46 = vmul.f32 1.442695, %v1496_v60  ;;  %v7218_v49 = vpop.eup %5940  ;;  %v908_v60 = vpop.f32.mrf.mxu3 }
 0x4e1   :  { %v7223_v5 = vpop.eup %5942  ;;  %v7254_v39 = vadd.f32 %v908_v60, %v67_v53 }
 0x4e2   :  { %5946 = vpow2.f32 %v1519_v46  ;;  %v7225_v63 = vpop.eup %5944  ;;  %v7252_v46 = vadd.f32 %v906_v57, %v66_v23 }
 0x4e3   :  { %5948 = vpow2.f32 %v1521_v17 }
 0x4e4   :  { %5950 = vpow2.f32 %v1523_v62 }
 0x4e6   :  { %v930_v14 = vpop.xlane.xlu1 %929 }
 0x4e7   :  { %v952_v24 = vsub.f32 %v7122_v16, %v930_v14  ;;  %v975_v16 = vmul.f32 1.442695, %v951_v6 }
 0x4e8   :  { %1549 = vadd.xlane.f32.xlu2 %v7216_v13  ;;  %1003 = vadd.xlane.f32.xlu1 %v7218_v49  ;;  %v7227_v51 = vpop.eup %5946 }
 0x4e9   :  { %v7240_v50 = vpop.eup %5948  ;;  %v977_v40 = vmul.f32 1.442695, %v952_v24 }
 0x4ea   :  { %v7260_v17 = vpop.eup %5950 }
 0x4eb   :  { %5952 = vpow2.f32 %v977_v40 }
 0x4ec   :  { %v1480_v59 = vpop.xlane.xlu2 %1479  ;;  %5954 = vpow2.f32 %v975_v16 }
 0x4ed   :  { %v1500_v57 = vsub.f32 %v7131_v18, %v1480_v59 }
 0x4ef   :  { %1545 = vadd.xlane.f32.xlu0 %v7223_v5  ;;  %v1527_v47 = vmul.f32 1.442695, %v1500_v57 }
 0x4f0   :  { %1005 = vadd.xlane.f32.xlu2 %v7225_v63  ;;  %1551 = vadd.xlane.f32.xlu1 %v7227_v51 }
 0x4f1   :  { %v7262_v29 = vpop.eup %5952  ;;  %5956 = vpow2.f32 %v1527_v47 }
 0x4f2   :  { %v7267_v33 = vpop.eup %5954 }
 0x4f7   :  { %937 = vmax.xlane.f32.xlu0 %v7236_v44  ;;  %v7272_v53 = vpop.eup %5956 }
 0x4f8   :  { %1553 = vadd.xlane.f32.xlu2 %v7240_v50  ;;  %1487 = vmax.xlane.f32.xlu1 %v7238_v1 }
 0x4ff   :  { %1485 = vmax.xlane.f32.xlu0 %v7250_v4 }
 0x500   :  { %941 = vmax.xlane.f32.xlu2 %v7254_v39  ;;  %939 = vmax.xlane.f32.xlu1 %v7252_v46 }
 0x507   :  { %1555 = vadd.xlane.f32.xlu0 %v7260_v17 }
 0x508   :  { %1009 = vadd.xlane.f32.xlu1 %v7262_v29 }
 0x50f   :  { %1007 = vadd.xlane.f32.xlu0 %v7267_v33 }
 0x513   :  { %v7270_v10 = vpop.xlane.xlu0 %1537 }
 0x514   :  { %5958 = vrcp.f32 %v7270_v10  ;;  %vm1574_vm6 = vweird.f32 %v7270_v10  ;;  %v1578_v26 = vand.u32 2147483647, %v7270_v10 }
 0x516   :  { %vm1579_vm4 = vcmp.eq.f32.partialorder %v1578_v26, 8.507059e+37 }
 0x517   :  { %1559 = vadd.xlane.f32.xlu0 %v7272_v53 }
 0x51a   :  { %v7276_v14 = vpop.eup %5958 }
 0x51b   :  { %v1540_v34 = vpop.xlane.xlu1 %1539  ;;  %v1570_v35 = vmul.f32 %v7276_v14, %v7270_v10  ;;  %vm1575_vm7 = vweird.f32 %v7276_v14 }
 0x51c   :  { %5960 = vrcp.f32 %v1540_v34  ;;  %v7278_v18 = vpop.xlane.xlu0 %991  ;;  %vm1588_vm9 = vweird.f32 %v1540_v34  ;;  %vm7325_vm13 = vmor %vm1574_vm6, %vm1575_vm7 }
 0x51d   :  { %5962 = vrcp.f32 %v7278_v18  ;;  %v1571_v60 = vsub.f32 1.0, %v1570_v35  ;;  %vm1028_vm12 = vweird.f32 %v7278_v18  ;;  %v1032_v22 = vand.u32 2147483647, %v7278_v18 }
 0x51f   :  { %v1572_v35 = vmul.f32 %v7276_v14, %v1571_v60  ;;  %v1592_v60 = vand.u32 2147483647, %v1540_v34  ;;  %vm1033_vm3 = vcmp.eq.f32.partialorder %v1032_v22, 8.507059e+37 }
 0x521   :  { %vm1593_vm15 = vcmp.eq.f32.partialorder %v1592_v60, 8.507059e+37 }
 0x522   :  { %v5961_v24 = vpop.eup %5960 }
 0x523   :  { %v7283_v23 = vpop.eup %5962  ;;  %v1584_v62 = vmul.f32 %v5961_v24, %v1540_v34  ;;  %v1478_v40 = vpop.xlane.xlu1 %1477  ;;  %vm1589_vm8 = vweird.f32 %v5961_v24 }
 0x524   :  { %v7285_v6 = vpop.xlane.xlu2 %1541  ;;  %v1024_v16 = vmul.f32 %v7283_v23, %v7278_v18  ;;  %v1499_v59 = vsub.f32 %v7152_v61, %v1478_v40  ;;  %v7290_v57 = vpop.xlane.xlu0 %993  ;;  %vm1029_vm10 = vweird.f32 %v7283_v23  ;;  %vm7313_vm11 = vmor %vm1588_vm9, %vm1589_vm8 }
 0x525   :  { %5964 = vrcp.f32 %v7285_v6  ;;  %v1585_v47 = vsub.f32 1.0, %v1584_v62  ;;  %v1594_v62 = vand.u32 2147483648, %v1540_v34  ;;  %v1048_v9 = vand.u32 2147483648, %v7290_v57  ;;  %vm7333_vm14 = vmor %vm1028_vm12, %vm1029_vm10 }
 0x526   :  { %5966 = vrcp.f32 %v7290_v57  ;;  %v1025_v12 = vsub.f32 1.0, %v1024_v16  ;;  %v1525_v52 = vmul.f32 1.442695, %v1499_v59  ;;  %v1573_v16 = vadd.f32 %v7276_v14, %v1572_v35 }
 0x527   :  { %v1586_v48 = vmul.f32 %v5961_v24, %v1585_v47  ;;  %vm1042_vm2 = vweird.f32 %v7290_v57  ;;  %vm1602_vm8 = vweird.f32 %v7285_v6 }
 0x528   :  { %v1026_v43 = vmul.f32 %v7283_v23, %v1025_v12  ;;  %5968 = vpow2.f32 %v1525_v52  ;;  %v1580_v12 = vand.u32 2147483648, %v7270_v10  ;;  %v1595_v10 = vor.u32 1.1754944e-38, %v1594_v62 }
 0x529   :  { %v1587_v61 = vadd.f32 %v5961_v24, %v1586_v48  ;;  %v1034_v48 = vand.u32 2147483648, %v7278_v18  ;;  %v1577_v18 = vsel %vm7325_vm13, %v7276_v14, %v1573_v16  ;;  %v1049_v16 = vor.u32 1.1754944e-38, %v1048_v9 }
 0x52a   :  { %v1027_v52 = vadd.f32 %v7283_v23, %v1026_v43  ;;  %v1581_v55 = vor.u32 1.1754944e-38, %v1580_v12 }
 0x52b   :  { %v7296_v37 = vpop.eup %5964  ;;  %v7300_v32 = vpop.xlane.xlu1 %995  ;;  %v1591_v0 = vsel %vm7313_vm11, %v5961_v24, %v1587_v61  ;;  %v1046_v24 = vand.u32 2147483647, %v7290_v57  ;;  %v1035_v58 = vor.u32 1.1754944e-38, %v1034_v48  ;;  %v1606_v48 = vand.u32 2147483647, %v7285_v6 }
 0x52c   :  { %v5967_v40 = vpop.eup %5966  ;;  %5970 = vrcp.f32 %v7300_v32  ;;  %v1598_v47 = vmul.f32 %v7296_v37, %v7285_v6  ;;  %v1031_v34 = vsel %vm7333_vm14, %v7283_v23, %v1027_v52  ;;  %v1596_v25 = vsel %vm1593_vm15, %v1595_v10, %v1591_v0 }
 0x52d   :  { %v1038_v59 = vmul.f32 %v5967_v40, %v7290_v57  ;;  %vm1043_vm0 = vweird.f32 %v5967_v40  ;;  %v1036_v23 = vsel %vm1033_vm3, %v1035_v58, %v1031_v34  ;;  %v1582_v60 = vsel %vm1579_vm4, %v1581_v55, %v1577_v18 }
 0x52e   :  { %v7317_v35 = vpop.eup %5968  ;;  %v1599_v61 = vsub.f32 1.0, %v1598_v47  ;;  %vm1044_vm5 = vmor %vm1042_vm2, %vm1043_vm0  ;;  %vm1047_vm6 = vcmp.eq.f32.partialorder %v1046_v24, 8.507059e+37  ;;  %v1794_v22 = vmul.f32 %v7142_v38, %v1596_v25  ;;  %v1247_v12 = vmul.f32 %v7144_v27, %v1036_v23 }
 0x52f   :  { %v1039_v43 = vsub.f32 1.0, %v1038_v59  ;;  %1557 = vadd.xlane.f32.xlu2 %v7317_v35  ;;  %v1608_v55 = vand.u32 2147483648, %v7285_v6  ;;  %v1060_v47 = vand.u32 2147483647, %v7300_v32  ;;  %v1062_v18 = vand.u32 2147483648, %v7300_v32 }
 0x530   :  { %v1600_v52 = vmul.f32 %v7296_v37, %v1599_v61  ;;  %vm1603_vm7 = vweird.f32 %v7296_v37  ;;  %vm7369_vm9 = vcmp.eq.f32.partialorder %v1606_v48, 8.507059e+37  ;;  %vm1056_vm10 = vweird.f32 %v7300_v32 }
 0x531   :  { %v1040_v59 = vmul.f32 %v5967_v40, %v1039_v43  ;;  %vm7376_vm12 = vcmp.eq.f32.partialorder %v1060_v47, 8.507059e+37  ;;  %vm7388_vm13 = vmor %vm1602_vm8, %vm1603_vm7 }
 0x532   :  { %v7344_v41 = vpop.eup %5970  ;;  %v1601_v27 = vadd.f32 %v7296_v37, %v1600_v52 }
 0x533   :  { %v1041_v2 = vadd.f32 %v5967_v40, %v1040_v59  ;;  %v1052_v14 = vmul.f32 %v7344_v41, %v7300_v32  ;;  %v7349_v62 = vpop.xlane.xlu1 %1543  ;;  %v7351_v36 = vpop.xlane.xlu2 %997  ;;  %vm1057_vm11 = vweird.f32 %v7344_v41 }
 0x534   :  { %5972 = vrcp.f32 %v7349_v62  ;;  %vm7401_vm14 = vmor %vm1056_vm10, %vm1057_vm11  ;;  %v1076_v48 = vand.u32 2147483648, %v7351_v36  ;;  %vm1070_vm2 = vweird.f32 %v7351_v36  ;;  %vm1616_vm3 = vweird.f32 %v7349_v62 }
 0x535   :  { %v1045_v0 = vsel %vm1044_vm5, %v5967_v40, %v1041_v2  ;;  %v1053_v57 = vsub.f32 1.0, %v1052_v14  ;;  %5974 = vrcp.f32 %v7351_v36  ;;  %v1793_v40 = vmul.f32 %v7137_v31, %v1582_v60 }
 0x536   :  { %v1050_v26 = vsel %vm1047_vm6, %v1049_v16, %v1045_v0  ;;  %v1609_v31 = vor.u32 1.1754944e-38, %v1608_v55 }
 0x537   :  { %v1248_v58 = vmul.f32 %v7156_v56, %v1050_v26  ;;  %v1826_v9 = vpop.permute.xlu0 %1825  ;;  %v1054_v38 = vmul.f32 %v7344_v41, %v1053_v57  ;;  %v1809_v43 = vpack.c.bf16 %v1794_v22, %v1793_v40  ;;  %v1063_v57 = vor.u32 1.1754944e-38, %v1062_v18 }
 0x538   :  { %1856 = vmatpush.bf16.msrb.mxu0 %v1826_v9  ;;  %v1074_v26 = vand.u32 2147483647, %v7351_v36  ;;  %v1620_v9 = vand.u32 2147483647, %v7349_v62 }
 0x539   :  { %v1263_v25 = vpack.c.bf16 %v1248_v58, %v1247_v12  ;;  %v1055_v60 = vadd.f32 %v7344_v41, %v1054_v38  ;;  %v1622_v58 = vand.u32 2147483648, %v7349_v62 }
 0x53a   :  { %v5973_v56 = vpop.eup %5972  ;;  %vm1075_vm4 = vcmp.eq.f32.partialorder %v1074_v26, 8.507059e+37  ;;  %vm1621_vm7 = vcmp.eq.f32.partialorder %v1620_v9, 8.507059e+37 }
 0x53b   :  { %1279 = vmatmul.bf16.vlgmr.msrb.gmra.mxu1 %v1263_v25  ;;  %v5975_v59 = vpop.eup %5974  ;;  %v1612_v34 = vmul.f32 %v5973_v56, %v7349_v62  ;;  %1857 = vmatmul.bf16.vlgmr.msrb.gmra.mxu0 %v1809_v43  ;;  %v934_v24 = vpop.xlane.xlu1 %933  ;;  %vm1617_vm15 = vweird.f32 %v5973_v56  ;;  %v1623_v38 = vor.u32 1.1754944e-38, %v1622_v58 }
 0x53c   :  { %v932_v61 = vpop.xlane.xlu2 %931  ;;  %v1066_v14 = vmul.f32 %v5975_v59, %v7351_v36  ;;  %v954_v23 = vsub.f32 %v7177_v19, %v934_v24  ;;  %v1605_v19 = vsel %vm7388_vm13, %v7296_v37, %v1601_v27  ;;  %v1059_v37 = vsel %vm7401_vm14, %v7344_v41, %v1055_v60  ;;  %vm1618_vm5 = vmor %vm1616_vm3, %vm1617_vm15 }
 0x53d   :  { %v953_v16 = vsub.f32 %v7174_v15, %v932_v61  ;;  %v1613_v22 = vsub.f32 1.0, %v1612_v34  ;;  %vm1071_vm0 = vweird.f32 %v5975_v59  ;;  %v1610_v25 = vsel %vm7369_vm9, %v1609_v31, %v1605_v19 }
 0x53e   :  { %v1067_v52 = vsub.f32 1.0, %v1066_v14  ;;  %v981_v15 = vmul.f32 1.442695, %v954_v23  ;;  %v1064_v41 = vsel %vm7376_vm12, %v1063_v57, %v1059_v37  ;;  %vm1072_vm6 = vmor %vm1070_vm2, %vm1071_vm0  ;;  %v1077_v27 = vor.u32 1.1754944e-38, %v1076_v48 }
 0x53f   :  { %v979_v12 = vmul.f32 1.442695, %v953_v16  ;;  %v1614_v55 = vmul.f32 %v5973_v56, %v1613_v22  ;;  %v1795_v10 = vmul.f32 %v7154_v54, %v1610_v25  ;;  %v1249_v60 = vmul.f32 %v7163_v3, %v1064_v41 }
 0x540   :  { %5976 = vpow2.f32 %v981_v15  ;;  %v1068_v40 = vmul.f32 %v5975_v59, %v1067_v52 }
 0x541   :  { %5978 = vpow2.f32 %v979_v12  ;;  %v1615_v32 = vadd.f32 %v5973_v56, %v1614_v55 }
 0x542   :  { %v1069_v47 = vadd.f32 %v5975_v59, %v1068_v40 }
 0x543   :  { %v1484_v43 = vpop.xlane.xlu1 %1483  ;;  %v1619_v34 = vsel %vm1618_vm5, %v5973_v56, %v1615_v32 }
 0x544   :  { %v1482_v18 = vpop.xlane.xlu2 %1481  ;;  %v1502_v36 = vsub.f32 %v7193_v45, %v1484_v43  ;;  %v1073_v24 = vsel %vm1072_vm6, %v5975_v59, %v1069_v47  ;;  %v1624_v61 = vsel %vm1621_vm7, %v1623_v38, %v1619_v34 }
 0x545   :  { %v1501_v62 = vsub.f32 %v7190_v8, %v1482_v18  ;;  %v1078_v14 = vsel %vm1075_vm4, %v1077_v27, %v1073_v24  ;;  %v1796_v31 = vmul.f32 %v7166_v21, %v1624_v61 }
 0x546   :  { %v7420_v23 = vpop.eup %5976  ;;  %v1531_v16 = vmul.f32 1.442695, %v1502_v36  ;;  %v1250_v56 = vmul.f32 %v7168_v28, %v1078_v14 }
 0x547   :  { %v1529_v2 = vmul.f32 1.442695, %v1501_v62  ;;  %v7424_v0 = vpop.eup %5978  ;;  %1013 = vadd.xlane.f32.xlu2 %v7420_v23  ;;  %v1810_v8 = vpack.c.bf16 %v1796_v31, %v1795_v10 }
 0x548   :  { %5980 = vpow2.f32 %v1531_v16  ;;  %1011 = vadd.xlane.f32.xlu1 %v7424_v0  ;;  %v1264_v45 = vpack.c.bf16 %v1250_v56, %v1249_v60 }
 0x549   :  { %5982 = vpow2.f32 %v1529_v2 }
 0x54b   :  { %1284 = vmatmul.bf16.gmra.mxu1 %v1264_v45  ;;  %1862 = vmatmul.bf16.gmra.mxu0 %v1810_v8  ;;  %v1548_v54 = vpop.xlane.xlu1 %1547 }
 0x54c   :  { %v936_v21 = vpop.xlane.xlu2 %935  ;;  %5984 = vrcp.f32 %v1548_v54  ;;  %v1648_v37 = vand.u32 2147483647, %v1548_v54  ;;  %v1650_v32 = vand.u32 2147483648, %v1548_v54  ;;  %vm1644_vm8 = vweird.f32 %v1548_v54 }
 0x54d   :  { %v955_v59 = vsub.f32 %v7199_v11, %v936_v21 }
 0x54e   :  { %v7429_v3 = vpop.eup %5980  ;;  %vm7449_vm11 = vcmp.eq.f32.partialorder %v1648_v37, 8.507059e+37  ;;  %v1651_v24 = vor.u32 1.1754944e-38, %v1650_v32 }
 0x54f   :  { %v983_v28 = vmul.f32 1.442695, %v955_v59  ;;  %v7431_v22 = vpop.eup %5982 }
 0x550   :  { %1563 = vadd.xlane.f32.xlu1 %v7429_v3  ;;  %1561 = vadd.xlane.f32.xlu0 %v7431_v22 }
 0x551   :  { %5986 = vpow2.f32 %v983_v28 }
 0x552   :  { %v7435_v57 = vpop.eup %5984 }
 0x553   :  { %v1640_v26 = vmul.f32 %v7435_v57, %v1548_v54  ;;  %v1002_v19 = vpop.xlane.xlu1 %1001  ;;  %vm1645_vm9 = vweird.f32 %v7435_v57 }
 0x554   :  { %v1000_v52 = vpop.xlane.xlu2 %999  ;;  %5988 = vrcp.f32 %v1002_v19  ;;  %v1102_v43 = vand.u32 2147483647, %v1002_v19  ;;  %v1104_v18 = vand.u32 2147483648, %v1002_v19  ;;  %vm1098_vm14 = vweird.f32 %v1002_v19  ;;  %vm7457_vm15 = vmor %vm1644_vm8, %vm1645_vm9 }
 0x555   :  { %5990 = vrcp.f32 %v1000_v52  ;;  %v1641_v11 = vsub.f32 1.0, %v1640_v26  ;;  %v1090_v38 = vand.u32 2147483648, %v1000_v52  ;;  %v1088_v62 = vand.u32 2147483647, %v1000_v52 }
 0x556   :  { %vm1084_vm13 = vweird.f32 %v1000_v52  ;;  %vm1103_vm2 = vcmp.eq.f32.partialorder %v1102_v43, 8.507059e+37  ;;  %v1105_v60 = vor.u32 1.1754944e-38, %v1104_v18 }
 0x557   :  { %v7438_v15 = vpop.eup %5986  ;;  %v1642_v9 = vmul.f32 %v7435_v57, %v1641_v11  ;;  %v1091_v2 = vor.u32 1.1754944e-38, %v1090_v38  ;;  %vm1089_vm4 = vcmp.eq.f32.partialorder %v1088_v62, 8.507059e+37 }
 0x558   :  { %1015 = vadd.xlane.f32.xlu2 %v7438_v15 }
 0x559   :  { %v1643_v27 = vadd.f32 %v7435_v57, %v1642_v9 }
 0x55a   :  { %v5989_v12 = vpop.eup %5988 }
 0x55b   :  { %v5991_v58 = vpop.eup %5990  ;;  %v1094_v6 = vmul.f32 %v5989_v12, %v1002_v19  ;;  %v7441_v48 = vpop.xlane.xlu1 %1003  ;;  %vm1099_vm10 = vweird.f32 %v5989_v12  ;;  %v1647_v21 = vsel %vm7457_vm15, %v7435_v57, %v1643_v27 }
 0x55c   :  { %v7443_v55 = vpop.xlane.xlu2 %1549  ;;  %v1080_v40 = vmul.f32 %v5991_v58, %v1000_v52  ;;  %5992 = vrcp.f32 %v7441_v48  ;;  %vm1085_vm12 = vweird.f32 %v5991_v58  ;;  %vm1100_vm0 = vmor %vm1098_vm14, %vm1099_vm10  ;;  %v1652_v52 = vsel %vm7449_vm11, %v1651_v24, %v1647_v21 }
 0x55d   :  { %v1095_v47 = vsub.f32 1.0, %v1094_v6  ;;  %5994 = vrcp.f32 %v7443_v55  ;;  %vm1086_vm3 = vmor %vm1084_vm13, %vm1085_vm12  ;;  %v1118_v57 = vand.u32 2147483648, %v7441_v48  ;;  %v7490_v32 = vmul.f32 %v7201_v7, %v1652_v52 }
 0x55e   :  { %v1081_v25 = vsub.f32 1.0, %v1080_v40  ;;  %vm1112_vm5 = vweird.f32 %v7441_v48 }
 0x55f   :  { %v1096_v41 = vmul.f32 %v5989_v12, %v1095_v47  ;;  %v1119_v43 = vor.u32 1.1754944e-38, %v1118_v57 }
 0x560   :  { %v1082_v36 = vmul.f32 %v5991_v58, %v1081_v25 }
 0x561   :  { %v1097_v61 = vadd.f32 %v5989_v12, %v1096_v41 }
 0x562   :  { %v7461_v10 = vpop.eup %5992  ;;  %v7463_v31 = vpop.xlane.xlu0 %1545  ;;  %v1083_v16 = vadd.f32 %v5991_v58, %v1082_v36 }
 0x563   :  { %v1108_v56 = vmul.f32 %v7461_v10, %v7441_v48  ;;  %5996 = vrcp.f32 %v7463_v31  ;;  %v7469_v8 = vpop.xlane.xlu1 %1551  ;;  %v1101_v54 = vsel %vm1100_vm0, %v5989_v12, %v1097_v61  ;;  %v1116_v12 = vand.u32 2147483647, %v7441_v48  ;;  %v7486_v9 = vpop.eup %5994 }
 0x564   :  { %v7471_v45 = vpop.xlane.xlu2 %1005  ;;  %5998 = vrcp.f32 %v7469_v8  ;;  %v1087_v59 = vsel %vm1086_vm3, %v5991_v58, %v1083_v16  ;;  %v1106_v28 = vsel %vm1103_vm2, %v1105_v60, %v1101_v54  ;;  %vm1113_vm7 = vweird.f32 %v7461_v10 }
 0x565   :  { %v1109_v26 = vsub.f32 1.0, %v1108_v56  ;;  %6000 = vrcp.f32 %v7471_v45  ;;  %v1092_v19 = vsel %vm1089_vm4, %v1091_v2, %v1087_v59  ;;  %v1252_v11 = vmul.f32 %v7209_v20, %v1106_v28  ;;  %vm7517_vm9 = vmor %vm1112_vm5, %vm1113_vm7 }
 0x566   :  { %v1251_v6 = vmul.f32 %v7207_v42, %v1092_v19  ;;  %v1654_v42 = vmul.f32 %v7486_v9, %v7443_v55  ;;  %vm7498_vm6 = vcmp.eq.f32.partialorder %v1116_v12, 8.507059e+37  ;;  %v1634_v14 = vand.u32 2147483647, %v7463_v31 }
 0x567   :  { %v1110_v58 = vmul.f32 %v7461_v10, %v1109_v26  ;;  %v1636_v2 = vand.u32 2147483648, %v7463_v31  ;;  %v1130_v60 = vand.u32 2147483647, %v7471_v45  ;;  %vm1630_vm10 = vweird.f32 %v7463_v31 }
 0x568   :  { %v1265_v37 = vpack.c.bf16 %v1252_v11, %v1251_v6  ;;  %v1655_v11 = vsub.f32 1.0, %v1654_v42  ;;  %vm1635_vm13 = vcmp.eq.f32.partialorder %v1634_v14, 8.507059e+37  ;;  %vm1126_vm14 = vweird.f32 %v7471_v45 }
 0x569   :  { %v5997_v40 = vpop.eup %5996  ;;  %v1111_v36 = vadd.f32 %v7461_v10, %v1110_v58  ;;  %v1637_v48 = vor.u32 1.1754944e-38, %v1636_v2  ;;  %vm1131_vm15 = vcmp.eq.f32.partialorder %v1130_v60, 8.507059e+37  ;;  %vm1659_vm3 = vweird.f32 %v7486_v9 }
 0x56a   :  { %v7493_v20 = vpop.eup %5998  ;;  %v1626_v47 = vmul.f32 %v5997_v40, %v7463_v31  ;;  %v938_v25 = vpop.xlane.xlu0 %937  ;;  %1289 = vmatmul.bf16.gmra.mxu1 %v1265_v37  ;;  %vm1631_vm8 = vweird.f32 %v5997_v40  ;;  %vm1672_vm4 = vweird.f32 %v7469_v8  ;;  %v1664_v2 = vand.u32 2147483648, %v7443_v55 }
 0x56b   :  { %v6001_v18 = vpop.eup %6000  ;;  %v1668_v7 = vmul.f32 %v7493_v20, %v7469_v8  ;;  %v956_v41 = vsub.f32 %v7236_v44, %v938_v25  ;;  %v1488_v27 = vpop.xlane.xlu1 %1487  ;;  %v1132_v44 = vand.u32 2147483648, %v7471_v45  ;;  %v1115_v28 = vsel %vm7517_vm9, %v7461_v10, %v1111_v36  ;;  %vm1632_vm12 = vmor %vm1630_vm10, %vm1631_vm8 }
 0x56c   :  { %v7505_v34 = vpop.xlane.xlu2 %1553  ;;  %v1627_v62 = vsub.f32 1.0, %v1626_v47  ;;  %v1122_v24 = vmul.f32 %v6001_v18, %v7471_v45  ;;  %v1504_v61 = vsub.f32 %v7238_v1, %v1488_v27  ;;  %vm1127_vm11 = vweird.f32 %v6001_v18 }
 0x56d   :  { %v985_v16 = vmul.f32 1.442695, %v956_v41  ;;  %v1669_v1 = vsub.f32 1.0, %v1668_v7  ;;  %v1133_v57 = vor.u32 1.1754944e-38, %v1132_v44  ;;  %v1120_v37 = vsel %vm7498_vm6, %v1119_v43, %v1115_v28  ;;  %vm1128_vm0 = vmor %vm1126_vm14, %vm1127_vm11 }
 0x56e   :  { %v1123_v56 = vsub.f32 1.0, %v1122_v24  ;;  %v1535_v54 = vmul.f32 1.442695, %v1504_v61  ;;  %v1628_v21 = vmul.f32 %v5997_v40, %v1627_v62  ;;  %vm1673_vm2 = vweird.f32 %v7493_v20 }
 0x56f   :  { %6002 = vpow2.f32 %v985_v16  ;;  %v1670_v25 = vmul.f32 %v7493_v20, %v1669_v1  ;;  %vm7560_vm5 = vmor %vm1672_vm4, %vm1673_vm2  ;;  %vm1658_vm6 = vweird.f32 %v7443_v55  ;;  %v1662_v44 = vand.u32 2147483647, %v7443_v55 }
 0x570   :  { %6004 = vpow2.f32 %v1535_v54  ;;  %v1629_v26 = vadd.f32 %v5997_v40, %v1628_v21  ;;  %v1124_v19 = vmul.f32 %v6001_v18, %v1123_v56  ;;  %vm1660_vm7 = vmor %vm1658_vm6, %vm1659_vm3  ;;  %v1665_v55 = vor.u32 1.1754944e-38, %v1664_v2 }
 0x571   :  { %6006 = vrcp.f32 %v7505_v34  ;;  %v1671_v24 = vadd.f32 %v7493_v20, %v1670_v25  ;;  %vm1663_vm9 = vcmp.eq.f32.partialorder %v1662_v44, 8.507059e+37  ;;  %vm1686_vm14 = vweird.f32 %v7505_v34 }
 0x572   :  { %v1486_v6 = vpop.xlane.xlu0 %1485  ;;  %v1633_v52 = vsel %vm1632_vm12, %v5997_v40, %v1629_v26  ;;  %v1125_v12 = vadd.f32 %v6001_v18, %v1124_v19 }
 0x573   :  { %v1503_v31 = vsub.f32 %v7250_v4, %v1486_v6  ;;  %v940_v10 = vpop.xlane.xlu1 %939  ;;  %v1638_v58 = vsel %vm1635_vm13, %v1637_v48, %v1633_v52  ;;  %v1656_v4 = vmul.f32 %v7486_v9, %v1655_v11 }
 0x574   :  { %v957_v42 = vsub.f32 %v7252_v46, %v940_v10  ;;  %v942_v47 = vpop.xlane.xlu2 %941  ;;  %v1797_v45 = vmul.f32 %v7223_v5, %v1638_v58  ;;  %v1129_v40 = vsel %vm1128_vm0, %v6001_v18, %v1125_v12  ;;  %v1253_v46 = vmul.f32 %v7218_v49, %v1120_v37 }
 0x575   :  { %v7534_v7 = vpop.eup %6002  ;;  %v1533_v41 = vmul.f32 1.442695, %v1503_v31  ;;  %v1134_v27 = vsel %vm1131_vm15, %v1133_v57, %v1129_v40  ;;  %v958_v18 = vsub.f32 %v7254_v39, %v942_v47  ;;  %v1657_v49 = vadd.f32 %v7486_v9, %v1656_v4 }
 0x576   :  { %v7537_v36 = vpop.eup %6004  ;;  %v987_v38 = vmul.f32 1.442695, %v957_v42  ;;  %1017 = vadd.xlane.f32.xlu0 %v7534_v7  ;;  %v1811_v43 = vpack.c.bf16 %v7490_v32, %v1797_v45  ;;  %v1254_v5 = vmul.f32 %v7225_v63, %v1134_v27  ;;  %v1678_v32 = vand.u32 2147483648, %v7469_v8 }
 0x577   :  { %6008 = vpow2.f32 %v1533_v41  ;;  %1567 = vadd.xlane.f32.xlu2 %v7537_v36  ;;  %v7547_v61 = vpop.eup %6006  ;;  %v1676_v63 = vand.u32 2147483647, %v7469_v8  ;;  %v989_v39 = vmul.f32 1.442695, %v958_v18  ;;  %v1675_v8 = vsel %vm7560_vm5, %v7493_v20, %v1671_v24 }
 0x578   :  { %6010 = vpow2.f32 %v987_v38  ;;  %1867 = vmatmul.bf16.gmra.mxu0 %v1811_v43  ;;  %v1266_v62 = vpack.c.bf16 %v1254_v5, %v1253_v46  ;;  %v1682_v54 = vmul.f32 %v7547_v61, %v7505_v34  ;;  %v1679_v21 = vor.u32 1.1754944e-38, %v1678_v32 }
 0x579   :  { %v1661_v1 = vsel %vm1660_vm7, %v7486_v9, %v1657_v49  ;;  %vm1677_vm8 = vcmp.eq.f32.partialorder %v1676_v63, 8.507059e+37  ;;  %vm1687_vm11 = vweird.f32 %v7547_v61  ;;  %v1692_v4 = vand.u32 2147483648, %v7505_v34 }
 0x57a   :  { %v7550_v14 = vpop.xlane.xlu0 %1555  ;;  %1294 = vmatmul.bf16.gmra.mxu1 %v1266_v62  ;;  %v1680_v28 = vsel %vm1677_vm8, %v1679_v21, %v1675_v8  ;;  %v1683_v26 = vsub.f32 1.0, %v1682_v54  ;;  %v1666_v19 = vsel %vm1663_vm9, %v1665_v55, %v1661_v1  ;;  %v1690_v43 = vand.u32 2147483647, %v7505_v34  ;;  %vm7602_vm2 = vmor %vm1686_vm14, %vm1687_vm11 }
 0x57b   :  { %6012 = vrcp.f32 %v7550_v14  ;;  %v7557_v16 = vpop.xlane.xlu1 %1009  ;;  %v1800_v52 = vmul.f32 %v7227_v51, %v1680_v28  ;;  %v1799_v57 = vmul.f32 %v7216_v13, %v1666_v19  ;;  %v1706_v40 = vand.u32 2147483648, %v7550_v14 }
 0x57c   :  { %6014 = vrcp.f32 %v7557_v16  ;;  %v1684_v10 = vmul.f32 %v7547_v61, %v1683_v26  ;;  %v1704_v13 = vand.u32 2147483647, %v7550_v14  ;;  %vm1700_vm12 = vweird.f32 %v7550_v14 }
 0x57d   :  { %v7570_v56 = vpop.eup %6008  ;;  %6016 = vpow2.f32 %v989_v39  ;;  %v1812_v42 = vpack.c.bf16 %v1800_v52, %v1799_v57  ;;  %v1160_v38 = vand.u32 2147483648, %v7557_v16  ;;  %vm1154_vm0 = vweird.f32 %v7557_v16 }
 0x57e   :  { %v7574_v59 = vpop.eup %6010  ;;  %1565 = vadd.xlane.f32.xlu1 %v7570_v56  ;;  %v1685_v25 = vadd.f32 %v7547_v61, %v1684_v10  ;;  %v1158_v18 = vand.u32 2147483647, %v7557_v16  ;;  %vm1705_vm4 = vcmp.eq.f32.partialorder %v1704_v13, 8.507059e+37  ;;  %v1707_v49 = vor.u32 1.1754944e-38, %v1706_v40 }
 0x57f   :  { %1019 = vadd.xlane.f32.xlu0 %v7574_v59  ;;  %v1161_v2 = vor.u32 1.1754944e-38, %v1160_v38  ;;  %v1693_v60 = vor.u32 1.1754944e-38, %v1692_v4  ;;  %vm1691_vm8 = vcmp.eq.f32.partialorder %v1690_v43, 8.507059e+37 }
 0x580   :  { %v1689_v34 = vsel %vm7602_vm2, %v7547_v61, %v1685_v25  ;;  %vm1159_vm7 = vcmp.eq.f32.partialorder %v1158_v18, 8.507059e+37 }
 0x581   :  { %v6013_v20 = vpop.eup %6012  ;;  %v1694_v1 = vsel %vm1691_vm8, %v1693_v60, %v1689_v34 }
 0x582   :  { %v6015_v11 = vpop.eup %6014  ;;  %v1696_v48 = vmul.f32 %v6013_v20, %v7550_v14  ;;  %v1008_v6 = vpop.xlane.xlu0 %1007  ;;  %vm1701_vm10 = vweird.f32 %v6013_v20 }
 0x583   :  { %v1150_v12 = vmul.f32 %v6015_v11, %v7557_v16  ;;  %6018 = vrcp.f32 %v1008_v6  ;;  %v7583_v31 = vpop.eup %6016  ;;  %vm1155_vm13 = vweird.f32 %v6015_v11  ;;  %vm7596_vm15 = vmor %vm1700_vm12, %vm1701_vm10  ;;  %v1146_v32 = vand.u32 2147483648, %v1008_v6 }
 0x584   :  { %v1697_v9 = vsub.f32 1.0, %v1696_v48  ;;  %vm7608_vm3 = vmor %vm1154_vm0, %vm1155_vm13  ;;  %v1144_v39 = vand.u32 2147483647, %v1008_v6  ;;  %vm1140_vm6 = vweird.f32 %v1008_v6 }
 0x585   :  { %v1151_v58 = vsub.f32 1.0, %v1150_v12  ;;  %v1147_v54 = vor.u32 1.1754944e-38, %v1146_v32 }
 0x586   :  { %v1698_v37 = vmul.f32 %v6013_v20, %v1697_v9  ;;  %1021 = vadd.xlane.f32.xlu1 %v7583_v31  ;;  %vm1145_vm10 = vcmp.eq.f32.partialorder %v1144_v39, 8.507059e+37 }
 0x587   :  { %v1152_v47 = vmul.f32 %v6015_v11, %v1151_v58 }
 0x588   :  { %1872 = vmatmul.bf16.gmra.mxu0 %v1812_v42  ;;  %v1699_v45 = vadd.f32 %v6013_v20, %v1698_v37 }
 0x589   :  { %v6019_v51 = vpop.eup %6018  ;;  %v1153_v27 = vadd.f32 %v6015_v11, %v1152_v47 }
 0x58a   :  { %v1136_v41 = vmul.f32 %v6019_v51, %v1008_v6  ;;  %v1703_v24 = vsel %vm7596_vm15, %v6013_v20, %v1699_v45  ;;  %vm1141_vm5 = vweird.f32 %v6019_v51  ;;  %v1560_v61 = vpop.xlane.xlu0 %1559 }
 0x58b   :  { %v1157_v16 = vsel %vm7608_vm3, %v6015_v11, %v1153_v27  ;;  %v1708_v44 = vsel %vm1705_vm4, %v1707_v49, %v1703_v24  ;;  %vm1142_vm9 = vmor %vm1140_vm6, %vm1141_vm5  ;;  %v1801_v11 = vmul.f32 %v7240_v50, %v1694_v1  ;;  %6020 = vrcp.f32 %v1560_v61  ;;  %v5843_v50 = vld [vmem:[%s9687_s7 + $0x10] sm:$0xff] }
 0x58c   :  { %v1137_v5 = vsub.f32 1.0, %v1136_v41  ;;  %v1162_v21 = vsel %vm1159_vm7, %v1161_v2, %v1157_v16  ;;  %v1802_v28 = vmul.f32 %v7260_v17, %v1708_v44  ;;  %v5844_v17 = vld [vmem:[%s9687_s7 + $0x18] sm:$0xff]  ;;  %v1734_v37 = vand.u32 2147483648, %v1560_v61 }
 0x58d   :  { %v1256_v19 = vmul.f32 %v7262_v29, %v1162_v21  ;;  %1948 = vmatpush.bf16.msrb.mxu3 %v5844_v17  ;;  %vm1728_vm12 = vweird.f32 %v1560_v61  ;;  %v1732_v47 = vand.u32 2147483647, %v1560_v61 }
 0x58e   :  { %v1138_v63 = vmul.f32 %v6019_v51, %v1137_v5  ;;  %v1813_v6 = vpack.c.bf16 %v1802_v28, %v1801_v11  ;;  %v1735_v13 = vor.u32 1.1754944e-38, %v1734_v37 }
 0x58f   :  { %vm1733_vm0 = vcmp.eq.f32.partialorder %v1732_v47, 8.507059e+37 }
 0x590   :  { %v1139_v8 = vadd.f32 %v6019_v51, %v1138_v63 }
 0x591   :  { %v6021_v52 = vpop.eup %6020  ;;  %1949 = vmatpush.bf16.msrb.mxu3 %v5843_v50 }
 0x592   :  { %v1143_v55 = vsel %vm1142_vm9, %v6019_v51, %v1139_v8  ;;  %v1724_v12 = vmul.f32 %v6021_v52, %v1560_v61  ;;  %vm1729_vm11 = vweird.f32 %v6021_v52 }
 0x593   :  { %v1148_v20 = vsel %vm1145_vm10, %v1147_v54, %v1143_v55  ;;  %vm1730_vm13 = vmor %vm1728_vm12, %vm1729_vm11 }
 0x594   :  { %v1255_v26 = vmul.f32 %v7267_v33, %v1148_v20  ;;  %v1725_v9 = vsub.f32 1.0, %v1724_v12 }
 0x596   :  { %v1267_v48 = vpack.c.bf16 %v1256_v19, %v1255_v26  ;;  %v1726_v10 = vmul.f32 %v6021_v52, %v1725_v9 }
 0x598   :  { %1299 = vmatmul.bf16.gmra.mxu1 %v1267_v48  ;;  %1877 = vmatmul.bf16.gmra.mxu0 %v1813_v6  ;;  %v1727_v58 = vadd.f32 %v6021_v52, %v1726_v10 }
 0x59a   :  { %v1731_v25 = vsel %vm1730_vm13, %v6021_v52, %v1727_v58 }
 0x59b   :  { %v1736_v4 = vsel %vm1733_vm0, %v1735_v13, %v1731_v25 }
 0x59c   :  { %v1804_v5 = vmul.f32 %v7272_v53, %v1736_v4 }
 0x5a2   :  { %v1558_v57 = vpop.xlane.xlu2 %1557 }
 0x5a3   :  { %6022 = vrcp.f32 %v1558_v57  ;;  %v1720_v45 = vand.u32 2147483648, %v1558_v57  ;;  %v1718_v40 = vand.u32 2147483647, %v1558_v57  ;;  %vm1714_vm15 = vweird.f32 %v1558_v57 }
 0x5a5   :  { %v1721_v27 = vor.u32 1.1754944e-38, %v1720_v45  ;;  %vm1719_vm3 = vcmp.eq.f32.partialorder %v1718_v40, 8.507059e+37 }
 0x5a9   :  { %v6023_v29 = vpop.eup %6022 }
 0x5aa   :  { %v1710_v33 = vmul.f32 %v6023_v29, %v1558_v57  ;;  %vm1715_vm14 = vweird.f32 %v6023_v29 }
 0x5ab   :  { %vm1716_vm2 = vmor %vm1714_vm15, %vm1715_vm14 }
 0x5ac   :  { %v1711_v42 = vsub.f32 1.0, %v1710_v33 }
 0x5ae   :  { %v1712_v51 = vmul.f32 %v6023_v29, %v1711_v42 }
 0x5b0   :  { %v1713_v41 = vadd.f32 %v6023_v29, %v1712_v51 }
 0x5b2   :  { %v1717_v38 = vsel %vm1716_vm2, %v6023_v29, %v1713_v41 }
 0x5b3   :  { %v1722_v43 = vsel %vm1719_vm3, %v1721_v27, %v1717_v38 }
 0x5b4   :  { %v1803_v46 = vmul.f32 %v7317_v35, %v1722_v43 }
 0x5b6   :  { %v1814_v18 = vpack.c.bf16 %v1804_v5, %v1803_v46 }
 0x5b8   :  { %v1858_v62 = vpop.f32.mrf.mxu0  ;;  %1882 = vmatmul.bf16.gmra.mxu0 %v1814_v18 }
 0x5ba   :  { %v1014_v24 = vpop.xlane.xlu2 %1013 }
 0x5bb   :  { %v1012_v32 = vpop.xlane.xlu1 %1011  ;;  %6024 = vrcp.f32 %v1014_v24  ;;  %v1188_v44 = vand.u32 2147483648, %v1014_v24  ;;  %v1186_v21 = vand.u32 2147483647, %v1014_v24  ;;  %vm1182_vm6 = vweird.f32 %v1014_v24 }
 0x5bc   :  { %6026 = vrcp.f32 %v1012_v32  ;;  %v1174_v8 = vand.u32 2147483648, %v1012_v32  ;;  %v1172_v61 = vand.u32 2147483647, %v1012_v32  ;;  %vm1168_vm7 = vweird.f32 %v1012_v32 }
 0x5bd   :  { %v1189_v26 = vor.u32 1.1754944e-38, %v1188_v44  ;;  %vm1187_vm10 = vcmp.eq.f32.partialorder %v1186_v21, 8.507059e+37 }
 0x5be   :  { %v1175_v11 = vor.u32 1.1754944e-38, %v1174_v8  ;;  %vm1173_vm11 = vcmp.eq.f32.partialorder %v1172_v61, 8.507059e+37 }
 0x5c0   :  { %v1860_v14 = vpop.f32.mrf.mxu0 }
 0x5c1   :  { %v6025_v34 = vpop.eup %6024  ;;  %v1898_v49 = vpack.c.bf16 %v1860_v14, %v1858_v62 }
 0x5c2   :  { %v6027_v63 = vpop.eup %6026  ;;  %v1178_v39 = vmul.f32 %v6025_v34, %v1014_v24  ;;  %vm1183_vm4 = vweird.f32 %v6025_v34 }
 0x5c3   :  { %v1164_v16 = vmul.f32 %v6027_v63, %v1012_v32  ;;  %5623 = vmatmul.msk.bf16.vlgmr.msrb.gmra.mxu3 %vm246_vm1, %v1898_v49  ;;  %v1564_v2 = vpop.xlane.xlu1 %1563  ;;  %v1562_v60 = vpop.xlane.xlu0 %1561  ;;  %vm1169_vm5 = vweird.f32 %v6027_v63  ;;  %vm1184_vm8 = vmor %vm1182_vm6, %vm1183_vm4 }
 0x5c4   :  { %v1179_v35 = vsub.f32 1.0, %v1178_v39  ;;  %6028 = vrcp.f32 %v1564_v2  ;;  %vm1170_vm9 = vmor %vm1168_vm7, %vm1169_vm5  ;;  %v1762_v33 = vand.u32 2147483648, %v1564_v2  ;;  %v1748_v37 = vand.u32 2147483648, %v1562_v60 }
 0x5c5   :  { %v1165_v53 = vsub.f32 1.0, %v1164_v16  ;;  %6030 = vrcp.f32 %v1562_v60  ;;  %v1760_v45 = vand.u32 2147483647, %v1564_v2  ;;  %v1746_v25 = vand.u32 2147483647, %v1562_v60 }
 0x5c6   :  { %v1180_v54 = vmul.f32 %v6025_v34, %v1179_v35  ;;  %vm1756_vm14 = vweird.f32 %v1564_v2  ;;  %vm1742_vm15 = vweird.f32 %v1562_v60  ;;  %v1763_v27 = vor.u32 1.1754944e-38, %v1762_v33 }
 0x5c7   :  { %v1166_v1 = vmul.f32 %v6027_v63, %v1165_v53  ;;  %vm1761_vm3 = vcmp.eq.f32.partialorder %v1760_v45, 8.507059e+37  ;;  %vm1747_vm4 = vcmp.eq.f32.partialorder %v1746_v25, 8.507059e+37 }
 0x5c8   :  { %v1863_v55 = vpop.f32.mrf.mxu0  ;;  %v1181_v28 = vadd.f32 %v6025_v34, %v1180_v54 }
 0x5c9   :  { %v1167_v20 = vadd.f32 %v6027_v63, %v1166_v1 }
 0x5ca   :  { %v6029_v19 = vpop.eup %6028  ;;  %v1185_v48 = vsel %vm1184_vm8, %v6025_v34, %v1181_v28  ;;  %v5842_v34 = vld [vmem:[%s9687_s7 + $0x8] sm:$0xff] }
 0x5cb   :  { %v6031_v6 = vpop.eup %6030  ;;  %v1752_v52 = vmul.f32 %v6029_v19, %v1564_v2  ;;  %v1171_v12 = vsel %vm1170_vm9, %v6027_v63, %v1167_v20  ;;  %v1190_v9 = vsel %vm1187_vm10, %v1189_v26, %v1185_v48  ;;  %vm1757_vm12 = vweird.f32 %v6029_v19  ;;  %v1016_v18 = vpop.xlane.xlu2 %1015  ;;  %2033 = vmatpush.bf16.msra.mxu1 %v5842_v34  ;;  %v5841_v48 = vld [vmem:[%s9687_s7] sm:$0xff] }
 0x5cc   :  { %v1738_v57 = vmul.f32 %v6031_v6, %v1562_v60  ;;  %v1176_v17 = vsel %vm1173_vm11, %v1175_v11, %v1171_v12  ;;  %v1258_v10 = vmul.f32 %v7420_v23, %v1190_v9  ;;  %vm1743_vm13 = vweird.f32 %v6031_v6  ;;  %vm1758_vm0 = vmor %vm1756_vm14, %vm1757_vm12 }
 0x5cd   :  { %v1753_v50 = vsub.f32 1.0, %v1752_v52  ;;  %v1257_v29 = vmul.f32 %v7424_v0, %v1176_v17  ;;  %vm1744_vm2 = vmor %vm1742_vm15, %vm1743_vm13  ;;  %v1749_v0 = vor.u32 1.1754944e-38, %v1748_v37  ;;  %6032 = vrcp.f32 %v1016_v18 }
 0x5ce   :  { %v1739_v58 = vsub.f32 1.0, %v1738_v57  ;;  %vm1196_vm6 = vweird.f32 %v1016_v18  ;;  %v1200_v60 = vand.u32 2147483647, %v1016_v18 }
 0x5cf   :  { %v1754_v42 = vmul.f32 %v6029_v19, %v1753_v50  ;;  %v1268_v47 = vpack.c.bf16 %v1258_v10, %v1257_v29  ;;  %2034 = vmatpush.bf16.msra.mxu1 %v5841_v48 }
 0x5d0   :  { %v1740_v51 = vmul.f32 %v6031_v6, %v1739_v58  ;;  %v1865_v40 = vpop.f32.mrf.mxu0  ;;  %vm1201_vm8 = vcmp.eq.f32.partialorder %v1200_v60, 8.507059e+37 }
 0x5d1   :  { %v1899_v13 = vpack.c.bf16 %v1865_v40, %v1863_v55  ;;  %1304 = vmatmul.bf16.gmra.mxu1 %v1268_v47  ;;  %v1755_v41 = vadd.f32 %v6029_v19, %v1754_v42 }
 0x5d2   :  { %v1741_v23 = vadd.f32 %v6031_v6, %v1740_v51 }
 0x5d3   :  { %5624 = vmatmul.msk.bf16.gmra.mxu3 %vm246_vm1, %v1899_v13  ;;  %v1759_v4 = vsel %vm1758_vm0, %v6029_v19, %v1755_v41  ;;  %v6033_v32 = vpop.eup %6032 }
 0x5d4   :  { %v1745_v38 = vsel %vm1744_vm2, %v6031_v6, %v1741_v23  ;;  %v1764_v43 = vsel %vm1761_vm3, %v1763_v27, %v1759_v4  ;;  %v1192_v14 = vmul.f32 %v6033_v32, %v1016_v18  ;;  %vm1197_vm5 = vweird.f32 %v6033_v32 }
 0x5d5   :  { %v1750_v46 = vsel %vm1747_vm4, %v1749_v0, %v1745_v38  ;;  %v1806_v5 = vmul.f32 %v7429_v3, %v1764_v43  ;;  %vm1198_vm7 = vmor %vm1196_vm6, %vm1197_vm5 }
 0x5d6   :  { %v1805_v62 = vmul.f32 %v7431_v22, %v1750_v46  ;;  %v1193_v49 = vsub.f32 1.0, %v1192_v14  ;;  %v1202_v22 = vand.u32 2147483648, %v1016_v18  ;;  %v1280_v14 = vpop.f32.mrf.mxu1 }
 0x5d8   :  { %v1815_v24 = vpack.c.bf16 %v1806_v5, %v1805_v62  ;;  %v1194_v16 = vmul.f32 %v6033_v32, %v1193_v49  ;;  %v1203_v61 = vor.u32 1.1754944e-38, %v1202_v22 }
 0x5da   :  { %1887 = vmatmul.bf16.gmra.mxu0 %v1815_v24  ;;  %v1195_v3 = vadd.f32 %v6033_v32, %v1194_v16 }
 0x5dc   :  { %v1199_v21 = vsel %vm1198_vm7, %v6033_v32, %v1195_v3 }
 0x5dd   :  { %v1204_v19 = vsel %vm1201_vm8, %v1203_v61, %v1199_v21 }
 0x5de   :  { %v1259_v57 = vmul.f32 %v7438_v15, %v1204_v19 }
 0x5e9   :  { %v1018_v63 = vpop.xlane.xlu0 %1017 }
 0x5ea   :  { %6034 = vrcp.f32 %v1018_v63  ;;  %v7638_v39 = vpop.xlane.xlu2 %1567  ;;  %v1214_v28 = vand.u32 2147483647, %v1018_v63  ;;  %v1216_v20 = vand.u32 2147483648, %v1018_v63  ;;  %vm1210_vm10 = vweird.f32 %v1018_v63 }
 0x5eb   :  { %6036 = vrcp.f32 %v7638_v39  ;;  %v1790_v58 = vand.u32 2147483648, %v7638_v39  ;;  %vm1784_vm14 = vweird.f32 %v7638_v39  ;;  %v1788_v45 = vand.u32 2147483647, %v7638_v39 }
 0x5ec   :  { %vm1215_vm12 = vcmp.eq.f32.partialorder %v1214_v28, 8.507059e+37  ;;  %v1217_v9 = vor.u32 1.1754944e-38, %v1216_v20  ;;  %v1282_v28 = vpop.f32.mrf.mxu1 }
 0x5ed   :  { %v1791_v38 = vor.u32 1.1754944e-38, %v1790_v58  ;;  %vm1789_vm3 = vcmp.eq.f32.partialorder %v1788_v45, 8.507059e+37 }
 0x5f0   :  { %v6035_v2 = vpop.eup %6034 }
 0x5f1   :  { %v7641_v35 = vpop.eup %6036  ;;  %v1206_v53 = vmul.f32 %v6035_v2, %v1018_v63  ;;  %v1566_v44 = vpop.xlane.xlu1 %1565  ;;  %vm1211_vm9 = vweird.f32 %v6035_v2 }
 0x5f2   :  { %v1780_v8 = vmul.f32 %v7641_v35, %v7638_v39  ;;  %6038 = vrcp.f32 %v1566_v44  ;;  %v7645_v54 = vpop.xlane.xlu0 %1019  ;;  %vm1212_vm11 = vmor %vm1210_vm10, %vm1211_vm9  ;;  %vm1785_vm13 = vweird.f32 %v7641_v35  ;;  %v1776_v51 = vand.u32 2147483648, %v1566_v44 }
 0x5f3   :  { %v1207_v1 = vsub.f32 1.0, %v1206_v53  ;;  %6040 = vrcp.f32 %v7645_v54  ;;  %v1774_v25 = vand.u32 2147483647, %v1566_v44  ;;  %vm7666_vm15 = vmor %vm1784_vm14, %vm1785_vm13  ;;  %vm1770_vm2 = vweird.f32 %v1566_v44 }
 0x5f4   :  { %v1781_v55 = vsub.f32 1.0, %v1780_v8  ;;  %v1777_v5 = vor.u32 1.1754944e-38, %v1776_v51  ;;  %vm1224_vm7 = vweird.f32 %v7645_v54  ;;  %v1230_v49 = vand.u32 2147483648, %v7645_v54  ;;  %v1285_v48 = vpop.f32.mrf.mxu1 }
 0x5f5   :  { %v1868_v26 = vpop.f32.mrf.mxu0  ;;  %v1208_v11 = vmul.f32 %v6035_v2, %v1207_v1  ;;  %vm1775_vm5 = vcmp.eq.f32.partialorder %v1774_v25, 8.507059e+37  ;;  %v1228_v3 = vand.u32 2147483647, %v7645_v54 }
 0x5f6   :  { %v1782_v6 = vmul.f32 %v7641_v35, %v1781_v55  ;;  %v1231_v8 = vor.u32 1.1754944e-38, %v1230_v49 }
 0x5f7   :  { %v1209_v52 = vadd.f32 %v6035_v2, %v1208_v11  ;;  %vm1229_vm10 = vcmp.eq.f32.partialorder %v1228_v3, 8.507059e+37 }
 0x5f8   :  { %v6039_v12 = vpop.eup %6038  ;;  %v1783_v33 = vadd.f32 %v7641_v35, %v1782_v6  ;;  %v1320_v6 = vpack.c.bf16 %v1282_v28, %v1280_v14  ;;  %v7705_v14 = vld [vmem:[%s9688_s8] ss:$0 sm:$0xff] }
 0x5f9   :  { %v7653_v17 = vpop.eup %6040  ;;  %v1766_v10 = vmul.f32 %v6039_v12, %v1566_v44  ;;  %v7655_v50 = vpop.xlane.xlu1 %1021  ;;  %v1213_v29 = vsel %vm1212_vm11, %v6035_v2, %v1209_v52  ;;  %vm1771_vm0 = vweird.f32 %v6039_v12 }
 0x5fa   :  { %v1220_v37 = vmul.f32 %v7653_v17, %v7645_v54  ;;  %6042 = vrcp.f32 %v7655_v50  ;;  %v1218_v42 = vsel %vm1215_vm12, %v1217_v9, %v1213_v29  ;;  %v1787_v0 = vsel %vm7666_vm15, %v7641_v35, %v1783_v33  ;;  %vm1772_vm4 = vmor %vm1770_vm2, %vm1771_vm0 }
 0x5fb   :  { %v1767_v15 = vsub.f32 1.0, %v1766_v10  ;;  %v1260_v47 = vmul.f32 %v7534_v7, %v1218_v42  ;;  %v1792_v18 = vsel %vm1789_vm3, %v1791_v38, %v1787_v0  ;;  %vm1225_vm6 = vweird.f32 %v7653_v17 }
 0x5fc   :  { %v1221_v40 = vsub.f32 1.0, %v1220_v37  ;;  %v1808_v16 = vmul.f32 %v7537_v36, %v1792_v18  ;;  %vm1226_vm8 = vmor %vm1224_vm7, %vm1225_vm6  ;;  %v1242_v22 = vand.u32 2147483647, %v7655_v50  ;;  %v1244_v2 = vand.u32 2147483648, %v7655_v50  ;;  %v1287_v9 = vpop.f32.mrf.mxu1 }
 0x5fd   :  { %v1768_v41 = vmul.f32 %v6039_v12, %v1767_v15  ;;  %v1870_v23 = vpop.f32.mrf.mxu0  ;;  %v1269_v27 = vpack.c.bf16 %v1260_v47, %v1259_v57  ;;  %vm1238_vm11 = vweird.f32 %v7655_v50  ;;  %v1321_v57 = vpack.c.bf16 %v1287_v9, %v1285_v48  ;;  %v9781_v48 = vld [vmem:[#allocation14_spill] sm:$0xff] }
 0x5fe   :  { %v1900_v4 = vpack.c.bf16 %v1870_v23, %v1868_v26  ;;  %v1222_v7 = vmul.f32 %v7653_v17, %v1221_v40  ;;  %vm1243_vm13 = vcmp.eq.f32.partialorder %v1242_v22, 8.507059e+37  ;;  %v9778_v22 = vld [vmem:[#allocation9_spill] sm:$0xff] }
 0x5ff   :  { %1309 = vmatmul.bf16.gmra.mxu1 %v1269_v27  ;;  %v1769_v43 = vadd.f32 %v6039_v12, %v1768_v41 }
 0x600   :  { %v6043_v46 = vpop.eup %6042  ;;  %5625 = vmatmul.msk.bf16.gmra.mxu3 %vm246_vm1, %v1900_v4  ;;  %v1223_v32 = vadd.f32 %v7653_v17, %v1222_v7 }
 0x601   :  { %v1234_v62 = vmul.f32 %v6043_v46, %v7655_v50  ;;  %v1773_v24 = vsel %vm1772_vm4, %v6039_v12, %v1769_v43  ;;  %vm1239_vm9 = vweird.f32 %v6043_v46 }
 0x602   :  { %v1778_v34 = vsel %vm1775_vm5, %v1777_v5, %v1773_v24  ;;  %v1227_v53 = vsel %vm1226_vm8, %v7653_v17, %v1223_v32  ;;  %vm1240_vm12 = vmor %vm1238_vm11, %vm1239_vm9 }
 0x603   :  { %v1235_v63 = vsub.f32 1.0, %v1234_v62  ;;  %v1807_v39 = vmul.f32 %v7570_v56, %v1778_v34  ;;  %v1232_v36 = vsel %vm1229_vm10, %v1231_v8, %v1227_v53  ;;  %v1245_v56 = vor.u32 1.1754944e-38, %v1244_v2  ;;  %v9779_v8 = vld [vmem:[#allocation17_spill] sm:$0xff] }
 0x604   :  { %v1261_v61 = vmul.f32 %v7574_v59, %v1232_v36  ;;  %v1290_v59 = vpop.f32.mrf.mxu1 }
 0x605   :  { %v1873_v60 = vpop.f32.mrf.mxu0  ;;  %v1816_v35 = vpack.c.bf16 %v1808_v16, %v1807_v39  ;;  %v1236_v44 = vmul.f32 %v6043_v46, %v1235_v63 }
 0x607   :  { %1892 = vmatmul.bf16.gmra.mxu0 %v1816_v35  ;;  %v1237_v21 = vadd.f32 %v6043_v46, %v1236_v44 }
 0x609   :  { %v1241_v54 = vsel %vm1240_vm12, %v6043_v46, %v1237_v21 }
 0x60a   :  { %v1246_v1 = vsel %vm1243_vm13, %v1245_v56, %v1241_v54 }
 0x60b   :  { %v1262_v55 = vmul.f32 %v7583_v31, %v1246_v1 }
 0x60c   :  { %v1292_v31 = vpop.f32.mrf.mxu1 }
 0x60d   :  { %v1875_v20 = vpop.f32.mrf.mxu0  ;;  %v1270_v26 = vpack.c.bf16 %v1262_v55, %v1261_v61  ;;  %v1322_v50 = vpack.c.bf16 %v1292_v31, %v1290_v59  ;;  %v9780_v55 = vld [vmem:[#allocation13_spill] sm:$0xff]  ;;  %v9782_v31 = vld [vmem:[#allocation18_spill] sm:$0xff] }
 0x60e   :  { %v1901_v19 = vpack.c.bf16 %v1875_v20, %v1873_v60 }
 0x60f   :  { %1314 = vmatmul.bf16.gmra.mxu1 %v1270_v26 }
 0x610   :  { %5626 = vmatmul.msk.bf16.gmra.mxu3 %vm246_vm1, %v1901_v19 }
 0x614   :  { %v1295_v10 = vpop.f32.mrf.mxu1 }
 0x615   :  { %v1878_v11 = vpop.f32.mrf.mxu0 }
 0x61c   :  { %v1297_v58 = vpop.f32.mrf.mxu1 }
 0x61d   :  { %v1880_v52 = vpop.f32.mrf.mxu0  ;;  %v1323_v37 = vpack.c.bf16 %v1297_v58, %v1295_v10 }
 0x61e   :  { %v1902_v12 = vpack.c.bf16 %v1880_v52, %v1878_v11 }
 0x61f   :  { %5639 = vmatmul.msk.bf16.vlgmr.msra.gmra.mxu1 %vm246_vm1, %v1320_v6 }
 0x620   :  { %5627 = vmatmul.msk.bf16.gmra.mxu3 %vm246_vm1, %v1902_v12 }
 0x624   :  { %v1300_v42 = vpop.f32.mrf.mxu1 }
 0x62c   :  { %v1302_v47 = vpop.f32.mrf.mxu1 }
 0x62d   :  { %v1324_v45 = vpack.c.bf16 %v1302_v47, %v1300_v42 }
 0x62f   :  { %5640 = vmatmul.msk.bf16.gmra.mxu1 %vm246_vm1, %v1321_v57 }
 0x635   :  { %v1883_v17 = vpop.f32.mrf.mxu0 }
 0x63d   :  { %v1885_v29 = vpop.f32.mrf.mxu0 }
 0x63e   :  { %v1903_v33 = vpack.c.bf16 %v1885_v29, %v1883_v17 }
 0x63f   :  { %5641 = vmatmul.msk.bf16.gmra.mxu1 %vm246_vm1, %v1322_v50 }
 0x640   :  { %5628 = vmatmul.msk.bf16.gmra.mxu3 %vm246_vm1, %v1903_v33 }
 0x646   :  { %v1951_v46 = vpop.f32.mrf.mxu3 }
 0x64e   :  { %v1305_v40 = vpop.f32.mrf.mxu1  ;;  %v1953_v62 = vpop.f32.mrf.mxu3 }
 0x64f   :  { %5642 = vmatmul.msk.bf16.gmra.mxu1 %vm246_vm1, %v1323_v37  ;;  %v9783_v37 = vld [vmem:[#allocation20_spill] sm:$0xff] }
 0x656   :  { %v1307_v13 = vpop.f32.mrf.mxu1  ;;  %v1956_v39 = vpop.f32.mrf.mxu3 }
 0x657   :  { %v1888_v15 = vpop.f32.mrf.mxu0  ;;  %v1325_v41 = vpack.c.bf16 %v1307_v13, %v1305_v40 }
 0x65e   :  { %v1958_v44 = vpop.f32.mrf.mxu3 }
 0x65f   :  { %v1890_v51 = vpop.f32.mrf.mxu0  ;;  %5643 = vmatmul.msk.bf16.gmra.mxu1 %vm246_vm1, %v1324_v45 }
 0x660   :  { %v1904_v25 = vpack.c.bf16 %v1890_v51, %v1888_v15 }
 0x662   :  { %5629 = vmatmul.msk.bf16.gmra.mxu3 %vm246_vm1, %v1904_v25  ;;  %v9784_v25 = vld [vmem:[#allocation19_spill] sm:$0xff] }
 0x66f   :  { %5644 = vmatmul.msk.bf16.gmra.mxu1 %vm246_vm1, %v1325_v41 }
 0x67c   :  { %v1310_v23 = vpop.f32.mrf.mxu1 }
 0x683   :  { %v1961_v61 = vpop.f32.mrf.mxu3 }
 0x684   :  { %v1312_v27 = vpop.f32.mrf.mxu1  ;;  %v1893_v0 = vpop.f32.mrf.mxu0 }
 0x685   :  { %v1326_v4 = vpack.c.bf16 %v1312_v27, %v1310_v23 }
 0x687   :  { %5645 = vmatmul.msk.bf16.gmra.mxu1 %vm246_vm1, %v1326_v4  ;;  %v9785_v4 = vld [vmem:[#allocation15_spill] sm:$0xff] }
 0x68b   :  { %v1963_v52 = vpop.f32.mrf.mxu3 }
 0x68c   :  { %v1315_v38 = vpop.f32.mrf.mxu1  ;;  %v1895_v7 = vpop.f32.mrf.mxu0 }
 0x68d   :  { %v1905_v43 = vpack.c.bf16 %v1895_v7, %v1893_v0 }
 0x68f   :  { %5630 = vmatmul.msk.bf16.gmra.mxu3 %vm246_vm1, %v1905_v43 }
 0x693   :  { %v1966_v50 = vpop.f32.mrf.mxu3 }
 0x694   :  { %v1317_v5 = vpop.f32.mrf.mxu1 }
 0x695   :  { %v1327_v18 = vpack.c.bf16 %v1317_v5, %v1315_v38 }
 0x697   :  { %5646 = vmatmul.msk.bf16.gmra.mxu1 %vm246_vm1, %v1327_v18 }
 0x69b   :  { %v1968_v45 = vpop.f32.mrf.mxu3 }
 0x69c   :  { %v2036_v24 = vpop.f32.mrf.mxu1 }
 0x69d   :  { %v2037_v32 = vadd.f32 %v2036_v24, %v1951_v46 }
 0x69f   :  { %v2076_v34 = vadd.f32 %v2037_v32, %v6525_v30 }
 0x6a1   :  { %v7709_v49 = vadd.f32 %v7705_v14, %v2076_v34 }
 0x6a3   :  { %v2110_v63 = vsel %vm246_vm1, %v7709_v49, 0.0  ;;  %v1971_v43 = vpop.f32.mrf.mxu3 }
 0x6a4   :  { %v2038_v16 = vpop.f32.mrf.mxu1  ;;  %2111 = vadd.xlane.f32.xlu2 %v2110_v63 }
 0x6a5   :  { %v2039_v3 = vadd.f32 %v2038_v16, %v1953_v62  ;;  %v9786_v16 = vld [vmem:[#allocation5_spill] sm:$0xff] }
 0x6a7   :  { %v2077_v2 = vadd.f32 %v2039_v3, %v9778_v22 }
 0x6a9   :  { %v7715_v60 = vadd.f32 %v7705_v14, %v2077_v2 }
 0x6ab   :  { %v2113_v35 = vsel %vm246_vm1, %v7715_v60, 0.0 }
 0x6ac   :  { %v2041_v53 = vpop.f32.mrf.mxu1  ;;  %2114 = vadd.xlane.f32.xlu0 %v2113_v35 }
 0x6ad   :  { %v2042_v30 = vadd.f32 %v2041_v53, %v1956_v39  ;;  %v1973_v39 = vpop.f32.mrf.mxu3 }
 0x6af   :  { %v2078_v21 = vadd.f32 %v2042_v30, %v9779_v8 }
 0x6b1   :  { %v7721_v36 = vadd.f32 %v7705_v14, %v2078_v21 }
 0x6b3   :  { %v2116_v56 = vsel %vm246_vm1, %v7721_v36, 0.0 }
 0x6b4   :  { %v2043_v54 = vpop.f32.mrf.mxu1  ;;  %2117 = vadd.xlane.f32.xlu1 %v2116_v56 }
 0x6b5   :  { %v2044_v1 = vadd.f32 %v2043_v54, %v1958_v44  ;;  %v9787_v54 = vld [vmem:[#allocation6_spill] sm:$0xff] }
 0x6b7   :  { %v2079_v28 = vadd.f32 %v2044_v1, %v9780_v55 }
 0x6b9   :  { %v7727_v20 = vadd.f32 %v7705_v14, %v2079_v28 }
 0x6bb   :  { %v2119_v26 = vsel %vm246_vm1, %v7727_v20, 0.0 }
 0x6bc   :  { %v2046_v19 = vpop.f32.mrf.mxu1  ;;  %2120 = vadd.xlane.f32.xlu2 %v2119_v26 }
 0x6bd   :  { %v2047_v11 = vadd.f32 %v2046_v19, %v1961_v61 }
 0x6bf   :  { %v2080_v6 = vadd.f32 %v2047_v11, %v9781_v48 }
 0x6c1   :  { %v7733_v12 = vadd.f32 %v7705_v14, %v2080_v6 }
 0x6c3   :  { %v2122_v9 = vsel %vm246_vm1, %v7733_v12, 0.0  ;;  %v1976_v56 = vpop.f32.mrf.mxu3 }
 0x6c4   :  { %v2048_v59 = vpop.f32.mrf.mxu1  ;;  %2123 = vadd.xlane.f32.xlu0 %v2122_v9  ;;  %v9788_v9 = vld [vmem:[#allocation7_spill] sm:$0xff] }
 0x6c5   :  { %v2049_v57 = vadd.f32 %v2048_v59, %v1963_v52 }
 0x6c7   :  { %v2081_v17 = vadd.f32 %v2049_v57, %v9782_v31 }
 0x6c9   :  { %v7739_v10 = vadd.f32 %v7705_v14, %v2081_v17 }
 0x6cb   :  { %v2125_v29 = vsel %vm246_vm1, %v7739_v10, 0.0  ;;  %v1978_v17 = vpop.f32.mrf.mxu3 }
 0x6cc   :  { %v2051_v33 = vpop.f32.mrf.mxu1  ;;  %2126 = vadd.xlane.f32.xlu1 %v2125_v29 }
 0x6cd   :  { %v2052_v58 = vadd.f32 %v2051_v33, %v1966_v50 }
 0x6cf   :  { %v2082_v42 = vadd.f32 %v2052_v58, %v9783_v37 }
 0x6d1   :  { %v7745_v15 = vadd.f32 %v7705_v14, %v2082_v42 }
 0x6d3   :  { %v2128_v47 = vsel %vm246_vm1, %v7745_v15, 0.0 }
 0x6d4   :  { %v2053_v51 = vpop.f32.mrf.mxu1  ;;  %2129 = vadd.xlane.f32.xlu2 %v2128_v47 }
 0x6d5   :  { %v2054_v40 = vadd.f32 %v2053_v51, %v1968_v45  ;;  %v9789_v45 = vld [vmem:[#allocation8_spill] sm:$0xff] }
 0x6d7   :  { %v2083_v13 = vadd.f32 %v2054_v40, %v9784_v25 }
 0x6d9   :  { %v7751_v41 = vadd.f32 %v7705_v14, %v2083_v13 }
 0x6db   :  { %v2131_v23 = vsel %vm246_vm1, %v7751_v41, 0.0 }
 0x6dc   :  { %2132 = vadd.xlane.f32.xlu0 %v2131_v23  ;;  %v2056_v27 = vpop.f32.mrf.mxu1 }
 0x6dd   :  { %v2057_v32 = vadd.f32 %v2056_v27, %v1971_v43 }
 0x6df   :  { %v2084_v3 = vadd.f32 %v2057_v32, %v9786_v16 }
 0x6e1   :  { %v7772_v30 = vadd.f32 %v7705_v14, %v2084_v3 }
 0x6e3   :  { %v2134_v55 = vsel %vm246_vm1, %v7772_v30, 0.0 }
 0x6e4   :  { %v2058_v18 = vpop.f32.mrf.mxu1 }
 0x6e5   :  { %v2059_v44 = vadd.f32 %v2058_v18, %v1973_v39  ;;  %v1981_v13 = vpop.f32.mrf.mxu3  ;;  %v9790_v18 = vld [vmem:[#allocation10_spill] sm:$0xff] }
 0x6e7   :  { %v2085_v1 = vadd.f32 %v2059_v44, %v9787_v54 }
 0x6e9   :  { %v7788_v48 = vadd.f32 %v7705_v14, %v2085_v1 }
 0x6eb   :  { %v2137_v57 = vsel %vm246_vm1, %v7788_v48, 0.0 }
 0x6ec   :  { %v2061_v53 = vpop.f32.mrf.mxu1 }
 0x6ed   :  { %v2062_v19 = vadd.f32 %v2061_v53, %v1976_v56  ;;  %v1983_v16 = vpop.f32.mrf.mxu3  ;;  %v9791_v53 = vld [vmem:[#allocation11_spill] sm:$0xff] }
 0x6ef   :  { %v2086_v59 = vadd.f32 %v2062_v19, %v9788_v9 }
 0x6f1   :  { %v7798_v33 = vadd.f32 %v7705_v14, %v2086_v59 }
 0x6f3   :  { %v2140_v40 = vsel %vm246_vm1, %v7798_v33, 0.0 }
 0x6f4   :  { %v2063_v6 = vpop.f32.mrf.mxu1 }
 0x6f5   :  { %v2064_v58 = vadd.f32 %v2063_v6, %v1978_v17 }
 0x6f7   :  { %v2087_v51 = vadd.f32 %v2064_v58, %v9789_v45  ;;  %v5846_v58 = vld [vmem:[%s9689_s9 + $0x8] sm:$0xff] }
 0x6f8   :  { %2518 = vmatpush.bf16.msra.mxu0 %v5846_v58  ;;  %5866 = vmatpush.bf16.msrb.mxu2 %v5846_v58 }
 0x704   :  { %v2066_v42 = vpop.f32.mrf.mxu1 }
 0x717   :  { %v2112_v0 = vpop.xlane.xlu2 %2111 }
 0x718   :  { %v2158_v38 = vmul.f32 %v2112_v0, %v9785_v4  ;;  %v7811_v0 = vadd.f32 %v7705_v14, %v2087_v51 }
 0x71a   :  { %v7757_v7 = vsub.f32 %v7709_v49, %v2158_v38  ;;  %v2067_v38 = vadd.f32 %v2066_v42, %v1981_v13  ;;  %v2143_v32 = vsel %vm246_vm1, %v7811_v0, 0.0 }
 0x71c   :  { %v2190_v46 = vmul.f32 %v7757_v7, %v7757_v7 }
 0x71e   :  { %v2206_v5 = vsel %vm246_vm1, %v2190_v46, 0.0 }
 0x71f   :  { %v2115_v62 = vpop.xlane.xlu0 %2114  ;;  %2207 = vadd.xlane.f32.xlu1 %v2206_v5  ;;  %v2068_v5 = vpop.f32.mrf.mxu1 }
 0x720   :  { %v2159_v24 = vmul.f32 %v2115_v62, %v9785_v4  ;;  %v2088_v62 = vadd.f32 %v2067_v38, %v9790_v18 }
 0x722   :  { %v7764_v34 = vsub.f32 %v7715_v60, %v2159_v24  ;;  %v7824_v3 = vadd.f32 %v7705_v14, %v2088_v62 }
 0x724   :  { %v2191_v63 = vmul.f32 %v7764_v34, %v7764_v34 }
 0x726   :  { %v2209_v22 = vsel %vm246_vm1, %v2191_v63, 0.0 }
 0x727   :  { %v2118_v2 = vpop.xlane.xlu1 %2117  ;;  %2210 = vadd.xlane.f32.xlu2 %v2209_v22  ;;  %v2069_v22 = vadd.f32 %v2068_v5, %v1983_v16  ;;  %v2071_v54 = vpop.f32.mrf.mxu1 }
 0x728   :  { %v2160_v35 = vmul.f32 %v2118_v2, %v9785_v4 }
 0x729   :  { %v2089_v44 = vadd.f32 %v2069_v22, %v9791_v53 }
 0x72a   :  { %v7775_v8 = vsub.f32 %v7721_v36, %v2160_v35 }
 0x72c   :  { %v2192_v21 = vmul.f32 %v7775_v8, %v7775_v8 }
 0x72e   :  { %v2212_v61 = vsel %vm246_vm1, %v2192_v21, 0.0  ;;  %v2146_v21 = vsel %vm246_vm1, %v7824_v3, 0.0 }
 0x72f   :  { %2213 = vadd.xlane.f32.xlu0 %v2212_v61  ;;  %2135 = vadd.xlane.f32.xlu2 %v2134_v55  ;;  %v2121_v28 = vpop.xlane.xlu2 %2120  ;;  %v1986_v55 = vpop.f32.mrf.mxu3 }
 0x730   :  { %v2161_v26 = vmul.f32 %v2121_v28, %v9785_v4  ;;  %v7837_v28 = vadd.f32 %v7705_v14, %v2089_v44 }
 0x732   :  { %v7785_v11 = vsub.f32 %v7727_v20, %v2161_v26  ;;  %v2072_v26 = vadd.f32 %v2071_v54, %v1986_v55 }
 0x734   :  { %v2193_v52 = vmul.f32 %v7785_v11, %v7785_v11 }
 0x736   :  { %v2215_v31 = vsel %vm246_vm1, %v2193_v52, 0.0  ;;  %v9792_v52 = vld [vmem:[#allocation12_spill] sm:$0xff] }
 0x737   :  { %2138 = vadd.xlane.f32.xlu0 %v2137_v57  ;;  %v2124_v50 = vpop.xlane.xlu0 %2123  ;;  %2216 = vadd.xlane.f32.xlu1 %v2215_v31  ;;  %v2090_v9 = vadd.f32 %v2072_v26, %v9792_v52  ;;  %v2149_v57 = vsel %vm246_vm1, %v7837_v28, 0.0 }
 0x738   :  { %v2162_v29 = vmul.f32 %v2124_v50, %v9785_v4 }
 0x739   :  { %v7849_v31 = vadd.f32 %v7705_v14, %v2090_v9 }
 0x73a   :  { %v7801_v37 = vsub.f32 %v7733_v12, %v2162_v29 }
 0x73b   :  { %v2152_v17 = vsel %vm246_vm1, %v7849_v31, 0.0 }
 0x73c   :  { %v2194_v47 = vmul.f32 %v7801_v37, %v7801_v37 }
 0x73e   :  { %v2218_v25 = vsel %vm246_vm1, %v2194_v47, 0.0 }
 0x73f   :  { %v2127_v23 = vpop.xlane.xlu1 %2126  ;;  %2141 = vadd.xlane.f32.xlu0 %v2140_v40  ;;  %2219 = vadd.xlane.f32.xlu1 %v2218_v25 }
 0x740   :  { %v2163_v27 = vmul.f32 %v2127_v23, %v9785_v4  ;;  %v5845_v23 = vld [vmem:[%s9689_s9] sm:$0xff] }
 0x741   :  { %2519 = vmatpush.bf16.msra.mxu0 %v5845_v23  ;;  %5867 = vmatpush.bf16.msrb.mxu2 %v5845_v23 }
 0x742   :  { %v7814_v43 = vsub.f32 %v7739_v10, %v2163_v27  ;;  %v2073_v27 = vpop.f32.mrf.mxu1 }
 0x744   :  { %v2195_v46 = vmul.f32 %v7814_v43, %v7814_v43 }
 0x746   :  { %v2221_v24 = vsel %vm246_vm1, %v2195_v46, 0.0 }
 0x747   :  { %2222 = vadd.xlane.f32.xlu2 %v2221_v24  ;;  %2144 = vadd.xlane.f32.xlu1 %v2143_v32  ;;  %v2130_v63 = vpop.xlane.xlu2 %2129  ;;  %v1988_v24 = vpop.f32.mrf.mxu3 }
 0x748   :  { %v2164_v39 = vmul.f32 %v2130_v63, %v9785_v4  ;;  %v2074_v63 = vadd.f32 %v2073_v27, %v1988_v24 }
 0x74a   :  { %v7827_v2 = vsub.f32 %v7745_v15, %v2164_v39 }
 0x74c   :  { %v2196_v35 = vmul.f32 %v7827_v2, %v7827_v2 }
 0x74e   :  { %v2224_v56 = vsel %vm246_vm1, %v2196_v35, 0.0 }
 0x74f   :  { %v2133_v1 = vpop.xlane.xlu0 %2132  ;;  %2147 = vadd.xlane.f32.xlu1 %v2146_v21  ;;  %2225 = vadd.xlane.f32.xlu2 %v2224_v56  ;;  %v9793_v21 = vld [vmem:[#allocation16_spill] sm:$0xff] }
 0x750   :  { %v2165_v61 = vmul.f32 %v2133_v1, %v9785_v4  ;;  %v2091_v56 = vadd.f32 %v2074_v63, %v9793_v21 }
 0x752   :  { %v7840_v19 = vsub.f32 %v7751_v41, %v2165_v61 }
 0x754   :  { %v2197_v6 = vmul.f32 %v7840_v19, %v7840_v19 }
 0x756   :  { %v2227_v59 = vsel %vm246_vm1, %v2197_v6, 0.0 }
 0x757   :  { %2228 = vadd.xlane.f32.xlu0 %v2227_v59  ;;  %2150 = vadd.xlane.f32.xlu2 %v2149_v57 }
 0x75f   :  { %2153 = vadd.xlane.f32.xlu2 %v2152_v17 }
 0x792   :  { %v2208_v50 = vpop.xlane.xlu1 %2207 }
 0x793   :  { %v2254_v29 = vmul.f32 %v2208_v50, %v9785_v4  ;;  %v7879_v50 = vadd.f32 %v7705_v14, %v2091_v56 }
 0x795   :  { %v2270_v42 = vadd.f32 1e-05, %v2254_v29  ;;  %v2155_v14 = vsel %vm246_vm1, %v7879_v50, 0.0 }
 0x797   :  { %6044 = vrsqrt.f32 %v2270_v42  ;;  %vm2292_vm15 = vweird.f32 %v2270_v42 }
 0x79a   :  { %v2211_v47 = vpop.xlane.xlu2 %2210 }
 0x79b   :  { %v2255_v45 = vmul.f32 %v2211_v47, %v9785_v4 }
 0x79d   :  { %v6045_v51 = vpop.eup %6044  ;;  %v2271_v40 = vadd.f32 1e-05, %v2255_v45 }
 0x79e   :  { %v2287_v25 = vmul.f32 %v6045_v51, %v2270_v42  ;;  %vm2293_vm14 = vweird.f32 %v6045_v51 }
 0x79f   :  { %6046 = vrsqrt.f32 %v2271_v40  ;;  %vm2294_vm2 = vmor %vm2292_vm15, %vm2293_vm14  ;;  %vm2302_vm3 = vweird.f32 %v2271_v40 }
 0x7a0   :  { %v2288_v13 = vmul.f32 %v6045_v51, %v2287_v25 }
 0x7a2   :  { %v2289_v38 = vmul.f32 0.5, %v2288_v13  ;;  %v2214_v46 = vpop.xlane.xlu0 %2213  ;;  %v2136_v5 = vpop.xlane.xlu2 %2135 }
 0x7a3   :  { %v2256_v18 = vmul.f32 %v2214_v46, %v9785_v4  ;;  %v2166_v62 = vmul.f32 %v2136_v5, %v9785_v4 }
 0x7a4   :  { %v2290_v22 = vsub.f32 1.5, %v2289_v38 }
 0x7a5   :  { %v6047_v32 = vpop.eup %6046  ;;  %v7863_v39 = vadd.f32 1e-05, %v2256_v18  ;;  %v7866_v16 = vsub.f32 %v7772_v30, %v2166_v62 }
 0x7a6   :  { %v2297_v35 = vmul.f32 %v6047_v32, %v2271_v40  ;;  %v2291_v1 = vmul.f32 %v6045_v51, %v2290_v22  ;;  %vm2303_vm0 = vweird.f32 %v6047_v32 }
 0x7a7   :  { %6048 = vrsqrt.f32 %v7863_v39  ;;  %v2198_v53 = vmul.f32 %v7866_v16, %v7866_v16  ;;  %vm2304_vm4 = vmor %vm2302_vm3, %vm2303_vm0  ;;  %vm2312_vm6 = vweird.f32 %v7863_v39 }
 0x7a8   :  { %v2298_v44 = vmul.f32 %v6047_v32, %v2297_v35  ;;  %v2295_v29 = vsel %vm2294_vm2, %v6045_v51, %v2291_v1 }
 0x7a9   :  { %v2230_v54 = vsel %vm246_vm1, %v2198_v53, 0.0  ;;  %v2446_v13 = vmul.f32 %v2295_v29, %v7757_v7 }
 0x7aa   :  { %v2299_v61 = vmul.f32 0.5, %v2298_v44  ;;  %v2139_v55 = vpop.xlane.xlu0 %2138  ;;  %v2217_v26 = vpop.xlane.xlu1 %2216  ;;  %2231 = vadd.xlane.f32.xlu0 %v2230_v54 }
 0x7ab   :  { %v2167_v6 = vmul.f32 %v2139_v55, %v9785_v4  ;;  %v2257_v52 = vmul.f32 %v2217_v26, %v9785_v4 }
 0x7ac   :  { %v2300_v9 = vsub.f32 1.5, %v2299_v61 }
 0x7ad   :  { %v6049_v59 = vpop.eup %6048  ;;  %v7876_v57 = vsub.f32 %v7788_v48, %v2167_v6  ;;  %v2273_v17 = vadd.f32 1e-05, %v2257_v52 }
 0x7ae   :  { %v2301_v58 = vmul.f32 %v6047_v32, %v2300_v9  ;;  %v2307_v47 = vmul.f32 %v6049_v59, %v7863_v39  ;;  %vm2313_vm5 = vweird.f32 %v6049_v59 }
 0x7af   :  { %6050 = vrsqrt.f32 %v2273_v17  ;;  %v2199_v42 = vmul.f32 %v7876_v57, %v7876_v57  ;;  %vm2314_vm8 = vmor %vm2312_vm6, %vm2313_vm5  ;;  %vm2322_vm9 = vweird.f32 %v2273_v17 }
 0x7b0   :  { %v2305_v45 = vsel %vm2304_vm4, %v6047_v32, %v2301_v58  ;;  %v2308_v25 = vmul.f32 %v6049_v59, %v2307_v47 }
 0x7b1   :  { %v2447_v23 = vmul.f32 %v2305_v45, %v7764_v34  ;;  %v2233_v27 = vsel %vm246_vm1, %v2199_v42, 0.0 }
 0x7b2   :  { %v2309_v51 = vmul.f32 0.5, %v2308_v25  ;;  %v2142_v40 = vpop.xlane.xlu0 %2141  ;;  %2234 = vadd.xlane.f32.xlu1 %v2233_v27  ;;  %v2220_v38 = vpop.xlane.xlu1 %2219  ;;  %2156 = vadd.xlane.f32.xlu0 %v2155_v14 }
 0x7b3   :  { %v2462_v46 = vpack.c.bf16 %v2447_v23, %v2446_v13  ;;  %v2168_v5 = vmul.f32 %v2142_v40, %v9785_v4  ;;  %v2258_v18 = vmul.f32 %v2220_v38, %v9785_v4 }
 0x7b4   :  { %v2310_v24 = vsub.f32 1.5, %v2309_v51 }
 0x7b5   :  { %v6051_v62 = vpop.eup %6050  ;;  %v7892_v7 = vsub.f32 %v7798_v33, %v2168_v5  ;;  %v7894_v34 = vadd.f32 1e-05, %v2258_v18  ;;  %5655 = vmatmul.msk.bf16.vlgmr.msra.gmra.mxu0 %vm246_vm1, %v2462_v46 }
 0x7b6   :  { %v2317_v32 = vmul.f32 %v6051_v62, %v2273_v17  ;;  %v2311_v53 = vmul.f32 %v6049_v59, %v2310_v24  ;;  %vm2323_vm7 = vweird.f32 %v6051_v62 }
 0x7b7   :  { %6052 = vrsqrt.f32 %v7894_v34  ;;  %v2200_v63 = vmul.f32 %v7892_v7, %v7892_v7  ;;  %vm2324_vm10 = vmor %vm2322_vm9, %vm2323_vm7  ;;  %vm2332_vm12 = vweird.f32 %v7894_v34 }
 0x7b8   :  { %v2318_v22 = vmul.f32 %v6051_v62, %v2317_v32  ;;  %v2315_v52 = vsel %vm2314_vm8, %v6049_v59, %v2311_v53 }
 0x7b9   :  { %v2236_v35 = vsel %vm246_vm1, %v2200_v63, 0.0  ;;  %v2448_v42 = vmul.f32 %v2315_v52, %v7775_v8 }
 0x7ba   :  { %v2319_v44 = vmul.f32 0.5, %v2318_v22  ;;  %2237 = vadd.xlane.f32.xlu1 %v2236_v35  ;;  %v2145_v21 = vpop.xlane.xlu1 %2144  ;;  %v2223_v56 = vpop.xlane.xlu2 %2222 }
 0x7bb   :  { %v2169_v54 = vmul.f32 %v2145_v21, %v9785_v4  ;;  %v2259_v1 = vmul.f32 %v2223_v56, %v9785_v4 }
 0x7bc   :  { %v2320_v61 = vsub.f32 1.5, %v2319_v44 }
 0x7bd   :  { %v6053_v55 = vpop.eup %6052  ;;  %v7905_v26 = vsub.f32 %v7811_v0, %v2169_v54  ;;  %v2275_v6 = vadd.f32 1e-05, %v2259_v1 }
 0x7be   :  { %v2321_v9 = vmul.f32 %v6051_v62, %v2320_v61  ;;  %v2327_v29 = vmul.f32 %v6053_v55, %v7894_v34  ;;  %vm2333_vm11 = vweird.f32 %v6053_v55 }
 0x7bf   :  { %6054 = vrsqrt.f32 %v2275_v6  ;;  %v2201_v58 = vmul.f32 %v7905_v26, %v7905_v26  ;;  %vm2334_vm14 = vmor %vm2332_vm12, %vm2333_vm11  ;;  %vm2342_vm15 = vweird.f32 %v2275_v6 }
 0x7c0   :  { %v2325_v47 = vsel %vm2324_vm10, %v6051_v62, %v2321_v9  ;;  %v2328_v39 = vmul.f32 %v6053_v55, %v2327_v29 }
 0x7c1   :  { %v2449_v45 = vmul.f32 %v2325_v47, %v7785_v11  ;;  %v2239_v25 = vsel %vm246_vm1, %v2201_v58, 0.0 }
 0x7c2   :  { %v2329_v13 = vmul.f32 0.5, %v2328_v39  ;;  %v2148_v23 = vpop.xlane.xlu1 %2147  ;;  %2240 = vadd.xlane.f32.xlu2 %v2239_v25  ;;  %v2226_v59 = vpop.xlane.xlu2 %2225 }
 0x7c3   :  { %v2463_v17 = vpack.c.bf16 %v2449_v45, %v2448_v42  ;;  %v2170_v27 = vmul.f32 %v2148_v23, %v9785_v4  ;;  %v2260_v14 = vmul.f32 %v2226_v59, %v9785_v4 }
 0x7c4   :  { %v2330_v8 = vsub.f32 1.5, %v2329_v13 }
 0x7c5   :  { %v6055_v51 = vpop.eup %6054  ;;  %v7916_v40 = vsub.f32 %v7824_v3, %v2170_v27  ;;  %v2276_v38 = vadd.f32 1e-05, %v2260_v14  ;;  %5656 = vmatmul.msk.bf16.vlgmr.msrb.gmra.mxu2 %vm246_vm1, %v2463_v17 }
 0x7c6   :  { %v2337_v11 = vmul.f32 %v6055_v51, %v2275_v6  ;;  %v2331_v62 = vmul.f32 %v6053_v55, %v2330_v8  ;;  %vm2343_vm13 = vweird.f32 %v6055_v51 }
 0x7c7   :  { %6056 = vrsqrt.f32 %v2276_v38  ;;  %v2202_v46 = vmul.f32 %v7916_v40, %v7916_v40  ;;  %vm2344_vm0 = vmor %vm2342_vm15, %vm2343_vm13  ;;  %vm2352_vm3 = vweird.f32 %v2276_v38 }
 0x7c8   :  { %v2338_v5 = vmul.f32 %v6055_v51, %v2337_v11  ;;  %v2335_v54 = vsel %vm2334_vm14, %v6053_v55, %v2331_v62 }
 0x7c9   :  { %v2242_v18 = vsel %vm246_vm1, %v2202_v46, 0.0  ;;  %v2450_v58 = vmul.f32 %v2335_v54, %v7801_v37 }
 0x7ca   :  { %v2339_v24 = vmul.f32 0.5, %v2338_v5  ;;  %v2229_v32 = vpop.xlane.xlu0 %2228  ;;  %2243 = vadd.xlane.f32.xlu0 %v2242_v18  ;;  %v2151_v63 = vpop.xlane.xlu2 %2150 }
 0x7cb   :  { %v2261_v22 = vmul.f32 %v2229_v32, %v9785_v4  ;;  %v2171_v35 = vmul.f32 %v2151_v63, %v9785_v4 }
 0x7cc   :  { %v2340_v53 = vsub.f32 1.5, %v2339_v24 }
 0x7cd   :  { %v6057_v44 = vpop.eup %6056  ;;  %v2277_v21 = vadd.f32 1e-05, %v2261_v22  ;;  %v7926_v56 = vsub.f32 %v7837_v28, %v2171_v35 }
 0x7ce   :  { %v2341_v1 = vmul.f32 %v6055_v51, %v2340_v53  ;;  %v2347_v61 = vmul.f32 %v6057_v44, %v2276_v38  ;;  %vm2353_vm2 = vweird.f32 %v6057_v44 }
 0x7cf   :  { %6058 = vrsqrt.f32 %v2277_v21  ;;  %v2203_v52 = vmul.f32 %v7926_v56, %v7926_v56  ;;  %vm2354_vm5 = vmor %vm2352_vm3, %vm2353_vm2  ;;  %vm2362_vm6 = vweird.f32 %v2277_v21 }
 0x7d0   :  { %v2345_v9 = vsel %vm2344_vm0, %v6055_v51, %v2341_v1  ;;  %v2348_v29 = vmul.f32 %v6057_v44, %v2347_v61 }
 0x7d1   :  { %v2245_v34 = vsel %vm246_vm1, %v2203_v52, 0.0  ;;  %v2451_v47 = vmul.f32 %v2345_v9, %v7814_v43 }
 0x7d2   :  { %v2349_v39 = vmul.f32 0.5, %v2348_v29  ;;  %2246 = vadd.xlane.f32.xlu1 %v2245_v34  ;;  %v2154_v42 = vpop.xlane.xlu2 %2153  ;;  %v7957_v29 = vld [vmem:[%s9690_s10] ss:$0 sm:$0xff] }
 0x7d3   :  { %v2172_v55 = vmul.f32 %v2154_v42, %v9785_v4  ;;  %v2464_v6 = vpack.c.bf16 %v2451_v47, %v2450_v58 }
 0x7d4   :  { %v2350_v13 = vsub.f32 1.5, %v2349_v39 }
 0x7d5   :  { %v6059_v45 = vpop.eup %6058  ;;  %v7935_v25 = vsub.f32 %v7849_v31, %v2172_v55  ;;  %5657 = vmatmul.msk.bf16.gmra.mxu2 %vm246_vm1, %v2464_v6 }
 0x7d6   :  { %v2357_v23 = vmul.f32 %v6059_v45, %v2277_v21  ;;  %v2351_v17 = vmul.f32 %v6057_v44, %v2350_v13  ;;  %vm2363_vm4 = vweird.f32 %v6059_v45 }
 0x7d7   :  { %v2204_v59 = vmul.f32 %v7935_v25, %v7935_v25  ;;  %vm2364_vm7 = vmor %vm2362_vm6, %vm2363_vm4 }
 0x7d8   :  { %v2358_v37 = vmul.f32 %v6059_v45, %v2357_v23  ;;  %v2355_v51 = vsel %vm2354_vm5, %v6057_v44, %v2351_v17 }
 0x7d9   :  { %v2248_v43 = vsel %vm246_vm1, %v2204_v59, 0.0  ;;  %v2452_v46 = vmul.f32 %v2355_v51, %v7827_v2 }
 0x7da   :  { %v2359_v27 = vmul.f32 0.5, %v2358_v37  ;;  %2249 = vadd.xlane.f32.xlu2 %v2248_v43 }
 0x7dc   :  { %v2360_v14 = vsub.f32 1.5, %v2359_v27 }
 0x7de   :  { %v2361_v8 = vmul.f32 %v6059_v45, %v2360_v14 }
 0x7e0   :  { %v2365_v11 = vsel %vm2364_vm7, %v6059_v45, %v2361_v8 }
 0x7e1   :  { %v2453_v5 = vmul.f32 %v2365_v11, %v7840_v19 }
 0x7e3   :  { %v2465_v18 = vpack.c.bf16 %v2453_v5, %v2452_v46 }
 0x7e5   :  { %5658 = vmatmul.msk.bf16.gmra.mxu2 %vm246_vm1, %v2465_v18 }
 0x81d   :  { %v2232_v62 = vpop.xlane.xlu0 %2231 }
 0x81e   :  { %v2262_v24 = vmul.f32 %v2232_v62, %v9785_v4 }
 0x820   :  { %v2278_v32 = vadd.f32 1e-05, %v2262_v24 }
 0x822   :  { %6060 = vrsqrt.f32 %v2278_v32  ;;  %vm2372_vm9 = vweird.f32 %v2278_v32 }
 0x825   :  { %v2235_v38 = vpop.xlane.xlu1 %2234  ;;  %v2157_v63 = vpop.xlane.xlu0 %2156 }
 0x826   :  { %v2263_v22 = vmul.f32 %v2235_v38, %v9785_v4  ;;  %v2173_v35 = vmul.f32 %v2157_v63, %v9785_v4  ;;  %v5848_v38 = vld [vmem:[%s9691_s11 + $0x8] sm:$0xff] }
 0x827   :  { %2759 = vmatpush.bf16.msrb.mxu0 %v5848_v38 }
 0x828   :  { %v6061_v53 = vpop.eup %6060  ;;  %v2279_v44 = vadd.f32 1e-05, %v2263_v22  ;;  %v7948_v2 = vsub.f32 %v7879_v50, %v2173_v35 }
 0x829   :  { %v2367_v19 = vmul.f32 %v6061_v53, %v2278_v32  ;;  %vm2373_vm8 = vweird.f32 %v6061_v53 }
 0x82a   :  { %6062 = vrsqrt.f32 %v2279_v44  ;;  %v2205_v21 = vmul.f32 %v7948_v2, %v7948_v2  ;;  %vm2374_vm11 = vmor %vm2372_vm9, %vm2373_vm8  ;;  %vm2382_vm12 = vweird.f32 %v2279_v44 }
 0x82b   :  { %v2368_v54 = vmul.f32 %v6061_v53, %v2367_v19 }
 0x82c   :  { %v2251_v1 = vsel %vm246_vm1, %v2205_v21, 0.0 }
 0x82d   :  { %v2369_v61 = vmul.f32 0.5, %v2368_v54  ;;  %v2238_v52 = vpop.xlane.xlu1 %2237  ;;  %2252 = vadd.xlane.f32.xlu0 %v2251_v1 }
 0x82e   :  { %v2264_v9 = vmul.f32 %v2238_v52, %v9785_v4 }
 0x82f   :  { %v2370_v47 = vsub.f32 1.5, %v2369_v61  ;;  %v5847_v61 = vld [vmem:[%s9691_s11] sm:$0xff] }
 0x830   :  { %v6063_v34 = vpop.eup %6062  ;;  %v7959_v58 = vadd.f32 1e-05, %v2264_v9  ;;  %2760 = vmatpush.bf16.msrb.mxu0 %v5847_v61 }
 0x831   :  { %v2377_v39 = vmul.f32 %v6063_v34, %v2279_v44  ;;  %v2371_v45 = vmul.f32 %v6061_v53, %v2370_v47  ;;  %vm2383_vm10 = vweird.f32 %v6063_v34 }
 0x832   :  { %6064 = vrsqrt.f32 %v7959_v58  ;;  %v2521_v42 = vpop.f32.mrf.mxu0  ;;  %vm2384_vm13 = vmor %vm2382_vm12, %vm2383_vm10  ;;  %vm2392_vm15 = vweird.f32 %v7959_v58 }
 0x833   :  { %v2378_v55 = vmul.f32 %v6063_v34, %v2377_v39  ;;  %v7963_v6 = vadd.f32 %v7957_v29, %v2521_v42  ;;  %v2375_v51 = vsel %vm2374_vm11, %v6061_v53, %v2371_v45 }
 0x834   :  { %v2454_v63 = vmul.f32 %v2375_v51, %v7866_v16 }
 0x835   :  { %v2379_v13 = vmul.f32 0.5, %v2378_v55  ;;  %v2577_v23 = vmul.f32 0.044715, %v7963_v6  ;;  %v2241_v59 = vpop.xlane.xlu2 %2240 }
 0x836   :  { %v2265_v37 = vmul.f32 %v2241_v59, %v9785_v4 }
 0x837   :  { %v2380_v43 = vsub.f32 1.5, %v2379_v13  ;;  %v2593_v17 = vmul.f32 %v2577_v23, %v7963_v6 }
 0x838   :  { %v7968_v27 = vpop.eup %6064  ;;  %v2281_v14 = vadd.f32 1e-05, %v2265_v37 }
 0x839   :  { %v2381_v8 = vmul.f32 %v6063_v34, %v2380_v43  ;;  %v2387_v11 = vmul.f32 %v7968_v27, %v7959_v58  ;;  %v2609_v46 = vmul.f32 %v2593_v17, %v7963_v6  ;;  %vm2393_vm14 = vweird.f32 %v7968_v27 }
 0x83a   :  { %6066 = vrsqrt.f32 %v2281_v14  ;;  %v2523_v5 = vpop.f32.mrf.mxu0  ;;  %vm2394_vm2 = vmor %vm2392_vm15, %vm2393_vm14  ;;  %vm2402_vm3 = vweird.f32 %v2281_v14 }
 0x83b   :  { %v2385_v18 = vsel %vm2384_vm13, %v6063_v34, %v2381_v8  ;;  %v2388_v62 = vmul.f32 %v7968_v27, %v2387_v11  ;;  %v2625_v24 = vadd.f32 %v2609_v46, %v7963_v6  ;;  %v2524_v32 = vadd.f32 %v7957_v29, %v2523_v5 }
 0x83c   :  { %v2455_v22 = vmul.f32 %v2385_v18, %v7876_v57 }
 0x83d   :  { %v2389_v35 = vmul.f32 0.5, %v2388_v62  ;;  %v2578_v53 = vmul.f32 0.044715, %v2524_v32  ;;  %v2244_v44 = vpop.xlane.xlu0 %2243  ;;  %v2641_v54 = vmul.f32 0.7978846, %v2625_v24 }
 0x83e   :  { %v2266_v19 = vmul.f32 %v2244_v44, %v9785_v4  ;;  %v2466_v21 = vpack.c.bf16 %v2455_v22, %v2454_v63 }
 0x83f   :  { %v2594_v1 = vmul.f32 %v2578_v53, %v2524_v32  ;;  %v2390_v16 = vsub.f32 1.5, %v2389_v35  ;;  %v2561_v35 = vmul.f32 0.5, %v7963_v6  ;;  %v2562_v53 = vmul.f32 0.5, %v2524_v32 }
 0x840   :  { %v6067_v52 = vpop.eup %6066  ;;  %v7985_v9 = vadd.f32 1e-05, %v2266_v19  ;;  %5659 = vmatmul.msk.bf16.gmra.mxu2 %vm246_vm1, %v2466_v21 }
 0x841   :  { %v2397_v57 = vmul.f32 %v6067_v52, %v2281_v14  ;;  %v2610_v34 = vmul.f32 %v2594_v1, %v2524_v32  ;;  %v2391_v42 = vmul.f32 %v7968_v27, %v2390_v16  ;;  %vm2403_vm0 = vweird.f32 %v6067_v52 }
 0x842   :  { %6068 = vrsqrt.f32 %v7985_v9  ;;  %vm2404_vm4 = vmor %vm2402_vm3, %vm2403_vm0  ;;  %vm2412_vm6 = vweird.f32 %v7985_v9 }
 0x843   :  { %6070 = vtanh.f32 %v2641_v54  ;;  %v2398_v47 = vmul.f32 %v6067_v52, %v2397_v57  ;;  %v2626_v39 = vadd.f32 %v2610_v34, %v2524_v32  ;;  %v2395_v8 = vsel %vm2394_vm2, %v7968_v27, %v2391_v42 }
 0x844   :  { %v2456_v14 = vmul.f32 %v2395_v8, %v7892_v7 }
 0x845   :  { %v2399_v55 = vmul.f32 0.5, %v2398_v47  ;;  %v2642_v45 = vmul.f32 0.7978846, %v2626_v39  ;;  %v2247_v13 = vpop.xlane.xlu1 %2246 }
 0x846   :  { %v2267_v23 = vmul.f32 %v2247_v13, %v9785_v4 }
 0x847   :  { %v2400_v59 = vsub.f32 1.5, %v2399_v55  ;;  %6072 = vtanh.f32 %v2642_v45 }
 0x848   :  { %v6069_v37 = vpop.eup %6068  ;;  %v2283_v43 = vadd.f32 1e-05, %v2267_v23  ;;  %v2526_v17 = vpop.f32.mrf.mxu2 }
 0x849   :  { %v6071_v51 = vpop.eup %6070  ;;  %v2401_v11 = vmul.f32 %v6067_v52, %v2400_v59  ;;  %v2407_v46 = vmul.f32 %v6069_v37, %v7985_v9  ;;  %v7996_v5 = vadd.f32 %v7957_v29, %v2526_v17  ;;  %vm2413_vm5 = vweird.f32 %v6069_v37 }
 0x84a   :  { %6074 = vrsqrt.f32 %v2283_v43  ;;  %v2673_v24 = vadd.f32 1.0, %v6071_v51  ;;  %vm2414_vm8 = vmor %vm2412_vm6, %vm2413_vm5  ;;  %vm2422_vm9 = vweird.f32 %v2283_v43 }
 0x84b   :  { %v2405_v58 = vsel %vm2404_vm4, %v6067_v52, %v2401_v11  ;;  %v2408_v18 = vmul.f32 %v6069_v37, %v2407_v46  ;;  %v2579_v62 = vmul.f32 0.044715, %v7996_v5 }
 0x84c   :  { %v2457_v38 = vmul.f32 %v2405_v58, %v7905_v26  ;;  %v2689_v1 = vmul.f32 %v2673_v24, %v2561_v35 }
 0x84d   :  { %v6073_v63 = vpop.eup %6072  ;;  %v2409_v22 = vmul.f32 0.5, %v2408_v18  ;;  %v2595_v27 = vmul.f32 %v2579_v62, %v7996_v5 }
 0x84e   :  { %v2674_v44 = vadd.f32 1.0, %v6073_v63  ;;  %v2467_v19 = vpack.c.bf16 %v2457_v38, %v2456_v14 }
 0x84f   :  { %v2611_v21 = vmul.f32 %v2595_v27, %v7996_v5  ;;  %v2410_v7 = vsub.f32 1.5, %v2409_v22 }
 0x850   :  { %v6075_v54 = vpop.eup %6074  ;;  %v2690_v61 = vmul.f32 %v2674_v44, %v2562_v53  ;;  %v2528_v52 = vpop.f32.mrf.mxu2  ;;  %5660 = vmatmul.msk.bf16.gmra.mxu2 %vm246_vm1, %v2467_v19  ;;  %v2563_v53 = vmul.f32 0.5, %v7996_v5 }
 0x851   :  { %v2417_v16 = vmul.f32 %v6075_v54, %v2283_v43  ;;  %v2627_v26 = vadd.f32 %v2611_v21, %v7996_v5  ;;  %v2529_v57 = vadd.f32 %v7957_v29, %v2528_v52  ;;  %v2411_v32 = vmul.f32 %v6069_v37, %v2410_v7 }
 0x852   :  { %v2705_v34 = vpack.c.bf16 %v2690_v61, %v2689_v1  ;;  %vm2423_vm7 = vweird.f32 %v6075_v54 }
 0x853   :  { %v2418_v47 = vmul.f32 %v6075_v54, %v2417_v16  ;;  %v2580_v6 = vmul.f32 0.044715, %v2529_v57  ;;  %v2643_v42 = vmul.f32 0.7978846, %v2627_v26  ;;  %v2415_v59 = vsel %vm2414_vm8, %v6069_v37, %v2411_v32  ;;  %vm2424_vm10 = vmor %vm2422_vm9, %vm2423_vm7 }
 0x854   :  { %5671 = vmatmul.msk.bf16.vlgmr.msrb.gmra.mxu0 %vm246_vm1, %v2705_v34  ;;  %v2458_v58 = vmul.f32 %v2415_v59, %v7916_v40 }
 0x855   :  { %v2419_v39 = vmul.f32 0.5, %v2418_v47  ;;  %v2596_v55 = vmul.f32 %v2580_v6, %v2529_v57  ;;  %6076 = vtanh.f32 %v2643_v42 }
 0x857   :  { %v2420_v45 = vsub.f32 1.5, %v2419_v39  ;;  %v2612_v13 = vmul.f32 %v2596_v55, %v2529_v57 }
 0x858   :  { %v2531_v23 = vpop.f32.mrf.mxu2 }
 0x859   :  { %v2421_v17 = vmul.f32 %v6075_v54, %v2420_v45  ;;  %v2532_v51 = vadd.f32 %v7957_v29, %v2531_v23  ;;  %v2628_v8 = vadd.f32 %v2612_v13, %v2529_v57 }
 0x85b   :  { %v2425_v11 = vsel %vm2424_vm10, %v6075_v54, %v2421_v17  ;;  %v2581_v46 = vmul.f32 0.044715, %v2532_v51  ;;  %v2644_v9 = vmul.f32 0.7978846, %v2628_v8  ;;  %v6077_v38 = vpop.eup %6076  ;;  %v2565_v13 = vmul.f32 0.5, %v2532_v51 }
 0x85c   :  { %v2459_v18 = vmul.f32 %v2425_v11, %v7926_v56  ;;  %v2675_v27 = vadd.f32 1.0, %v6077_v38  ;;  %v2564_v56 = vmul.f32 0.5, %v2529_v57 }
 0x85d   :  { %v2597_v62 = vmul.f32 %v2581_v46, %v2532_v51  ;;  %6078 = vtanh.f32 %v2644_v9 }
 0x85e   :  { %v2468_v24 = vpack.c.bf16 %v2459_v18, %v2458_v58  ;;  %v2691_v54 = vmul.f32 %v2675_v27, %v2563_v53 }
 0x85f   :  { %v2613_v14 = vmul.f32 %v2597_v62, %v2532_v51 }
 0x860   :  { %v2533_v37 = vpop.f32.mrf.mxu2  ;;  %5661 = vmatmul.msk.bf16.gmra.mxu2 %vm246_vm1, %v2468_v24 }
 0x861   :  { %v2629_v43 = vadd.f32 %v2613_v14, %v2532_v51  ;;  %v2534_v63 = vadd.f32 %v7957_v29, %v2533_v37 }
 0x863   :  { %v2582_v22 = vmul.f32 0.044715, %v2534_v63  ;;  %v6079_v35 = vpop.eup %6078  ;;  %v2645_v40 = vmul.f32 0.7978846, %v2629_v43  ;;  %v2566_v23 = vmul.f32 0.5, %v2534_v63 }
 0x864   :  { %v2676_v19 = vadd.f32 1.0, %v6079_v35  ;;  %v2250_v35 = vpop.xlane.xlu2 %2249 }
 0x865   :  { %v2598_v44 = vmul.f32 %v2582_v22, %v2534_v63  ;;  %6080 = vtanh.f32 %v2645_v40  ;;  %v2268_v53 = vmul.f32 %v2250_v35, %v9785_v4 }
 0x866   :  { %v2692_v1 = vmul.f32 %v2676_v19, %v2564_v56 }
 0x867   :  { %v2614_v21 = vmul.f32 %v2598_v44, %v2534_v63  ;;  %v2284_v40 = vadd.f32 1e-05, %v2268_v53 }
 0x868   :  { %v2536_v61 = vpop.f32.mrf.mxu2  ;;  %v2706_v7 = vpack.c.bf16 %v2692_v1, %v2691_v54 }
 0x869   :  { %v2537_v52 = vadd.f32 %v7957_v29, %v2536_v61  ;;  %v2630_v16 = vadd.f32 %v2614_v21, %v2534_v63  ;;  %vm2432_vm12 = vweird.f32 %v2284_v40 }
 0x86a   :  { %5672 = vmatmul.msk.bf16.gmra.mxu0 %vm246_vm1, %v2706_v7 }
 0x86b   :  { %v2583_v26 = vmul.f32 0.044715, %v2537_v52  ;;  %v2646_v34 = vmul.f32 0.7978846, %v2630_v16  ;;  %v6081_v5 = vpop.eup %6080  ;;  %v2567_v37 = vmul.f32 0.5, %v2537_v52 }
 0x86c   :  { %v2677_v42 = vadd.f32 1.0, %v6081_v5 }
 0x86d   :  { %v2599_v47 = vmul.f32 %v2583_v26, %v2537_v52  ;;  %6082 = vtanh.f32 %v2646_v34 }
 0x86e   :  { %v2693_v11 = vmul.f32 %v2677_v42, %v2565_v13 }
 0x86f   :  { %v2615_v6 = vmul.f32 %v2599_v47, %v2537_v52 }
 0x870   :  { %v2538_v32 = vpop.f32.mrf.mxu2 }
 0x871   :  { %v2631_v57 = vadd.f32 %v2615_v6, %v2537_v52  ;;  %v2539_v39 = vadd.f32 %v7957_v29, %v2538_v32 }
 0x873   :  { %v6083_v55 = vpop.eup %6082  ;;  %v2584_v45 = vmul.f32 0.044715, %v2539_v39  ;;  %v2647_v17 = vmul.f32 0.7978846, %v2631_v57  ;;  %v2568_v43 = vmul.f32 0.5, %v2539_v39 }
 0x874   :  { %v2678_v59 = vadd.f32 1.0, %v6083_v55 }
 0x875   :  { %v2600_v8 = vmul.f32 %v2584_v45, %v2539_v39  ;;  %6084 = vtanh.f32 %v2647_v17 }
 0x876   :  { %v2694_v46 = vmul.f32 %v2678_v59, %v2566_v23 }
 0x877   :  { %v2616_v58 = vmul.f32 %v2600_v8, %v2539_v39 }
 0x878   :  { %v2707_v18 = vpack.c.bf16 %v2694_v46, %v2693_v11 }
 0x879   :  { %v2632_v9 = vadd.f32 %v2616_v58, %v2539_v39 }
 0x87a   :  { %5673 = vmatmul.msk.bf16.gmra.mxu0 %vm246_vm1, %v2707_v18 }
 0x87b   :  { %v2648_v62 = vmul.f32 0.7978846, %v2632_v9  ;;  %v6085_v24 = vpop.eup %6084 }
 0x87c   :  { %v2679_v14 = vadd.f32 1.0, %v6085_v24 }
 0x87d   :  { %6086 = vtanh.f32 %v2648_v62 }
 0x87e   :  { %v2695_v63 = vmul.f32 %v2679_v14, %v2567_v37  ;;  %6088 = vrsqrt.f32 %v2284_v40 }
 0x883   :  { %v6087_v38 = vpop.eup %6086 }
 0x884   :  { %v2680_v51 = vadd.f32 1.0, %v6087_v38  ;;  %v6089_v44 = vpop.eup %6088 }
 0x885   :  { %v2427_v56 = vmul.f32 %v6089_v44, %v2284_v40  ;;  %vm2433_vm11 = vweird.f32 %v6089_v44 }
 0x886   :  { %v2696_v22 = vmul.f32 %v2680_v51, %v2568_v43  ;;  %vm2434_vm14 = vmor %vm2432_vm12, %vm2433_vm11 }
 0x887   :  { %v2428_v1 = vmul.f32 %v6089_v44, %v2427_v56 }
 0x888   :  { %v2708_v27 = vpack.c.bf16 %v2696_v22, %v2695_v63 }
 0x889   :  { %v2429_v61 = vmul.f32 0.5, %v2428_v1 }
 0x88a   :  { %5674 = vmatmul.msk.bf16.gmra.mxu0 %vm246_vm1, %v2708_v27 }
 0x88b   :  { %v2430_v7 = vsub.f32 1.5, %v2429_v61 }
 0x88d   :  { %v2431_v34 = vmul.f32 %v6089_v44, %v2430_v7 }
 0x88f   :  { %v2435_v6 = vsel %vm2434_vm14, %v6089_v44, %v2431_v34 }
 0x890   :  { %v2460_v39 = vmul.f32 %v2435_v6, %v7935_v25  ;;  %v8030_v25 = vld [vmem:[%s9692_s12] ss:$0 sm:$0xff] }
 0x8a0   :  { %v2253_v19 = vpop.xlane.xlu0 %2252 }
 0x8a1   :  { %v2269_v21 = vmul.f32 %v2253_v19, %v9785_v4 }
 0x8a3   :  { %v2285_v54 = vadd.f32 1e-05, %v2269_v21 }
 0x8a5   :  { %6090 = vrsqrt.f32 %v2285_v54  ;;  %vm2442_vm15 = vweird.f32 %v2285_v54 }
 0x8ab   :  { %v6091_v52 = vpop.eup %6090 }
 0x8ac   :  { %v2437_v16 = vmul.f32 %v6091_v52, %v2285_v54  ;;  %vm2443_vm13 = vweird.f32 %v6091_v52 }
 0x8ad   :  { %vm2444_vm0 = vmor %vm2442_vm15, %vm2443_vm13 }
 0x8ae   :  { %v2438_v26 = vmul.f32 %v6091_v52, %v2437_v16 }
 0x8b0   :  { %v2439_v47 = vmul.f32 0.5, %v2438_v26 }
 0x8b2   :  { %v2440_v5 = vsub.f32 1.5, %v2439_v47 }
 0x8b4   :  { %v2441_v32 = vmul.f32 %v6091_v52, %v2440_v5 }
 0x8b6   :  { %v2445_v57 = vsel %vm2444_vm0, %v6091_v52, %v2441_v32 }
 0x8b7   :  { %v2461_v42 = vmul.f32 %v2445_v57, %v7948_v2 }
 0x8b9   :  { %v2469_v55 = vpack.c.bf16 %v2461_v42, %v2460_v39 }
 0x8bb   :  { %5662 = vmatmul.msk.bf16.gmra.mxu2 %vm246_vm1, %v2469_v55 }
 0x8c3   :  { %v2541_v45 = vpop.f32.mrf.mxu2 }
 0x8c4   :  { %v2542_v13 = vadd.f32 %v7957_v29, %v2541_v45 }
 0x8c6   :  { %v2585_v23 = vmul.f32 0.044715, %v2542_v13  ;;  %v2569_v7 = vmul.f32 0.5, %v2542_v13 }
 0x8c8   :  { %v2601_v59 = vmul.f32 %v2585_v23, %v2542_v13 }
 0x8ca   :  { %v2617_v17 = vmul.f32 %v2601_v59, %v2542_v13 }
 0x8cb   :  { %v2543_v8 = vpop.f32.mrf.mxu2 }
 0x8cc   :  { %v2633_v11 = vadd.f32 %v2617_v17, %v2542_v13  ;;  %v2544_v46 = vadd.f32 %v7957_v29, %v2543_v8 }
 0x8ce   :  { %v2586_v58 = vmul.f32 0.044715, %v2544_v46  ;;  %v2649_v18 = vmul.f32 0.7978846, %v2633_v11  ;;  %v2570_v16 = vmul.f32 0.5, %v2544_v46 }
 0x8d0   :  { %v2602_v9 = vmul.f32 %v2586_v58, %v2544_v46  ;;  %6092 = vtanh.f32 %v2649_v18 }
 0x8d1   :  { %v2762_v2 = vpop.f32.mrf.mxu0 }
 0x8d2   :  { %v2618_v62 = vmul.f32 %v2602_v9, %v2544_v46  ;;  %v2802_v24 = vadd.f32 %v2762_v2, %v7709_v49 }
 0x8d3   :  { %v2546_v14 = vpop.f32.mrf.mxu2 }
 0x8d4   :  { %v8034_v38 = vadd.f32 %v8030_v25, %v2802_v24  ;;  %v2547_v37 = vadd.f32 %v7957_v29, %v2546_v14  ;;  %v2634_v43 = vadd.f32 %v2618_v62, %v2544_v46 }
 0x8d6   :  { %v2587_v51 = vmul.f32 0.044715, %v2547_v37  ;;  %v2836_v63 = vsel %vm246_vm1, %v8034_v38, 0.0  ;;  %v2650_v22 = vmul.f32 0.7978846, %v2634_v43  ;;  %v6093_v53 = vpop.eup %6092  ;;  %v2571_v14 = vmul.f32 0.5, %v2547_v37 }
 0x8d7   :  { %2837 = vadd.xlane.f32.xlu1 %v2836_v63  ;;  %v2681_v54 = vadd.f32 1.0, %v6093_v53 }
 0x8d8   :  { %v2603_v27 = vmul.f32 %v2587_v51, %v2547_v37  ;;  %6094 = vtanh.f32 %v2650_v22 }
 0x8d9   :  { %v2764_v35 = vpop.f32.mrf.mxu0 }
 0x8da   :  { %v2619_v40 = vmul.f32 %v2603_v27, %v2547_v37  ;;  %v2803_v49 = vadd.f32 %v2764_v35, %v7715_v60  ;;  %v2697_v60 = vmul.f32 %v2681_v54, %v2569_v7 }
 0x8db   :  { %v2548_v44 = vpop.f32.mrf.mxu2 }
 0x8dc   :  { %v2635_v56 = vadd.f32 %v2619_v40, %v2547_v37  ;;  %v8041_v19 = vadd.f32 %v8030_v25, %v2803_v49  ;;  %v2549_v21 = vadd.f32 %v7957_v29, %v2548_v44 }
 0x8de   :  { %v6095_v1 = vpop.eup %6094  ;;  %v2588_v61 = vmul.f32 0.044715, %v2549_v21  ;;  %v2839_v52 = vsel %vm246_vm1, %v8041_v19, 0.0  ;;  %v2651_v34 = vmul.f32 0.7978846, %v2635_v56  ;;  %v2572_v43 = vmul.f32 0.5, %v2549_v21 }
 0x8df   :  { %2840 = vadd.xlane.f32.xlu2 %v2839_v52  ;;  %v2682_v26 = vadd.f32 1.0, %v6095_v1 }
 0x8e0   :  { %v2604_v47 = vmul.f32 %v2588_v61, %v2549_v21  ;;  %6096 = vtanh.f32 %v2651_v34 }
 0x8e1   :  { %v2698_v5 = vmul.f32 %v2682_v26, %v2570_v16 }
 0x8e2   :  { %v2620_v6 = vmul.f32 %v2604_v47, %v2549_v21 }
 0x8e3   :  { %v2551_v32 = vpop.f32.mrf.mxu2  ;;  %v2709_v57 = vpack.c.bf16 %v2698_v5, %v2697_v60 }
 0x8e4   :  { %v2552_v39 = vadd.f32 %v7957_v29, %v2551_v32  ;;  %v2636_v42 = vadd.f32 %v2620_v6, %v2549_v21 }
 0x8e5   :  { %5675 = vmatmul.msk.bf16.gmra.mxu0 %vm246_vm1, %v2709_v57 }
 0x8e6   :  { %v2589_v55 = vmul.f32 0.044715, %v2552_v39  ;;  %v2652_v45 = vmul.f32 0.7978846, %v2636_v42  ;;  %v6097_v17 = vpop.eup %6096  ;;  %v2573_v26 = vmul.f32 0.5, %v2552_v39 }
 0x8e7   :  { %v2767_v59 = vpop.f32.mrf.mxu0  ;;  %v2683_v2 = vadd.f32 1.0, %v6097_v17 }
 0x8e8   :  { %v2605_v23 = vmul.f32 %v2589_v55, %v2552_v39  ;;  %6098 = vtanh.f32 %v2652_v45  ;;  %v2804_v13 = vadd.f32 %v2767_v59, %v7721_v36 }
 0x8e9   :  { %v2699_v35 = vmul.f32 %v2683_v2, %v2571_v14 }
 0x8ea   :  { %v2621_v8 = vmul.f32 %v2605_v23, %v2552_v39  ;;  %v8050_v11 = vadd.f32 %v8030_v25, %v2804_v13 }
 0x8eb   :  { %v2553_v46 = vpop.f32.mrf.mxu2 }
 0x8ec   :  { %9794 = vst [vmem:[#allocation9_spill] sm:$0xff] %v8050_v11  ;;  %v2637_v58 = vadd.f32 %v2621_v8, %v2552_v39  ;;  %v2554_v18 = vadd.f32 %v7957_v29, %v2553_v46  ;;  %v2842_v9 = vsel %vm246_vm1, %v8050_v11, 0.0 }
 0x8ed   :  { %2843 = vadd.xlane.f32.xlu0 %v2842_v9 }
 0x8ee   :  { %v6099_v62 = vpop.eup %6098  ;;  %v2590_v24 = vmul.f32 0.044715, %v2554_v18  ;;  %v2653_v36 = vmul.f32 0.7978846, %v2637_v58  ;;  %v2574_v34 = vmul.f32 0.5, %v2554_v18 }
 0x8ef   :  { %v2684_v51 = vadd.f32 1.0, %v6099_v62  ;;  %v2769_v22 = vpop.f32.mrf.mxu0 }
 0x8f0   :  { %v2606_v63 = vmul.f32 %v2590_v24, %v2554_v18  ;;  %v2805_v27 = vadd.f32 %v2769_v22, %v7727_v20  ;;  %6100 = vtanh.f32 %v2653_v36 }
 0x8f1   :  { %v2700_v53 = vmul.f32 %v2684_v51, %v2572_v43 }
 0x8f2   :  { %v2622_v40 = vmul.f32 %v2606_v63, %v2554_v18  ;;  %v8057_v49 = vadd.f32 %v8030_v25, %v2805_v27 }
 0x8f3   :  { %v2710_v44 = vpack.c.bf16 %v2700_v53, %v2699_v35 }
 0x8f4   :  { %9795 = vst [vmem:[#allocation17_spill] sm:$0xff] %v8057_v49  ;;  %v2638_v56 = vadd.f32 %v2622_v40, %v2554_v18  ;;  %v2845_v54 = vsel %vm246_vm1, %v8057_v49, 0.0 }
 0x8f5   :  { %5676 = vmatmul.msk.bf16.gmra.mxu0 %vm246_vm1, %v2710_v44  ;;  %2846 = vadd.xlane.f32.xlu1 %v2845_v54 }
 0x8f6   :  { %v2654_v37 = vmul.f32 0.7978846, %v2638_v56  ;;  %v6101_v1 = vpop.eup %6100 }
 0x8f7   :  { %v2772_v21 = vpop.f32.mrf.mxu0  ;;  %v2685_v7 = vadd.f32 1.0, %v6101_v1 }
 0x8f8   :  { %6102 = vtanh.f32 %v2654_v37  ;;  %v2806_v20 = vadd.f32 %v2772_v21, %v7733_v12 }
 0x8f9   :  { %v2701_v6 = vmul.f32 %v2685_v7, %v2573_v26 }
 0x8fa   :  { %v8064_v61 = vadd.f32 %v8030_v25, %v2806_v20 }
 0x8fc   :  { %9796 = vst [vmem:[#allocation13_spill] sm:$0xff] %v8064_v61  ;;  %v2848_v52 = vsel %vm246_vm1, %v8064_v61, 0.0 }
 0x8fd   :  { %2849 = vadd.xlane.f32.xlu2 %v2848_v52 }
 0x8fe   :  { %v6103_v16 = vpop.eup %6102 }
 0x8ff   :  { %v2686_v47 = vadd.f32 1.0, %v6103_v16  ;;  %v2774_v60 = vpop.f32.mrf.mxu0 }
 0x900   :  { %v2807_v5 = vadd.f32 %v2774_v60, %v7739_v10 }
 0x901   :  { %v2702_v32 = vmul.f32 %v2686_v47, %v2574_v34 }
 0x902   :  { %v8070_v12 = vadd.f32 %v8030_v25, %v2807_v5 }
 0x903   :  { %v2711_v57 = vpack.c.bf16 %v2702_v32, %v2701_v6 }
 0x904   :  { %9797 = vst [vmem:[#allocation14_spill] sm:$0xff] %v8070_v12  ;;  %v2851_v42 = vsel %vm246_vm1, %v8070_v12, 0.0 }
 0x905   :  { %5677 = vmatmul.msk.bf16.gmra.mxu0 %vm246_vm1, %v2711_v57  ;;  %2852 = vadd.xlane.f32.xlu0 %v2851_v42 }
 0x907   :  { %v2777_v55 = vpop.f32.mrf.mxu0 }
 0x908   :  { %v2808_v39 = vadd.f32 %v2777_v55, %v7745_v15 }
 0x90a   :  { %v8077_v45 = vadd.f32 %v8030_v25, %v2808_v39 }
 0x90c   :  { %9798 = vst [vmem:[#allocation18_spill] sm:$0xff] %v8077_v45  ;;  %v2854_v10 = vsel %vm246_vm1, %v8077_v45, 0.0 }
 0x90d   :  { %2855 = vadd.xlane.f32.xlu0 %v2854_v10 }
 0x90f   :  { %v2779_v51 = vpop.f32.mrf.mxu0 }
 0x910   :  { %v2809_v22 = vadd.f32 %v2779_v51, %v7751_v41 }
 0x912   :  { %v8093_v44 = vadd.f32 %v8030_v25, %v2809_v22 }
 0x914   :  { %9799 = vst [vmem:[#allocation20_spill] sm:$0xff] %v8093_v44  ;;  %v2857_v21 = vsel %vm246_vm1, %v8093_v44, 0.0 }
 0x93e   :  { %v2556_v23 = vpop.f32.mrf.mxu2 }
 0x93f   :  { %v2557_v59 = vadd.f32 %v7957_v29, %v2556_v23 }
 0x941   :  { %v2591_v13 = vmul.f32 0.044715, %v2557_v59  ;;  %v2575_v1 = vmul.f32 0.5, %v2557_v59 }
 0x943   :  { %v2607_v17 = vmul.f32 %v2591_v13, %v2557_v59 }
 0x945   :  { %v2623_v8 = vmul.f32 %v2607_v17, %v2557_v59 }
 0x946   :  { %v2558_v46 = vpop.f32.mrf.mxu2 }
 0x947   :  { %v2639_v58 = vadd.f32 %v2623_v8, %v2557_v59  ;;  %v2559_v18 = vadd.f32 %v7957_v29, %v2558_v46 }
 0x949   :  { %v2592_v9 = vmul.f32 0.044715, %v2559_v18  ;;  %v2655_v15 = vmul.f32 0.7978846, %v2639_v58  ;;  %v2576_v52 = vmul.f32 0.5, %v2559_v18 }
 0x94a   :  { %v2838_v2 = vpop.xlane.xlu1 %2837 }
 0x94b   :  { %v2608_v62 = vmul.f32 %v2592_v9, %v2559_v18  ;;  %v2884_v24 = vmul.f32 %v2838_v2, %v9785_v4  ;;  %6104 = vtanh.f32 %v2655_v15 }
 0x94d   :  { %v2624_v14 = vmul.f32 %v2608_v62, %v2559_v18  ;;  %v8085_v43 = vsub.f32 %v8034_v38, %v2884_v24 }
 0x94f   :  { %v2916_v36 = vmul.f32 %v8085_v43, %v8085_v43  ;;  %v2640_v63 = vadd.f32 %v2624_v14, %v2559_v18 }
 0x951   :  { %v2932_v29 = vsel %vm246_vm1, %v2916_v36, 0.0  ;;  %v2656_v27 = vmul.f32 0.7978846, %v2640_v63  ;;  %v6105_v40 = vpop.eup %6104 }
 0x952   :  { %2933 = vadd.xlane.f32.xlu1 %v2932_v29  ;;  %v2841_v35 = vpop.xlane.xlu2 %2840  ;;  %v2687_v37 = vadd.f32 1.0, %v6105_v40 }
 0x953   :  { %v2885_v53 = vmul.f32 %v2841_v35, %v9785_v4  ;;  %6106 = vtanh.f32 %v2656_v27 }
 0x954   :  { %v2703_v16 = vmul.f32 %v2687_v37, %v2575_v1 }
 0x955   :  { %v8096_v56 = vsub.f32 %v8041_v19, %v2885_v53 }
 0x957   :  { %v2917_v54 = vmul.f32 %v8096_v56, %v8096_v56 }
 0x959   :  { %v6107_v41 = vpop.eup %6106  ;;  %v2935_v20 = vsel %vm246_vm1, %v2917_v54, 0.0 }
 0x95a   :  { %2858 = vadd.xlane.f32.xlu1 %v2857_v21  ;;  %2936 = vadd.xlane.f32.xlu2 %v2935_v20  ;;  %v2688_v7 = vadd.f32 1.0, %v6107_v41 }
 0x95c   :  { %v2704_v26 = vmul.f32 %v2688_v7, %v2576_v52 }
 0x95e   :  { %v2712_v34 = vpack.c.bf16 %v2704_v26, %v2703_v16 }
 0x960   :  { %5678 = vmatmul.msk.bf16.gmra.mxu0 %vm246_vm1, %v2712_v34  ;;  %v2844_v47 = vpop.xlane.xlu0 %2843 }
 0x961   :  { %v2886_v60 = vmul.f32 %v2844_v47, %v9785_v4 }
 0x962   :  { %v2782_v5 = vpop.f32.mrf.mxu0 }
 0x963   :  { %v2810_v6 = vadd.f32 %v2782_v5, %v7772_v30  ;;  %v8107_v32 = vsub.f32 %v8050_v11, %v2886_v60 }
 0x965   :  { %v8110_v57 = vadd.f32 %v8030_v25, %v2810_v6  ;;  %v2918_v42 = vmul.f32 %v8107_v32, %v8107_v32 }
 0x967   :  { %9800 = vst [vmem:[#allocation19_spill] sm:$0xff] %v8110_v57  ;;  %v2860_v55 = vsel %vm246_vm1, %v8110_v57, 0.0  ;;  %v2938_v39 = vsel %vm246_vm1, %v2918_v42, 0.0 }
 0x968   :  { %2861 = vadd.xlane.f32.xlu1 %v2860_v55  ;;  %v2847_v10 = vpop.xlane.xlu1 %2846  ;;  %2939 = vadd.xlane.f32.xlu2 %v2938_v39 }
 0x969   :  { %v2887_v23 = vmul.f32 %v2847_v10, %v9785_v4  ;;  %v5852_v10 = vld [vmem:[%s9685_s5 + $0x34] sm:$0xf0] }
 0x96a   :  { %v2784_v30 = vpop.f32.mrf.mxu0 }
 0x96b   :  { %v2811_v59 = vadd.f32 %v2784_v30, %v7788_v48  ;;  %v8120_v13 = vsub.f32 %v8057_v49, %v2887_v23  ;;  %v5851_v23 = vld [vmem:[%s9685_s5 + $0x34] sm:$0xf] }
 0x96d   :  { %v8123_v17 = vadd.f32 %v8030_v25, %v2811_v59  ;;  %v2919_v8 = vmul.f32 %v8120_v13, %v8120_v13  ;;  %v5696_v59 = vld [vmem:[%s9685_s5 + $0x38] sm:$0xf0] }
 0x96f   :  { %9801 = vst [vmem:[#allocation5_spill] sm:$0xff] %v8123_v17  ;;  %v2863_v46 = vsel %vm246_vm1, %v8123_v17, 0.0  ;;  %v2941_v58 = vsel %vm246_vm1, %v2919_v8, 0.0 }
 0x970   :  { %2942 = vadd.xlane.f32.xlu0 %v2941_v58  ;;  %2864 = vadd.xlane.f32.xlu2 %v2863_v46  ;;  %v2850_v18 = vpop.xlane.xlu2 %2849 }
 0x971   :  { %v2888_v9 = vmul.f32 %v2850_v18, %v9785_v4  ;;  %v5699_v18 = vor.u32 %v5851_v23, %v5696_v59 }
 0x972   :  { %v2787_v48 = vpop.f32.mrf.mxu0 }
 0x973   :  { %v2812_v2 = vadd.f32 %v2787_v48, %v7798_v33  ;;  %v8133_v15 = vsub.f32 %v8064_v61, %v2888_v9  ;;  %3307 = vmatpush.bf16.msrb.mxu1 %v5699_v18 }
 0x975   :  { %v8136_v62 = vadd.f32 %v8030_v25, %v2812_v2  ;;  %v2920_v24 = vmul.f32 %v8133_v15, %v8133_v15  ;;  %v5686_v2 = vld [vmem:[%s9685_s5 + $0x20] sm:$0xf] }
 0x977   :  { %9802 = vst [vmem:[#allocation6_spill] sm:$0xff] %v8136_v62  ;;  %v2866_v14 = vsel %vm246_vm1, %v8136_v62, 0.0  ;;  %v2944_v51 = vsel %vm246_vm1, %v2920_v24, 0.0  ;;  %v5850_v24 = vld [vmem:[%s9685_s5 + $0x24] sm:$0xf0] }
 0x978   :  { %v2853_v36 = vpop.xlane.xlu0 %2852  ;;  %2867 = vadd.xlane.f32.xlu2 %v2866_v14  ;;  %2945 = vadd.xlane.f32.xlu0 %v2944_v51  ;;  %v5687_v51 = vor.u32 %v5850_v24, %v5686_v2 }
 0x979   :  { %v2889_v63 = vmul.f32 %v2853_v36, %v9785_v4  ;;  %v5849_v36 = vld [vmem:[%s9685_s5 + $0x24] sm:$0xf] }
 0x97a   :  { %v2789_v33 = vpop.f32.mrf.mxu0 }
 0x97b   :  { %v2813_v22 = vadd.f32 %v2789_v33, %v7811_v0  ;;  %v8146_v29 = vsub.f32 %v8070_v12, %v2889_v63  ;;  %v5688_v63 = vld [vmem:[%s9685_s5 + $0x28] sm:$0xf0] }
 0x97d   :  { %v8149_v27 = vadd.f32 %v8030_v25, %v2813_v22  ;;  %v2921_v35 = vmul.f32 %v8146_v29, %v8146_v29  ;;  %v5691_v22 = vor.u32 %v5849_v36, %v5688_v63 }
 0x97f   :  { %9803 = vst [vmem:[#allocation7_spill] sm:$0xff] %v8149_v27  ;;  %v2869_v53 = vsel %vm246_vm1, %v8149_v27, 0.0  ;;  %v2947_v40 = vsel %vm246_vm1, %v2921_v35, 0.0  ;;  %3308 = vmatpush.bf16.msrb.mxu1 %v5691_v22 }
 0x980   :  { %v2856_v54 = vpop.xlane.xlu0 %2855  ;;  %2948 = vadd.xlane.f32.xlu1 %v2947_v40  ;;  %2870 = vadd.xlane.f32.xlu0 %v2869_v53 }
 0x981   :  { %v2890_v37 = vmul.f32 %v2856_v54, %v9785_v4 }
 0x982   :  { %v2792_v0 = vpop.f32.mrf.mxu0 }
 0x983   :  { %v2814_v41 = vadd.f32 %v2792_v0, %v7824_v3  ;;  %v8159_v21 = vsub.f32 %v8077_v45, %v2890_v37 }
 0x985   :  { %v8162_v20 = vadd.f32 %v8030_v25, %v2814_v41  ;;  %v2922_v1 = vmul.f32 %v8159_v21, %v8159_v21 }
 0x987   :  { %9804 = vst [vmem:[#allocation8_spill] sm:$0xff] %v8162_v20  ;;  %v2872_v52 = vsel %vm246_vm1, %v8162_v20, 0.0  ;;  %v2950_v7 = vsel %vm246_vm1, %v2922_v1, 0.0 }
 0x988   :  { %2951 = vadd.xlane.f32.xlu1 %v2950_v7  ;;  %2873 = vadd.xlane.f32.xlu0 %v2872_v52 }
 0x98a   :  { %v2794_v16 = vpop.f32.mrf.mxu0 }
 0x98b   :  { %v2815_v26 = vadd.f32 %v2794_v16, %v7837_v28  ;;  %v5694_v28 = vld [vmem:[%s9685_s5 + $0x30] sm:$0xf]  ;;  %s6379_s5 = smov 128  }
 0x98c   :  { %v5695_v30 = vor.u32 %v5852_v10, %v5694_v28 }
 0x98d   :  { %v8171_v3 = vadd.f32 %v8030_v25, %v2815_v26 }
 0x98e   :  { %3258 = vmatpush.bf16.msra.mxu3 %v5695_v30 }
 0x98f   :  { %9805 = vst [vmem:[#allocation10_spill] sm:$0xff] %v8171_v3  ;;  %v2875_v34 = vsel %vm246_vm1, %v8171_v3, 0.0 }
 0x990   :  { %2876 = vadd.xlane.f32.xlu1 %v2875_v34 }
 0x992   :  { %3259 = vmatpush.bf16.msra.mxu3 %v5687_v51 }
 0x9c5   :  { %v2934_v47 = vpop.xlane.xlu1 %2933 }
 0x9c6   :  { %v2980_v60 = vmul.f32 %v2934_v47, %v9785_v4 }
 0x9c8   :  { %v2996_v5 = vadd.f32 1e-05, %v2980_v60 }
 0x9ca   :  { %6108 = vrsqrt.f32 %v2996_v5  ;;  %vm3018_vm3 = vweird.f32 %v2996_v5 }
 0x9cd   :  { %v2859_v6 = vpop.xlane.xlu1 %2858  ;;  %v2937_v42 = vpop.xlane.xlu2 %2936 }
 0x9ce   :  { %v2891_v55 = vmul.f32 %v2859_v6, %v9785_v4  ;;  %v2981_v39 = vmul.f32 %v2937_v42, %v9785_v4 }
 0x9d0   :  { %v6109_v8 = vpop.eup %6108  ;;  %v8191_v46 = vsub.f32 %v8093_v44, %v2891_v55  ;;  %v2997_v58 = vadd.f32 1e-05, %v2981_v39 }
 0x9d1   :  { %v3013_v9 = vmul.f32 %v6109_v8, %v2996_v5  ;;  %vm3019_vm2 = vweird.f32 %v6109_v8 }
 0x9d2   :  { %6110 = vrsqrt.f32 %v2997_v58  ;;  %v2923_v48 = vmul.f32 %v8191_v46, %v8191_v46  ;;  %vm3020_vm5 = vmor %vm3018_vm3, %vm3019_vm2  ;;  %vm3028_vm6 = vweird.f32 %v2997_v58 }
 0x9d3   :  { %v3014_v14 = vmul.f32 %v6109_v8, %v3013_v9 }
 0x9d4   :  { %v2953_v33 = vsel %vm246_vm1, %v2923_v48, 0.0 }
 0x9d5   :  { %v3015_v35 = vmul.f32 0.5, %v3014_v14  ;;  %2954 = vadd.xlane.f32.xlu2 %v2953_v33 }
 0x9d7   :  { %v3016_v40 = vsub.f32 1.5, %v3015_v35 }
 0x9d8   :  { %v6111_v53 = vpop.eup %6110 }
 0x9d9   :  { %v3023_v54 = vmul.f32 %v6111_v53, %v2997_v58  ;;  %v3017_v52 = vmul.f32 %v6109_v8, %v3016_v40  ;;  %vm3029_vm4 = vweird.f32 %v6111_v53 }
 0x9da   :  { %vm3030_vm7 = vmor %vm3028_vm6, %vm3029_vm4 }
 0x9db   :  { %v3024_v37 = vmul.f32 %v6111_v53, %v3023_v54  ;;  %v2862_v0 = vpop.xlane.xlu1 %2861  ;;  %v2940_v1 = vpop.xlane.xlu2 %2939  ;;  %v3021_v39 = vsel %vm3020_vm5, %v6109_v8, %v3017_v52 }
 0x9dc   :  { %v2892_v41 = vmul.f32 %v2862_v0, %v9785_v4  ;;  %v2982_v16 = vmul.f32 %v2940_v1, %v9785_v4  ;;  %v3172_v23 = vmul.f32 %v3021_v39, %v8085_v43 }
 0x9dd   :  { %v3025_v7 = vmul.f32 0.5, %v3024_v37  ;;  %v2797_v26 = vpop.f32.mrf.mxu0 }
 0x9de   :  { %v8211_v34 = vsub.f32 %v8110_v57, %v2892_v41  ;;  %v2816_v47 = vadd.f32 %v2797_v26, %v7849_v31  ;;  %v8214_v6 = vadd.f32 1e-05, %v2982_v16 }
 0x9df   :  { %v3026_v60 = vsub.f32 1.5, %v3025_v7 }
 0x9e0   :  { %v8217_v42 = vadd.f32 %v8030_v25, %v2816_v47  ;;  %v2924_v55 = vmul.f32 %v8211_v34, %v8211_v34  ;;  %6112 = vrsqrt.f32 %v8214_v6  ;;  %vm3038_vm9 = vweird.f32 %v8214_v6 }
 0x9e1   :  { %v3027_v28 = vmul.f32 %v6111_v53, %v3026_v60 }
 0x9e2   :  { %9806 = vst [vmem:[#allocation11_spill] sm:$0xff] %v8217_v42  ;;  %v2878_v31 = vsel %vm246_vm1, %v8217_v42, 0.0  ;;  %v2956_v5 = vsel %vm246_vm1, %v2924_v55, 0.0 }
 0x9e3   :  { %v3031_v10 = vsel %vm3030_vm7, %v6111_v53, %v3027_v28  ;;  %2879 = vadd.xlane.f32.xlu1 %v2878_v31  ;;  %2957 = vadd.xlane.f32.xlu2 %v2956_v5  ;;  %v2943_v59 = vpop.xlane.xlu0 %2942  ;;  %v2865_v18 = vpop.xlane.xlu2 %2864 }
 0x9e4   :  { %v3173_v30 = vmul.f32 %v3031_v10, %v8096_v56  ;;  %v2983_v8 = vmul.f32 %v2943_v59, %v9785_v4  ;;  %v2893_v58 = vmul.f32 %v2865_v18, %v9785_v4 }
 0x9e5   :  { %v2799_v9 = vpop.f32.mrf.mxu0 }
 0x9e6   :  { %v3188_v48 = vpack.c.bf16 %v3173_v30, %v3172_v23  ;;  %v2817_v2 = vadd.f32 %v2799_v9, %v7879_v50  ;;  %v6113_v24 = vpop.eup %6112  ;;  %v2999_v14 = vadd.f32 1e-05, %v2983_v8  ;;  %v8231_v51 = vsub.f32 %v8123_v17, %v2893_v58 }
 0x9e7   :  { %v3033_v36 = vmul.f32 %v6113_v24, %v8214_v6  ;;  %vm3039_vm8 = vweird.f32 %v6113_v24 }
 0x9e8   :  { %v8235_v43 = vadd.f32 %v8030_v25, %v2817_v2  ;;  %5700 = vmatmul.msk.bf16.vlgmr.msra.gmra.mxu3 %vm246_vm1, %v3188_v48  ;;  %5708 = vmatmul.msk.bf16.vlgmr.msrb.gmra.mxu1 %vm246_vm1, %v3188_v48  ;;  %6114 = vrsqrt.f32 %v2999_v14  ;;  %v2925_v56 = vmul.f32 %v8231_v51, %v8231_v51  ;;  %vm3040_vm11 = vmor %vm3038_vm9, %vm3039_vm8  ;;  %vm3048_vm12 = vweird.f32 %v2999_v14 }
 0x9e9   :  { %v3034_v63 = vmul.f32 %v6113_v24, %v3033_v36 }
 0x9ea   :  { %9807 = vst [vmem:[#allocation12_spill] sm:$0xff] %v8235_v43  ;;  %v2881_v50 = vsel %vm246_vm1, %v8235_v43, 0.0  ;;  %v2959_v33 = vsel %vm246_vm1, %v2925_v56, 0.0 }
 0x9eb   :  { %2882 = vadd.xlane.f32.xlu2 %v2881_v50  ;;  %v3035_v22 = vmul.f32 0.5, %v3034_v63  ;;  %v2946_v35 = vpop.xlane.xlu0 %2945  ;;  %2960 = vadd.xlane.f32.xlu0 %v2959_v33  ;;  %v2868_v25 = vpop.xlane.xlu2 %2867 }
 0x9ec   :  { %v2984_v53 = vmul.f32 %v2946_v35, %v9785_v4  ;;  %v2894_v40 = vmul.f32 %v2868_v25, %v9785_v4 }
 0x9ed   :  { %v3036_v41 = vsub.f32 1.5, %v3035_v22 }
 0x9ee   :  { %v6115_v54 = vpop.eup %6114  ;;  %v3000_v37 = vadd.f32 1e-05, %v2984_v53  ;;  %v8247_v0 = vsub.f32 %v8136_v62, %v2894_v40 }
 0x9ef   :  { %v3043_v1 = vmul.f32 %v6115_v54, %v2999_v14  ;;  %v3037_v26 = vmul.f32 %v6113_v24, %v3036_v41  ;;  %vm3049_vm10 = vweird.f32 %v6115_v54 }
 0x9f0   :  { %6116 = vrsqrt.f32 %v3000_v37  ;;  %v2926_v52 = vmul.f32 %v8247_v0, %v8247_v0  ;;  %vm3050_vm13 = vmor %vm3048_vm12, %vm3049_vm10  ;;  %vm3058_vm15 = vweird.f32 %v3000_v37 }
 0x9f1   :  { %v3044_v7 = vmul.f32 %v6115_v54, %v3043_v1  ;;  %v3041_v30 = vsel %vm3040_vm11, %v6113_v24, %v3037_v26 }
 0x9f2   :  { %v2962_v16 = vsel %vm246_vm1, %v2926_v52, 0.0  ;;  %v3174_v48 = vmul.f32 %v3041_v30, %v8107_v32 }
 0x9f3   :  { %v3045_v47 = vmul.f32 0.5, %v3044_v7  ;;  %v2949_v60 = vpop.xlane.xlu1 %2948  ;;  %v2871_v55 = vpop.xlane.xlu0 %2870  ;;  %2963 = vadd.xlane.f32.xlu0 %v2962_v16 }
 0x9f4   :  { %v2985_v39 = vmul.f32 %v2949_v60, %v9785_v4  ;;  %v2895_v28 = vmul.f32 %v2871_v55, %v9785_v4 }
 0x9f5   :  { %v3046_v31 = vsub.f32 1.5, %v3045_v47 }
 0x9f6   :  { %v6117_v5 = vpop.eup %6116  ;;  %v3001_v10 = vadd.f32 1e-05, %v2985_v39  ;;  %v8256_v23 = vsub.f32 %v8149_v27, %v2895_v28 }
 0x9f7   :  { %v3047_v59 = vmul.f32 %v6115_v54, %v3046_v31  ;;  %v3053_v18 = vmul.f32 %v6117_v5, %v3000_v37  ;;  %vm3059_vm14 = vweird.f32 %v6117_v5 }
 0x9f8   :  { %6118 = vrsqrt.f32 %v3001_v10  ;;  %v2927_v8 = vmul.f32 %v8256_v23, %v8256_v23  ;;  %vm3060_vm2 = vmor %vm3058_vm15, %vm3059_vm14  ;;  %vm3068_vm3 = vweird.f32 %v3001_v10 }
 0x9f9   :  { %v3051_v58 = vsel %vm3050_vm13, %v6115_v54, %v3047_v59  ;;  %v3054_v9 = vmul.f32 %v6117_v5, %v3053_v18 }
 0x9fa   :  { %v2965_v6 = vsel %vm246_vm1, %v2927_v8, 0.0  ;;  %v3175_v2 = vmul.f32 %v3051_v58, %v8120_v13 }
 0x9fb   :  { %v3055_v36 = vmul.f32 0.5, %v3054_v9  ;;  %v2952_v56 = vpop.xlane.xlu1 %2951  ;;  %2966 = vadd.xlane.f32.xlu1 %v2965_v6  ;;  %v2874_v24 = vpop.xlane.xlu0 %2873 }
 0x9fc   :  { %v2896_v14 = vmul.f32 %v2874_v24, %v9785_v4  ;;  %v3189_v63 = vpack.c.bf16 %v3175_v2, %v3174_v48  ;;  %v2986_v28 = vmul.f32 %v2952_v56, %v9785_v4 }
 0x9fd   :  { %v3056_v22 = vsub.f32 1.5, %v3055_v36 }
 0x9fe   :  { %v6119_v50 = vpop.eup %6118  ;;  %v8265_v33 = vsub.f32 %v8162_v20, %v2896_v14  ;;  %5701 = vmatmul.msk.bf16.gmra.mxu3 %vm246_vm1, %v3189_v63  ;;  %5709 = vmatmul.msk.bf16.gmra.mxu1 %vm246_vm1, %v3189_v63  ;;  %v3002_v31 = vadd.f32 1e-05, %v2986_v28 }
 0x9ff   :  { %v3063_v35 = vmul.f32 %v6119_v50, %v3001_v10  ;;  %v3057_v53 = vmul.f32 %v6117_v5, %v3056_v22  ;;  %vm3069_vm0 = vweird.f32 %v6119_v50 }
 0xa00   :  { %v2928_v32 = vmul.f32 %v8265_v33, %v8265_v33  ;;  %vm3070_vm4 = vmor %vm3068_vm3, %vm3069_vm0  ;;  %6120 = vrsqrt.f32 %v3002_v31  ;;  %vm3078_vm6 = vweird.f32 %v3002_v31 }
 0xa01   :  { %v3064_v13 = vmul.f32 %v6119_v50, %v3063_v35  ;;  %v3061_v7 = vsel %vm3060_vm2, %v6117_v5, %v3057_v53 }
 0xa02   :  { %v2968_v25 = vsel %vm246_vm1, %v2928_v32, 0.0  ;;  %v3176_v55 = vmul.f32 %v3061_v7, %v8133_v15 }
 0xa03   :  { %v3065_v40 = vmul.f32 0.5, %v3064_v13  ;;  %v2877_v54 = vpop.xlane.xlu1 %2876  ;;  %2969 = vadd.xlane.f32.xlu2 %v2968_v25 }
 0xa04   :  { %v2897_v41 = vmul.f32 %v2877_v54, %v9785_v4 }
 0xa05   :  { %v3066_v1 = vsub.f32 1.5, %v3065_v40 }
 0xa06   :  { %v8274_v52 = vsub.f32 %v8171_v3, %v2897_v41  ;;  %v6121_v5 = vpop.eup %6120 }
 0xa07   :  { %v3067_v16 = vmul.f32 %v6119_v50, %v3066_v1  ;;  %v3073_v10 = vmul.f32 %v6121_v5, %v3002_v31  ;;  %vm3079_vm5 = vweird.f32 %v6121_v5 }
 0xa08   :  { %v2929_v26 = vmul.f32 %v8274_v52, %v8274_v52  ;;  %vm3080_vm8 = vmor %vm3078_vm6, %vm3079_vm5 }
 0xa09   :  { %v3071_v47 = vsel %vm3070_vm4, %v6119_v50, %v3067_v16  ;;  %v3074_v8 = vmul.f32 %v6121_v5, %v3073_v10  ;;  %v8299_v16 = vld [vmem:[%s9686_s6 + $0x1] ss:$2 sm:$0x3] }
 0xa0a   :  { %v2971_v60 = vsel %vm246_vm1, %v2929_v26, 0.0  ;;  %v3177_v37 = vmul.f32 %v3071_v47, %v8146_v29  ;;  %v8306_v28 = vperm.slane %v8299_v16, 1 }
 0xa0b   :  { %2972 = vadd.xlane.f32.xlu0 %v2971_v60  ;;  %v3075_v15 = vmul.f32 0.5, %v3074_v8 }
 0xa0c   :  { %v3190_v39 = vpack.c.bf16 %v3177_v37, %v3176_v55 }
 0xa0d   :  { %v3076_v58 = vsub.f32 1.5, %v3075_v15 }
 0xa0e   :  { %5702 = vmatmul.msk.bf16.gmra.mxu3 %vm246_vm1, %v3190_v39  ;;  %5710 = vmatmul.msk.bf16.gmra.mxu1 %vm246_vm1, %v3190_v39 }
 0xa0f   :  { %v3077_v24 = vmul.f32 %v6121_v5, %v3076_v58 }
 0xa11   :  { %v3081_v32 = vsel %vm3080_vm8, %v6121_v5, %v3077_v24 }
 0xa12   :  { %v3178_v1 = vmul.f32 %v3081_v32, %v8159_v21 }
 0xa48   :  { %v2955_v30 = vpop.xlane.xlu2 %2954 }
 0xa49   :  { %v2987_v59 = vmul.f32 %v2955_v30, %v9785_v4 }
 0xa4b   :  { %v3003_v18 = vadd.f32 1e-05, %v2987_v59 }
 0xa4d   :  { %6122 = vrsqrt.f32 %v3003_v18  ;;  %vm3088_vm9 = vweird.f32 %v3003_v18 }
 0xa53   :  { %v6123_v29 = vpop.eup %6122 }
 0xa54   :  { %v3083_v9 = vmul.f32 %v6123_v29, %v3003_v18  ;;  %vm3089_vm7 = vweird.f32 %v6123_v29 }
 0xa55   :  { %vm3090_vm10 = vmor %vm3088_vm9, %vm3089_vm7 }
 0xa56   :  { %v3084_v6 = vmul.f32 %v6123_v29, %v3083_v9  ;;  %v2880_v48 = vpop.xlane.xlu1 %2879  ;;  %v2958_v2 = vpop.xlane.xlu2 %2957 }
 0xa57   :  { %v2898_v36 = vmul.f32 %v2880_v48, %v9785_v4  ;;  %v2988_v56 = vmul.f32 %v2958_v2, %v9785_v4 }
 0xa58   :  { %v3085_v14 = vmul.f32 0.5, %v3084_v6 }
 0xa59   :  { %v8288_v63 = vsub.f32 %v8217_v42, %v2898_v36  ;;  %v3004_v50 = vadd.f32 1e-05, %v2988_v56 }
 0xa5a   :  { %v3086_v22 = vsub.f32 1.5, %v3085_v14 }
 0xa5b   :  { %6124 = vrsqrt.f32 %v3004_v50  ;;  %v2930_v35 = vmul.f32 %v8288_v63, %v8288_v63  ;;  %vm3098_vm12 = vweird.f32 %v3004_v50 }
 0xa5c   :  { %v3087_v13 = vmul.f32 %v6123_v29, %v3086_v22 }
 0xa5d   :  { %v2974_v25 = vsel %vm246_vm1, %v2930_v35, 0.0 }
 0xa5e   :  { %v3091_v53 = vsel %vm3090_vm10, %v6123_v29, %v3087_v13  ;;  %2975 = vadd.xlane.f32.xlu1 %v2974_v25  ;;  %v2883_v40 = vpop.xlane.xlu2 %2882  ;;  %v2961_v54 = vpop.xlane.xlu0 %2960 }
 0xa5f   :  { %v2899_v41 = vmul.f32 %v2883_v40, %v9785_v4  ;;  %v3179_v7 = vmul.f32 %v3091_v53, %v8191_v46  ;;  %v2989_v26 = vmul.f32 %v2961_v54, %v9785_v4 }
 0xa61   :  { %v6125_v47 = vpop.eup %6124  ;;  %v8303_v60 = vsub.f32 %v8235_v43, %v2899_v41  ;;  %v3191_v55 = vpack.c.bf16 %v3179_v7, %v3178_v1  ;;  %v3005_v39 = vadd.f32 1e-05, %v2989_v26 }
 0xa62   :  { %v3093_v37 = vmul.f32 %v6125_v47, %v3004_v50  ;;  %vm3099_vm11 = vweird.f32 %v6125_v47 }
 0xa63   :  { %5703 = vmatmul.msk.bf16.gmra.mxu3 %vm246_vm1, %v3191_v55  ;;  %5711 = vmatmul.msk.bf16.gmra.mxu1 %vm246_vm1, %v3191_v55  ;;  %v2931_v21 = vmul.f32 %v8303_v60, %v8303_v60  ;;  %6126 = vrsqrt.f32 %v3005_v39  ;;  %vm3100_vm14 = vmor %vm3098_vm12, %vm3099_vm11  ;;  %vm3108_vm15 = vweird.f32 %v3005_v39 }
 0xa64   :  { %v3094_v46 = vmul.f32 %v6125_v47, %v3093_v37 }
 0xa65   :  { %v3310_v31 = vpop.f32.mrf.mxu1  ;;  %v2977_v5 = vsel %vm246_vm1, %v2931_v21, 0.0 }
 0xa66   :  { %v3311_v10 = vadd.f32 %v3310_v31, %v8306_v28  ;;  %2978 = vadd.xlane.f32.xlu2 %v2977_v5  ;;  %v3095_v30 = vmul.f32 0.5, %v3094_v46  ;;  %v2964_v59 = vpop.xlane.xlu0 %2963 }
 0xa67   :  { %v2990_v18 = vmul.f32 %v2964_v59, %v9785_v4 }
 0xa68   :  { %v3096_v29 = vsub.f32 1.5, %v3095_v30 }
 0xa69   :  { %v6127_v8 = vpop.eup %6126  ;;  %v3006_v15 = vadd.f32 1e-05, %v2990_v18 }
 0xa6a   :  { %v3103_v58 = vmul.f32 %v6127_v8, %v3005_v39  ;;  %v3097_v2 = vmul.f32 %v6125_v47, %v3096_v29  ;;  %vm3109_vm13 = vweird.f32 %v6127_v8 }
 0xa6b   :  { %6128 = vrsqrt.f32 %v3006_v15  ;;  %vm3110_vm0 = vmor %vm3108_vm15, %vm3109_vm13  ;;  %vm3118_vm3 = vweird.f32 %v3006_v15 }
 0xa6c   :  { %v3104_v9 = vmul.f32 %v6127_v8, %v3103_v58  ;;  %v3101_v13 = vsel %vm3100_vm14, %v6125_v47, %v3097_v2 }
 0xa6d   :  { %v3312_v6 = vpop.f32.mrf.mxu1  ;;  %v3180_v41 = vmul.f32 %v3101_v13, %v8211_v34 }
 0xa6e   :  { %v3313_v48 = vadd.f32 %v3312_v6, %v8306_v28  ;;  %v3105_v36 = vmul.f32 0.5, %v3104_v9  ;;  %v2967_v56 = vpop.xlane.xlu1 %2966 }
 0xa6f   :  { %v2991_v14 = vmul.f32 %v2967_v56, %v9785_v4 }
 0xa70   :  { %v8316_v24 = vpack.c.bf16 %v3313_v48, %v3311_v10  ;;  %v3106_v22 = vsub.f32 1.5, %v3105_v36 }
 0xa71   :  { %v6129_v35 = vpop.eup %6128  ;;  %v3007_v32 = vadd.f32 1e-05, %v2991_v14 }
 0xa72   :  { %v3107_v25 = vmul.f32 %v6127_v8, %v3106_v22  ;;  %v3113_v53 = vmul.f32 %v6129_v35, %v3006_v15  ;;  %vm3119_vm2 = vweird.f32 %v6129_v35 }
 0xa73   :  { %6130 = vrsqrt.f32 %v3007_v32  ;;  %vm3120_vm5 = vmor %vm3118_vm3, %vm3119_vm2  ;;  %vm3128_vm6 = vweird.f32 %v3007_v32 }
 0xa74   :  { %v3111_v40 = vsel %vm3110_vm0, %v6127_v8, %v3107_v25  ;;  %v3114_v54 = vmul.f32 %v6129_v35, %v3113_v53 }
 0xa75   :  { %v3181_v1 = vmul.f32 %v3111_v40, %v8231_v51 }
 0xa76   :  { %v3115_v7 = vmul.f32 0.5, %v3114_v54  ;;  %v2970_v26 = vpop.xlane.xlu2 %2969 }
 0xa77   :  { %v2992_v50 = vmul.f32 %v2970_v26, %v9785_v4  ;;  %v3192_v55 = vpack.c.bf16 %v3181_v1, %v3180_v41 }
 0xa78   :  { %v3116_v47 = vsub.f32 1.5, %v3115_v7 }
 0xa79   :  { %v6131_v37 = vpop.eup %6130  ;;  %v3008_v21 = vadd.f32 1e-05, %v2992_v50  ;;  %5704 = vmatmul.msk.bf16.gmra.mxu3 %vm246_vm1, %v3192_v55  ;;  %5712 = vmatmul.msk.bf16.gmra.mxu1 %vm246_vm1, %v3192_v55 }
 0xa7a   :  { %v3123_v39 = vmul.f32 %v6131_v37, %v3007_v32  ;;  %v3117_v5 = vmul.f32 %v6129_v35, %v3116_v47  ;;  %vm3129_vm4 = vweird.f32 %v6131_v37 }
 0xa7b   :  { %6132 = vrsqrt.f32 %v3008_v21  ;;  %v3315_v46 = vpop.f32.mrf.mxu1  ;;  %vm3130_vm7 = vmor %vm3128_vm6, %vm3129_vm4  ;;  %vm3138_vm9 = vweird.f32 %v3008_v21 }
 0xa7c   :  { %v3124_v31 = vmul.f32 %v6131_v37, %v3123_v39  ;;  %v3316_v34 = vadd.f32 %v3315_v46, %v8306_v28  ;;  %v3121_v29 = vsel %vm3120_vm5, %v6129_v35, %v3117_v5 }
 0xa7d   :  { %v3182_v56 = vmul.f32 %v3121_v29, %v8247_v0 }
 0xa7e   :  { %v3125_v51 = vmul.f32 0.5, %v3124_v31  ;;  %v2973_v10 = vpop.xlane.xlu0 %2972 }
 0xa7f   :  { %v2993_v30 = vmul.f32 %v2973_v10, %v9785_v4 }
 0xa80   :  { %v3126_v59 = vsub.f32 1.5, %v3125_v51 }
 0xa81   :  { %v6133_v18 = vpop.eup %6132  ;;  %v3009_v8 = vadd.f32 1e-05, %v2993_v30 }
 0xa82   :  { %v3127_v58 = vmul.f32 %v6131_v37, %v3126_v59  ;;  %v3133_v9 = vmul.f32 %v6133_v18, %v3008_v21  ;;  %vm3139_vm8 = vweird.f32 %v6133_v18  ;;  %v8341_v21 = vpop.f32.mrf.mxu3 }
 0xa83   :  { %6134 = vrsqrt.f32 %v3009_v8  ;;  %v3317_v6 = vpop.f32.mrf.mxu1  ;;  %vm3140_vm11 = vmor %vm3138_vm9, %vm3139_vm8  ;;  %vm3148_vm12 = vweird.f32 %v3009_v8 }
 0xa84   :  { %v3131_v48 = vsel %vm3130_vm7, %v6131_v37, %v3127_v58  ;;  %v3134_v2 = vmul.f32 %v6133_v18, %v3133_v9  ;;  %v3318_v36 = vadd.f32 %v3317_v6, %v8306_v28 }
 0xa85   :  { %v3183_v15 = vmul.f32 %v3131_v48, %v8256_v23 }
 0xa86   :  { %v3135_v14 = vmul.f32 0.5, %v3134_v2  ;;  %v8329_v22 = vpack.c.bf16 %v3318_v36, %v3316_v34 }
 0xa87   :  { %v3193_v13 = vpack.c.bf16 %v3183_v15, %v3182_v56 }
 0xa88   :  { %v3136_v35 = vsub.f32 1.5, %v3135_v14 }
 0xa89   :  { %v6135_v25 = vpop.eup %6134  ;;  %5705 = vmatmul.msk.bf16.gmra.mxu3 %vm246_vm1, %v3193_v13  ;;  %5713 = vmatmul.msk.bf16.gmra.mxu1 %vm246_vm1, %v3193_v13 }
 0xa8a   :  { %v3143_v32 = vmul.f32 %v6135_v25, %v3009_v8  ;;  %v3137_v41 = vmul.f32 %v6133_v18, %v3136_v35  ;;  %vm3149_vm10 = vweird.f32 %v6135_v25  ;;  %v8343_v31 = vpop.f32.mrf.mxu3 }
 0xa8b   :  { %v3320_v53 = vpop.f32.mrf.mxu1  ;;  %vm3150_vm13 = vmor %vm3148_vm12, %vm3149_vm10 }
 0xa8c   :  { %v3144_v40 = vmul.f32 %v6135_v25, %v3143_v32  ;;  %v3321_v54 = vadd.f32 %v3320_v53, %v8306_v28  ;;  %v3141_v1 = vsel %vm3140_vm11, %v6133_v18, %v3137_v41 }
 0xa8d   :  { %v3184_v37 = vmul.f32 %v3141_v1, %v8265_v33 }
 0xa8e   :  { %v3145_v0 = vmul.f32 0.5, %v3144_v40 }
 0xa90   :  { %v3146_v23 = vsub.f32 1.5, %v3145_v0 }
 0xa92   :  { %v3147_v7 = vmul.f32 %v6135_v25, %v3146_v23  ;;  %v8345_v34 = vpop.f32.mrf.mxu3 }
 0xa93   :  { %v3322_v26 = vpop.f32.mrf.mxu1 }
 0xa94   :  { %v3151_v50 = vsel %vm3150_vm13, %v6135_v25, %v3147_v7  ;;  %v3323_v55 = vadd.f32 %v3322_v26, %v8306_v28 }
 0xa95   :  { %v3185_v47 = vmul.f32 %v3151_v50, %v8274_v52 }
 0xa96   :  { %v8337_v39 = vpack.c.bf16 %v3323_v55, %v3321_v54 }
 0xa97   :  { %v3194_v46 = vpack.c.bf16 %v3185_v47, %v3184_v37 }
 0xa99   :  { %5706 = vmatmul.msk.bf16.gmra.mxu3 %vm246_vm1, %v3194_v46  ;;  %5714 = vmatmul.msk.bf16.gmra.mxu1 %vm246_vm1, %v3194_v46 }
 0xa9a   :  { %v8347_v5 = vpop.f32.mrf.mxu3 }
 0xaa2   :  { %v8350_v52 = vpop.f32.mrf.mxu3 }
 0xaaa   :  { %v3273_v2 = vpop.f32.mrf.mxu3 }
 0xad1   :  { %v2976_v51 = vpop.xlane.xlu1 %2975 }
 0xad2   :  { %v2994_v33 = vmul.f32 %v2976_v51, %v9785_v4 }
 0xad4   :  { %v3010_v10 = vadd.f32 1e-05, %v2994_v33 }
 0xad6   :  { %6136 = vrsqrt.f32 %v3010_v10  ;;  %vm3158_vm15 = vweird.f32 %v3010_v10 }
 0xad9   :  { %v2979_v30 = vpop.xlane.xlu2 %2978 }
 0xada   :  { %v2995_v59 = vmul.f32 %v2979_v30, %v9785_v4 }
 0xadc   :  { %v6137_v18 = vpop.eup %6136  ;;  %v3011_v8 = vadd.f32 1e-05, %v2995_v59 }
 0xadd   :  { %v3153_v29 = vmul.f32 %v6137_v18, %v3010_v10  ;;  %vm3159_vm14 = vweird.f32 %v6137_v18 }
 0xade   :  { %6138 = vrsqrt.f32 %v3011_v8  ;;  %vm3160_vm2 = vmor %vm3158_vm15, %vm3159_vm14  ;;  %vm3168_vm3 = vweird.f32 %v3011_v8 }
 0xadf   :  { %v3154_v58 = vmul.f32 %v6137_v18, %v3153_v29 }
 0xae0   :  { %v3325_v9 = vpop.f32.mrf.mxu1 }
 0xae1   :  { %v3155_v6 = vmul.f32 0.5, %v3154_v58  ;;  %v3326_v48 = vadd.f32 %v3325_v9, %v8306_v28 }
 0xae3   :  { %v3156_v56 = vsub.f32 1.5, %v3155_v6 }
 0xae4   :  { %v6139_v36 = vpop.eup %6138 }
 0xae5   :  { %v3163_v15 = vmul.f32 %v6139_v36, %v3011_v8  ;;  %v3157_v25 = vmul.f32 %v6137_v18, %v3156_v56  ;;  %vm3169_vm0 = vweird.f32 %v6139_v36 }
 0xae6   :  { %v3276_v40 = vpop.f32.mrf.mxu3  ;;  %vm3170_vm4 = vmor %vm3168_vm3, %vm3169_vm0 }
 0xae7   :  { %v3164_v14 = vmul.f32 %v6139_v36, %v3163_v15  ;;  %v3161_v41 = vsel %vm3160_vm2, %v6137_v18, %v3157_v25 }
 0xae8   :  { %v3327_v13 = vpop.f32.mrf.mxu1  ;;  %v3186_v1 = vmul.f32 %v3161_v41, %v8288_v63 }
 0xae9   :  { %v3165_v35 = vmul.f32 0.5, %v3164_v14  ;;  %v3328_v32 = vadd.f32 %v3327_v13, %v8306_v28 }
 0xaeb   :  { %v3166_v53 = vsub.f32 1.5, %v3165_v35  ;;  %v8355_v54 = vpack.c.bf16 %v3328_v32, %v3326_v48 }
 0xaed   :  { %v3167_v0 = vmul.f32 %v6139_v36, %v3166_v53 }
 0xaee   :  { %v3278_v50 = vpop.f32.mrf.mxu3 }
 0xaef   :  { %v3171_v23 = vsel %vm3170_vm4, %v6139_v36, %v3167_v0 }
 0xaf0   :  { %v3187_v7 = vmul.f32 %v3171_v23, %v8303_v60  ;;  %v3204_v60 = vperm.slane %v8299_v16, 0 }
 0xaf2   :  { %v3195_v26 = vpack.c.bf16 %v3187_v7, %v3186_v1  ;;  %v3279_v36 = vadd.f32 %v3278_v50, %v3204_v60  ;;  %v3277_v56 = vadd.f32 %v3276_v40, %v3204_v60  ;;  %v3274_v16 = vadd.f32 %v3273_v2, %v3204_v60 }
 0xaf3   :  { %v3272_v14 = vadd.f32 %v8350_v52, %v3204_v60  ;;  %v3264_v25 = vadd.f32 %v8343_v31, %v3204_v60  ;;  %v3262_v35 = vadd.f32 %v8341_v21, %v3204_v60  ;;  %v3269_v40 = vadd.f32 %v8347_v5, %v3204_v60 }
 0xaf4   :  { %5707 = vmatmul.msk.bf16.gmra.mxu3 %vm246_vm1, %v3195_v26  ;;  %5715 = vmatmul.msk.bf16.gmra.mxu1 %vm246_vm1, %v3195_v26  ;;  %v8372_v15 = vpack.c.bf16 %v3279_v36, %v3277_v56  ;;  %v3267_v2 = vadd.f32 %v8345_v34, %v3204_v60 }
 0xaf5   :  { %v8377_v13 = vpack.c.bf16 %v3274_v16, %v3272_v14  ;;  %v8383_v32 = vpack.c.bf16 %v3264_v25, %v3262_v35 }
 0xaf6   :  { %v3330_v55 = vpop.f32.mrf.mxu1  ;;  %v8389_v52 = vpack.c.bf16 %v3269_v40, %v3267_v2 }
 0xaf7   :  { %v3331_v37 = vadd.f32 %v3330_v55, %v8306_v28 }
 0xafc   :  { %v3281_v47 = vpop.f32.mrf.mxu3 }
 0xafd   :  { %v3282_v31 = vadd.f32 %v3281_v47, %v3204_v60 }
 0xafe   :  { %v3332_v46 = vpop.f32.mrf.mxu1 }
 0xaff   :  { %v3333_v51 = vadd.f32 %v3332_v46, %v8306_v28 }
 0xb01   :  { %v3371_v33 = vpack.c.bf16 %v3333_v51, %v3331_v37 }
 0xb04   :  { %v3283_v10 = vpop.f32.mrf.mxu3 }
 0xb05   :  { %v3284_v41 = vadd.f32 %v3283_v10, %v3204_v60 }
 0xb06   :  { %v3335_v53 = vpop.f32.mrf.mxu1 }
 0xb07   :  { %v8393_v23 = vpack.c.bf16 %v3284_v41, %v3282_v31 }
 0xb0c   :  { %v3286_v30 = vpop.f32.mrf.mxu3 }
 0xb0d   :  { %v3287_v6 = vadd.f32 %v3286_v30, %v3204_v60 }
 0xb0e   :  { %v3337_v0 = vpop.f32.mrf.mxu1 }
 0xb0f   :  { %v3338_v51 = vadd.f32 %v3337_v0, %v8306_v28 }
 0xb14   :  { %v3288_v59 = vpop.f32.mrf.mxu3 }
 0xb15   :  { %v3289_v9 = vadd.f32 %v3288_v59, %v3204_v60 }
 0xb16   :  { %v3340_v21 = vpop.f32.mrf.mxu1 }
 0xb17   :  { %v8368_v48 = vpack.c.bf16 %v3289_v9, %v3287_v6  ;;  %v3341_v46 = vadd.f32 %v3340_v21, %v8306_v28 }
 0xb1c   :  { %v3291_v63 = vpop.f32.mrf.mxu3 }
 0xb1d   :  { %v3292_v8 = vadd.f32 %v3291_v63, %v3204_v60  ;;  %v3336_v63 = vadd.f32 %v3335_v53, %v8306_v28 }
 0xb1e   :  { %v3342_v1 = vpop.f32.mrf.mxu1 }
 0xb1f   :  { %v3343_v55 = vadd.f32 %v3342_v1, %v8306_v28 }
 0xb21   :  { %v3373_v10 = vpack.c.bf16 %v3343_v55, %v3341_v46 }
 0xb24   :  { %v3293_v18 = vpop.f32.mrf.mxu3 }
 0xb25   :  { %v3294_v29 = vadd.f32 %v3293_v18, %v3204_v60 }
 0xb27   :  { %v8364_v58 = vpack.c.bf16 %v3294_v29, %v3292_v8  ;;  %v3372_v8 = vpack.c.bf16 %v3338_v51, %v3336_v63 }
 0xb29   :  { %3941 = vrot.lane.b32.xlu2 %v8364_v58, %s6375_s1 }
 0xb31   :  { %3393 = vrot.lane.b32.xlu2 %v8368_v48, %s6376_s24 }
 0xb39   :  { %3935 = vrot.lane.b32.xlu2 %v8372_v15, %s6375_s1 }
 0xb41   :  { %3387 = vrot.lane.b32.xlu2 %v8377_v13, %s6376_s24 }
 0xb49   :  { %3929 = vrot.lane.b32.xlu2 %v8383_v32, %s6375_s1 }
 0xb51   :  { %3915 = vrot.lane.b32.xlu2 %v8389_v52, %s6377_s25 }
 0xb59   :  { %3921 = vrot.lane.b32.xlu2 %v8393_v23, %s6377_s25 }
 0xb71   :  { %v3345_v7 = vpop.f32.mrf.mxu1 }
 0xb72   :  { %v3346_v34 = vadd.f32 %v3345_v7, %v8306_v28 }
 0xb77   :  { %v3296_v26 = vpop.f32.mrf.mxu3 }
 0xb78   :  { %v3297_v30 = vadd.f32 %v3296_v26, %v3204_v60 }
 0xb79   :  { %v3347_v5 = vpop.f32.mrf.mxu1 }
 0xb7a   :  { %v3348_v50 = vadd.f32 %v3347_v5, %v8306_v28 }
 0xb7c   :  { %v3374_v37 = vpack.c.bf16 %v3348_v50, %v3346_v34 }
 0xb7e   :  { %3856 = vmatpush.bf16.msra.mxu0 %v3374_v37 }
 0xb7f   :  { %v3298_v47 = vpop.f32.mrf.mxu3 }
 0xb80   :  { %v3299_v59 = vadd.f32 %v3298_v47, %v3204_v60 }
 0xb82   :  { %v8403_v18 = vpack.c.bf16 %v3299_v59, %v3297_v30  ;;  %3857 = vmatpush.bf16.msra.mxu0 %v3373_v10 }
 0xb83   :  { %v3942_v28 = vpop.permute.xlu2 %3941 }
 0xb84   :  { %3927 = vrot.lane.b32.xlu2 %v8403_v18, %s6377_s25  ;;  %3397 = vrot.lane.b32.xlu1 %v8403_v18, %s6376_s24  ;;  %v3988_v36 = vsel %vm246_vm1, %v3942_v28, 0 }
 0xb85   :  { %3943 = vrot.lane.b32.xlu0 %v8403_v18, %s6375_s1 }
 0xb86   :  { %3858 = vmatpush.bf16.msra.mxu0 %v3372_v8 }
 0xb8a   :  { %3859 = vmatpush.bf16.msra.mxu0 %v3371_v33 }
 0xb8b   :  { %v3394_v56 = vpop.permute.xlu2 %3393 }
 0xb8c   :  { %4418 = vrot.lane.b32.xlu2 %v3371_v33, %s6377_s25  ;;  %3939 = vrot.lane.b32.xlu1 %v8368_v48, %s6375_s1  ;;  %v3439_v14 = vsel %vm246_vm1, %v3394_v56, 0 }
 0xb8d   :  { %3395 = vrot.lane.b32.xlu0 %v8364_v58, %s6376_s24 }
 0xb8e   :  { %3860 = vmatpush.bf16.msra.mxu0 %v8355_v54 }
 0xb92   :  { %3861 = vmatpush.bf16.msra.mxu0 %v8337_v39 }
 0xb93   :  { %v3936_v35 = vpop.permute.xlu2 %3935 }
 0xb94   :  { %4412 = vrot.lane.b32.xlu2 %v8329_v22, %s6377_s25  ;;  %3391 = vrot.lane.b32.xlu1 %v8393_v23, %s6376_s24  ;;  %v3979_v1 = vsel %vm246_vm1, %v3936_v35, 0 }
 0xb95   :  { %3937 = vrot.lane.b32.xlu0 %v8393_v23, %s6375_s1 }
 0xb96   :  { %3862 = vmatpush.bf16.msra.mxu0 %v8329_v22 }
 0xb9a   :  { %3863 = vmatpush.bf16.msra.mxu0 %v8316_v24 }
 0xb9b   :  { %v3388_v0 = vpop.permute.xlu2 %3387 }
 0xb9c   :  { %3933 = vrot.lane.b32.xlu1 %v8377_v13, %s6375_s1  ;;  %v3430_v50 = vsel %vm246_vm1, %v3388_v0, 0 }
 0xb9d   :  { %3389 = vrot.lane.b32.xlu0 %v8372_v15, %s6376_s24 }
 0xba3   :  { %v3930_v26 = vpop.permute.xlu2 %3929 }
 0xba4   :  { %3385 = vrot.lane.b32.xlu1 %v8389_v52, %s6376_s24  ;;  %v3970_v59 = vsel %vm246_vm1, %v3930_v26, 0 }
 0xba5   :  { %3931 = vrot.lane.b32.xlu0 %v8389_v52, %s6375_s1 }
 0xbab   :  { %v3916_v46 = vpop.permute.xlu2 %3915 }
 0xbac   :  { %3913 = vrot.lane.b32.xlu1 %v8383_v32, %s6377_s25 }
 0xbad   :  { %3383 = vrot.lane.b32.xlu0 %v8383_v32, %s6376_s24 }
 0xbb4   :  { %3919 = vrot.lane.b32.xlu1 %v8372_v15, %s6377_s25 }
 0xbb5   :  { %3917 = vrot.lane.b32.xlu0 %v8377_v13, %s6377_s25 }
 0xbbc   :  { %3925 = vrot.lane.b32.xlu1 %v8364_v58, %s6377_s25 }
 0xbbd   :  { %3923 = vrot.lane.b32.xlu0 %v8368_v48, %s6377_s25 }
 0xbc4   :  { %4422 = vrot.lane.b32.xlu1 %v3373_v10, %s6377_s25 }
 0xbc5   :  { %4424 = vrot.lane.b32.xlu0 %v3374_v37, %s6377_s25 }
 0xbcc   :  { %4416 = vrot.lane.b32.xlu1 %v8355_v54, %s6377_s25 }
 0xbcd   :  { %4420 = vrot.lane.b32.xlu0 %v3372_v8, %s6377_s25  ;;  %v3922_v8 = vpop.permute.xlu2 %3921 }
 0xbd5   :  { %4414 = vrot.lane.b32.xlu0 %v8337_v39, %s6377_s25 }
 0xbf6   :  { %v3398_v22 = vpop.permute.xlu1 %3397 }
 0xbf7   :  { %v3445_v33 = vsel %vm246_vm1, %v3398_v22, 0  ;;  %v3944_v60 = vpop.permute.xlu0 %3943 }
 0xbf8   :  { %v3991_v29 = vsel %vm246_vm1, %v3944_v60, 0  ;;  %3447 = vmatpush.bf16.xpose.msra.mxu2 %v3445_v33  ;;  %v3928_v33 = vpop.permute.xlu2 %3927 }
 0xbf9   :  { %3993 = vmatpush.bf16.xpose.msrb.mxu3 %v3991_v29 }
 0xbfe   :  { %v3940_v9 = vpop.permute.xlu1 %3939 }
 0xbff   :  { %v3396_v6 = vpop.permute.xlu0 %3395  ;;  %v3985_v25 = vsel %vm246_vm1, %v3940_v9, 0 }
 0xc00   :  { %v3442_v54 = vsel %vm246_vm1, %v3396_v6, 0  ;;  %v4419_v9 = vpop.permute.xlu2 %4418 }
 0xc01   :  { %3448 = vmatpush.bf16.xpose.msra.mxu2 %v3442_v54  ;;  %3994 = vmatpush.bf16.xpose.msrb.mxu3 %v3988_v36 }
 0xc06   :  { %v3392_v16 = vpop.permute.xlu1 %3391 }
 0xc07   :  { %v3938_v39 = vpop.permute.xlu0 %3937  ;;  %v3436_v2 = vsel %vm246_vm1, %v3392_v16, 0 }
 0xc08   :  { %v3982_v41 = vsel %vm246_vm1, %v3938_v39, 0 }
 0xc09   :  { %3449 = vmatpush.bf16.xpose.msra.mxu2 %v3439_v14  ;;  %3995 = vmatpush.bf16.xpose.msrb.mxu3 %v3985_v25  ;;  %v6334_v25 = vld [vmem:[%s9682_s2 + $0x10] sm:$0xff] }
 0xc0e   :  { %v3934_v53 = vpop.permute.xlu1 %3933 }
 0xc0f   :  { %v3390_v40 = vpop.permute.xlu0 %3389  ;;  %v3976_v55 = vsel %vm246_vm1, %v3934_v53, 0 }
 0xc10   :  { %v3433_v7 = vsel %vm246_vm1, %v3390_v40, 0 }
 0xc11   :  { %3450 = vmatpush.bf16.xpose.msra.mxu2 %v3436_v2  ;;  %3996 = vmatpush.bf16.xpose.msrb.mxu3 %v3982_v41  ;;  %v6335_v41 = vld [vmem:[%s9682_s2 + $0x18] sm:$0xff] }
 0xc16   :  { %v3386_v31 = vpop.permute.xlu1 %3385 }
 0xc17   :  { %v3932_v21 = vpop.permute.xlu0 %3931  ;;  %v3427_v47 = vsel %vm246_vm1, %v3386_v31, 0 }
 0xc18   :  { %v3973_v51 = vsel %vm246_vm1, %v3932_v21, 0 }
 0xc19   :  { %3451 = vmatpush.bf16.xpose.msra.mxu2 %v3433_v7  ;;  %3997 = vmatpush.bf16.xpose.msrb.mxu3 %v3979_v1  ;;  %v6336_v7 = vld [vmem:[%s9682_s2 + $0x20] sm:$0xff] }
 0xc1e   :  { %v3914_v5 = vpop.permute.xlu1 %3913 }
 0xc1f   :  { %v3384_v34 = vpop.permute.xlu0 %3383 }
 0xc20   :  { %v3424_v63 = vsel %vm246_vm1, %v3384_v34, 0 }
 0xc21   :  { %3452 = vmatpush.bf16.xpose.msra.mxu2 %v3430_v50  ;;  %3998 = vmatpush.bf16.xpose.msrb.mxu3 %v3976_v55  ;;  %v6337_v55 = vld [vmem:[%s9682_s2 + $0x28] sm:$0xff] }
 0xc26   :  { %v3920_v10 = vpop.permute.xlu1 %3919 }
 0xc27   :  { %v3918_v37 = vpop.permute.xlu0 %3917 }
 0xc29   :  { %3453 = vmatpush.bf16.xpose.msra.mxu2 %v3427_v47  ;;  %3999 = vmatpush.bf16.xpose.msrb.mxu3 %v3973_v51 }
 0xc2e   :  { %v3926_v28 = vpop.permute.xlu1 %3925 }
 0xc2f   :  { %v3924_v30 = vpop.permute.xlu0 %3923 }
 0xc31   :  { %3454 = vmatpush.bf16.xpose.msra.mxu2 %v3424_v63  ;;  %4000 = vmatpush.bf16.xpose.msrb.mxu3 %v3970_v59 }
 0xc36   :  { %v4423_v60 = vpop.permute.xlu1 %4422 }
 0xc37   :  { %v4425_v22 = vpop.permute.xlu0 %4424 }
 0xc38   :  { %5724 = vmatmul.msk.bf16.vlgmr.msra.gmra.mxu2 %vm246_vm1, %v8383_v32  ;;  %5732 = vmatmul.msk.bf16.vlgmr.msrb.gmra.mxu3 %vm246_vm1, %v3914_v5  ;;  %v4413_v32 = vpop.permute.xlu2 %4412 }
 0xc39   :  { %4434 = vmatpush.bf16.msra.mxu1 %v4425_v22 }
 0xc3d   :  { %4435 = vmatpush.bf16.msra.mxu1 %v4423_v60 }
 0xc3e   :  { %v4417_v6 = vpop.permute.xlu1 %4416 }
 0xc3f   :  { %v4421_v29 = vpop.permute.xlu0 %4420 }
 0xc41   :  { %4436 = vmatpush.bf16.msra.mxu1 %v4421_v29 }
 0xc45   :  { %4437 = vmatpush.bf16.msra.mxu1 %v4419_v9  ;;  %v6340_v9 = vld [vmem:[%s9682_s2 + $0x40] sm:$0xff] }
 0xc47   :  { %v4415_v36 = vpop.permute.xlu0 %4414 }
 0xc48   :  { %5725 = vmatmul.msk.bf16.gmra.mxu2 %vm246_vm1, %v8389_v52  ;;  %5733 = vmatmul.msk.bf16.gmra.mxu3 %vm246_vm1, %v3916_v46  ;;  %v6332_v52 = vld [vmem:[%s9682_s2] sm:$0xff] }
 0xc49   :  { %4438 = vmatpush.bf16.msra.mxu1 %v4417_v6 }
 0xc4d   :  { %4439 = vmatpush.bf16.msra.mxu1 %v4415_v36 }
 0xc51   :  { %4440 = vmatpush.bf16.msra.mxu1 %v4413_v32 }
 0xc58   :  { %5726 = vmatmul.msk.bf16.gmra.mxu2 %vm246_vm1, %v8377_v13  ;;  %5734 = vmatmul.msk.bf16.gmra.mxu3 %vm246_vm1, %v3918_v37 }
 0xc68   :  { %5727 = vmatmul.msk.bf16.gmra.mxu2 %vm246_vm1, %v8372_v15  ;;  %5735 = vmatmul.msk.bf16.gmra.mxu3 %vm246_vm1, %v3920_v10  ;;  %v6338_v10 = vld [vmem:[%s9682_s2 + $0x30] sm:$0xff] }
 0xc78   :  { %5728 = vmatmul.msk.bf16.gmra.mxu2 %vm246_vm1, %v8393_v23  ;;  %5736 = vmatmul.msk.bf16.gmra.mxu3 %vm246_vm1, %v3922_v8 }
 0xc88   :  { %5729 = vmatmul.msk.bf16.gmra.mxu2 %vm246_vm1, %v8368_v48  ;;  %5737 = vmatmul.msk.bf16.gmra.mxu3 %vm246_vm1, %v3924_v30 }
 0xc98   :  { %5730 = vmatmul.msk.bf16.gmra.mxu2 %vm246_vm1, %v8364_v58  ;;  %5738 = vmatmul.msk.bf16.gmra.mxu3 %vm246_vm1, %v3926_v28  ;;  %v6339_v28 = vld [vmem:[%s9682_s2 + $0x38] sm:$0xff] }
 0xca8   :  { %5731 = vmatmul.msk.bf16.gmra.mxu2 %vm246_vm1, %v8403_v18  ;;  %5739 = vmatmul.msk.bf16.gmra.mxu3 %vm246_vm1, %v3928_v33  ;;  %v6333_v18 = vld [vmem:[%s9682_s2 + $0x8] sm:$0xff] }
 0xcbb   :  { %v3456_v15 = vpop.f32.mrf.mxu2  ;;  %v4002_v13 = vpop.f32.mrf.mxu3 }
 0xcbc   :  { %v8496_v23 = vadd.f32 %v6332_v52, %v3456_v15  ;;  %v8498_v48 = vadd.f32 %v6332_v52, %v4002_v13  ;;  %v6341_v13 = vld [vmem:[%s9682_s2 + $0x48] sm:$0xff] }
 0xcbe   :  { %3496 = vmax.xlane.f32.xlu2 %v8496_v23  ;;  %4042 = vmax.xlane.f32.xlu0 %v8498_v48 }
 0xcc3   :  { %v3458_v58 = vpop.f32.mrf.mxu2  ;;  %v4004_v56 = vpop.f32.mrf.mxu3 }
 0xcc4   :  { %v8505_v54 = vadd.f32 %v6333_v18, %v3458_v58  ;;  %v8507_v16 = vadd.f32 %v6333_v18, %v4004_v56  ;;  %v8586_v18 = vld [vmem:[%s9682_s2 + $0x50] sm:$0xff] }
 0xcc6   :  { %4044 = vmax.xlane.f32.xlu1 %v8507_v16  ;;  %3498 = vmax.xlane.f32.xlu0 %v8505_v54 }
 0xccb   :  { %v3461_v39 = vpop.f32.mrf.mxu2  ;;  %v4007_v14 = vpop.f32.mrf.mxu3 }
 0xccc   :  { %v8514_v35 = vadd.f32 %v6334_v25, %v3461_v39  ;;  %v8516_v53 = vadd.f32 %v6334_v25, %v4007_v14  ;;  %v6343_v25 = vld [vmem:[%s9682_s2 + $0x58] sm:$0xff] }
 0xcce   :  { %3500 = vmax.xlane.f32.xlu0 %v8514_v35  ;;  %4046 = vmax.xlane.f32.xlu1 %v8516_v53 }
 0xcd3   :  { %v3463_v40 = vpop.f32.mrf.mxu2  ;;  %v4009_v2 = vpop.f32.mrf.mxu3 }
 0xcd4   :  { %v8523_v0 = vadd.f32 %v6335_v41, %v3463_v40  ;;  %v8525_v31 = vadd.f32 %v6335_v41, %v4009_v2 }
 0xcd6   :  { %4048 = vmax.xlane.f32.xlu2 %v8525_v31  ;;  %3502 = vmax.xlane.f32.xlu1 %v8523_v0 }
 0xcdb   :  { %v3466_v21 = vpop.f32.mrf.mxu2  ;;  %v4012_v1 = vpop.f32.mrf.mxu3 }
 0xcdc   :  { %v8532_v26 = vadd.f32 %v6336_v7, %v3466_v21  ;;  %v8534_v5 = vadd.f32 %v6336_v7, %v4012_v1 }
 0xcde   :  { %4050 = vmax.xlane.f32.xlu2 %v8534_v5  ;;  %3504 = vmax.xlane.f32.xlu1 %v8532_v26 }
 0xce3   :  { %v3468_v34 = vpop.f32.mrf.mxu2  ;;  %v4014_v50 = vpop.f32.mrf.mxu3 }
 0xce4   :  { %v8541_v37 = vadd.f32 %v6337_v55, %v3468_v34  ;;  %v8543_v46 = vadd.f32 %v6337_v55, %v4014_v50 }
 0xce6   :  { %4052 = vmax.xlane.f32.xlu0 %v8543_v46  ;;  %3506 = vmax.xlane.f32.xlu2 %v8541_v37 }
 0xceb   :  { %v3471_v47 = vpop.f32.mrf.mxu2  ;;  %v4017_v51 = vpop.f32.mrf.mxu3 }
 0xcec   :  { %v8550_v30 = vadd.f32 %v6338_v10, %v4017_v51  ;;  %v8553_v8 = vadd.f32 %v6338_v10, %v3471_v47 }
 0xcee   :  { %4054 = vmax.xlane.f32.xlu2 %v8550_v30 }
 0xcf3   :  { %v3473_v59 = vpop.f32.mrf.mxu2  ;;  %v4019_v63 = vpop.f32.mrf.mxu3 }
 0xcf4   :  { %v8558_v22 = vadd.f32 %v6339_v28, %v3473_v59  ;;  %v8562_v29 = vadd.f32 %v6339_v28, %v4019_v63 }
 0xcf6   :  { %3508 = vmax.xlane.f32.xlu2 %v8553_v8  ;;  %3510 = vmax.xlane.f32.xlu1 %v8558_v22 }
 0xcfb   :  { %v3476_v33 = vpop.f32.mrf.mxu2  ;;  %v4022_v60 = vpop.f32.mrf.mxu3 }
 0xcfc   :  { %v8567_v6 = vadd.f32 %v6340_v9, %v3476_v33  ;;  %v8569_v36 = vadd.f32 %v6340_v9, %v4022_v60 }
 0xcfe   :  { %4056 = vmax.xlane.f32.xlu2 %v8562_v29  ;;  %3512 = vmax.xlane.f32.xlu1 %v8567_v6 }
 0xcff   :  { %4058 = vmax.xlane.f32.xlu0 %v8569_v36 }
 0xd03   :  { %v3478_v32 = vpop.f32.mrf.mxu2  ;;  %v4024_v15 = vpop.f32.mrf.mxu3 }
 0xd04   :  { %v8577_v52 = vadd.f32 %v6341_v13, %v3478_v32  ;;  %v8579_v58 = vadd.f32 %v6341_v13, %v4024_v15 }
 0xd06   :  { %4060 = vmax.xlane.f32.xlu1 %v8579_v58 }
 0xd07   :  { %3514 = vmax.xlane.f32.xlu0 %v8577_v52 }
 0xd0b   :  { %v4027_v56 = vpop.f32.mrf.mxu3  ;;  %v8607_v59 = vpop.f32.mrf.mxu2 }
 0xd0c   :  { %v8589_v39 = vadd.f32 %v8586_v18, %v4027_v56 }
 0xd0e   :  { %4062 = vmax.xlane.f32.xlu2 %v8589_v39 }
 0xd13   :  { %v4029_v14 = vpop.f32.mrf.mxu3  ;;  %v3483_v13 = vpop.f32.mrf.mxu2 }
 0xd14   :  { %v8595_v40 = vadd.f32 %v6343_v25, %v4029_v14 }
 0xd16   :  { %4064 = vmax.xlane.f32.xlu0 %v8595_v40 }
 0xd1b   :  { %v4032_v56 = vpop.f32.mrf.mxu3 }
 0xd1f   :  { %4410 = vrot.lane.b32.xlu1 %v8316_v24, %s6377_s25 }
 0xd31   :  { %v4043_v2 = vpop.xlane.xlu0 %4042  ;;  %v3497_v21 = vpop.xlane.xlu2 %3496 }
 0xd32   :  { %v4074_v41 = vsub.f32 %v8498_v48, %v4043_v2  ;;  %v3528_v7 = vsub.f32 %v8496_v23, %v3497_v21 }
 0xd34   :  { %v4090_v1 = vmul.f32 1.442695, %v4074_v41  ;;  %v3544_v34 = vmul.f32 1.442695, %v3528_v7  ;;  %v8627_v7 = vadd.f32 %v6343_v25, %v3483_v13  ;;  %v6344_v25 = vld [vmem:[%s9682_s2 + $0x68] sm:$0xff] }
 0xd36   :  { %6140 = vpow2.f32 %v4090_v1 }
 0xd37   :  { %6142 = vpow2.f32 %v3544_v34 }
 0xd39   :  { %v4045_v50 = vpop.xlane.xlu1 %4044  ;;  %v3499_v55 = vpop.xlane.xlu0 %3498 }
 0xd3a   :  { %v4075_v47 = vsub.f32 %v8507_v16, %v4045_v50  ;;  %v3529_v24 = vsub.f32 %v8505_v54, %v3499_v55  ;;  %v3486_v55 = vpop.f32.mrf.mxu2 }
 0xd3c   :  { %v8603_v51 = vpop.eup %6140  ;;  %v4092_v10 = vmul.f32 1.442695, %v4075_v47  ;;  %v3546_v63 = vmul.f32 1.442695, %v3529_v24 }
 0xd3d   :  { %4122 = vadd.xlane.f32.xlu2 %v8603_v51  ;;  %v8610_v28 = vpop.eup %6142 }
 0xd3e   :  { %6144 = vpow2.f32 %v4092_v10 }
 0xd3f   :  { %6146 = vpow2.f32 %v3546_v63 }
 0xd41   :  { %v4047_v48 = vpop.xlane.xlu1 %4046  ;;  %v3501_v33 = vpop.xlane.xlu0 %3500 }
 0xd42   :  { %v4076_v23 = vsub.f32 %v8516_v53, %v4047_v48  ;;  %v3530_v9 = vsub.f32 %v8514_v35, %v3501_v33  ;;  %v3488_v33 = vpop.f32.mrf.mxu2 }
 0xd44   :  { %v8612_v60 = vpop.eup %6144  ;;  %v4094_v16 = vmul.f32 1.442695, %v4076_v23  ;;  %v3548_v32 = vmul.f32 1.442695, %v3530_v9 }
 0xd45   :  { %4124 = vadd.xlane.f32.xlu0 %v8612_v60  ;;  %3576 = vadd.xlane.f32.xlu2 %v8610_v28  ;;  %v8617_v15 = vpop.eup %6146 }
 0xd46   :  { %6148 = vpow2.f32 %v4094_v16 }
 0xd47   :  { %6150 = vpow2.f32 %v3548_v32 }
 0xd49   :  { %v4049_v54 = vpop.xlane.xlu2 %4048  ;;  %v3503_v41 = vpop.xlane.xlu1 %3502 }
 0xd4a   :  { %v4077_v14 = vsub.f32 %v8525_v31, %v4049_v54  ;;  %v3531_v50 = vsub.f32 %v8523_v0, %v3503_v41  ;;  %v4034_v31 = vpop.f32.mrf.mxu3 }
 0xd4b   :  { %v8638_v0 = vadd.f32 %v6344_v25, %v4034_v31 }
 0xd4c   :  { %v8619_v53 = vpop.eup %6148  ;;  %v4096_v21 = vmul.f32 1.442695, %v4077_v14  ;;  %v3550_v47 = vmul.f32 1.442695, %v3531_v50  ;;  %v8650_v14 = vadd.f32 %v6344_v25, %v3488_v33 }
 0xd4d   :  { %3578 = vadd.xlane.f32.xlu0 %v8617_v15  ;;  %4126 = vadd.xlane.f32.xlu2 %v8619_v53  ;;  %v8625_v1 = vpop.eup %6150 }
 0xd4e   :  { %6152 = vpow2.f32 %v4096_v21 }
 0xd51   :  { %v4051_v2 = vpop.xlane.xlu2 %4050  ;;  %v3505_v16 = vpop.xlane.xlu1 %3504 }
 0xd52   :  { %v4078_v35 = vsub.f32 %v8534_v5, %v4051_v2  ;;  %v4037_v2 = vpop.f32.mrf.mxu3 }
 0xd54   :  { %v4098_v34 = vmul.f32 1.442695, %v4078_v35  ;;  %v8633_v48 = vpop.eup %6152  ;;  %v8658_v35 = vadd.f32 %v8586_v18, %v8607_v59  ;;  %v6346_v59 = vld [vmem:[%s9682_s2 + $0x60] sm:$0xff] }
 0xd55   :  { %3580 = vadd.xlane.f32.xlu0 %v8625_v1  ;;  %3518 = vmax.xlane.f32.xlu2 %v8627_v7 }
 0xd56   :  { %6154 = vpow2.f32 %v4098_v34  ;;  %v6345_v34 = vld [vmem:[%s9682_s2 + $0x70] sm:$0xff] }
 0xd57   :  { %6156 = vpow2.f32 %v3550_v47  ;;  %v8663_v50 = vadd.f32 %v6345_v34, %v4037_v2  ;;  %v8682_v2 = vadd.f32 %v6346_v59, %v3486_v55 }
 0xd59   :  { %v4053_v10 = vpop.xlane.xlu0 %4052  ;;  %v3507_v24 = vpop.xlane.xlu2 %3506 }
 0xd5a   :  { %v4079_v5 = vsub.f32 %v8543_v46, %v4053_v10  ;;  %v3533_v46 = vsub.f32 %v8541_v37, %v3507_v24  ;;  %v8674_v24 = vadd.f32 %v6346_v59, %v4032_v56 }
 0xd5c   :  { %v4100_v63 = vmul.f32 1.442695, %v4079_v5  ;;  %v8640_v23 = vpop.eup %6154  ;;  %v3554_v32 = vmul.f32 1.442695, %v3533_v46 }
 0xd5d   :  { %4128 = vadd.xlane.f32.xlu0 %v8633_v48  ;;  %4068 = vmax.xlane.f32.xlu2 %v8638_v0  ;;  %v8646_v54 = vpop.eup %6156 }
 0xd5e   :  { %6158 = vpow2.f32 %v4100_v63  ;;  %4130 = vadd.xlane.f32.xlu1 %v8640_v23  ;;  %v3532_v63 = vsub.f32 %v8532_v26, %v3505_v16 }
 0xd5f   :  { %6160 = vpow2.f32 %v3554_v32 }
 0xd60   :  { %v3552_v33 = vmul.f32 1.442695, %v3532_v63  ;;  %v3491_v63 = vpop.f32.mrf.mxu2 }
 0xd61   :  { %v4055_v9 = vpop.xlane.xlu2 %4054 }
 0xd62   :  { %v4080_v56 = vsub.f32 %v8550_v30, %v4055_v9  ;;  %v6347_v30 = vld [vmem:[%s9682_s2 + $0x78] sm:$0xff] }
 0xd64   :  { %v8648_v13 = vpop.eup %6158  ;;  %v4102_v16 = vmul.f32 1.442695, %v4080_v56 }
 0xd65   :  { %3582 = vadd.xlane.f32.xlu0 %v8646_v54  ;;  %4132 = vadd.xlane.f32.xlu2 %v8648_v13  ;;  %v8665_v47 = vpop.eup %6160 }
 0xd66   :  { %3522 = vmax.xlane.f32.xlu1 %v8650_v14 }
 0xd69   :  { %v3511_v41 = vpop.xlane.xlu1 %3510  ;;  %v3509_v37 = vpop.xlane.xlu2 %3508 }
 0xd6a   :  { %v3534_v21 = vsub.f32 %v8553_v8, %v3509_v37 }
 0xd6c   :  { %v3556_v31 = vmul.f32 1.442695, %v3534_v21 }
 0xd6d   :  { %3516 = vmax.xlane.f32.xlu0 %v8658_v35  ;;  %3586 = vadd.xlane.f32.xlu2 %v8665_v47 }
 0xd6e   :  { %4070 = vmax.xlane.f32.xlu1 %v8663_v50  ;;  %6162 = vpow2.f32 %v3556_v31 }
 0xd71   :  { %v3513_v8 = vpop.xlane.xlu1 %3512  ;;  %v4057_v10 = vpop.xlane.xlu2 %4056 }
 0xd72   :  { %v4081_v18 = vsub.f32 %v8562_v29, %v4057_v10  ;;  %v4059_v46 = vpop.xlane.xlu0 %4058  ;;  %v3536_v26 = vsub.f32 %v8567_v6, %v3513_v8  ;;  %v4039_v10 = vpop.f32.mrf.mxu3  ;;  %v3535_v6 = vsub.f32 %v8558_v22, %v3511_v41  ;;  %v8709_v41 = vadd.f32 %v6345_v34, %v3491_v63 }
 0xd73   :  { %v8697_v9 = vadd.f32 %v6347_v30, %v4039_v10  ;;  %v3493_v10 = vpop.f32.mrf.mxu2 }
 0xd74   :  { %v4104_v5 = vmul.f32 1.442695, %v4081_v18  ;;  %v8676_v25 = vpop.eup %6162  ;;  %v3560_v18 = vmul.f32 1.442695, %v3536_v26  ;;  %v3558_v59 = vmul.f32 1.442695, %v3535_v6  ;;  %v8728_v6 = vadd.f32 %v6347_v30, %v3493_v10 }
 0xd75   :  { %4066 = vmax.xlane.f32.xlu0 %v8674_v24  ;;  %3588 = vadd.xlane.f32.xlu2 %v8676_v25 }
 0xd76   :  { %6164 = vpow2.f32 %v4104_v5 }
 0xd77   :  { %6166 = vpow2.f32 %v3552_v33 }
 0xd79   :  { %v4061_v32 = vpop.xlane.xlu1 %4060 }
 0xd7a   :  { %v4083_v29 = vsub.f32 %v8579_v58, %v4061_v32  ;;  %v3515_v31 = vpop.xlane.xlu0 %3514 }
 0xd7b   :  { %v3537_v8 = vsub.f32 %v8577_v52, %v3515_v31  ;;  %v4082_v52 = vsub.f32 %v8569_v36, %v4059_v46 }
 0xd7c   :  { %v4108_v37 = vmul.f32 1.442695, %v4083_v29  ;;  %v8686_v21 = vpop.eup %6164 }
 0xd7d   :  { %3520 = vmax.xlane.f32.xlu0 %v8682_v2  ;;  %4136 = vadd.xlane.f32.xlu2 %v8686_v21  ;;  %v8690_v58 = vpop.eup %6166  ;;  %v4106_v56 = vmul.f32 1.442695, %v4082_v52 }
 0xd7e   :  { %6168 = vpow2.f32 %v4108_v37  ;;  %v3562_v37 = vmul.f32 1.442695, %v3537_v8 }
 0xd7f   :  { %6170 = vpow2.f32 %v4102_v16 }
 0xd80   :  { %6172 = vpow2.f32 %v3560_v18 }
 0xd81   :  { %6174 = vpow2.f32 %v3558_v59  ;;  %v4063_v36 = vpop.xlane.xlu2 %4062 }
 0xd82   :  { %v4084_v31 = vsub.f32 %v8589_v39, %v4063_v36 }
 0xd84   :  { %v8692_v55 = vpop.eup %6168  ;;  %v4110_v18 = vmul.f32 1.442695, %v4084_v31 }
 0xd85   :  { %3584 = vadd.xlane.f32.xlu0 %v8690_v58  ;;  %4140 = vadd.xlane.f32.xlu1 %v8692_v55  ;;  %v8705_v32 = vpop.eup %6170 }
 0xd86   :  { %4072 = vmax.xlane.f32.xlu2 %v8697_v9  ;;  %v8707_v29 = vpop.eup %6172 }
 0xd87   :  { %v8715_v26 = vpop.eup %6174 }
 0xd89   :  { %v4065_v5 = vpop.xlane.xlu0 %4064 }
 0xd8a   :  { %v4085_v33 = vsub.f32 %v8595_v40, %v4065_v5 }
 0xd8c   :  { %v4112_v22 = vmul.f32 1.442695, %v4085_v33 }
 0xd8d   :  { %3592 = vadd.xlane.f32.xlu1 %v8707_v29  ;;  %4134 = vadd.xlane.f32.xlu0 %v8705_v32 }
 0xd8e   :  { %6176 = vpow2.f32 %v4112_v22  ;;  %3524 = vmax.xlane.f32.xlu2 %v8709_v41 }
 0xd8f   :  { %6178 = vpow2.f32 %v3562_v37 }
 0xd90   :  { %6180 = vpow2.f32 %v4106_v56 }
 0xd91   :  { %v4411_v40 = vpop.permute.xlu1 %4410  ;;  %6182 = vpow2.f32 %v4110_v18 }
 0xd92   :  { %4441 = vmatpush.bf16.msra.mxu1 %v4411_v40 }
 0xd94   :  { %v8717_v16 = vpop.eup %6176 }
 0xd95   :  { %4144 = vadd.xlane.f32.xlu1 %v8717_v16  ;;  %3590 = vadd.xlane.f32.xlu0 %v8715_v26  ;;  %v8721_v34 = vpop.eup %6178 }
 0xd96   :  { %3594 = vadd.xlane.f32.xlu2 %v8721_v34  ;;  %v8724_v46 = vpop.eup %6180 }
 0xd97   :  { %v8731_v8 = vpop.eup %6182 }
 0xd9d   :  { %4138 = vadd.xlane.f32.xlu0 %v8724_v46 }
 0xda5   :  { %3526 = vmax.xlane.f32.xlu0 %v8728_v6 }
 0xdad   :  { %4142 = vadd.xlane.f32.xlu0 %v8731_v8 }
 0xdb0   :  { %v4123_v59 = vpop.xlane.xlu2 %4122 }
 0xdb1   :  { %6184 = vrcp.f32 %v4123_v59  ;;  %v4165_v31 = vand.u32 2147483648, %v4123_v59  ;;  %vm4159_vm6 = vweird.f32 %v4123_v59  ;;  %v4163_v43 = vand.u32 2147483647, %v4123_v59 }
 0xdb3   :  { %v4166_v27 = vor.u32 1.1754944e-38, %v4165_v31  ;;  %vm4164_vm9 = vcmp.eq.f32.partialorder %v4163_v43, 8.507059e+37 }
 0xdb7   :  { %v6185_v5 = vpop.eup %6184 }
 0xdb8   :  { %v4155_v63 = vmul.f32 %v6185_v5, %v4123_v59  ;;  %v4125_v33 = vpop.xlane.xlu0 %4124  ;;  %v8734_v37 = vpop.xlane.xlu2 %3576  ;;  %vm4160_vm5 = vweird.f32 %v6185_v5 }
 0xdb9   :  { %6186 = vrcp.f32 %v4125_v33  ;;  %vm4161_vm7 = vmor %vm4159_vm6, %vm4160_vm5  ;;  %v4179_v42 = vand.u32 2147483648, %v4125_v33  ;;  %vm4173_vm10 = vweird.f32 %v4125_v33  ;;  %v3619_v43 = vand.u32 2147483648, %v8734_v37 }
 0xdba   :  { %v4156_v39 = vsub.f32 1.0, %v4155_v63  ;;  %6188 = vrcp.f32 %v8734_v37  ;;  %vm3613_vm14 = vweird.f32 %v8734_v37 }
 0xdbb   :  { %v4180_v4 = vor.u32 1.1754944e-38, %v4179_v42 }
 0xdbc   :  { %v4157_v30 = vmul.f32 %v6185_v5, %v4156_v39 }
 0xdbe   :  { %v4158_v40 = vadd.f32 %v6185_v5, %v4157_v30  ;;  %v4177_v30 = vand.u32 2147483647, %v4125_v33 }
 0xdbf   :  { %v6187_v22 = vpop.eup %6186 }
 0xdc0   :  { %v8737_v52 = vpop.eup %6188  ;;  %v4169_v56 = vmul.f32 %v6187_v22, %v4125_v33  ;;  %v3579_v36 = vpop.xlane.xlu0 %3578  ;;  %v4162_v3 = vsel %vm4161_vm7, %v6185_v5, %v4158_v40  ;;  %vm4174_vm8 = vweird.f32 %v6187_v22  ;;  %vm4178_vm12 = vcmp.eq.f32.partialorder %v4177_v30, 8.507059e+37 }
 0xdc1   :  { %v3609_v10 = vmul.f32 %v8737_v52, %v8734_v37  ;;  %6190 = vrcp.f32 %v3579_v36  ;;  %v8741_v18 = vpop.xlane.xlu2 %4126  ;;  %v4167_v44 = vsel %vm4164_vm9, %v4166_v27, %v4162_v3  ;;  %vm4175_vm11 = vmor %vm4173_vm10, %vm4174_vm8  ;;  %vm3614_vm13 = vweird.f32 %v8737_v52 }
 0xdc2   :  { %v4170_v63 = vsub.f32 1.0, %v4169_v56  ;;  %6192 = vrcp.f32 %v8741_v18  ;;  %v4378_v33 = vmul.f32 %v8603_v51, %v4167_v44  ;;  %v3631_v42 = vand.u32 2147483647, %v3579_v36  ;;  %vm8755_vm15 = vmor %vm3613_vm14, %vm3614_vm13 }
 0xdc3   :  { %v3610_v39 = vsub.f32 1.0, %v3609_v10  ;;  %vm3627_vm2 = vweird.f32 %v3579_v36  ;;  %vm4187_vm7 = vweird.f32 %v8741_v18 }
 0xdc4   :  { %v4171_v20 = vmul.f32 %v6187_v22, %v4170_v63  ;;  %v3620_v63 = vor.u32 1.1754944e-38, %v3619_v43  ;;  %vm3632_vm5 = vcmp.eq.f32.partialorder %v3631_v42, 8.507059e+37 }
 0xdc5   :  { %v3611_v62 = vmul.f32 %v8737_v52, %v3610_v39 }
 0xdc6   :  { %v4172_v17 = vadd.f32 %v6187_v22, %v4171_v20 }
 0xdc7   :  { %v6191_v57 = vpop.eup %6190  ;;  %v3612_v40 = vadd.f32 %v8737_v52, %v3611_v62 }
 0xdc8   :  { %v4176_v59 = vsel %vm4175_vm11, %v6187_v22, %v4172_v17  ;;  %v3623_v56 = vmul.f32 %v6191_v57, %v3579_v36  ;;  %v8745_v10 = vpop.xlane.xlu0 %3580  ;;  %v3617_v17 = vand.u32 2147483647, %v8734_v37  ;;  %vm3628_vm0 = vweird.f32 %v6191_v57  ;;  %v8760_v51 = vpop.eup %6192 }
 0xdc9   :  { %v4181_v5 = vsel %vm4178_vm12, %v4180_v4, %v4176_v59  ;;  %v3519_v20 = vpop.xlane.xlu2 %3518  ;;  %6194 = vrcp.f32 %v8745_v10  ;;  %v3633_v4 = vand.u32 2147483648, %v3579_v36  ;;  %vm3629_vm4 = vmor %vm3627_vm2, %vm3628_vm0  ;;  %vm4188_vm6 = vweird.f32 %v8760_v51 }
 0xdca   :  { %v4379_v27 = vmul.f32 %v8612_v60, %v4181_v5  ;;  %v3624_v3 = vsub.f32 1.0, %v3623_v56  ;;  %v3539_v31 = vsub.f32 %v8627_v7, %v3519_v20  ;;  %v3616_v60 = vsel %vm8755_vm15, %v8737_v52, %v3612_v40  ;;  %vm8802_vm11 = vmor %vm4187_vm7, %vm4188_vm6 }
 0xdcb   :  { %vm3618_vm3 = vcmp.eq.f32.partialorder %v3617_v17, 8.507059e+37  ;;  %v3634_v30 = vor.u32 1.1754944e-38, %v3633_v4  ;;  %v4183_v7 = vmul.f32 %v8760_v51, %v8741_v18  ;;  %vm3641_vm9 = vweird.f32 %v8745_v10 }
 0xdcc   :  { %v3625_v22 = vmul.f32 %v6191_v57, %v3624_v3  ;;  %v4394_v44 = vpack.c.bf16 %v4379_v27, %v4378_v33  ;;  %v3566_v37 = vmul.f32 1.442695, %v3539_v31  ;;  %v3621_v56 = vsel %vm3618_vm3, %v3620_v63, %v3616_v60 }
 0xdcd   :  { %v3832_v40 = vmul.f32 %v8610_v28, %v3621_v56  ;;  %v4184_v27 = vsub.f32 1.0, %v4183_v7  ;;  %v4191_v31 = vand.u32 2147483647, %v8741_v18 }
 0xdce   :  { %v3626_v39 = vadd.f32 %v6191_v57, %v3625_v22  ;;  %4442 = vmatmul.bf16.vlgmr.msra.gmra.mxu1 %v4394_v44  ;;  %6196 = vpow2.f32 %v3566_v37  ;;  %v4193_v44 = vand.u32 2147483648, %v8741_v18  ;;  %v3645_v37 = vand.u32 2147483647, %v8745_v10 }
 0xdcf   :  { %v8765_v59 = vpop.eup %6194  ;;  %v4185_v62 = vmul.f32 %v8760_v51, %v4184_v27  ;;  %vm8797_vm8 = vcmp.eq.f32.partialorder %v4191_v31, 8.507059e+37  ;;  %v3647_v27 = vand.u32 2147483648, %v8745_v10 }
 0xdd0   :  { %v3630_v5 = vsel %vm3629_vm4, %v6191_v57, %v3626_v39  ;;  %v4129_v20 = vpop.xlane.xlu0 %4128  ;;  %v3637_v43 = vmul.f32 %v8765_v59, %v8745_v10  ;;  %vm3642_vm12 = vweird.f32 %v8765_v59  ;;  %vm8809_vm13 = vcmp.eq.f32.partialorder %v3645_v37, 8.507059e+37 }
 0xdd1   :  { %v3635_v33 = vsel %vm3632_vm5, %v3634_v30, %v3630_v5  ;;  %v8769_v52 = vpop.xlane.xlu2 %4068  ;;  %6198 = vrcp.f32 %v4129_v20  ;;  %v8775_v3 = vpop.xlane.xlu1 %4130  ;;  %v4186_v39 = vadd.f32 %v8760_v51, %v4185_v62  ;;  %v4205_v56 = vand.u32 2147483647, %v4129_v20  ;;  %vm8836_vm2 = vmor %vm3641_vm9, %vm3642_vm12 }
 0xdd2   :  { %v3833_v36 = vmul.f32 %v8617_v15, %v3635_v33  ;;  %v3638_v42 = vsub.f32 1.0, %v3637_v43  ;;  %6200 = vrcp.f32 %v8775_v3  ;;  %v4207_v5 = vand.u32 2147483648, %v4129_v20 }
 0xdd3   :  { %vm4201_vm14 = vweird.f32 %v4129_v20  ;;  %v4190_v31 = vsel %vm8802_vm11, %v8760_v51, %v4186_v39  ;;  %vm8823_vm0 = vcmp.eq.f32.partialorder %v4205_v56, 8.507059e+37  ;;  %v4087_v39 = vsub.f32 %v8638_v0, %v8769_v52 }
 0xdd4   :  { %v3848_v57 = vpack.c.bf16 %v3833_v36, %v3832_v40  ;;  %v8777_v17 = vpop.eup %6196  ;;  %v3639_v60 = vmul.f32 %v8765_v59, %v3638_v42  ;;  %v4194_v36 = vor.u32 1.1754944e-38, %v4193_v44  ;;  %v4208_v37 = vor.u32 1.1754944e-38, %v4207_v5 }
 0xdd5   :  { %3598 = vadd.xlane.f32.xlu0 %v8777_v17  ;;  %vm4215_vm11 = vweird.f32 %v8775_v3 }
 0xdd6   :  { %3864 = vmatmul.bf16.vlgmr.msra.gmra.mxu0 %v3848_v57  ;;  %v3640_v18 = vadd.f32 %v8765_v59, %v3639_v60  ;;  %v4195_v10 = vsel %vm8797_vm8, %v4194_v36, %v4190_v31 }
 0xdd7   :  { %v6199_v4 = vpop.eup %6198  ;;  %v4380_v33 = vmul.f32 %v8619_v53, %v4195_v10 }
 0xdd8   :  { %v8782_v15 = vpop.xlane.xlu0 %3582  ;;  %v4197_v28 = vmul.f32 %v6199_v4, %v4129_v20  ;;  %v8795_v7 = vpop.eup %6200  ;;  %vm4202_vm10 = vweird.f32 %v6199_v4  ;;  %v3644_v61 = vsel %vm8836_vm2, %v8765_v59, %v3640_v18 }
 0xdd9   :  { %6202 = vrcp.f32 %v8782_v15  ;;  %v8785_v22 = vpop.xlane.xlu2 %4132  ;;  %vm8819_vm15 = vmor %vm4201_vm14, %vm4202_vm10  ;;  %v4211_v20 = vmul.f32 %v8795_v7, %v8775_v3  ;;  %v3661_v43 = vand.u32 2147483648, %v8782_v15  ;;  %v3659_v0 = vand.u32 2147483647, %v8782_v15 }
 0xdda   :  { %v4198_v63 = vsub.f32 1.0, %v4197_v28  ;;  %6204 = vrcp.f32 %v8785_v22  ;;  %vm3655_vm4 = vweird.f32 %v8782_v15  ;;  %vm4216_vm8 = vweird.f32 %v8795_v7 }
 0xddb   :  { %v4212_v11 = vsub.f32 1.0, %v4211_v20  ;;  %v3662_v36 = vor.u32 1.1754944e-38, %v3661_v43  ;;  %vm3660_vm6 = vcmp.eq.f32.partialorder %v3659_v0, 8.507059e+37  ;;  %vm4229_vm9 = vweird.f32 %v8785_v22  ;;  %vm8896_vm12 = vmor %vm4215_vm11, %vm4216_vm8 }
 0xddc   :  { %v4199_v30 = vmul.f32 %v6199_v4, %v4198_v63 }
 0xddd   :  { %v4213_v63 = vmul.f32 %v8795_v7, %v4212_v11 }
 0xdde   :  { %v4200_v57 = vadd.f32 %v6199_v4, %v4199_v30  ;;  %v3523_v30 = vpop.xlane.xlu1 %3522 }
 0xddf   :  { %v6203_v40 = vpop.eup %6202  ;;  %v3541_v20 = vsub.f32 %v8650_v14, %v3523_v30  ;;  %v4233_v14 = vand.u32 2147483647, %v8785_v22 }
 0xde0   :  { %v3651_v62 = vmul.f32 %v6203_v40, %v8782_v15  ;;  %v3517_v28 = vpop.xlane.xlu0 %3516  ;;  %v8817_v44 = vpop.eup %6204  ;;  %vm3656_vm3 = vweird.f32 %v6203_v40 }
 0xde1   :  { %v3538_v45 = vsub.f32 %v8658_v35, %v3517_v28  ;;  %v8830_v12 = vpop.xlane.xlu2 %3586  ;;  %v4225_v5 = vmul.f32 %v8817_v44, %v8785_v22  ;;  %v4204_v35 = vsel %vm8819_vm15, %v6199_v4, %v4200_v57  ;;  %v4116_v57 = vmul.f32 1.442695, %v4087_v39  ;;  %vm3657_vm5 = vmor %vm3655_vm4, %vm3656_vm3 }
 0xde2   :  { %v3652_v56 = vsub.f32 1.0, %v3651_v62  ;;  %v3648_v62 = vor.u32 1.1754944e-38, %v3647_v27  ;;  %v4209_v4 = vsel %vm8823_vm0, %v4208_v37, %v4204_v35  ;;  %vm4230_vm7 = vweird.f32 %v8817_v44 }
 0xde3   :  { %v3564_v28 = vmul.f32 1.442695, %v3538_v45  ;;  %v4226_v52 = vsub.f32 1.0, %v4225_v5  ;;  %v4381_v18 = vmul.f32 %v8633_v48, %v4209_v4  ;;  %v4221_v39 = vand.u32 2147483648, %v8775_v3  ;;  %vm8882_vm10 = vmor %vm4229_vm9, %vm4230_vm7 }
 0xde4   :  { %v3653_v49 = vmul.f32 %v6203_v40, %v3652_v56  ;;  %v3649_v27 = vsel %vm8809_vm13, %v3648_v62, %v3644_v61  ;;  %v4219_v5 = vand.u32 2147483647, %v8775_v3  ;;  %v3570_v35 = vmul.f32 1.442695, %v3541_v20 }
 0xde5   :  { %6206 = vpow2.f32 %v3564_v28  ;;  %v4227_v59 = vmul.f32 %v8817_v44, %v4226_v52  ;;  %v4395_v37 = vpack.c.bf16 %v4381_v18, %v4380_v33  ;;  %v3834_v51 = vmul.f32 %v8625_v1, %v3649_v27 }
 0xde6   :  { %v3654_v45 = vadd.f32 %v6203_v40, %v3653_v49  ;;  %6208 = vpow2.f32 %v4116_v57  ;;  %v4214_v1 = vadd.f32 %v8795_v7, %v4213_v63  ;;  %vm4234_vm13 = vcmp.eq.f32.partialorder %v4233_v14, 8.507059e+37 }
 0xde7   :  { %v4228_v61 = vadd.f32 %v8817_v44, %v4227_v59  ;;  %4447 = vmatmul.bf16.gmra.mxu1 %v4395_v37  ;;  %6210 = vrcp.f32 %v8830_v12  ;;  %vm4220_vm14 = vcmp.eq.f32.partialorder %v4219_v5, 8.507059e+37  ;;  %v3687_v14 = vand.u32 2147483647, %v8830_v12 }
 0xde8   :  { %v4067_v31 = vpop.xlane.xlu0 %4066  ;;  %v3658_v60 = vsel %vm3657_vm5, %v6203_v40, %v3654_v45  ;;  %v4071_v40 = vpop.xlane.xlu1 %4070  ;;  %v4218_v3 = vsel %vm8896_vm12, %v8795_v7, %v4214_v1  ;;  %vm3683_vm0 = vweird.f32 %v8830_v12 }
 0xde9   :  { %v4086_v49 = vsub.f32 %v8674_v24, %v4067_v31  ;;  %v8863_v15 = vpop.xlane.xlu2 %3588  ;;  %v3663_v53 = vsel %vm3660_vm6, %v3662_v36, %v3658_v60  ;;  %v4235_v24 = vand.u32 2147483648, %v8785_v22  ;;  %v4088_v56 = vsub.f32 %v8663_v50, %v4071_v40 }
 0xdea   :  { %v3835_v42 = vmul.f32 %v8646_v54, %v3663_v53  ;;  %v4232_v22 = vsel %vm8882_vm10, %v8817_v44, %v4228_v61  ;;  %v4222_v44 = vor.u32 1.1754944e-38, %v4221_v39  ;;  %vm8963_vm3 = vcmp.eq.f32.partialorder %v3687_v14, 8.507059e+37 }
 0xdeb   :  { %v8867_v48 = vpop.eup %6206  ;;  %v4114_v11 = vmul.f32 1.442695, %v4086_v49  ;;  %v4236_v10 = vor.u32 1.1754944e-38, %v4235_v24  ;;  %v4118_v62 = vmul.f32 1.442695, %v4088_v56 }
 0xdec   :  { %3596 = vadd.xlane.f32.xlu2 %v8867_v48  ;;  %v3849_v30 = vpack.c.bf16 %v3835_v42, %v3834_v51  ;;  %v8892_v43 = vpop.eup %6208 }
 0xded   :  { %6212 = vpow2.f32 %v4114_v11  ;;  %v8904_v52 = vpop.eup %6210  ;;  %v4237_v57 = vsel %vm4234_vm13, %v4236_v10, %v4232_v22  ;;  %vm3697_vm13 = vweird.f32 %v8863_v15 }
 0xdee   :  { %3869 = vmatmul.bf16.gmra.mxu0 %v3849_v30  ;;  %6214 = vpow2.f32 %v3570_v35  ;;  %v3679_v7 = vmul.f32 %v8904_v52, %v8830_v12  ;;  %v4383_v36 = vmul.f32 %v8648_v13, %v4237_v57  ;;  %vm3684_vm15 = vweird.f32 %v8904_v52 }
 0xdef   :  { %v3689_v30 = vand.u32 2147483648, %v8830_v12  ;;  %vm8955_vm2 = vmor %vm3683_vm0, %vm3684_vm15 }
 0xdf0   :  { %v3521_v50 = vpop.xlane.xlu0 %3520  ;;  %v3680_v31 = vsub.f32 1.0, %v3679_v7 }
 0xdf1   :  { %v3540_v0 = vsub.f32 %v8682_v2, %v3521_v50  ;;  %v8906_v4 = vpop.xlane.xlu2 %4136  ;;  %v4223_v2 = vsel %vm4220_vm14, %v4222_v44, %v4218_v3  ;;  %v3690_v3 = vor.u32 1.1754944e-38, %v3689_v30  ;;  %v3701_v44 = vand.u32 2147483647, %v8863_v15 }
 0xdf2   :  { %6216 = vrcp.f32 %v8906_v4  ;;  %v4382_v59 = vmul.f32 %v8640_v23, %v4223_v2  ;;  %v3681_v51 = vmul.f32 %v8904_v52, %v3680_v31  ;;  %vm4257_vm9 = vweird.f32 %v8906_v4 }
 0xdf3   :  { %v8908_v45 = vpop.eup %6212  ;;  %v3568_v33 = vmul.f32 1.442695, %v3540_v0 }
 0xdf4   :  { %4146 = vadd.xlane.f32.xlu1 %v8908_v45  ;;  %4148 = vadd.xlane.f32.xlu2 %v8892_v43  ;;  %v8920_v27 = vpop.eup %6214  ;;  %v4396_v60 = vpack.c.bf16 %v4383_v36, %v4382_v59  ;;  %v3682_v1 = vadd.f32 %v8904_v52, %v3681_v51 }
 0xdf5   :  { %6218 = vpow2.f32 %v3568_v33  ;;  %v4263_v33 = vand.u32 2147483648, %v8906_v4 }
 0xdf6   :  { %6220 = vpow2.f32 %v4118_v62  ;;  %v3686_v0 = vsel %vm8955_vm2, %v8904_v52, %v3682_v1  ;;  %vm9046_vm2 = vcmp.eq.f32.partialorder %v3701_v44, 8.507059e+37 }
 0xdf7   :  { %6222 = vrcp.f32 %v8863_v15  ;;  %4452 = vmatmul.bf16.gmra.mxu1 %v4396_v60  ;;  %v3691_v60 = vsel %vm8963_vm3, %v3690_v3, %v3686_v0  ;;  %v4264_v30 = vor.u32 1.1754944e-38, %v4263_v33 }
 0xdf8   :  { %v8918_v18 = vpop.xlane.xlu0 %3584  ;;  %v8923_v63 = vpop.eup %6216 }
 0xdf9   :  { %6224 = vrcp.f32 %v8918_v18  ;;  %v4073_v37 = vpop.xlane.xlu2 %4072  ;;  %v8929_v53 = vpop.xlane.xlu1 %4140  ;;  %v4253_v61 = vmul.f32 %v8923_v63, %v8906_v4  ;;  %v3675_v59 = vand.u32 2147483648, %v8918_v18  ;;  %vm3669_vm5 = vweird.f32 %v8918_v18 }
 0xdfa   :  { %v4089_v23 = vsub.f32 %v8697_v9, %v4073_v37  ;;  %6226 = vrcp.f32 %v8929_v53  ;;  %v3673_v37 = vand.u32 2147483647, %v8918_v18  ;;  %vm4258_vm7 = vweird.f32 %v8923_v63 }
 0xdfb   :  { %v8925_v49 = vpop.eup %6218  ;;  %v4254_v39 = vsub.f32 1.0, %v4253_v61  ;;  %vm9014_vm10 = vmor %vm4257_vm9, %vm4258_vm7 }
 0xdfc   :  { %v8927_v13 = vpop.eup %6220  ;;  %3602 = vadd.xlane.f32.xlu1 %v8920_v27  ;;  %3600 = vadd.xlane.f32.xlu0 %v8925_v49  ;;  %v4120_v40 = vmul.f32 1.442695, %v4089_v23  ;;  %vm3674_vm11 = vcmp.eq.f32.partialorder %v3673_v37, 8.507059e+37 }
 0xdfd   :  { %v8934_v20 = vpop.eup %6222  ;;  %4150 = vadd.xlane.f32.xlu2 %v8927_v13  ;;  %v4255_v62 = vmul.f32 %v8923_v63, %v4254_v39  ;;  %v3676_v39 = vor.u32 1.1754944e-38, %v3675_v59 }
 0xdfe   :  { %v3693_v9 = vmul.f32 %v8934_v20, %v8863_v15  ;;  %6228 = vpow2.f32 %v4120_v40  ;;  %vm3698_vm6 = vweird.f32 %v8934_v20 }
 0xdff   :  { %v8940_v11 = vpop.eup %6224  ;;  %v4256_v61 = vadd.f32 %v8923_v63, %v4255_v62  ;;  %vm9038_vm0 = vmor %vm3697_vm13, %vm3698_vm6  ;;  %vm4285_vm6 = vweird.f32 %v8929_v53 }
 0xe00   :  { %v3665_v42 = vmul.f32 %v8940_v11, %v8918_v18  ;;  %v8947_v24 = vpop.xlane.xlu0 %4134  ;;  %v3694_v35 = vsub.f32 1.0, %v3693_v9  ;;  %v8961_v10 = vpop.eup %6226  ;;  %vm3670_vm4 = vweird.f32 %v8940_v11  ;;  %v4261_v18 = vand.u32 2147483647, %v8906_v4 }
 0xe01   :  { %6230 = vrcp.f32 %v8947_v24  ;;  %v3525_v56 = vpop.xlane.xlu2 %3524  ;;  %v8978_v7 = vpop.xlane.xlu1 %3592  ;;  %v4281_v23 = vmul.f32 %v8961_v10, %v8929_v53  ;;  %vm9000_vm8 = vmor %vm3669_vm5, %vm3670_vm4  ;;  %v4247_v50 = vand.u32 2147483647, %v8947_v24  ;;  %vm4243_vm15 = vweird.f32 %v8947_v24 }
 0xe02   :  { %v3666_v54 = vsub.f32 1.0, %v3665_v42  ;;  %v3542_v28 = vsub.f32 %v8709_v41, %v3525_v56  ;;  %v3703_v41 = vand.u32 2147483648, %v8863_v15  ;;  %v3695_v36 = vmul.f32 %v8934_v20, %v3694_v35 }
 0xe03   :  { %v4282_v5 = vsub.f32 1.0, %v4281_v23  ;;  %vm4262_vm14 = vcmp.eq.f32.partialorder %v4261_v18, 8.507059e+37  ;;  %vm4248_vm4 = vcmp.eq.f32.partialorder %v4247_v50, 8.507059e+37 }
 0xe04   :  { %v3667_v22 = vmul.f32 %v8940_v11, %v3666_v54  ;;  %v8970_v12 = vpop.eup %6228  ;;  %v3572_v57 = vmul.f32 1.442695, %v3542_v28  ;;  %v3696_v14 = vadd.f32 %v8934_v20, %v3695_v36  ;;  %v3837_v54 = vmul.f32 %v8665_v47, %v3691_v60 }
 0xe05   :  { %4152 = vadd.xlane.f32.xlu0 %v8970_v12  ;;  %v4260_v47 = vsel %vm9014_vm10, %v8923_v63, %v4256_v61  ;;  %v4283_v37 = vmul.f32 %v8961_v10, %v4282_v5 }
 0xe06   :  { %v3668_v2 = vadd.f32 %v8940_v11, %v3667_v22  ;;  %6232 = vpow2.f32 %v3572_v57  ;;  %v3700_v59 = vsel %vm9038_vm0, %v8934_v20, %v3696_v14 }
 0xe07   :  { %v8981_v52 = vpop.eup %6230  ;;  %v4284_v5 = vadd.f32 %v8961_v10, %v4283_v37 }
 0xe08   :  { %v8985_v31 = vpop.xlane.xlu0 %3590  ;;  %v4239_v51 = vmul.f32 %v8981_v52, %v8947_v24  ;;  %v3672_v1 = vsel %vm9000_vm8, %v8940_v11, %v3668_v2  ;;  %v4249_v11 = vand.u32 2147483648, %v8947_v24  ;;  %vm4244_vm12 = vweird.f32 %v8981_v52 }
 0xe09   :  { %6234 = vrcp.f32 %v8985_v31  ;;  %v9007_v42 = vpop.xlane.xlu2 %3594  ;;  %v3677_v22 = vsel %vm3674_vm11, %v3676_v39, %v3672_v1  ;;  %v9042_v57 = vpop.xlane.xlu1 %4144  ;;  %v3704_v24 = vor.u32 1.1754944e-38, %v3703_v41  ;;  %vm4245_vm3 = vmor %vm4243_vm15, %vm4244_vm12  ;;  %v3717_v41 = vand.u32 2147483648, %v8985_v31 }
 0xe0a   :  { %v4240_v9 = vsub.f32 1.0, %v4239_v51  ;;  %6236 = vrcp.f32 %v8978_v7  ;;  %v3836_v0 = vmul.f32 %v8690_v58, %v3677_v22  ;;  %v4265_v58 = vsel %vm4262_vm14, %v4264_v30, %v4260_v47 }
 0xe0b   :  { %6238 = vrcp.f32 %v9007_v42  ;;  %v4250_v36 = vor.u32 1.1754944e-38, %v4249_v11  ;;  %v4385_v40 = vmul.f32 %v8686_v21, %v4265_v58  ;;  %v3715_v20 = vand.u32 2147483647, %v8985_v31 }
 0xe0c   :  { %v4241_v4 = vmul.f32 %v8981_v52, %v4240_v9  ;;  %v9020_v35 = vpop.eup %6232  ;;  %v3850_v2 = vpack.c.bf16 %v3837_v54, %v3836_v0  ;;  %vm3711_vm7 = vweird.f32 %v8985_v31  ;;  %vm4286_vm8 = vweird.f32 %v8961_v10 }
 0xe0d   :  { %3604 = vadd.xlane.f32.xlu1 %v9020_v35  ;;  %vm3716_vm10 = vcmp.eq.f32.partialorder %v3715_v20, 8.507059e+37  ;;  %v4289_v22 = vand.u32 2147483647, %v8929_v53  ;;  %v4291_v47 = vand.u32 2147483648, %v8929_v53  ;;  %vm9088_vm11 = vmor %vm4285_vm6, %vm4286_vm8  ;;  %vm3725_vm6 = vweird.f32 %v8978_v7 }
 0xe0e   :  { %v4242_v28 = vadd.f32 %v8981_v52, %v4241_v4  ;;  %3874 = vmatmul.bf16.gmra.mxu0 %v3850_v2 }
 0xe0f   :  { %v6235_v3 = vpop.eup %6234  ;;  %v4292_v53 = vor.u32 1.1754944e-38, %v4291_v47  ;;  %vm4290_vm14 = vcmp.eq.f32.partialorder %v4289_v22, 8.507059e+37  ;;  %v4319_v47 = vand.u32 2147483648, %v9042_v57 }
 0xe10   :  { %v9034_v62 = vpop.xlane.xlu0 %4138  ;;  %v3707_v33 = vmul.f32 %v6235_v3, %v8985_v31  ;;  %v9055_v60 = vpop.eup %6236  ;;  %v4246_v44 = vsel %vm4245_vm3, %v8981_v52, %v4242_v28  ;;  %vm3712_vm5 = vweird.f32 %v6235_v3  ;;  %v3705_v52 = vsel %vm9046_vm2, %v3704_v24, %v3700_v59 }
 0xe11   :  { %6240 = vrcp.f32 %v9034_v62  ;;  %v9059_v51 = vpop.eup %6238  ;;  %v4251_v61 = vsel %vm4248_vm4, %v4250_v36, %v4246_v44  ;;  %v3721_v21 = vmul.f32 %v9055_v60, %v8978_v7  ;;  %vm3713_vm9 = vmor %vm3711_vm7, %vm3712_vm5  ;;  %v4277_v15 = vand.u32 2147483648, %v9034_v62 }
 0xe12   :  { %v3708_v23 = vsub.f32 1.0, %v3707_v33  ;;  %6242 = vrcp.f32 %v9042_v57  ;;  %v4384_v9 = vmul.f32 %v8705_v32, %v4251_v61  ;;  %v3735_v30 = vmul.f32 %v9059_v51, %v9007_v42 }
 0xe13   :  { %v3718_v32 = vor.u32 1.1754944e-38, %v3717_v41  ;;  %v3838_v33 = vmul.f32 %v8676_v25, %v3705_v52  ;;  %v4275_v25 = vand.u32 2147483647, %v9034_v62  ;;  %vm4271_vm13 = vweird.f32 %v9034_v62 }
 0xe14   :  { %v3709_v18 = vmul.f32 %v6235_v3, %v3708_v23  ;;  %v4397_v39 = vpack.c.bf16 %v4385_v40, %v4384_v9  ;;  %v3736_v0 = vsub.f32 1.0, %v3735_v30  ;;  %v4278_v23 = vor.u32 1.1754944e-38, %v4277_v15 }
 0xe15   :  { %vm4276_vm0 = vcmp.eq.f32.partialorder %v4275_v25, 8.507059e+37  ;;  %vm3740_vm2 = vweird.f32 %v9059_v51  ;;  %vm3726_vm3 = vweird.f32 %v9055_v60  ;;  %vm3739_vm4 = vweird.f32 %v9007_v42 }
 0xe16   :  { %v3710_v14 = vadd.f32 %v6235_v3, %v3709_v18  ;;  %4457 = vmatmul.bf16.gmra.mxu1 %v4397_v39  ;;  %v3737_v59 = vmul.f32 %v9059_v51, %v3736_v0  ;;  %v3743_v39 = vand.u32 2147483647, %v9007_v42  ;;  %vm9116_vm5 = vmor %vm3739_vm4, %vm3740_vm2 }
 0xe17   :  { %v6241_v1 = vpop.eup %6240  ;;  %vm9125_vm7 = vmor %vm3725_vm6, %vm3726_vm3 }
 0xe18   :  { %v4267_v54 = vmul.f32 %v6241_v1, %v9034_v62  ;;  %v3527_v56 = vpop.xlane.xlu0 %3526  ;;  %v3714_v4 = vsel %vm3713_vm9, %v6235_v3, %v3710_v14  ;;  %v9078_v11 = vpop.eup %6242  ;;  %v3722_v3 = vsub.f32 1.0, %v3721_v21  ;;  %vm4272_vm12 = vweird.f32 %v6241_v1 }
 0xe19   :  { %v3543_v31 = vsub.f32 %v8728_v6, %v3527_v56  ;;  %v3719_v50 = vsel %vm3716_vm10, %v3718_v32, %v3714_v4  ;;  %v4309_v24 = vmul.f32 %v9078_v11, %v9042_v57  ;;  %vm4273_vm15 = vmor %vm4271_vm13, %vm4272_vm12  ;;  %v3738_v9 = vadd.f32 %v9059_v51, %v3737_v59 }
 0xe1a   :  { %v4268_v28 = vsub.f32 1.0, %v4267_v54  ;;  %v3839_v2 = vmul.f32 %v8715_v26, %v3719_v50  ;;  %v4288_v26 = vsel %vm9088_vm11, %v8961_v10, %v4284_v5  ;;  %v3723_v40 = vmul.f32 %v9055_v60, %v3722_v3 }
 0xe1b   :  { %v3574_v63 = vmul.f32 1.442695, %v3543_v31  ;;  %v4293_v61 = vsel %vm4290_vm14, %v4292_v53, %v4288_v26  ;;  %v4310_v18 = vsub.f32 1.0, %v4309_v24  ;;  %v3731_v32 = vand.u32 2147483648, %v8978_v7 }
 0xe1c   :  { %v4269_v58 = vmul.f32 %v6241_v1, %v4268_v28  ;;  %v3851_v37 = vpack.c.bf16 %v3839_v2, %v3838_v33  ;;  %v4387_v52 = vmul.f32 %v8692_v55, %v4293_v61  ;;  %v3724_v14 = vadd.f32 %v9055_v60, %v3723_v40 }
 0xe1d   :  { %6244 = vpow2.f32 %v3574_v63  ;;  %v4311_v30 = vmul.f32 %v9078_v11, %v4310_v18  ;;  %v3729_v54 = vand.u32 2147483647, %v8978_v7  ;;  %v3742_v56 = vsel %vm9116_vm5, %v9059_v51, %v3738_v9 }
 0xe1e   :  { %v4270_v36 = vadd.f32 %v6241_v1, %v4269_v58  ;;  %3879 = vmatmul.bf16.gmra.mxu0 %v3851_v37  ;;  %vm4314_vm8 = vweird.f32 %v9078_v11  ;;  %vm3744_vm9 = vcmp.eq.f32.partialorder %v3743_v39, 8.507059e+37  ;;  %v3728_v7 = vsel %vm9125_vm7, %v9055_v60, %v3724_v14 }
 0xe1f   :  { %v4312_v4 = vadd.f32 %v9078_v11, %v4311_v30  ;;  %v3732_v22 = vor.u32 1.1754944e-38, %v3731_v32  ;;  %vm3730_vm10 = vcmp.eq.f32.partialorder %v3729_v54, 8.507059e+37  ;;  %vm4313_vm11 = vweird.f32 %v9042_v57 }
 0xe20   :  { %v4143_v44 = vpop.xlane.xlu0 %4142  ;;  %v4274_v41 = vsel %vm4273_vm15, %v6241_v1, %v4270_v36  ;;  %v3745_v1 = vand.u32 2147483648, %v9007_v42  ;;  %v4317_v50 = vand.u32 2147483647, %v9042_v57  ;;  %vm9137_vm12 = vmor %vm4313_vm11, %vm4314_vm8  ;;  %v4320_v58 = vor.u32 1.1754944e-38, %v4319_v47 }
 0xe21   :  { %6246 = vrcp.f32 %v4143_v44  ;;  %v4279_v20 = vsel %vm4276_vm0, %v4278_v23, %v4274_v41  ;;  %v4305_v0 = vand.u32 2147483648, %v4143_v44  ;;  %v4303_v2 = vand.u32 2147483647, %v4143_v44 }
 0xe22   :  { %v4386_v62 = vmul.f32 %v8724_v46, %v4279_v20  ;;  %v3746_v42 = vor.u32 1.1754944e-38, %v3745_v1  ;;  %v3733_v6 = vsel %vm3730_vm10, %v3732_v22, %v3728_v7  ;;  %v4316_v3 = vsel %vm9137_vm12, %v9078_v11, %v4312_v4  ;;  %v5856_v11 = vld [vmem:[%s9687_s7 + $0x38] sm:$0xff] }
 0xe23   :  { %v9102_v10 = vpop.eup %6244  ;;  %vm4299_vm14 = vweird.f32 %v4143_v44  ;;  %vm4318_vm15 = vcmp.eq.f32.partialorder %v4317_v50, 8.507059e+37  ;;  %v4306_v57 = vor.u32 1.1754944e-38, %v4305_v0  ;;  %v3840_v24 = vmul.f32 %v8707_v29, %v3733_v6  ;;  %4533 = vmatpush.bf16.msrb.mxu2 %v5856_v11  ;;  %v5855_v29 = vld [vmem:[%s9687_s7 + $0x30] sm:$0xff] }
 0xe24   :  { %3606 = vadd.xlane.f32.xlu2 %v9102_v10  ;;  %v4398_v21 = vpack.c.bf16 %v4387_v52, %v4386_v62  ;;  %v3747_v28 = vsel %vm3744_vm9, %v3746_v42, %v3742_v56  ;;  %vm4304_vm2 = vcmp.eq.f32.partialorder %v4303_v2, 8.507059e+37  ;;  %v4321_v26 = vsel %vm4318_vm15, %v4320_v58, %v4316_v3 }
 0xe25   :  { %v3841_v60 = vmul.f32 %v8721_v34, %v3747_v28  ;;  %v4389_v34 = vmul.f32 %v8717_v16, %v4321_v26 }
 0xe26   :  { %4462 = vmatmul.bf16.gmra.mxu1 %v4398_v21 }
 0xe27   :  { %v6247_v55 = vpop.eup %6246  ;;  %v3852_v53 = vpack.c.bf16 %v3841_v60, %v3840_v24  ;;  %4534 = vmatpush.bf16.msrb.mxu2 %v5855_v29 }
 0xe28   :  { %v4295_v31 = vmul.f32 %v6247_v55, %v4143_v44  ;;  %vm4300_vm13 = vweird.f32 %v6247_v55 }
 0xe29   :  { %vm4301_vm0 = vmor %vm4299_vm14, %vm4300_vm13 }
 0xe2a   :  { %v4296_v51 = vsub.f32 1.0, %v4295_v31 }
 0xe2c   :  { %v4297_v33 = vmul.f32 %v6247_v55, %v4296_v51 }
 0xe2e   :  { %v4298_v15 = vadd.f32 %v6247_v55, %v4297_v33  ;;  %3884 = vmatmul.bf16.gmra.mxu0 %v3852_v53 }
 0xe30   :  { %v4302_v25 = vsel %vm4301_vm0, %v6247_v55, %v4298_v15 }
 0xe31   :  { %v4307_v36 = vsel %vm4304_vm2, %v4306_v57, %v4302_v25 }
 0xe32   :  { %v4388_v59 = vmul.f32 %v8731_v8, %v4307_v36 }
 0xe34   :  { %v4399_v37 = vpack.c.bf16 %v4389_v34, %v4388_v59 }
 0xe36   :  { %4467 = vmatmul.bf16.gmra.mxu1 %v4399_v37 }
 0xe48   :  { %v3599_v44 = vpop.xlane.xlu0 %3598 }
 0xe49   :  { %6248 = vrcp.f32 %v3599_v44  ;;  %v3773_v39 = vand.u32 2147483648, %v3599_v44  ;;  %vm3767_vm4 = vweird.f32 %v3599_v44  ;;  %v3771_v32 = vand.u32 2147483647, %v3599_v44 }
 0xe4b   :  { %v4443_v23 = vpop.f32.mrf.mxu1  ;;  %v3774_v54 = vor.u32 1.1754944e-38, %v3773_v39  ;;  %vm3772_vm6 = vcmp.eq.f32.partialorder %v3771_v32, 8.507059e+37 }
 0xe4f   :  { %v6249_v16 = vpop.eup %6248 }
 0xe50   :  { %v3763_v61 = vmul.f32 %v6249_v16, %v3599_v44  ;;  %vm3768_vm3 = vweird.f32 %v6249_v16 }
 0xe51   :  { %vm3769_vm5 = vmor %vm3767_vm4, %vm3768_vm3 }
 0xe52   :  { %v3764_v18 = vsub.f32 1.0, %v3763_v61 }
 0xe53   :  { %v4445_v41 = vpop.f32.mrf.mxu1 }
 0xe54   :  { %v4483_v8 = vpack.c.bf16 %v4445_v41, %v4443_v23  ;;  %v3765_v20 = vmul.f32 %v6249_v16, %v3764_v18 }
 0xe56   :  { %5748 = vmatmul.msk.bf16.vlgmr.msrb.gmra.mxu2 %vm246_vm1, %v4483_v8  ;;  %v3766_v14 = vadd.f32 %v6249_v16, %v3765_v20 }
 0xe58   :  { %v3770_v55 = vsel %vm3769_vm5, %v6249_v16, %v3766_v14 }
 0xe59   :  { %v3775_v22 = vsel %vm3772_vm6, %v3774_v54, %v3770_v55 }
 0xe5a   :  { %v3843_v36 = vmul.f32 %v8777_v17, %v3775_v22 }
 0xe5f   :  { %v3597_v40 = vpop.xlane.xlu2 %3596 }
 0xe60   :  { %6250 = vrcp.f32 %v3597_v40  ;;  %vm3753_vm8 = vweird.f32 %v3597_v40  ;;  %v3759_v47 = vand.u32 2147483648, %v3597_v40  ;;  %v3757_v50 = vand.u32 2147483647, %v3597_v40 }
 0xe62   :  { %v3760_v25 = vor.u32 1.1754944e-38, %v3759_v47  ;;  %vm3758_vm12 = vcmp.eq.f32.partialorder %v3757_v50, 8.507059e+37 }
 0xe64   :  { %v4448_v30 = vpop.f32.mrf.mxu1 }
 0xe66   :  { %v6251_v9 = vpop.eup %6250 }
 0xe67   :  { %v3749_v62 = vmul.f32 %v6251_v9, %v3597_v40  ;;  %v4147_v52 = vpop.xlane.xlu1 %4146  ;;  %v4149_v1 = vpop.xlane.xlu2 %4148  ;;  %vm3754_vm7 = vweird.f32 %v6251_v9 }
 0xe68   :  { %6252 = vrcp.f32 %v4147_v52  ;;  %v4331_v63 = vand.u32 2147483647, %v4147_v52  ;;  %vm9166_vm9 = vmor %vm3753_vm8, %vm3754_vm7  ;;  %v4333_v60 = vand.u32 2147483648, %v4147_v52  ;;  %v4345_v58 = vand.u32 2147483647, %v4149_v1 }
 0xe69   :  { %v3750_v21 = vsub.f32 1.0, %v3749_v62  ;;  %6254 = vrcp.f32 %v4149_v1  ;;  %v4347_v57 = vand.u32 2147483648, %v4149_v1  ;;  %vm4327_vm13 = vweird.f32 %v4147_v52 }
 0xe6a   :  { %vm9182_vm15 = vcmp.eq.f32.partialorder %v4331_v63, 8.507059e+37  ;;  %vm4341_vm0 = vweird.f32 %v4149_v1  ;;  %v4334_v23 = vor.u32 1.1754944e-38, %v4333_v60  ;;  %vm9191_vm3 = vcmp.eq.f32.partialorder %v4345_v58, 8.507059e+37 }
 0xe6b   :  { %v3751_v46 = vmul.f32 %v6251_v9, %v3750_v21  ;;  %v4348_v41 = vor.u32 1.1754944e-38, %v4347_v57 }
 0xe6c   :  { %v4450_v28 = vpop.f32.mrf.mxu1 }
 0xe6d   :  { %v3752_v42 = vadd.f32 %v6251_v9, %v3751_v46  ;;  %v4484_v33 = vpack.c.bf16 %v4450_v28, %v4448_v30 }
 0xe6e   :  { %v6253_v56 = vpop.eup %6252 }
 0xe6f   :  { %v9155_v5 = vpop.eup %6254  ;;  %v4323_v31 = vmul.f32 %v6253_v56, %v4147_v52  ;;  %v9157_v4 = vpop.xlane.xlu1 %3602  ;;  %vm4328_vm10 = vweird.f32 %v6253_v56  ;;  %5749 = vmatmul.msk.bf16.gmra.mxu2 %vm246_vm1, %v4484_v33  ;;  %v3756_v24 = vsel %vm9166_vm9, %v6251_v9, %v3752_v42 }
 0xe70   :  { %v9159_v7 = vpop.xlane.xlu0 %3600  ;;  %v4337_v51 = vmul.f32 %v9155_v5, %v4149_v1  ;;  %6256 = vrcp.f32 %v9157_v4  ;;  %v9163_v2 = vpop.xlane.xlu2 %4150  ;;  %vm4342_vm11 = vweird.f32 %v9155_v5  ;;  %vm9178_vm14 = vmor %vm4327_vm13, %vm4328_vm10  ;;  %v3761_v29 = vsel %vm3758_vm12, %v3760_v25, %v3756_v24 }
 0xe71   :  { %v4324_v0 = vsub.f32 1.0, %v4323_v31  ;;  %6258 = vrcp.f32 %v9159_v7  ;;  %vm9187_vm2 = vmor %vm4341_vm0, %vm4342_vm11  ;;  %vm3795_vm4 = vweird.f32 %v9157_v4  ;;  %v3842_v40 = vmul.f32 %v8867_v48, %v3761_v29 }
 0xe72   :  { %v4338_v3 = vsub.f32 1.0, %v4337_v51  ;;  %6260 = vrcp.f32 %v9163_v2  ;;  %v3799_v62 = vand.u32 2147483647, %v9157_v4  ;;  %v3801_v48 = vand.u32 2147483648, %v9157_v4 }
 0xe73   :  { %v4325_v15 = vmul.f32 %v6253_v56, %v4324_v0  ;;  %v3853_v30 = vpack.c.bf16 %v3843_v36, %v3842_v40  ;;  %vm3781_vm8 = vweird.f32 %v9159_v7  ;;  %v4361_v57 = vand.u32 2147483648, %v9163_v2  ;;  %v5854_v36 = vld [vmem:[%s9687_s7 + $0x28] sm:$0xff] }
 0xe74   :  { %v4339_v26 = vmul.f32 %v9155_v5, %v4338_v3  ;;  %v4453_v61 = vpop.f32.mrf.mxu1  ;;  %vm3800_vm9 = vcmp.eq.f32.partialorder %v3799_v62, 8.507059e+37  ;;  %vm4355_vm13 = vweird.f32 %v9163_v2  ;;  %4618 = vmatpush.bf16.msrb.mxu0 %v5854_v36 }
 0xe75   :  { %v4326_v53 = vadd.f32 %v6253_v56, %v4325_v15  ;;  %3889 = vmatmul.bf16.gmra.mxu0 %v3853_v30 }
 0xe76   :  { %v6257_v59 = vpop.eup %6256  ;;  %v4340_v11 = vadd.f32 %v9155_v5, %v4339_v26  ;;  %v4359_v26 = vand.u32 2147483647, %v9163_v2 }
 0xe77   :  { %v3791_v8 = vmul.f32 %v6257_v59, %v9157_v4  ;;  %v6259_v16 = vpop.eup %6258  ;;  %v4330_v18 = vsel %vm9178_vm14, %v6253_v56, %v4326_v53  ;;  %vm3796_vm5 = vweird.f32 %v6257_v59  ;;  %v3785_v56 = vand.u32 2147483647, %v9159_v7 }
 0xe78   :  { %v4344_v20 = vsel %vm9187_vm2, %v9155_v5, %v4340_v11  ;;  %v3777_v52 = vmul.f32 %v6259_v16, %v9159_v7  ;;  %v4335_v1 = vsel %vm9182_vm15, %v4334_v23, %v4330_v18  ;;  %v9207_v14 = vpop.eup %6260  ;;  %v4153_v39 = vpop.xlane.xlu0 %4152  ;;  %vm3782_vm6 = vweird.f32 %v6259_v16  ;;  %vm9221_vm7 = vmor %vm3795_vm4, %vm3796_vm5 }
 0xe79   :  { %v3792_v9 = vsub.f32 1.0, %v3791_v8  ;;  %v4349_v21 = vsel %vm9191_vm3, %v4348_v41, %v4344_v20  ;;  %v4351_v55 = vmul.f32 %v9207_v14, %v9163_v2  ;;  %v4390_v54 = vmul.f32 %v8908_v45, %v4335_v1  ;;  %vm3783_vm10 = vmor %vm3781_vm8, %vm3782_vm6  ;;  %v5853_v1 = vld [vmem:[%s9687_s7 + $0x20] sm:$0xff] }
 0xe7a   :  { %v3778_v46 = vsub.f32 1.0, %v3777_v52  ;;  %v3787_v5 = vand.u32 2147483648, %v9159_v7  ;;  %6262 = vrcp.f32 %v4153_v39  ;;  %v4391_v47 = vmul.f32 %v8892_v43, %v4349_v21  ;;  %4619 = vmatpush.bf16.msrb.mxu0 %v5853_v1  ;;  %v9271_v1 = vld [vmem:[%s9688_s8 + $0x1] ss:$0 sm:$0xff] }
 0xe7b   :  { %v3793_v32 = vmul.f32 %v6257_v59, %v3792_v9  ;;  %v4352_v22 = vsub.f32 1.0, %v4351_v55  ;;  %v3802_v45 = vor.u32 1.1754944e-38, %v3801_v48  ;;  %vm3786_vm11 = vcmp.eq.f32.partialorder %v3785_v56, 8.507059e+37  ;;  %v3865_v48 = vpop.f32.mrf.mxu0 }
 0xe7c   :  { %v3779_v31 = vmul.f32 %v6259_v16, %v3778_v46  ;;  %v4400_v0 = vpack.c.bf16 %v4391_v47, %v4390_v54  ;;  %v3788_v43 = vor.u32 1.1754944e-38, %v3787_v5  ;;  %v4455_v33 = vpop.f32.mrf.mxu1  ;;  %vm4356_vm12 = vweird.f32 %v9207_v14 }
 0xe7d   :  { %v3794_v42 = vadd.f32 %v6257_v59, %v3793_v32  ;;  %v4353_v50 = vmul.f32 %v9207_v14, %v4352_v22  ;;  %v4485_v4 = vpack.c.bf16 %v4455_v33, %v4453_v61  ;;  %vm9241_vm14 = vmor %vm4355_vm13, %vm4356_vm12  ;;  %v4375_v34 = vand.u32 2147483648, %v4153_v39 }
 0xe7e   :  { %v3780_v28 = vadd.f32 %v6259_v16, %v3779_v31  ;;  %4472 = vmatmul.bf16.gmra.mxu1 %v4400_v0  ;;  %v4373_v11 = vand.u32 2147483647, %v4153_v39  ;;  %v4362_v2 = vor.u32 1.1754944e-38, %v4361_v57  ;;  %vm4360_vm0 = vcmp.eq.f32.partialorder %v4359_v26, 8.507059e+37 }
 0xe7f   :  { %v3798_v63 = vsel %vm9221_vm7, %v6257_v59, %v3794_v42  ;;  %v4354_v7 = vadd.f32 %v9207_v14, %v4353_v50  ;;  %5750 = vmatmul.msk.bf16.gmra.mxu2 %vm246_vm1, %v4485_v4  ;;  %vm4369_vm2 = vweird.f32 %v4153_v39  ;;  %v4376_v44 = vor.u32 1.1754944e-38, %v4375_v34 }
 0xe80   :  { %v3784_v6 = vsel %vm3783_vm10, %v6259_v16, %v3780_v28  ;;  %v3803_v60 = vsel %vm3800_vm9, %v3802_v45, %v3798_v63  ;;  %v6263_v3 = vpop.eup %6262  ;;  %vm4374_vm4 = vcmp.eq.f32.partialorder %v4373_v11, 8.507059e+37 }
 0xe81   :  { %v3789_v58 = vsel %vm3786_vm11, %v3788_v43, %v3784_v6  ;;  %v4365_v15 = vmul.f32 %v6263_v3, %v4153_v39  ;;  %v3845_v25 = vmul.f32 %v8920_v27, %v3803_v60  ;;  %vm4370_vm15 = vweird.f32 %v6263_v3 }
 0xe82   :  { %v3844_v24 = vmul.f32 %v8925_v49, %v3789_v58  ;;  %v3605_v49 = vpop.xlane.xlu1 %3604  ;;  %v4358_v27 = vsel %vm9241_vm14, %v9207_v14, %v4354_v7  ;;  %vm4371_vm3 = vmor %vm4369_vm2, %vm4370_vm15 }
 0xe83   :  { %v4366_v53 = vsub.f32 1.0, %v4365_v15  ;;  %6264 = vrcp.f32 %v3605_v49  ;;  %v4363_v17 = vsel %vm4360_vm0, %v4362_v2, %v4358_v27  ;;  %v3815_v32 = vand.u32 2147483648, %v3605_v49  ;;  %v3867_v47 = vpop.f32.mrf.mxu0 }
 0xe84   :  { %v3854_v29 = vpack.c.bf16 %v3845_v25, %v3844_v24  ;;  %v4392_v16 = vmul.f32 %v8927_v13, %v4363_v17  ;;  %vm3809_vm6 = vweird.f32 %v3605_v49  ;;  %v3813_v46 = vand.u32 2147483647, %v3605_v49 }
 0xe85   :  { %v4367_v37 = vmul.f32 %v6263_v3, %v4366_v53  ;;  %v3816_v31 = vor.u32 1.1754944e-38, %v3815_v32  ;;  %v3905_v7 = vpack.c.bf16 %v3867_v47, %v3865_v48 }
 0xe86   :  { %3894 = vmatmul.bf16.gmra.mxu0 %v3854_v29  ;;  %vm3814_vm9 = vcmp.eq.f32.partialorder %v3813_v46, 8.507059e+37 }
 0xe87   :  { %v4368_v23 = vadd.f32 %v6263_v3, %v4367_v37 }
 0xe89   :  { %v4372_v41 = vsel %vm4371_vm3, %v6263_v3, %v4368_v23  ;;  %v6265_v18 = vpop.eup %6264 }
 0xe8a   :  { %v4377_v8 = vsel %vm4374_vm4, %v4376_v44, %v4372_v41  ;;  %v3805_v20 = vmul.f32 %v6265_v18, %v3605_v49  ;;  %vm3810_vm5 = vweird.f32 %v6265_v18 }
 0xe8b   :  { %v4393_v61 = vmul.f32 %v8970_v12, %v4377_v8  ;;  %vm3811_vm7 = vmor %vm3809_vm6, %vm3810_vm5  ;;  %v3870_v4 = vpop.f32.mrf.mxu0 }
 0xe8c   :  { %v3806_v62 = vsub.f32 1.0, %v3805_v20 }
 0xe8d   :  { %v4401_v40 = vpack.c.bf16 %v4393_v61, %v4392_v16 }
 0xe8e   :  { %v3807_v14 = vmul.f32 %v6265_v18, %v3806_v62 }
 0xe8f   :  { %4477 = vmatmul.bf16.gmra.mxu1 %v4401_v40 }
 0xe90   :  { %v3808_v13 = vadd.f32 %v6265_v18, %v3807_v14 }
 0xe92   :  { %v3812_v42 = vsel %vm3811_vm7, %v6265_v18, %v3808_v13 }
 0xe93   :  { %v4458_v9 = vpop.f32.mrf.mxu1  ;;  %v3817_v28 = vsel %vm3814_vm9, %v3816_v31, %v3812_v42  ;;  %v3872_v58 = vpop.f32.mrf.mxu0 }
 0xe94   :  { %v3846_v63 = vmul.f32 %v9020_v35, %v3817_v28  ;;  %v3906_v25 = vpack.c.bf16 %v3872_v58, %v3870_v4 }
 0xe97   :  { %v3607_v52 = vpop.xlane.xlu2 %3606 }
 0xe98   :  { %6266 = vrcp.f32 %v3607_v52  ;;  %v3829_v54 = vand.u32 2147483648, %v3607_v52  ;;  %v3827_v5 = vand.u32 2147483647, %v3607_v52  ;;  %vm3823_vm10 = vweird.f32 %v3607_v52 }
 0xe9a   :  { %v3830_v51 = vor.u32 1.1754944e-38, %v3829_v54  ;;  %vm3828_vm12 = vcmp.eq.f32.partialorder %v3827_v5, 8.507059e+37 }
 0xe9b   :  { %v4460_v39 = vpop.f32.mrf.mxu1  ;;  %v3875_v24 = vpop.f32.mrf.mxu0 }
 0xe9c   :  { %v4486_v21 = vpack.c.bf16 %v4460_v39, %v4458_v9 }
 0xe9e   :  { %v6267_v30 = vpop.eup %6266  ;;  %5751 = vmatmul.msk.bf16.gmra.mxu2 %vm246_vm1, %v4486_v21 }
 0xe9f   :  { %v3819_v12 = vmul.f32 %v6267_v30, %v3607_v52  ;;  %vm3824_vm8 = vweird.f32 %v6267_v30 }
 0xea0   :  { %vm3825_vm11 = vmor %vm3823_vm10, %vm3824_vm8 }
 0xea1   :  { %v3820_v55 = vsub.f32 1.0, %v3819_v12 }
 0xea3   :  { %v3821_v56 = vmul.f32 %v6267_v30, %v3820_v55  ;;  %v4463_v45 = vpop.f32.mrf.mxu1  ;;  %v3877_v35 = vpop.f32.mrf.mxu0 }
 0xea4   :  { %v3907_v26 = vpack.c.bf16 %v3877_v35, %v3875_v24 }
 0xea5   :  { %v3822_v22 = vadd.f32 %v6267_v30, %v3821_v56  ;;  %v9860_v56 = vld [vmem:[#allocation9_spill] sm:$0xff] }
 0xea7   :  { %v3826_v50 = vsel %vm3825_vm11, %v6267_v30, %v3822_v22 }
 0xea8   :  { %v3831_v0 = vsel %vm3828_vm12, %v3830_v51, %v3826_v50  ;;  %v9861_v51 = vld [vmem:[#allocation17_spill] sm:$0xff] }
 0xea9   :  { %v3847_v43 = vmul.f32 %v9102_v10, %v3831_v0 }
 0xeab   :  { %v3855_v33 = vpack.c.bf16 %v3847_v43, %v3846_v63  ;;  %v4465_v6 = vpop.f32.mrf.mxu1  ;;  %v3880_v10 = vpop.f32.mrf.mxu0 }
 0xeac   :  { %v4487_v60 = vpack.c.bf16 %v4465_v6, %v4463_v45 }
 0xead   :  { %3899 = vmatmul.bf16.gmra.mxu0 %v3855_v33  ;;  %v9862_v33 = vld [vmem:[#allocation13_spill] sm:$0xff] }
 0xeae   :  { %5752 = vmatmul.msk.bf16.gmra.mxu2 %vm246_vm1, %v4487_v60 }
 0xeb3   :  { %v4468_v3 = vpop.f32.mrf.mxu1  ;;  %v3882_v53 = vpop.f32.mrf.mxu0 }
 0xeb4   :  { %v3908_v59 = vpack.c.bf16 %v3882_v53, %v3880_v10  ;;  %v9864_v53 = vld [vmem:[#allocation18_spill] sm:$0xff] }
 0xebb   :  { %v4470_v15 = vpop.f32.mrf.mxu1  ;;  %v3885_v36 = vpop.f32.mrf.mxu0 }
 0xebc   :  { %v4488_v57 = vpack.c.bf16 %v4470_v15, %v4468_v3  ;;  %v9863_v15 = vld [vmem:[#allocation14_spill] sm:$0xff] }
 0xebd   :  { %5764 = vmatmul.msk.bf16.vlgmr.msrb.gmra.mxu0 %vm246_vm1, %v3905_v7 }
 0xebe   :  { %5753 = vmatmul.msk.bf16.gmra.mxu2 %vm246_vm1, %v4488_v57 }
 0xec3   :  { %v3887_v34 = vpop.f32.mrf.mxu0 }
 0xec4   :  { %v3909_v11 = vpack.c.bf16 %v3887_v34, %v3885_v36 }
 0xecd   :  { %5765 = vmatmul.msk.bf16.gmra.mxu0 %vm246_vm1, %v3906_v25 }
 0xed9   :  { %v4536_v18 = vpop.f32.mrf.mxu2 }
 0xedd   :  { %5766 = vmatmul.msk.bf16.gmra.mxu0 %vm246_vm1, %v3907_v26 }
 0xee1   :  { %v4538_v14 = vpop.f32.mrf.mxu2 }
 0xeed   :  { %5767 = vmatmul.msk.bf16.gmra.mxu0 %vm246_vm1, %v3908_v59 }
 0xef2   :  { %v3890_v37 = vpop.f32.mrf.mxu0  ;;  %v4541_v21 = vpop.f32.mrf.mxu2 }
 0xefa   :  { %v3892_v27 = vpop.f32.mrf.mxu0  ;;  %v4543_v42 = vpop.f32.mrf.mxu2 }
 0xefb   :  { %v4473_v49 = vpop.f32.mrf.mxu1  ;;  %v3910_v23 = vpack.c.bf16 %v3892_v27, %v3890_v37 }
 0xefd   :  { %5768 = vmatmul.msk.bf16.gmra.mxu0 %vm246_vm1, %v3909_v11 }
 0xf02   :  { %v4546_v50 = vpop.f32.mrf.mxu2 }
 0xf03   :  { %v4475_v2 = vpop.f32.mrf.mxu1  ;;  %v3895_v44 = vpop.f32.mrf.mxu0 }
 0xf04   :  { %v4489_v29 = vpack.c.bf16 %v4475_v2, %v4473_v49 }
 0xf06   :  { %5754 = vmatmul.msk.bf16.gmra.mxu2 %vm246_vm1, %v4489_v29  ;;  %v9865_v29 = vld [vmem:[#allocation15_spill] sm:$0xff] }
 0xf0a   :  { %v4548_v3 = vpop.f32.mrf.mxu2 }
 0xf0b   :  { %v3897_v16 = vpop.f32.mrf.mxu0 }
 0xf0c   :  { %v4478_v17 = vpop.f32.mrf.mxu1  ;;  %v3911_v61 = vpack.c.bf16 %v3897_v16, %v3895_v44 }
 0xf0d   :  { %5769 = vmatmul.msk.bf16.gmra.mxu0 %vm246_vm1, %v3910_v23 }
 0xf14   :  { %v4480_v41 = vpop.f32.mrf.mxu1 }
 0xf15   :  { %v4490_v8 = vpack.c.bf16 %v4480_v41, %v4478_v17 }
 0xf17   :  { %5755 = vmatmul.msk.bf16.gmra.mxu2 %vm246_vm1, %v4490_v8  ;;  %v9866_v8 = vld [vmem:[#allocation20_spill] sm:$0xff] }
 0xf1d   :  { %5770 = vmatmul.msk.bf16.gmra.mxu0 %vm246_vm1, %v3911_v61 }
 0xf21   :  { %v4551_v25 = vpop.f32.mrf.mxu2 }
 0xf29   :  { %v4553_v11 = vpop.f32.mrf.mxu2 }
 0xf2a   :  { %v3900_v40 = vpop.f32.mrf.mxu0 }
 0xf31   :  { %v4556_v27 = vpop.f32.mrf.mxu2 }
 0xf32   :  { %v3902_v20 = vpop.f32.mrf.mxu0 }
 0xf33   :  { %v3912_v9 = vpack.c.bf16 %v3902_v20, %v3900_v40 }
 0xf35   :  { %5771 = vmatmul.msk.bf16.gmra.mxu0 %vm246_vm1, %v3912_v9 }
 0xf39   :  { %v4558_v20 = vpop.f32.mrf.mxu2 }
 0xf3a   :  { %v4621_v62 = vpop.f32.mrf.mxu0 }
 0xf3b   :  { %v4622_v52 = vadd.f32 %v4621_v62, %v4536_v18 }
 0xf3d   :  { %v4661_v48 = vadd.f32 %v4622_v52, %v8034_v38 }
 0xf3f   :  { %v9275_v30 = vadd.f32 %v9271_v1, %v4661_v48 }
 0xf41   :  { %v4695_v39 = vsel %vm246_vm1, %v9275_v30, 0.0 }
 0xf42   :  { %v4623_v13 = vpop.f32.mrf.mxu0  ;;  %4696 = vadd.xlane.f32.xlu0 %v4695_v39  ;;  %v9867_v39 = vld [vmem:[#allocation19_spill] sm:$0xff] }
 0xf43   :  { %v4624_v12 = vadd.f32 %v4623_v13, %v4538_v14 }
 0xf45   :  { %v4662_v32 = vadd.f32 %v4624_v12, %v8041_v19 }
 0xf47   :  { %v9281_v46 = vadd.f32 %v9271_v1, %v4662_v32 }
 0xf49   :  { %v4698_v55 = vsel %vm246_vm1, %v9281_v46, 0.0 }
 0xf4a   :  { %v4626_v54 = vpop.f32.mrf.mxu0  ;;  %4699 = vadd.xlane.f32.xlu1 %v4698_v55 }
 0xf4b   :  { %v4627_v38 = vadd.f32 %v4626_v54, %v4541_v21 }
 0xf4d   :  { %v4663_v5 = vadd.f32 %v4627_v38, %v9860_v56  ;;  %v4561_v38 = vpop.f32.mrf.mxu2 }
 0xf4f   :  { %v9287_v31 = vadd.f32 %v9271_v1, %v4663_v5 }
 0xf51   :  { %v4701_v22 = vsel %vm246_vm1, %v9287_v31, 0.0 }
 0xf52   :  { %v4628_v47 = vpop.f32.mrf.mxu0  ;;  %4702 = vadd.xlane.f32.xlu2 %v4701_v22 }
 0xf53   :  { %v4629_v19 = vadd.f32 %v4628_v47, %v4543_v42  ;;  %v9868_v47 = vld [vmem:[#allocation5_spill] sm:$0xff] }
 0xf55   :  { %v4664_v45 = vadd.f32 %v4629_v19, %v9861_v51 }
 0xf57   :  { %v9293_v28 = vadd.f32 %v9271_v1, %v4664_v45 }
 0xf59   :  { %v4704_v0 = vsel %vm246_vm1, %v9293_v28, 0.0 }
 0xf5a   :  { %v4631_v63 = vpop.f32.mrf.mxu0  ;;  %4705 = vadd.xlane.f32.xlu0 %v4704_v0 }
 0xf5b   :  { %v4632_v43 = vadd.f32 %v4631_v63, %v4546_v50 }
 0xf5d   :  { %v4665_v4 = vadd.f32 %v4632_v43, %v9862_v33 }
 0xf5f   :  { %v9299_v6 = vadd.f32 %v9271_v1, %v4665_v4 }
 0xf61   :  { %v4707_v60 = vsel %vm246_vm1, %v9299_v6, 0.0 }
 0xf62   :  { %v4633_v58 = vpop.f32.mrf.mxu0  ;;  %4708 = vadd.xlane.f32.xlu1 %v4707_v60  ;;  %v4563_v60 = vpop.f32.mrf.mxu2 }
 0xf63   :  { %v4634_v7 = vadd.f32 %v4633_v58, %v4548_v3  ;;  %v9869_v58 = vld [vmem:[#allocation6_spill] sm:$0xff] }
 0xf65   :  { %v4666_v57 = vadd.f32 %v4634_v7, %v9863_v15 }
 0xf67   :  { %v9305_v24 = vadd.f32 %v9271_v1, %v4666_v57 }
 0xf69   :  { %v4710_v35 = vsel %vm246_vm1, %v9305_v24, 0.0 }
 0xf6a   :  { %v4636_v10 = vpop.f32.mrf.mxu0  ;;  %4711 = vadd.xlane.f32.xlu2 %v4710_v35 }
 0xf6b   :  { %v4637_v26 = vadd.f32 %v4636_v10, %v4551_v25 }
 0xf6d   :  { %v4667_v36 = vadd.f32 %v4637_v26, %v9864_v53 }
 0xf6f   :  { %v9311_v59 = vadd.f32 %v9271_v1, %v4667_v36 }
 0xf71   :  { %v4713_v34 = vsel %vm246_vm1, %v9311_v59, 0.0 }
 0xf72   :  { %4714 = vadd.xlane.f32.xlu2 %v4713_v34  ;;  %v4638_v37 = vpop.f32.mrf.mxu0 }
 0xf73   :  { %v4639_v44 = vadd.f32 %v4638_v37, %v4553_v11  ;;  %v9870_v11 = vld [vmem:[#allocation7_spill] sm:$0xff] }
 0xf75   :  { %v4668_v16 = vadd.f32 %v4639_v44, %v9866_v8 }
 0xf77   :  { %v9325_v62 = vadd.f32 %v9271_v1, %v4668_v16 }
 0xf79   :  { %v4716_v21 = vsel %vm246_vm1, %v9325_v62, 0.0 }
 0xf7a   :  { %v4641_v49 = vpop.f32.mrf.mxu0 }
 0xf7b   :  { %v4642_v52 = vadd.f32 %v4641_v49, %v4556_v27 }
 0xf7d   :  { %v4669_v13 = vadd.f32 %v4642_v52, %v9867_v39 }
 0xf7f   :  { %v9338_v56 = vadd.f32 %v9271_v1, %v4669_v13 }
 0xf81   :  { %v4719_v45 = vsel %vm246_vm1, %v9338_v56, 0.0 }
 0xf82   :  { %v4643_v40 = vpop.f32.mrf.mxu0 }
 0xf83   :  { %v4644_v5 = vadd.f32 %v4643_v40, %v4558_v20 }
 0xf85   :  { %v4670_v19 = vadd.f32 %v4644_v5, %v9868_v47 }
 0xf87   :  { %v9351_v63 = vadd.f32 %v9271_v1, %v4670_v19 }
 0xf89   :  { %v4722_v15 = vsel %vm246_vm1, %v9351_v63, 0.0  ;;  %v4566_v36 = vpop.f32.mrf.mxu2 }
 0xf8a   :  { %v4646_v54 = vpop.f32.mrf.mxu0 }
 0xf8b   :  { %v4647_v43 = vadd.f32 %v4646_v54, %v4561_v38  ;;  %v9872_v54 = vld [vmem:[#allocation10_spill] sm:$0xff] }
 0xf8d   :  { %v4671_v7 = vadd.f32 %v4647_v43, %v9869_v58 }
 0xf8f   :  { %v9364_v10 = vadd.f32 %v9271_v1, %v4671_v7 }
 0xf91   :  { %v4725_v27 = vsel %vm246_vm1, %v9364_v10, 0.0  ;;  %v4568_v40 = vpop.f32.mrf.mxu2 }
 0xf92   :  { %v4648_v4 = vpop.f32.mrf.mxu0 }
 0xf93   :  { %v4649_v26 = vadd.f32 %v4648_v4, %v4563_v60 }
 0xf95   :  { %v4672_v49 = vadd.f32 %v4649_v26, %v9870_v11  ;;  %v5858_v26 = vld [vmem:[%s9689_s9 + $0x18] sm:$0xff] }
 0xf96   :  { %5104 = vmatpush.bf16.msra.mxu3 %v5858_v26 }
 0xf9a   :  { %v4651_v37 = vpop.f32.mrf.mxu0  ;;  %v4571_v19 = vpop.f32.mrf.mxu2 }
 0xf9b   :  { %v4652_v8 = vadd.f32 %v4651_v37, %v4566_v36 }
 0xfb5   :  { %v4697_v2 = vpop.xlane.xlu0 %4696 }
 0xfb6   :  { %v4743_v23 = vmul.f32 %v4697_v2, %v9865_v29 }
 0xfb8   :  { %v9317_v17 = vsub.f32 %v9275_v30, %v4743_v23 }
 0xfba   :  { %v4775_v41 = vmul.f32 %v9317_v17, %v9317_v17 }
 0xfbc   :  { %v4791_v61 = vsel %vm246_vm1, %v4775_v41, 0.0  ;;  %v9377_v41 = vadd.f32 %v9271_v1, %v4672_v49 }
 0xfbd   :  { %v4700_v18 = vpop.xlane.xlu1 %4699  ;;  %4792 = vadd.xlane.f32.xlu0 %v4791_v61 }
 0xfbe   :  { %v4744_v9 = vmul.f32 %v4700_v18, %v9865_v29  ;;  %v9871_v18 = vld [vmem:[#allocation8_spill] sm:$0xff]  ;;  %v4728_v52 = vsel %vm246_vm1, %v9377_v41, 0.0 }
 0xfbf   :  { %v4673_v20 = vadd.f32 %v4652_v8, %v9871_v18 }
 0xfc0   :  { %v9328_v14 = vsub.f32 %v9281_v46, %v4744_v9 }
 0xfc2   :  { %v4776_v48 = vmul.f32 %v9328_v14, %v9328_v14 }
 0xfc4   :  { %v4794_v12 = vsel %vm246_vm1, %v4776_v48, 0.0  ;;  %v4653_v48 = vpop.f32.mrf.mxu0 }
 0xfc5   :  { %v4703_v32 = vpop.xlane.xlu2 %4702  ;;  %4795 = vadd.xlane.f32.xlu1 %v4794_v12  ;;  %4717 = vadd.xlane.f32.xlu0 %v4716_v21  ;;  %v9390_v12 = vadd.f32 %v9271_v1, %v4673_v20  ;;  %v4654_v21 = vadd.f32 %v4653_v48, %v4568_v40 }
 0xfc6   :  { %v4745_v55 = vmul.f32 %v4703_v32, %v9865_v29 }
 0xfc7   :  { %v4674_v38 = vadd.f32 %v4654_v21, %v9872_v54 }
 0xfc8   :  { %v9341_v42 = vsub.f32 %v9287_v31, %v4745_v55 }
 0xfca   :  { %v4777_v22 = vmul.f32 %v9341_v42, %v9341_v42 }
 0xfcc   :  { %v4797_v51 = vsel %vm246_vm1, %v4777_v22, 0.0  ;;  %v4731_v22 = vsel %vm246_vm1, %v9390_v12, 0.0  ;;  %v4656_v47 = vpop.f32.mrf.mxu0 }
 0xfcd   :  { %4798 = vadd.xlane.f32.xlu1 %v4797_v51  ;;  %4720 = vadd.xlane.f32.xlu0 %v4719_v45  ;;  %v4706_v50 = vpop.xlane.xlu0 %4705  ;;  %v9402_v51 = vadd.f32 %v9271_v1, %v4674_v38  ;;  %v4657_v45 = vadd.f32 %v4656_v47, %v4571_v19 }
 0xfce   :  { %v4746_v0 = vmul.f32 %v4706_v50, %v9865_v29  ;;  %v9873_v50 = vld [vmem:[#allocation11_spill] sm:$0xff] }
 0xfcf   :  { %v4734_v43 = vsel %vm246_vm1, %v9402_v51, 0.0 }
 0xfd0   :  { %v9354_v33 = vsub.f32 %v9293_v28, %v4746_v0  ;;  %v4675_v0 = vadd.f32 %v4657_v45, %v9873_v50 }
 0xfd2   :  { %v4778_v3 = vmul.f32 %v9354_v33, %v9354_v33  ;;  %v9408_v4 = vadd.f32 %v9271_v1, %v4675_v0 }
 0xfd4   :  { %v4800_v57 = vsel %vm246_vm1, %v4778_v3, 0.0  ;;  %v4737_v60 = vsel %vm246_vm1, %v9408_v4, 0.0 }
 0xfd5   :  { %4723 = vadd.xlane.f32.xlu1 %v4722_v15  ;;  %v4709_v35 = vpop.xlane.xlu1 %4708  ;;  %4801 = vadd.xlane.f32.xlu2 %v4800_v57 }
 0xfd6   :  { %v4747_v25 = vmul.f32 %v4709_v35, %v9865_v29 }
 0xfd8   :  { %v9367_v53 = vsub.f32 %v9299_v6, %v4747_v25 }
 0xfda   :  { %v4779_v34 = vmul.f32 %v9367_v53, %v9367_v53 }
 0xfdc   :  { %v4803_v2 = vsel %vm246_vm1, %v4779_v34, 0.0 }
 0xfdd   :  { %v4712_v23 = vpop.xlane.xlu2 %4711  ;;  %4726 = vadd.xlane.f32.xlu1 %v4725_v27  ;;  %4804 = vadd.xlane.f32.xlu2 %v4803_v2  ;;  %v5857_v27 = vld [vmem:[%s9689_s9 + $0x10] sm:$0xff] }
 0xfde   :  { %v4748_v44 = vmul.f32 %v4712_v23, %v9865_v29  ;;  %v4658_v23 = vpop.f32.mrf.mxu0  ;;  %5105 = vmatpush.bf16.msra.mxu3 %v5857_v27 }
 0xfe0   :  { %v9380_v16 = vsub.f32 %v9305_v24, %v4748_v44 }
 0xfe2   :  { %v4780_v61 = vmul.f32 %v9380_v16, %v9380_v16 }
 0xfe4   :  { %v4806_v9 = vsel %vm246_vm1, %v4780_v61, 0.0 }
 0xfe5   :  { %v4715_v39 = vpop.xlane.xlu2 %4714  ;;  %4807 = vadd.xlane.f32.xlu0 %v4806_v9  ;;  %4729 = vadd.xlane.f32.xlu2 %v4728_v52  ;;  %v4573_v9 = vpop.f32.mrf.mxu2 }
 0xfe6   :  { %v4749_v13 = vmul.f32 %v4715_v39, %v9865_v29  ;;  %v4659_v48 = vadd.f32 %v4658_v23, %v4573_v9 }
 0xfe8   :  { %v9393_v32 = vsub.f32 %v9311_v59, %v4749_v13 }
 0xfea   :  { %v4781_v55 = vmul.f32 %v9393_v32, %v9393_v32 }
 0xfec   :  { %v4809_v5 = vsel %vm246_vm1, %v4781_v55, 0.0 }
 0xfed   :  { %4810 = vadd.xlane.f32.xlu0 %v4809_v5  ;;  %4732 = vadd.xlane.f32.xlu2 %v4731_v22  ;;  %v9874_v5 = vld [vmem:[#allocation12_spill] sm:$0xff] }
 0xfee   :  { %v4676_v22 = vadd.f32 %v4659_v48, %v9874_v5 }
 0xff5   :  { %4735 = vadd.xlane.f32.xlu0 %v4734_v43 }
 0xffd   :  { %4738 = vadd.xlane.f32.xlu0 %v4737_v60 }
0x1030   :  { %v4793_v3 = vpop.xlane.xlu0 %4792 }
0x1031   :  { %v4839_v58 = vmul.f32 %v4793_v3, %v9865_v29 }
0x1033   :  { %v4855_v7 = vadd.f32 1e-05, %v4839_v58 }
0x1035   :  { %6268 = vrsqrt.f32 %v4855_v7  ;;  %vm4877_vm14 = vweird.f32 %v4855_v7 }
0x1038   :  { %v4796_v15 = vpop.xlane.xlu1 %4795  ;;  %v4718_v57 = vpop.xlane.xlu0 %4717 }
0x1039   :  { %v4840_v35 = vmul.f32 %v4796_v15, %v9865_v29  ;;  %v4750_v25 = vmul.f32 %v4718_v57, %v9865_v29  ;;  %v9442_v15 = vadd.f32 %v9271_v1, %v4676_v22 }
0x103b   :  { %v6269_v36 = vpop.eup %6268  ;;  %v4856_v34 = vadd.f32 1e-05, %v4840_v35  ;;  %v9419_v37 = vsub.f32 %v9325_v62, %v4750_v25 }
0x103c   :  { %v4872_v11 = vmul.f32 %v6269_v36, %v4855_v7  ;;  %vm4878_vm13 = vweird.f32 %v6269_v36 }
0x103d   :  { %6270 = vrsqrt.f32 %v4856_v34  ;;  %v4782_v49 = vmul.f32 %v9419_v37, %v9419_v37  ;;  %vm4879_vm0 = vmor %vm4877_vm14, %vm4878_vm13  ;;  %vm4887_vm2 = vweird.f32 %v4856_v34 }
0x103e   :  { %v4873_v2 = vmul.f32 %v6269_v36, %v4872_v11 }
0x103f   :  { %v4812_v44 = vsel %vm246_vm1, %v4782_v49, 0.0 }
0x1040   :  { %v4874_v8 = vmul.f32 0.5, %v4873_v2  ;;  %v4799_v61 = vpop.xlane.xlu1 %4798  ;;  %4813 = vadd.xlane.f32.xlu1 %v4812_v44  ;;  %v4721_v40 = vpop.xlane.xlu0 %4720 }
0x1041   :  { %v4841_v18 = vmul.f32 %v4799_v61, %v9865_v29  ;;  %v4751_v20 = vmul.f32 %v4721_v40, %v9865_v29 }
0x1042   :  { %v4875_v21 = vsub.f32 1.5, %v4874_v8 }
0x1043   :  { %v6271_v52 = vpop.eup %6270  ;;  %v9429_v39 = vadd.f32 1e-05, %v4841_v18  ;;  %v9432_v13 = vsub.f32 %v9338_v56, %v4751_v20 }
0x1044   :  { %v4882_v55 = vmul.f32 %v6271_v52, %v4856_v34  ;;  %v4876_v19 = vmul.f32 %v6269_v36, %v4875_v21  ;;  %vm4888_vm15 = vweird.f32 %v6271_v52 }
0x1045   :  { %6272 = vrsqrt.f32 %v9429_v39  ;;  %v4783_v54 = vmul.f32 %v9432_v13, %v9432_v13  ;;  %vm4889_vm3 = vmor %vm4887_vm2, %vm4888_vm15  ;;  %vm4897_vm5 = vweird.f32 %v9429_v39 }
0x1046   :  { %v4883_v38 = vmul.f32 %v6271_v52, %v4882_v55  ;;  %v4880_v25 = vsel %vm4879_vm0, %v6269_v36, %v4876_v19  ;;  %v4740_v36 = vsel %vm246_vm1, %v9442_v15, 0.0 }
0x1047   :  { %v4815_v47 = vsel %vm246_vm1, %v4783_v54, 0.0  ;;  %v5031_v1 = vmul.f32 %v4880_v25, %v9317_v17 }
0x1048   :  { %v4884_v45 = vmul.f32 0.5, %v4883_v38  ;;  %v4724_v50 = vpop.xlane.xlu1 %4723  ;;  %v4802_v0 = vpop.xlane.xlu2 %4801  ;;  %4816 = vadd.xlane.f32.xlu1 %v4815_v47 }
0x1049   :  { %v4752_v43 = vmul.f32 %v4724_v50, %v9865_v29  ;;  %v4842_v60 = vmul.f32 %v4802_v0, %v9865_v29 }
0x104a   :  { %v4885_v3 = vsub.f32 1.5, %v4884_v45 }
0x104b   :  { %v6273_v58 = vpop.eup %6272  ;;  %v9445_v57 = vsub.f32 %v9351_v63, %v4752_v43  ;;  %v4858_v35 = vadd.f32 1e-05, %v4842_v60 }
0x104c   :  { %v4886_v26 = vmul.f32 %v6271_v52, %v4885_v3  ;;  %v4892_v11 = vmul.f32 %v6273_v58, %v9429_v39  ;;  %vm4898_vm4 = vweird.f32 %v6273_v58 }
0x104d   :  { %6274 = vrsqrt.f32 %v4858_v35  ;;  %v4784_v7 = vmul.f32 %v9445_v57, %v9445_v57  ;;  %vm4899_vm7 = vmor %vm4897_vm5, %vm4898_vm4  ;;  %vm4907_vm8 = vweird.f32 %v4858_v35 }
0x104e   :  { %v4890_v49 = vsel %vm4889_vm3, %v6271_v52, %v4886_v26  ;;  %v4893_v27 = vmul.f32 %v6273_v58, %v4892_v11 }
0x104f   :  { %v5032_v2 = vmul.f32 %v4890_v49, %v9328_v14  ;;  %v4818_v23 = vsel %vm246_vm1, %v4784_v7, 0.0 }
0x1050   :  { %v4894_v44 = vmul.f32 0.5, %v4893_v27  ;;  %v4727_v34 = vpop.xlane.xlu1 %4726  ;;  %4819 = vadd.xlane.f32.xlu2 %v4818_v23  ;;  %v4805_v8 = vpop.xlane.xlu2 %4804  ;;  %4741 = vadd.xlane.f32.xlu1 %v4740_v36 }
0x1051   :  { %v5047_v61 = vpack.c.bf16 %v5032_v2, %v5031_v1  ;;  %v4753_v40 = vmul.f32 %v4727_v34, %v9865_v29  ;;  %v4843_v18 = vmul.f32 %v4805_v8, %v9865_v29 }
0x1052   :  { %v4895_v9 = vsub.f32 1.5, %v4894_v44 }
0x1053   :  { %v6275_v20 = vpop.eup %6274  ;;  %v9458_v17 = vsub.f32 %v9364_v10, %v4753_v40  ;;  %v4859_v14 = vadd.f32 1e-05, %v4843_v18  ;;  %5784 = vmatmul.msk.bf16.vlgmr.msra.gmra.mxu3 %vm246_vm1, %v5047_v61 }
0x1054   :  { %v4902_v52 = vmul.f32 %v6275_v20, %v4858_v35  ;;  %v4896_v54 = vmul.f32 %v6273_v58, %v4895_v9  ;;  %vm4908_vm6 = vweird.f32 %v6275_v20 }
0x1055   :  { %6276 = vrsqrt.f32 %v4859_v14  ;;  %v4785_v48 = vmul.f32 %v9458_v17, %v9458_v17  ;;  %vm4909_vm9 = vmor %vm4907_vm8, %vm4908_vm6  ;;  %vm4917_vm11 = vweird.f32 %v4859_v14 }
0x1056   :  { %v4903_v21 = vmul.f32 %v6275_v20, %v4902_v52  ;;  %v4900_v60 = vsel %vm4899_vm7, %v6273_v58, %v4896_v54 }
0x1057   :  { %v4821_v55 = vsel %vm246_vm1, %v4785_v48, 0.0  ;;  %v5033_v49 = vmul.f32 %v4900_v60, %v9341_v42 }
0x1058   :  { %v4904_v38 = vmul.f32 0.5, %v4903_v21  ;;  %4822 = vadd.xlane.f32.xlu2 %v4821_v55  ;;  %v4730_v5 = vpop.xlane.xlu2 %4729  ;;  %v4808_v22 = vpop.xlane.xlu0 %4807 }
0x1059   :  { %v4754_v47 = vmul.f32 %v4730_v5, %v9865_v29  ;;  %v4844_v19 = vmul.f32 %v4808_v22, %v9865_v29 }
0x105a   :  { %v4905_v45 = vsub.f32 1.5, %v4904_v38 }
0x105b   :  { %v6277_v50 = vpop.eup %6276  ;;  %v9468_v0 = vsub.f32 %v9377_v41, %v4754_v47  ;;  %v4860_v43 = vadd.f32 1e-05, %v4844_v19 }
0x105c   :  { %v4906_v3 = vmul.f32 %v6275_v20, %v4905_v45  ;;  %v4912_v25 = vmul.f32 %v6277_v50, %v4859_v14  ;;  %vm4918_vm10 = vweird.f32 %v6277_v50 }
0x105d   :  { %6278 = vrsqrt.f32 %v4860_v43  ;;  %v4786_v26 = vmul.f32 %v9468_v0, %v9468_v0  ;;  %vm4919_vm13 = vmor %vm4917_vm11, %vm4918_vm10  ;;  %vm4927_vm14 = vweird.f32 %v4860_v43 }
0x105e   :  { %v4910_v11 = vsel %vm4909_vm9, %v6275_v20, %v4906_v3  ;;  %v4913_v7 = vmul.f32 %v6277_v50, %v4912_v25 }
0x105f   :  { %v4824_v39 = vsel %vm246_vm1, %v4786_v26, 0.0  ;;  %v5034_v27 = vmul.f32 %v4910_v11, %v9354_v33 }
0x1060   :  { %v4914_v1 = vmul.f32 0.5, %v4913_v7  ;;  %v4733_v2 = vpop.xlane.xlu2 %4732  ;;  %v4811_v23 = vpop.xlane.xlu0 %4810  ;;  %4825 = vadd.xlane.f32.xlu0 %v4824_v39 }
0x1061   :  { %v4755_v58 = vmul.f32 %v4733_v2, %v9865_v29  ;;  %v5048_v35 = vpack.c.bf16 %v5034_v27, %v5033_v49 }
0x1062   :  { %v4915_v34 = vsub.f32 1.5, %v4914_v1 }
0x1063   :  { %v6279_v36 = vpop.eup %6278  ;;  %v9477_v44 = vsub.f32 %v9390_v12, %v4755_v58  ;;  %5785 = vmatmul.msk.bf16.gmra.mxu3 %vm246_vm1, %v5048_v35 }
0x1064   :  { %v4922_v8 = vmul.f32 %v6279_v36, %v4860_v43  ;;  %v4916_v40 = vmul.f32 %v6277_v50, %v4915_v34  ;;  %vm4928_vm12 = vweird.f32 %v6279_v36 }
0x1065   :  { %v4787_v42 = vmul.f32 %v9477_v44, %v9477_v44  ;;  %vm4929_vm15 = vmor %vm4927_vm14, %vm4928_vm12 }
0x1066   :  { %v4923_v61 = vmul.f32 %v6279_v36, %v4922_v8  ;;  %v4920_v21 = vsel %vm4919_vm13, %v6277_v50, %v4916_v40 }
0x1067   :  { %v4827_v33 = vsel %vm246_vm1, %v4787_v42, 0.0  ;;  %v5035_v22 = vmul.f32 %v4920_v21, %v9367_v53  ;;  %v4845_v53 = vmul.f32 %v4811_v23, %v9865_v29 }
0x1068   :  { %v4924_v18 = vmul.f32 0.5, %v4923_v61  ;;  %v4736_v20 = vpop.xlane.xlu0 %4735  ;;  %4828 = vadd.xlane.f32.xlu1 %v4827_v33 }
0x1069   :  { %v4756_v9 = vmul.f32 %v4736_v20, %v9865_v29  ;;  %v4861_v3 = vadd.f32 1e-05, %v4845_v53 }
0x106a   :  { %v4925_v52 = vsub.f32 1.5, %v4924_v18 }
0x106b   :  { %v9485_v48 = vsub.f32 %v9402_v51, %v4756_v9  ;;  %6280 = vrsqrt.f32 %v4861_v3  ;;  %vm4937_vm2 = vweird.f32 %v4861_v3 }
0x106c   :  { %v4926_v55 = vmul.f32 %v6279_v36, %v4925_v52 }
0x106d   :  { %v4788_v54 = vmul.f32 %v9485_v48, %v9485_v48 }
0x106e   :  { %v4930_v38 = vsel %vm4929_vm15, %v6279_v36, %v4926_v55 }
0x106f   :  { %v4830_v5 = vsel %vm246_vm1, %v4788_v54, 0.0  ;;  %v5036_v14 = vmul.f32 %v4930_v38, %v9380_v16 }
0x1070   :  { %4831 = vadd.xlane.f32.xlu2 %v4830_v5  ;;  %v4739_v47 = vpop.xlane.xlu0 %4738 }
0x1071   :  { %v4757_v19 = vmul.f32 %v4739_v47, %v9865_v29  ;;  %v5049_v45 = vpack.c.bf16 %v5036_v14, %v5035_v22  ;;  %v6281_v16 = vpop.eup %6280 }
0x1072   :  { %v4932_v25 = vmul.f32 %v6281_v16, %v4861_v3  ;;  %vm4938_vm0 = vweird.f32 %v6281_v16 }
0x1073   :  { %v9494_v50 = vsub.f32 %v9408_v4, %v4757_v19  ;;  %5786 = vmatmul.msk.bf16.gmra.mxu3 %vm246_vm1, %v5049_v45  ;;  %vm4939_vm4 = vmor %vm4937_vm2, %vm4938_vm0 }
0x1074   :  { %v4933_v39 = vmul.f32 %v6281_v16, %v4932_v25 }
0x1075   :  { %v4789_v43 = vmul.f32 %v9494_v50, %v9494_v50 }
0x1076   :  { %v4934_v49 = vmul.f32 0.5, %v4933_v39 }
0x1077   :  { %v4833_v60 = vsel %vm246_vm1, %v4789_v43, 0.0 }
0x1078   :  { %4834 = vadd.xlane.f32.xlu0 %v4833_v60  ;;  %v4935_v35 = vsub.f32 1.5, %v4934_v49 }
0x107a   :  { %v4936_v34 = vmul.f32 %v6281_v16, %v4935_v35 }
0x107c   :  { %v4940_v21 = vsel %vm4939_vm4, %v6281_v16, %v4936_v34 }
0x107d   :  { %v5037_v47 = vmul.f32 %v4940_v21, %v9393_v32 }
0x10b3   :  { %v4814_v26 = vpop.xlane.xlu1 %4813 }
0x10b4   :  { %v4846_v11 = vmul.f32 %v4814_v26, %v9865_v29 }
0x10b6   :  { %v4862_v7 = vadd.f32 1e-05, %v4846_v11 }
0x10b8   :  { %6282 = vrsqrt.f32 %v4862_v7  ;;  %vm4947_vm5 = vweird.f32 %v4862_v7 }
0x10bb   :  { %v4817_v27 = vpop.xlane.xlu1 %4816 }
0x10bc   :  { %v4847_v1 = vmul.f32 %v4817_v27, %v9865_v29 }
0x10be   :  { %v6283_v2 = vpop.eup %6282  ;;  %v4863_v58 = vadd.f32 1e-05, %v4847_v1 }
0x10bf   :  { %v4942_v36 = vmul.f32 %v6283_v2, %v4862_v7  ;;  %vm4948_vm3 = vweird.f32 %v6283_v2 }
0x10c0   :  { %6284 = vrsqrt.f32 %v4863_v58  ;;  %vm4949_vm6 = vmor %vm4947_vm5, %vm4948_vm3  ;;  %vm4957_vm8 = vweird.f32 %v4863_v58 }
0x10c1   :  { %v4943_v23 = vmul.f32 %v6283_v2, %v4942_v36 }
0x10c3   :  { %v4944_v8 = vmul.f32 0.5, %v4943_v23  ;;  %v4820_v42 = vpop.xlane.xlu2 %4819  ;;  %v4742_v61 = vpop.xlane.xlu1 %4741 }
0x10c4   :  { %v4848_v33 = vmul.f32 %v4820_v42, %v9865_v29  ;;  %v4758_v40 = vmul.f32 %v4742_v61, %v9865_v29 }
0x10c5   :  { %v4945_v18 = vsub.f32 1.5, %v4944_v8 }
0x10c6   :  { %v6285_v20 = vpop.eup %6284  ;;  %v4864_v9 = vadd.f32 1e-05, %v4848_v33  ;;  %v9506_v52 = vsub.f32 %v9442_v15, %v4758_v40 }
0x10c7   :  { %v4946_v55 = vmul.f32 %v6283_v2, %v4945_v18  ;;  %v4952_v54 = vmul.f32 %v6285_v20, %v4863_v58  ;;  %vm4958_vm7 = vweird.f32 %v6285_v20 }
0x10c8   :  { %6286 = vrsqrt.f32 %v4864_v9  ;;  %v4790_v38 = vmul.f32 %v9506_v52, %v9506_v52  ;;  %vm4959_vm10 = vmor %vm4957_vm8, %vm4958_vm7  ;;  %vm4967_vm11 = vweird.f32 %v4864_v9 }
0x10c9   :  { %v4950_v5 = vsel %vm4949_vm6, %v6283_v2, %v4946_v55  ;;  %v4953_v22 = vmul.f32 %v6285_v20, %v4952_v54 }
0x10ca   :  { %v4836_v14 = vsel %vm246_vm1, %v4790_v38, 0.0  ;;  %v5038_v19 = vmul.f32 %v4950_v5, %v9419_v37  ;;  %v9518_v37 = vld [vmem:[%s9690_s10 + $0x1] ss:$0 sm:$0xff] }
0x10cb   :  { %v4954_v45 = vmul.f32 0.5, %v4953_v22  ;;  %v4823_v43 = vpop.xlane.xlu2 %4822  ;;  %4837 = vadd.xlane.f32.xlu1 %v4836_v14 }
0x10cc   :  { %v4849_v60 = vmul.f32 %v4823_v43, %v9865_v29  ;;  %v5050_v53 = vpack.c.bf16 %v5038_v19, %v5037_v47  ;;  %v5859_v43 = vld [vmem:[%s9691_s11 + $0x10] sm:$0xff] }
0x10cd   :  { %v4955_v25 = vsub.f32 1.5, %v4954_v45 }
0x10ce   :  { %v6287_v3 = vpop.eup %6286  ;;  %v4865_v16 = vadd.f32 1e-05, %v4849_v60  ;;  %5787 = vmatmul.msk.bf16.gmra.mxu3 %vm246_vm1, %v5050_v53 }
0x10cf   :  { %v4962_v26 = vmul.f32 %v6287_v3, %v4864_v9  ;;  %v4956_v7 = vmul.f32 %v6285_v20, %v4955_v25  ;;  %vm4968_vm9 = vweird.f32 %v6287_v3 }
0x10d0   :  { %6288 = vrsqrt.f32 %v4865_v16  ;;  %vm4969_vm12 = vmor %vm4967_vm11, %vm4968_vm9  ;;  %vm4977_vm14 = vweird.f32 %v4865_v16 }
0x10d1   :  { %v4963_v11 = vmul.f32 %v6287_v3, %v4962_v26  ;;  %v4960_v36 = vsel %vm4959_vm10, %v6285_v20, %v4956_v7 }
0x10d2   :  { %v5039_v33 = vmul.f32 %v4960_v36, %v9432_v13  ;;  %v5860_v13 = vld [vmem:[%s9691_s11 + $0x18] sm:$0xff] }
0x10d3   :  { %v4964_v39 = vmul.f32 0.5, %v4963_v11  ;;  %v4826_v32 = vpop.xlane.xlu0 %4825  ;;  %5346 = vmatpush.bf16.msrb.mxu1 %v5860_v13 }
0x10d4   :  { %v4850_v49 = vmul.f32 %v4826_v32, %v9865_v29 }
0x10d5   :  { %v4965_v27 = vsub.f32 1.5, %v4964_v39 }
0x10d6   :  { %v9521_v1 = vpop.eup %6288  ;;  %v4866_v2 = vadd.f32 1e-05, %v4850_v49  ;;  %v5107_v35 = vpop.f32.mrf.mxu3 }
0x10d7   :  { %v4966_v23 = vmul.f32 %v6287_v3, %v4965_v27  ;;  %v4972_v34 = vmul.f32 %v9521_v1, %v4865_v16  ;;  %v9525_v8 = vadd.f32 %v9518_v37, %v5107_v35  ;;  %vm4978_vm13 = vweird.f32 %v9521_v1  ;;  %5347 = vmatpush.bf16.msrb.mxu1 %v5859_v43 }
0x10d8   :  { %6290 = vrsqrt.f32 %v4866_v2  ;;  %vm9549_vm15 = vmor %vm4977_vm14, %vm4978_vm13  ;;  %vm4987_vm2 = vweird.f32 %v4866_v2 }
0x10d9   :  { %v4970_v42 = vsel %vm4969_vm12, %v6287_v3, %v4966_v23  ;;  %v4973_v58 = vmul.f32 %v9521_v1, %v4972_v34  ;;  %v5163_v61 = vmul.f32 0.044715, %v9525_v8  ;;  %v5147_v43 = vmul.f32 0.5, %v9525_v8 }
0x10da   :  { %v5040_v40 = vmul.f32 %v4970_v42, %v9445_v57 }
0x10db   :  { %v4974_v18 = vmul.f32 0.5, %v4973_v58  ;;  %v5179_v20 = vmul.f32 %v5163_v61, %v9525_v8  ;;  %v4829_v9 = vpop.xlane.xlu1 %4828 }
0x10dc   :  { %v4851_v21 = vmul.f32 %v4829_v9, %v9865_v29  ;;  %v5051_v55 = vpack.c.bf16 %v5040_v40, %v5039_v33 }
0x10dd   :  { %v5195_v54 = vmul.f32 %v5179_v20, %v9525_v8  ;;  %v4975_v5 = vsub.f32 1.5, %v4974_v18 }
0x10de   :  { %v6291_v38 = vpop.eup %6290  ;;  %v9534_v22 = vadd.f32 1e-05, %v4851_v21  ;;  %v5109_v14 = vpop.f32.mrf.mxu3  ;;  %5788 = vmatmul.msk.bf16.gmra.mxu3 %vm246_vm1, %v5051_v55 }
0x10df   :  { %v4982_v57 = vmul.f32 %v6291_v38, %v4866_v2  ;;  %v5211_v47 = vadd.f32 %v5195_v54, %v9525_v8  ;;  %v5110_v19 = vadd.f32 %v9518_v37, %v5109_v14  ;;  %v4976_v60 = vmul.f32 %v9521_v1, %v4975_v5 }
0x10e0   :  { %6292 = vrsqrt.f32 %v9534_v22  ;;  %vm4988_vm0 = vweird.f32 %v6291_v38  ;;  %vm4997_vm5 = vweird.f32 %v9534_v22 }
0x10e1   :  { %v4983_v45 = vmul.f32 %v6291_v38, %v4982_v57  ;;  %v5164_v53 = vmul.f32 0.044715, %v5110_v19  ;;  %v5227_v25 = vmul.f32 0.7978846, %v5211_v47  ;;  %v4980_v27 = vsel %vm9549_vm15, %v9521_v1, %v4976_v60  ;;  %vm4989_vm3 = vmor %vm4987_vm2, %vm4988_vm0 }
0x10e2   :  { %v5041_v40 = vmul.f32 %v4980_v27, %v9458_v17  ;;  %v5148_v60 = vmul.f32 0.5, %v5110_v19 }
0x10e3   :  { %v4984_v3 = vmul.f32 0.5, %v4983_v45  ;;  %v4832_v26 = vpop.xlane.xlu2 %4831  ;;  %v5180_v11 = vmul.f32 %v5164_v53, %v5110_v19  ;;  %6294 = vtanh.f32 %v5227_v25 }
0x10e4   :  { %v4852_v7 = vmul.f32 %v4832_v26, %v9865_v29 }
0x10e5   :  { %v4985_v32 = vsub.f32 1.5, %v4984_v3  ;;  %v5196_v35 = vmul.f32 %v5180_v11, %v5110_v19 }
0x10e6   :  { %v9553_v49 = vpop.eup %6292  ;;  %v4868_v36 = vadd.f32 1e-05, %v4852_v7  ;;  %v5112_v16 = vpop.f32.mrf.mxu3 }
0x10e7   :  { %v4986_v23 = vmul.f32 %v6291_v38, %v4985_v32  ;;  %v4992_v34 = vmul.f32 %v9553_v49, %v9534_v22  ;;  %v9561_v42 = vadd.f32 %v9518_v37, %v5112_v16  ;;  %v5212_v58 = vadd.f32 %v5196_v35, %v5110_v19 }
0x10e8   :  { %6296 = vrsqrt.f32 %v4868_v36  ;;  %vm4998_vm4 = vweird.f32 %v9553_v49  ;;  %vm5007_vm8 = vweird.f32 %v4868_v36 }
0x10e9   :  { %v4990_v61 = vsel %vm4989_vm3, %v6291_v38, %v4986_v23  ;;  %v4993_v33 = vmul.f32 %v9553_v49, %v4992_v34  ;;  %v5165_v1 = vmul.f32 0.044715, %v9561_v42  ;;  %v5228_v2 = vmul.f32 0.7978846, %v5212_v58  ;;  %v6295_v55 = vpop.eup %6294  ;;  %vm4999_vm7 = vmor %vm4997_vm5, %vm4998_vm4 }
0x10ea   :  { %v5042_v18 = vmul.f32 %v4990_v61, %v9468_v0  ;;  %v5259_v47 = vadd.f32 1.0, %v6295_v55 }
0x10eb   :  { %v4994_v20 = vmul.f32 0.5, %v4993_v33  ;;  %v5181_v9 = vmul.f32 %v5165_v1, %v9561_v42  ;;  %6298 = vtanh.f32 %v5228_v2 }
0x10ec   :  { %v5052_v21 = vpack.c.bf16 %v5042_v18, %v5041_v40  ;;  %v5275_v39 = vmul.f32 %v5259_v47, %v5147_v43 }
0x10ed   :  { %v5197_v54 = vmul.f32 %v5181_v9, %v9561_v42  ;;  %v4995_v38 = vsub.f32 1.5, %v4994_v20 }
0x10ee   :  { %v6297_v5 = vpop.eup %6296  ;;  %v5114_v14 = vpop.f32.mrf.mxu3  ;;  %5789 = vmatmul.msk.bf16.gmra.mxu3 %vm246_vm1, %v5052_v21 }
0x10ef   :  { %v5002_v13 = vmul.f32 %v6297_v5, %v4868_v36  ;;  %v5213_v57 = vadd.f32 %v5197_v54, %v9561_v42  ;;  %v5115_v17 = vadd.f32 %v9518_v37, %v5114_v14  ;;  %v4996_v3 = vmul.f32 %v9553_v49, %v4995_v38 }
0x10f0   :  { %vm5008_vm6 = vweird.f32 %v6297_v5  ;;  %v5149_v14 = vmul.f32 0.5, %v9561_v42 }
0x10f1   :  { %v5003_v0 = vmul.f32 %v6297_v5, %v5002_v13  ;;  %v6299_v45 = vpop.eup %6298  ;;  %v5166_v53 = vmul.f32 0.044715, %v5115_v17  ;;  %v5229_v11 = vmul.f32 0.7978846, %v5213_v57  ;;  %v5000_v8 = vsel %vm4999_vm7, %v9553_v49, %v4996_v3  ;;  %vm5009_vm9 = vmor %vm5007_vm8, %vm5008_vm6 }
0x10f2   :  { %v5260_v25 = vadd.f32 1.0, %v6299_v45  ;;  %v5043_v1 = vmul.f32 %v5000_v8, %v9477_v44  ;;  %v5150_v13 = vmul.f32 0.5, %v5115_v17 }
0x10f3   :  { %v5004_v26 = vmul.f32 0.5, %v5003_v0  ;;  %v5182_v7 = vmul.f32 %v5166_v53, %v5115_v17  ;;  %6300 = vtanh.f32 %v5229_v11 }
0x10f4   :  { %v5276_v32 = vmul.f32 %v5260_v25, %v5148_v60 }
0x10f5   :  { %v5005_v27 = vsub.f32 1.5, %v5004_v26  ;;  %v5198_v35 = vmul.f32 %v5182_v7, %v5115_v17 }
0x10f6   :  { %v5117_v16 = vpop.f32.mrf.mxu3  ;;  %v5291_v19 = vpack.c.bf16 %v5276_v32, %v5275_v39  ;;  %v4835_v32 = vpop.xlane.xlu0 %4834 }
0x10f7   :  { %v5006_v23 = vmul.f32 %v6297_v5, %v5005_v27  ;;  %v5214_v34 = vadd.f32 %v5198_v35, %v5115_v17  ;;  %v5118_v58 = vadd.f32 %v9518_v37, %v5117_v16  ;;  %v4853_v27 = vmul.f32 %v4835_v32, %v9865_v29 }
0x10f8   :  { %5804 = vmatmul.msk.bf16.vlgmr.msrb.gmra.mxu1 %vm246_vm1, %v5291_v19 }
0x10f9   :  { %v5010_v22 = vsel %vm5009_vm9, %v6297_v5, %v5006_v23  ;;  %v5230_v61 = vmul.f32 0.7978846, %v5214_v34  ;;  %v5167_v33 = vmul.f32 0.044715, %v5118_v58  ;;  %v6301_v49 = vpop.eup %6300  ;;  %v5151_v26 = vmul.f32 0.5, %v5118_v58 }
0x10fa   :  { %v5044_v2 = vmul.f32 %v5010_v22, %v9485_v48  ;;  %v5261_v54 = vadd.f32 1.0, %v6301_v49  ;;  %v4869_v35 = vadd.f32 1e-05, %v4853_v27 }
0x10fb   :  { %v5183_v40 = vmul.f32 %v5167_v33, %v5118_v58  ;;  %6302 = vtanh.f32 %v5230_v61 }
0x10fc   :  { %v5053_v18 = vpack.c.bf16 %v5044_v2, %v5043_v1  ;;  %v5277_v47 = vmul.f32 %v5261_v54, %v5149_v14  ;;  %vm5017_vm11 = vweird.f32 %v4869_v35 }
0x10fd   :  { %v5199_v20 = vmul.f32 %v5183_v40, %v5118_v58 }
0x10fe   :  { %v5119_v36 = vpop.f32.mrf.mxu3  ;;  %5790 = vmatmul.msk.bf16.gmra.mxu3 %vm246_vm1, %v5053_v18 }
0x10ff   :  { %v5120_v9 = vadd.f32 %v9518_v37, %v5119_v36  ;;  %v5215_v21 = vadd.f32 %v5199_v20, %v5118_v58 }
0x1101   :  { %v5168_v55 = vmul.f32 0.044715, %v5120_v9  ;;  %v6303_v5 = vpop.eup %6302  ;;  %v5231_v38 = vmul.f32 0.7978846, %v5215_v21  ;;  %v5152_v11 = vmul.f32 0.5, %v5120_v9 }
0x1102   :  { %v5262_v48 = vadd.f32 1.0, %v6303_v5 }
0x1103   :  { %v5184_v44 = vmul.f32 %v5168_v55, %v5120_v9  ;;  %6304 = vtanh.f32 %v5231_v38 }
0x1104   :  { %v5278_v0 = vmul.f32 %v5262_v48, %v5150_v13 }
0x1105   :  { %v5200_v57 = vmul.f32 %v5184_v44, %v5120_v9 }
0x1106   :  { %v5292_v43 = vpack.c.bf16 %v5278_v0, %v5277_v47 }
0x1107   :  { %v5216_v45 = vadd.f32 %v5200_v57, %v5120_v9 }
0x1108   :  { %5805 = vmatmul.msk.bf16.gmra.mxu1 %vm246_vm1, %v5292_v43 }
0x1109   :  { %v5232_v60 = vmul.f32 0.7978846, %v5216_v45  ;;  %v6305_v53 = vpop.eup %6304 }
0x110a   :  { %v5263_v3 = vadd.f32 1.0, %v6305_v53 }
0x110b   :  { %6306 = vtanh.f32 %v5232_v60 }
0x110c   :  { %v5279_v7 = vmul.f32 %v5263_v3, %v5151_v26  ;;  %6308 = vrsqrt.f32 %v4869_v35 }
0x1111   :  { %v6307_v25 = vpop.eup %6306 }
0x1112   :  { %v5264_v42 = vadd.f32 1.0, %v6307_v25  ;;  %v6309_v16 = vpop.eup %6308 }
0x1113   :  { %v5012_v8 = vmul.f32 %v6309_v16, %v4869_v35  ;;  %vm5018_vm10 = vweird.f32 %v6309_v16 }
0x1114   :  { %v5280_v39 = vmul.f32 %v5264_v42, %v5152_v11  ;;  %vm5019_vm13 = vmor %vm5017_vm11, %vm5018_vm10 }
0x1115   :  { %v5013_v22 = vmul.f32 %v6309_v16, %v5012_v8 }
0x1116   :  { %v5293_v17 = vpack.c.bf16 %v5280_v39, %v5279_v7 }
0x1117   :  { %v5014_v58 = vmul.f32 0.5, %v5013_v22 }
0x1118   :  { %5806 = vmatmul.msk.bf16.gmra.mxu1 %vm246_vm1, %v5293_v17 }
0x1119   :  { %v5015_v33 = vsub.f32 1.5, %v5014_v58 }
0x111b   :  { %v5016_v40 = vmul.f32 %v6309_v16, %v5015_v33 }
0x111d   :  { %v5020_v36 = vsel %vm5019_vm13, %v6309_v16, %v5016_v40 }
0x111e   :  { %v5045_v54 = vmul.f32 %v5020_v36, %v9494_v50 }
0x113e   :  { %v4838_v19 = vpop.xlane.xlu1 %4837 }
0x113f   :  { %v4854_v23 = vmul.f32 %v4838_v19, %v9865_v29 }
0x1141   :  { %v4870_v34 = vadd.f32 1e-05, %v4854_v23 }
0x1143   :  { %6310 = vrsqrt.f32 %v4870_v34  ;;  %vm5027_vm14 = vweird.f32 %v4870_v34 }
0x1149   :  { %v6311_v61 = vpop.eup %6310 }
0x114a   :  { %v5022_v1 = vmul.f32 %v6311_v61, %v4870_v34  ;;  %vm5028_vm12 = vweird.f32 %v6311_v61 }
0x114b   :  { %vm5029_vm15 = vmor %vm5027_vm14, %vm5028_vm12 }
0x114c   :  { %v5023_v2 = vmul.f32 %v6311_v61, %v5022_v1 }
0x114e   :  { %v5024_v18 = vmul.f32 0.5, %v5023_v2 }
0x1150   :  { %v5025_v49 = vsub.f32 1.5, %v5024_v18 }
0x1151   :  { %v5122_v20 = vpop.f32.mrf.mxu3 }
0x1152   :  { %v5026_v9 = vmul.f32 %v6311_v61, %v5025_v49  ;;  %v5123_v29 = vadd.f32 %v9518_v37, %v5122_v20 }
0x1154   :  { %v5030_v21 = vsel %vm5029_vm15, %v6311_v61, %v5026_v9  ;;  %v5169_v55 = vmul.f32 0.044715, %v5123_v29  ;;  %v5153_v35 = vmul.f32 0.5, %v5123_v29 }
0x1155   :  { %v5046_v5 = vmul.f32 %v5030_v21, %v9506_v52 }
0x1156   :  { %v5185_v14 = vmul.f32 %v5169_v55, %v5123_v29 }
0x1157   :  { %v5054_v38 = vpack.c.bf16 %v5046_v5, %v5045_v54 }
0x1158   :  { %v5201_v44 = vmul.f32 %v5185_v14, %v5123_v29 }
0x1159   :  { %v5124_v13 = vpop.f32.mrf.mxu3  ;;  %5791 = vmatmul.msk.bf16.gmra.mxu3 %vm246_vm1, %v5054_v38 }
0x115a   :  { %v5217_v48 = vadd.f32 %v5201_v44, %v5123_v29  ;;  %v5125_v57 = vadd.f32 %v9518_v37, %v5124_v13  ;;  %v9602_v44 = vld [vmem:[%s9692_s12 + $0x1] ss:$0 sm:$0xff] }
0x115c   :  { %v5170_v47 = vmul.f32 0.044715, %v5125_v57  ;;  %v5233_v0 = vmul.f32 0.7978846, %v5217_v48  ;;  %v5154_v16 = vmul.f32 0.5, %v5125_v57 }
0x115e   :  { %v5186_v45 = vmul.f32 %v5170_v47, %v5125_v57  ;;  %6312 = vtanh.f32 %v5233_v0 }
0x1160   :  { %v5202_v43 = vmul.f32 %v5186_v45, %v5125_v57 }
0x1161   :  { %v5127_v60 = vpop.f32.mrf.mxu3 }
0x1162   :  { %v5218_v53 = vadd.f32 %v5202_v43, %v5125_v57  ;;  %v5128_v3 = vadd.f32 %v9518_v37, %v5127_v60 }
0x1164   :  { %v5234_v50 = vmul.f32 0.7978846, %v5218_v53  ;;  %v5171_v52 = vmul.f32 0.044715, %v5128_v3  ;;  %v6313_v26 = vpop.eup %6312  ;;  %v5155_v13 = vmul.f32 0.5, %v5128_v3 }
0x1165   :  { %v5265_v17 = vadd.f32 1.0, %v6313_v26 }
0x1166   :  { %v5187_v25 = vmul.f32 %v5171_v52, %v5128_v3  ;;  %6314 = vtanh.f32 %v5234_v50 }
0x1167   :  { %v5281_v34 = vmul.f32 %v5265_v17, %v5153_v35 }
0x1168   :  { %v5203_v11 = vmul.f32 %v5187_v25, %v5128_v3 }
0x1169   :  { %v5129_v42 = vpop.f32.mrf.mxu3 }
0x116a   :  { %v5219_v7 = vadd.f32 %v5203_v11, %v5128_v3  ;;  %v5130_v39 = vadd.f32 %v9518_v37, %v5129_v42 }
0x116c   :  { %v6315_v32 = vpop.eup %6314  ;;  %v5172_v27 = vmul.f32 0.044715, %v5130_v39  ;;  %v5235_v19 = vmul.f32 0.7978846, %v5219_v7  ;;  %v5156_v48 = vmul.f32 0.5, %v5130_v39 }
0x116d   :  { %v5266_v8 = vadd.f32 1.0, %v6315_v32 }
0x116e   :  { %v5188_v23 = vmul.f32 %v5172_v27, %v5130_v39  ;;  %6316 = vtanh.f32 %v5235_v19 }
0x116f   :  { %v5282_v22 = vmul.f32 %v5266_v8, %v5154_v16 }
0x1170   :  { %v5204_v58 = vmul.f32 %v5188_v23, %v5130_v39 }
0x1171   :  { %v5132_v61 = vpop.f32.mrf.mxu3  ;;  %v5294_v33 = vpack.c.bf16 %v5282_v22, %v5281_v34 }
0x1172   :  { %v5220_v1 = vadd.f32 %v5204_v58, %v5130_v39  ;;  %v5133_v2 = vadd.f32 %v9518_v37, %v5132_v61 }
0x1173   :  { %5807 = vmatmul.msk.bf16.gmra.mxu1 %vm246_vm1, %v5294_v33 }
0x1174   :  { %v5236_v40 = vmul.f32 0.7978846, %v5220_v1  ;;  %v5173_v18 = vmul.f32 0.044715, %v5133_v2  ;;  %v6317_v36 = vpop.eup %6316  ;;  %v5157_v58 = vmul.f32 0.5, %v5133_v2 }
0x1175   :  { %v5349_v20 = vpop.f32.mrf.mxu1  ;;  %v5267_v54 = vadd.f32 1.0, %v6317_v36 }
0x1176   :  { %v5189_v49 = vmul.f32 %v5173_v18, %v5133_v2  ;;  %6318 = vtanh.f32 %v5236_v40  ;;  %v5389_v38 = vadd.f32 %v5349_v20, %v9275_v30 }
0x1177   :  { %v5283_v60 = vmul.f32 %v5267_v54, %v5155_v13 }
0x1178   :  { %v5205_v9 = vmul.f32 %v5189_v49, %v5133_v2  ;;  %v9606_v52 = vadd.f32 %v9602_v44, %v5389_v38 }
0x1179   :  { %v5134_v29 = vpop.f32.mrf.mxu3 }
0x117a   :  { %v5221_v21 = vadd.f32 %v5205_v9, %v5133_v2  ;;  %v5135_v55 = vadd.f32 %v9518_v37, %v5134_v29 }
0x117c   :  { %v6319_v5 = vpop.eup %6318  ;;  %v5174_v14 = vmul.f32 0.044715, %v5135_v55  ;;  %v5237_v47 = vmul.f32 0.7978846, %v5221_v21  ;;  %v5158_v61 = vmul.f32 0.5, %v5135_v55 }
0x117d   :  { %v5268_v57 = vadd.f32 1.0, %v6319_v5  ;;  %v5351_v45 = vpop.f32.mrf.mxu1 }
0x117e   :  { %v5190_v0 = vmul.f32 %v5174_v14, %v5135_v55  ;;  %v5390_v43 = vadd.f32 %v5351_v45, %v9281_v46  ;;  %6320 = vtanh.f32 %v5237_v47 }
0x117f   :  { %v5284_v53 = vmul.f32 %v5268_v57, %v5156_v48 }
0x1180   :  { %v5206_v50 = vmul.f32 %v5190_v0, %v5135_v55  ;;  %v9609_v30 = vadd.f32 %v9602_v44, %v5390_v43 }
0x1181   :  { %v5137_v25 = vpop.f32.mrf.mxu3  ;;  %v5295_v26 = vpack.c.bf16 %v5284_v53, %v5283_v60 }
0x1182   :  { %v5222_v11 = vadd.f32 %v5206_v50, %v5135_v55  ;;  %v5138_v3 = vadd.f32 %v9518_v37, %v5137_v25  ;;  %v5425_v46 = vpack.c.bf16 %v9609_v30, %v9606_v52 }
0x1183   :  { %5808 = vmatmul.msk.bf16.gmra.mxu1 %vm246_vm1, %v5295_v26 }
0x1184   :  { %v5238_v42 = vmul.f32 0.7978846, %v5222_v11  ;;  %v5175_v7 = vmul.f32 0.044715, %v5138_v3  ;;  %v6321_v32 = vpop.eup %6320  ;;  %v5159_v38 = vmul.f32 0.5, %v5138_v3 }
0x1185   :  { %v5354_v17 = vpop.f32.mrf.mxu1  ;;  %v5269_v19 = vadd.f32 1.0, %v6321_v32 }
0x1186   :  { %v5191_v39 = vmul.f32 %v5175_v7, %v5138_v3  ;;  %6322 = vtanh.f32 %v5238_v42  ;;  %v5391_v22 = vadd.f32 %v5354_v17, %v9287_v31 }
0x1187   :  { %v5285_v20 = vmul.f32 %v5269_v19, %v5157_v58 }
0x1188   :  { %v5207_v27 = vmul.f32 %v5191_v39, %v5138_v3  ;;  %v9619_v29 = vadd.f32 %v9602_v44, %v5391_v22 }
0x1189   :  { %v5139_v35 = vpop.f32.mrf.mxu3 }
0x118a   :  { %v5223_v16 = vadd.f32 %v5207_v27, %v5138_v3  ;;  %v5140_v8 = vadd.f32 %v9518_v37, %v5139_v35 }
0x118c   :  { %v6323_v23 = vpop.eup %6322  ;;  %v5176_v34 = vmul.f32 0.044715, %v5140_v8  ;;  %v5239_v1 = vmul.f32 0.7978846, %v5223_v16  ;;  %v5160_v13 = vmul.f32 0.5, %v5140_v8 }
0x118d   :  { %v5270_v33 = vadd.f32 1.0, %v6323_v23  ;;  %v5356_v18 = vpop.f32.mrf.mxu1 }
0x118e   :  { %v5192_v40 = vmul.f32 %v5176_v34, %v5140_v8  ;;  %v5392_v49 = vadd.f32 %v5356_v18, %v9293_v28  ;;  %6324 = vtanh.f32 %v5239_v1 }
0x118f   :  { %v5286_v36 = vmul.f32 %v5270_v33, %v5158_v61 }
0x1190   :  { %v5208_v9 = vmul.f32 %v5192_v40, %v5140_v8  ;;  %v9622_v21 = vadd.f32 %v9602_v44, %v5392_v49 }
0x1191   :  { %v5296_v54 = vpack.c.bf16 %v5286_v36, %v5285_v20 }
0x1192   :  { %v5224_v5 = vadd.f32 %v5208_v9, %v5140_v8  ;;  %v5426_v31 = vpack.c.bf16 %v9622_v21, %v9619_v29 }
0x1193   :  { %5809 = vmatmul.msk.bf16.gmra.mxu1 %vm246_vm1, %v5296_v54 }
0x1194   :  { %v5240_v2 = vmul.f32 0.7978846, %v5224_v5  ;;  %v6325_v28 = vpop.eup %6324 }
0x1195   :  { %v5271_v55 = vadd.f32 1.0, %v6325_v28  ;;  %v9629_v60 = vpop.f32.mrf.mxu1 }
0x1196   :  { %6326 = vtanh.f32 %v5240_v2 }
0x1197   :  { %v5287_v57 = vmul.f32 %v5271_v55, %v5159_v38 }
0x119c   :  { %v6327_v14 = vpop.eup %6326 }
0x119d   :  { %v5272_v48 = vadd.f32 1.0, %v6327_v14  ;;  %v5361_v7 = vpop.f32.mrf.mxu1 }
0x119f   :  { %v5288_v47 = vmul.f32 %v5272_v48, %v5160_v13 }
0x11a1   :  { %v5297_v0 = vpack.c.bf16 %v5288_v47, %v5287_v57 }
0x11a3   :  { %5810 = vmatmul.msk.bf16.gmra.mxu1 %vm246_vm1, %v5297_v0 }
0x11dc   :  { %v5142_v45 = vpop.f32.mrf.mxu3 }
0x11dd   :  { %v5143_v43 = vadd.f32 %v9518_v37, %v5142_v45 }
0x11df   :  { %v5177_v53 = vmul.f32 0.044715, %v5143_v43  ;;  %v5161_v58 = vmul.f32 0.5, %v5143_v43 }
0x11e1   :  { %v5193_v50 = vmul.f32 %v5177_v53, %v5143_v43 }
0x11e3   :  { %v5209_v25 = vmul.f32 %v5193_v50, %v5143_v43 }
0x11e4   :  { %v5144_v26 = vpop.f32.mrf.mxu3 }
0x11e5   :  { %v5225_v11 = vadd.f32 %v5209_v25, %v5143_v43  ;;  %v5145_v42 = vadd.f32 %v9518_v37, %v5144_v26 }
0x11e7   :  { %v5178_v3 = vmul.f32 0.044715, %v5145_v42  ;;  %v5241_v39 = vmul.f32 0.7978846, %v5225_v11  ;;  %v5162_v61 = vmul.f32 0.5, %v5145_v42 }
0x11e9   :  { %v5194_v17 = vmul.f32 %v5178_v3, %v5145_v42  ;;  %6328 = vtanh.f32 %v5241_v39  ;;  %v5394_v3 = vadd.f32 %v5361_v7, %v9305_v24  ;;  %v5861_v24 = vld [vmem:[%s9683_s3] sm:$0xff] }
0x11eb   :  { %v5210_v32 = vmul.f32 %v5194_v17, %v5145_v42  ;;  %v5412_v17 = vadd.f32 %v9602_v44, %v5394_v3 }
0x11ed   :  { %v5226_v27 = vadd.f32 %v5210_v32, %v5145_v42 }
0x11ef   :  { %v5242_v35 = vmul.f32 0.7978846, %v5226_v27  ;;  %v6329_v8 = vpop.eup %6328 }
0x11f0   :  { %v5364_v16 = vpop.f32.mrf.mxu1  ;;  %v5273_v19 = vadd.f32 1.0, %v6329_v8 }
0x11f1   :  { %6330 = vtanh.f32 %v5242_v35  ;;  %v5395_v34 = vadd.f32 %v5364_v16, %v9311_v59 }
0x11f2   :  { %v5289_v1 = vmul.f32 %v5273_v19, %v5161_v58 }
0x11f3   :  { %v5413_v18 = vadd.f32 %v9602_v44, %v5395_v34 }
0x11f7   :  { %v6331_v23 = vpop.eup %6330 }
0x11f8   :  { %v5366_v22 = vpop.f32.mrf.mxu1  ;;  %v5274_v33 = vadd.f32 1.0, %v6331_v23 }
0x11f9   :  { %v5396_v37 = vadd.f32 %v5366_v22, %v9325_v62 }
0x11fa   :  { %v5290_v40 = vmul.f32 %v5274_v33, %v5162_v61 }
0x11fb   :  { %v5414_v49 = vadd.f32 %v9602_v44, %v5396_v37 }
0x11fc   :  { %v5298_v20 = vpack.c.bf16 %v5290_v40, %v5289_v1 }
0x11fd   :  { %v5428_v36 = vpack.c.bf16 %v5414_v49, %v5413_v18 }
0x11fe   :  { %5811 = vmatmul.msk.bf16.gmra.mxu1 %vm246_vm1, %v5298_v20 }
0x1200   :  { %v5369_v9 = vpop.f32.mrf.mxu1 }
0x1201   :  { %v5397_v25 = vadd.f32 %v5369_v9, %v9338_v56 }
0x1203   :  { %v5415_v42 = vadd.f32 %v9602_v44, %v5397_v25 }
0x1208   :  { %v5371_v54 = vpop.f32.mrf.mxu1 }
0x1210   :  { %v5374_v5 = vpop.f32.mrf.mxu1 }
0x1211   :  { %v5399_v53 = vadd.f32 %v5374_v5, %v9364_v10 }
0x1213   :  { %v5417_v26 = vadd.f32 %v9602_v44, %v5399_v53 }
0x1218   :  { %v5376_v59 = vpop.f32.mrf.mxu1 }
0x1219   :  { %v5400_v0 = vadd.f32 %v5376_v59, %v9377_v41 }
0x121b   :  { %v5418_v41 = vadd.f32 %v9602_v44, %v5400_v0 }
0x121d   :  { %v5430_v11 = vpack.c.bf16 %v5418_v41, %v5417_v26 }
0x1220   :  { %v5379_v2 = vpop.f32.mrf.mxu1 }
0x1221   :  { %v5401_v48 = vadd.f32 %v5379_v2, %v9390_v12  ;;  %v5862_v12 = vld [vmem:[%s9693_s13] sm:$0xff] }
0x1228   :  { %v5381_v28 = vpop.f32.mrf.mxu1 }
0x1229   :  { %v5402_v38 = vadd.f32 %v5381_v28, %v9402_v51  ;;  %v5419_v51 = vadd.f32 %v9602_v44, %v5401_v48 }
0x122b   :  { %v5420_v45 = vadd.f32 %v9602_v44, %v5402_v38 }
0x122d   :  { %v5431_v50 = vpack.c.bf16 %v5420_v45, %v5419_v51 }
0x127b   :  { %v5384_v55 = vpop.f32.mrf.mxu1 }
0x127c   :  { %v5403_v14 = vadd.f32 %v5384_v55, %v9408_v4  ;;  %v5863_v4 = vld [vmem:[%s9693_s13 + $0x8] sm:$0xff] }
0x127d   :  { %5483 = vmatpush.bf16.msra.mxu0 %v5863_v4 }
0x127e   :  { %v5421_v57 = vadd.f32 %v9602_v44, %v5403_v14 }
0x1281   :  { %5484 = vmatpush.bf16.msra.mxu0 %v5862_v12 }
0x1283   :  { %v5386_v62 = vpop.f32.mrf.mxu1 }
0x1284   :  { %v5404_v13 = vadd.f32 %v5386_v62, %v9442_v15  ;;  %v5398_v15 = vadd.f32 %v5371_v54, %v9351_v63  ;;  %v5393_v63 = vadd.f32 %v9629_v60, %v9299_v6 }
0x1286   :  { %v5422_v47 = vadd.f32 %v9602_v44, %v5404_v13  ;;  %v5416_v10 = vadd.f32 %v9602_v44, %v5398_v15  ;;  %v5411_v56 = vadd.f32 %v9602_v44, %v5393_v63  ;;  %v5881_v44 = vld [vmem:[%s9694_s14] ss:$0 sm:$0xff] }
0x1288   :  { %v5432_v43 = vpack.c.bf16 %v5422_v47, %v5421_v57  ;;  %v5429_v39 = vpack.c.bf16 %v5416_v10, %v5415_v42  ;;  %v5427_v32 = vpack.c.bf16 %v5412_v17, %v5411_v56 }
0x128a   :  { %5439 = vmatpush.bf16.msra.mxu2 %v5432_v43 }
0x128e   :  { %5440 = vmatpush.bf16.msra.mxu2 %v5431_v50 }
0x1292   :  { %5441 = vmatpush.bf16.msra.mxu2 %v5430_v11 }
0x1296   :  { %5442 = vmatpush.bf16.msra.mxu2 %v5429_v39 }
0x129a   :  { %5443 = vmatpush.bf16.msra.mxu2 %v5428_v36 }
0x129e   :  { %5444 = vmatpush.bf16.msra.mxu2 %v5427_v32 }
0x12a2   :  { %5445 = vmatpush.bf16.msra.mxu2 %v5426_v31 }
0x12a6   :  { %5446 = vmatpush.bf16.msra.mxu2 %v5425_v46 }
0x12a9   :  { %5447 = vmatmul.bf16.vlgmr.msra.gmra.mxu2 %v5861_v24 }
0x132c   :  { %v5448_v6 = vpop.f32.mrf.mxu2 }
0x1334   :  { %v5450_v60 = vpop.f32.mrf.mxu2 }
0x1335   :  { %v5453_v7 = vpack.c.bf16 %v5450_v60, %v5448_v6 }
0x1337   :  { %5824 = vmatmul.msk.bf16.vlgmr.msra.gmra.mxu0 %vm246_vm1, %v5453_v7 }
0x13b4   :  { %v5486_v29 = vpop.f32.mrf.mxu0 }
0x13b5   :  { %v5487_v21 = vadd.f32 %v5881_v44, %v5486_v29 }
0x13b7   :  { %5491 = vst [vmem:[#allocation2] sm:$0xff] %v5487_v21 }
0x13bc   :  { %v5488_v52 = vpop.f32.mrf.mxu0 }
0x13bd   :  { %v5489_v30 = vadd.f32 %v5881_v44, %v5488_v52 }
0x13bf   :  { %5492 = vst [vmem:[#allocation2 + $0x8] sm:$0xff] %v5489_v30 }
0x13c0   :  { %5505 = dma.vmem_to_hbm [thread:$0]  %s5498_s17, 256, %s5500_s4, [#allocation3], %s6379_s5, %s6379_s5, %s6380_s19  }
0x13c1   :  { %6372 = dma.done.wait [#allocation3], 256  }
0x13c2   :  { %6373 = vsyncadd [#allocation3], 4294967040 }
0x13c3   :  { %5510 = vsyncpa [#allocation3], 1 }

</bundles_post_ra>
